<compile_context>
chip_gen: v5e
topology: v5e:2x2
jax: 0.10.0
libtpu: 0.0.40
codegen_flags: <defaults>
</compile_context>

<pallas_src>
import functools
import math

import jax
import jax.numpy as jnp
from jax import lax
from jax.experimental import pallas as pl
from jax.experimental.pallas import tpu as pltpu

_INV_SQRT2 = 0.7071067811865476
_SQRT_2_OVER_PI = 0.7978845608028654
_GELU_C = 0.044715


def _gelu_tanh(h):
    """tanh-approximate GELU; the tanh lowers to the EUP slot."""
    inner = _SQRT_2_OVER_PI * (h + _GELU_C * (h * h * h))
    return 0.5 * h * (1.0 + jnp.tanh(inner))


def _mlp_kernel(x_ref, w1_ref, b1_ref, w2_ref, b2_ref, o_ref):
    # x block: (tm, D) f32; weights already (in, out) bf16 layout.
    x = x_ref[...].astype(jnp.bfloat16)
    h = jnp.dot(x, w1_ref[...], preferred_element_type=jnp.float32)
    h = h + b1_ref[...]                      # bias in f32 (VPU)
    h = _gelu_tanh(h)                        # GELU in f32, tanh on EUP
    # dropout(p=0.0) == identity.
    o = jnp.dot(h.astype(jnp.bfloat16), w2_ref[...],
                preferred_element_type=jnp.float32)
    o_ref[...] = (o + b2_ref[...]).astype(o_ref.dtype)


def prepare_params(params):
    """One-time conversion of PyTorch-layout Linear params for the kernel.

    Call this ONCE (outside jit / the hot loop): it pre-transposes the weights
    to (in, out), casts them to bf16 for the MXU and reshapes biases to (1, N),
    so mlp_forward does no per-call layout/convert work.
    """
    w1, b1 = params["fc1_w"], params["fc1_b"]     # (H, D), (H,)
    w2, b2 = params["fc2_w"], params["fc2_b"]     # (Dout, H), (Dout,)
    return {
        "w1t": jnp.asarray(w1.T, jnp.bfloat16),               # (D, H)
        "b1": jnp.asarray(b1, jnp.float32).reshape(1, -1),     # (1, H)
        "w2t": jnp.asarray(w2.T, jnp.bfloat16),               # (H, Dout)
        "b2": jnp.asarray(b2, jnp.float32).reshape(1, -1),     # (1, Dout)
    }


def _choose_block_rows(M, target):
    """Largest multiple-of-8 tile <= target that divides M (avoids padding)."""
    tm = min(target, M)
    for cand in range(tm, 7, -1):
        if cand % 8 == 0 and M % cand == 0:
            return cand
    return max(8, (tm // 8) * 8)  # fall back: pad the tail


@functools.partial(jax.jit, static_argnames=("block_rows",))
def mlp_forward(x, prepared, *, block_rows=128):
    """Pallas MLP forward.  `prepared` comes from prepare_params()."""
    B, N, D = x.shape
    w1t, b1r = prepared["w1t"], prepared["b1"]
    w2t, b2r = prepared["w2t"], prepared["b2"]
    H = w1t.shape[1]
    Dout = w2t.shape[1]

    # Flatten batch*sequence into one lane-dense row axis.
    M = B * N
    xm = x.reshape(M, D)
    tm = _choose_block_rows(M, block_rows)
    n_blocks = (M + tm - 1) // tm
    Mp = n_blocks * tm
    if Mp != M:  # only when no divisor tile exists; not hit for M=640
        xm = jnp.pad(xm, ((0, Mp - M), (0, 0)))

    cost = pl.CostEstimate(
        flops=2 * Mp * D * H + 2 * Mp * H * Dout,
        transcendentals=Mp * H,  # one tanh per hidden element
        bytes_accessed=(Mp * D * 4 + D * H * 2 + H * Dout * 2
                        + (H + Dout) * 4 + Mp * Dout * 4),
    )

    out = pl.pallas_call(
        _mlp_kernel,
        out_shape=jax.ShapeDtypeStruct((Mp, Dout), x.dtype),
        grid_spec=pltpu.PrefetchScalarGridSpec(
            num_scalar_prefetch=0,
            grid=(n_blocks,),
            in_specs=[
                pl.BlockSpec((tm, D), lambda i: (i, 0)),     # x rows
                pl.BlockSpec((D, H), lambda i: (0, 0)),      # W1 (grid-invariant)
                pl.BlockSpec((1, H), lambda i: (0, 0)),      # b1
                pl.BlockSpec((H, Dout), lambda i: (0, 0)),   # W2 (grid-invariant)
                pl.BlockSpec((1, Dout), lambda i: (0, 0)),   # b2
            ],
            out_specs=pl.BlockSpec((tm, Dout), lambda i: (i, 0)),
        ),
        compiler_params=pltpu.CompilerParams(
            dimension_semantics=("parallel",)),
        cost_estimate=cost,
    )(xm, w1t, b1r, w2t, b2r)

    out = out if Mp == M else out[:M]
    return out.reshape(B, N, Dout)


def mlp_reference(x, params):
    """Pure-JAX f32 reference matching the PyTorch module (exact erf GELU)."""
    h = x @ params["fc1_w"].T + params["fc1_b"]
    h = 0.5 * h * (1.0 + lax.erf(h * _INV_SQRT2))   # torch.nn.GELU() exact form
    # dropout(p=0.0) == identity
    return h @ params["fc2_w"].T + params["fc2_b"]


if __name__ == "__main__":
    # Shapes implied by the module spec: x = torch.ones([2, 320, 768]),
    # hidden_features / out_features default to in_features.
    B, N, D = 2, 320, 768
    H = D
    Dout = D

    key = jax.random.PRNGKey(0)
    ks = jax.random.split(key, 5)
    x = jax.random.normal(ks[0], (B, N, D), jnp.float32)

    lim1 = 1.0 / math.sqrt(D)
    lim2 = 1.0 / math.sqrt(H)
    params = {
        "fc1_w": jax.random.uniform(ks[1], (H, D), jnp.float32, -lim1, lim1),
        "fc1_b": jax.random.uniform(ks[2], (H,), jnp.float32, -lim1, lim1),
        "fc2_w": jax.random.uniform(ks[3], (Dout, H), jnp.float32, -lim2, lim2),
        "fc2_b": jax.random.uniform(ks[4], (Dout,), jnp.float32, -lim2, lim2),
    }

    # One-time weight layout/convert, hoisted out of the per-call path.
    prepared = prepare_params(params)

    out = jax.block_until_ready(mlp_forward(x, prepared))
    ref = jax.block_until_ready(mlp_reference(x, params))

    assert out.shape == (B, N, Dout), out.shape
    rel_err = float(jnp.max(jnp.abs(out - ref)) / (jnp.max(jnp.abs(ref)) + 1e-8))
    assert rel_err < 3e-2, f"kernel/reference mismatch, rel err = {rel_err}"
    print("KERNEL_OK")
</pallas_src>

<mosaic_0001>
module attributes {stable_mosaic.version = 11 : i64} {
  func.func @_mlp_kernel(%arg0: i32, %arg1: memref<128x768xf32, #tpu.memory_space<vmem>>, %arg2: memref<768x768xbf16, #tpu.memory_space<vmem>>, %arg3: memref<1x768xf32, #tpu.memory_space<vmem>>, %arg4: memref<768x768xbf16, #tpu.memory_space<vmem>>, %arg5: memref<1x768xf32, #tpu.memory_space<vmem>>, %arg6: memref<128x768xf32, #tpu.memory_space<vmem>>) attributes {dimension_semantics = [#tpu.dimension_semantics<parallel>], iteration_bounds = array<i64: 5>, scalar_prefetch = 0 : i64, scratch_operands = 0 : i64, tpu.core_type = #tpu.core_type<tc>, window_params = [{transform_indices = @transform_0, window_bounds = array<i64: 128, 768>}, {pipeline_mode = #tpu.pipeline_mode<synchronous>, transform_indices = @transform_1, window_bounds = array<i64: 768, 768>}, {pipeline_mode = #tpu.pipeline_mode<synchronous>, transform_indices = @transform_2, window_bounds = array<i64: 1, 768>}, {pipeline_mode = #tpu.pipeline_mode<synchronous>, transform_indices = @transform_3, window_bounds = array<i64: 768, 768>}, {pipeline_mode = #tpu.pipeline_mode<synchronous>, transform_indices = @transform_4, window_bounds = array<i64: 1, 768>}, {transform_indices = @transform_5, window_bounds = array<i64: 128, 768>}]} {
    %c0 = arith.constant 0 : index
    %c0_0 = arith.constant 0 : index
    %0 = vector.load %arg1[%c0, %c0_0] : memref<128x768xf32, #tpu.memory_space<vmem>>, vector<128x768xf32>
    %1 = arith.truncf %0 : vector<128x768xf32> to vector<128x768xbf16>
    %c0_1 = arith.constant 0 : index
    %c0_2 = arith.constant 0 : index
    %2 = vector.load %arg2[%c0_1, %c0_2] : memref<768x768xbf16, #tpu.memory_space<vmem>>, vector<768x768xbf16>
    %cst = arith.constant dense<0.000000e+00> : vector<128x768xf32>
    %3 = tpu.matmul %1, %2, %cst {dimension_numbers = #tpu.dot_dimension_numbers<[1], [0], [0], [1], [0, 0, 1, 1], [], []>} : vector<128x768xbf16>, vector<768x768xbf16>, vector<128x768xf32> -> vector<128x768xf32>
    %c0_3 = arith.constant 0 : index
    %c0_4 = arith.constant 0 : index
    %4 = vector.load %arg3[%c0_3, %c0_4] : memref<1x768xf32, #tpu.memory_space<vmem>>, vector<1x768xf32>
    %5 = vector.broadcast %4 : vector<1x768xf32> to vector<128x768xf32>
    %6 = arith.addf %3, %5 : vector<128x768xf32>
    %7 = arith.mulf %6, %6 : vector<128x768xf32>
    %8 = arith.mulf %7, %6 : vector<128x768xf32>
    %cst_5 = arith.constant 4.471500e-02 : f32
    %9 = vector.broadcast %cst_5 : f32 to vector<128x768xf32>
    %10 = arith.mulf %9, %8 : vector<128x768xf32>
    %11 = arith.addf %6, %10 : vector<128x768xf32>
    %cst_6 = arith.constant 0.797884583 : f32
    %12 = vector.broadcast %cst_6 : f32 to vector<128x768xf32>
    %13 = arith.mulf %12, %11 : vector<128x768xf32>
    %cst_7 = arith.constant 5.000000e-01 : f32
    %14 = vector.broadcast %cst_7 : f32 to vector<128x768xf32>
    %15 = arith.mulf %14, %6 : vector<128x768xf32>
    %16 = math.tanh %13 : vector<128x768xf32>
    %cst_8 = arith.constant 1.000000e+00 : f32
    %17 = vector.broadcast %cst_8 : f32 to vector<128x768xf32>
    %18 = arith.addf %17, %16 : vector<128x768xf32>
    %19 = arith.mulf %15, %18 : vector<128x768xf32>
    %20 = arith.truncf %19 : vector<128x768xf32> to vector<128x768xbf16>
    %c0_9 = arith.constant 0 : index
    %c0_10 = arith.constant 0 : index
    %21 = vector.load %arg4[%c0_9, %c0_10] : memref<768x768xbf16, #tpu.memory_space<vmem>>, vector<768x768xbf16>
    %cst_11 = arith.constant dense<0.000000e+00> : vector<128x768xf32>
    %22 = tpu.matmul %20, %21, %cst_11 {dimension_numbers = #tpu.dot_dimension_numbers<[1], [0], [0], [1], [0, 0, 1, 1], [], []>} : vector<128x768xbf16>, vector<768x768xbf16>, vector<128x768xf32> -> vector<128x768xf32>
    %c0_12 = arith.constant 0 : index
    %c0_13 = arith.constant 0 : index
    %23 = vector.load %arg5[%c0_12, %c0_13] : memref<1x768xf32, #tpu.memory_space<vmem>>, vector<1x768xf32>
    %24 = vector.broadcast %23 : vector<1x768xf32> to vector<128x768xf32>
    %25 = arith.addf %22, %24 : vector<128x768xf32>
    %c0_14 = arith.constant 0 : index
    %c0_15 = arith.constant 0 : index
    %26 = vector.load %arg6[%c0_14, %c0_15] : memref<128x768xf32, #tpu.memory_space<vmem>>, vector<128x768xf32>
    tpu.vector_store %arg6[%c0_14, %c0_15], %25 {strides = array<i32>} : memref<128x768xf32, #tpu.memory_space<vmem>>, vector<128x768xf32>,
    return
  }
  func.func @transform_0(%arg0: i32) -> (i32, i32) {
    %c0_i32 = arith.constant 0 : i32
    %c0_i32_0 = arith.constant 0 : i32
    return %arg0, %c0_i32 : i32, i32
  }
  func.func @transform_1(%arg0: i32) -> (i32, i32) {
    %c0_i32 = arith.constant 0 : i32
    %c0_i32_0 = arith.constant 0 : i32
    %c0_i32_1 = arith.constant 0 : i32
    return %c0_i32, %c0_i32_0 : i32, i32
  }
  func.func @transform_2(%arg0: i32) -> (i32, i32) {
    %c0_i32 = arith.constant 0 : i32
    %c0_i32_0 = arith.constant 0 : i32
    %c0_i32_1 = arith.constant 0 : i32
    return %c0_i32, %c0_i32_0 : i32, i32
  }
  func.func @transform_3(%arg0: i32) -> (i32, i32) {
    %c0_i32 = arith.constant 0 : i32
    %c0_i32_0 = arith.constant 0 : i32
    %c0_i32_1 = arith.constant 0 : i32
    return %c0_i32, %c0_i32_0 : i32, i32
  }
  func.func @transform_4(%arg0: i32) -> (i32, i32) {
    %c0_i32 = arith.constant 0 : i32
    %c0_i32_0 = arith.constant 0 : i32
    %c0_i32_1 = arith.constant 0 : i32
    return %c0_i32, %c0_i32_0 : i32, i32
  }
  func.func @transform_5(%arg0: i32) -> (i32, i32) {
    %c0_i32 = arith.constant 0 : i32
    %c0_i32_0 = arith.constant 0 : i32
    return %arg0, %c0_i32 : i32, i32
  }
}

</mosaic_0001>

<bundles_post_ra>
// kernel: mlp_forward.1
= control target key start
LH: loop header
LB: loop body
LE: loop exit
PB: predicated region body
PF: predicated region fallthrough
CT: control target
= control target key end

     0   :  { %s14553_s0 = inlined_call_operand.hbm [shape: f32[640,768], index: 0, kind: input, shape index: {}]   ;;  %s14554_s1 = inlined_call_operand.hbm [shape: bf16[768,768], index: 1, kind: input, shape index: {}]   ;;  %s14555_s2 = inlined_call_operand.hbm [shape: f32[1,768], index: 2, kind: input, shape index: {}]   ;;  %s14556_s3 = inlined_call_operand.hbm [shape: bf16[768,768], index: 3, kind: input, shape index: {}]   ;;  %s14557_s4 = inlined_call_operand.hbm [shape: f32[1,768], index: 4, kind: input, shape index: {}]   ;;  %s14558_s5 = inlined_call_operand.hbm [shape: f32[640,768], index: 5, kind: output, shape index: {}]  }
   0x1   :  { %14736 = sst [smem:[#allocation70_spill]] %s14554_s1 }
   0x2   :  { %10 = vsyncpa [#allocation3], 0 }
   0x3   :  { %12 = vsyncpa [#allocation3 + $0x1], 0 }
   0x4   :  { %13 = vsyncpa [#allocation6], 0 }
   0x5   :  { %14 = vsyncpa [#allocation9], 0 }
   0x6   :  { %15 = vsyncpa [#allocation4], 0 }
   0x7   :  { %17 = vsyncpa [#allocation4 + $0x1], 0  ;;  %s12061_s18 = smov 0   ;;  %s12063_s19 = smov 0  }
   0x8   :  { %s12065_s20 = smov 0   ;;  %s12067_s21 = smov 0  }
   0x9 LB: > { %s12082_s22 = sadd.s32 4294967295, %s12019_s21   ;;  %s8602_s23 = sadd.s32 4294967294, %s12019_s21   ;;  %s12019_s21 = sphi %s12067_s21, %s14977_s21   ;;  %s12015_s20 = sphi %s12065_s20, %s14976_s20   ;;  %s12011_s19 = sphi %s12063_s19, %s14975_s19   ;;  %s12007_s18 = sphi %s12061_s18, %s14974_s18  }
   0xa   : > { %p43_p0 = scmp.ne.s32.totalorder %s12011_s19, %s12007_s18  ;;  %p44_p1 = scmp.eq.s32.totalorder %s12082_s22, 0 }
   0xb   : > { %p151_p2 = scmp.eq.s32.totalorder %s12082_s22, 4  ;;  %p157_p3 = scmp.eq.s32.totalorder %s8602_s23, 4 }
   0xc   : > { %p12091_p4 = por %p44_p1, %p43_p0  ;;  %p8603_p5 = scmp.ge.s32.totalorder %s12019_s21, 1 }
   0xd   : > { %p12096_p6 = por %p157_p3, %p43_p0  ;;  %p164_p7 = scmp.lt.s32.totalorder %s12019_s21, 6 }
   0xe   : > { %s14739_s1 = sld [smem:[#allocation70_spill]]  ;;  %s12021_s30 = smov [#allocation5]  }
   0xf   : > { %p12104_p8 = pnand %p8603_p5, %p164_p7  ;;  %s177_s6 = sshll.u32 %s12021_s30, 4  ;;  %s178_s6 = int_to_ptr.vmem [resolvable:$true] %s177_s6 }
  0x10   : > { %s201_s10 = sshll.u32 %s14556_s3, 4  ;;  %s12022_s11 = smov 384   ;;  %s202_s10 = int_to_ptr.hbm [resolvable:$true] %s201_s10 }
  0x11   : > { %p11526_p9 = pneg %p12104_p8  ;;  %s12023_s12 = smov 24  }
  0x12   : > { %s12024_s13 = smov [#allocation8]   ;;  %s190_s17 = sshll.u32 %s14555_s2, 4  ;;  %s191_s17 = int_to_ptr.hbm [resolvable:$true] %s190_s17 }
  0x13   : > { %p12112_p10 = pnand %p11526_p9, %p44_p1  ;;  %s203_s14 = sshll.u32 %s12024_s13, 4  ;;  %s204_s14 = int_to_ptr.vmem [resolvable:$true] %s203_s14 }
  0x14   : > { %s175_s28 = sshll.u32 %s14739_s1, 4  ;;  %s216_s27 = sshll.u32 %s14557_s4, 4  ;;  %s176_s28 = int_to_ptr.hbm [resolvable:$true] %s175_s28  ;;  %s217_s27 = int_to_ptr.hbm [resolvable:$true] %s216_s27 }
  0x15   : > { %11529 = dma.hbm_to_vmem [thread:$0]  (!%p12112_p10), %s176_s28, 36864, %s178_s6, [#allocation6], %s12022_s11, %s12022_s11, %s12023_s12  }
  0x16   : > { %11535 = dma.hbm_to_vmem [thread:$0]  (!%p12112_p10), %s202_s10, 36864, %s204_s14, [#allocation9], %s12022_s11, %s12022_s11, %s12023_s12  }
  0x17   : > { %s12025_s28 = smov [#allocation7]   ;;  %s12026_s6 = smov [#allocation10]  }
  0x18   : > { %s192_s30 = sshll.u32 %s12025_s28, 4  ;;  %s218_s8 = sshll.u32 %s12026_s6, 4  ;;  %s193_s30 = int_to_ptr.vmem [resolvable:$true] %s192_s30  ;;  %s219_s8 = int_to_ptr.vmem [resolvable:$true] %s218_s8 }
  0x19   : > { %11532 = dma.hbm_to_vmem [thread:$0]  (!%p12112_p10), %s191_s17, 96, %s193_s30, [#allocation6]  }
  0x1a   : > { %11538 = dma.hbm_to_vmem [thread:$0]  (!%p12112_p10), %s217_s27, 96, %s219_s8, [#allocation9]  }
  0x1b   : > { %s12134_s9 = sadd.s32 1, %s12019_s21   ;;  %s30_s10 = sadd.s32 1, %s12015_s20 }
  0x1c   : > { %s27_s11 = ssub.s32 %s12019_s21, %s12134_s9  ;;  %p37_p11 = scmp.ne.s32.totalorder %s12015_s20, %s12011_s19 }
  0x1d   : > { %p28_p12 = scmp.eq.s32.totalorder %s27_s11, 0  ;;  %p38_p13 = scmp.eq.s32.totalorder %s12019_s21, 0 }
  0x1e   : > { %p12144_p0 = por %p151_p2, %p37_p11  ;;  %p11551_p3 = scmp.lt.s32.totalorder %s12019_s21, 5 }
  0x1f   : > { %s12150_s13 = scalar_select %p28_p12, %s12015_s20, %s30_s10  }
  0x20   : > { %p39_p5 = por %p38_p13, %p37_p11  ;;  %s229_s14 = sand.u32 1, %s12015_s20  }
  0x21   : > { %s11502_s7 = smul.u32 768, %s229_s14  ;;  %s230_s6 = scalar_lea.sflag [#allocation3], %s229_s14 }
  0x22   : > { %s11503_s15 = smul.u32 768, %s12019_s21  ;;  %p12154_p7 = pnand %p11551_p3, %p39_p5 }
  0x23   : > { %s233_s27 = scalar_lea.vmem [#allocation2], %s11502_s7  ;;  %s11922_s17 = scalar_lea.hbm %s14553_s0, 3840 }
  0x24   : > { %s239_s26 = scalar_lea.hbm %s14553_s0, %s11503_s15  ;;  %s242_s28 = sshll.u32 %s233_s27, 4  ;;  %s243_s28 = int_to_ptr.vmem [resolvable:$true] %s242_s28 }
  0x25   : > { %s240_s30 = sshll.u32 %s239_s26, 4  ;;  %p11919_p9 = pneg %p12154_p7  ;;  %s241_s30 = int_to_ptr.hbm [resolvable:$true] %s240_s30 }
  0x26   : > { %s11915_s8 = sshra.s32 %s241_s30, 4  ;;  %s11916_s8 = int_to_ptr.hbm [resolvable:$true] %s11915_s8 }
  0x27   : > { %s11917_s10 = scalar_lea.hbm %s11916_s8, 768  ;;  %p11923_p12 = scmp.lt.s32.totalorder %s11916_s8, %s14553_s0 }
  0x28   : > { %p11918_p2 = scmp.ne.s32.totalorder %s11916_s8, %s11917_s10  ;;  %p11924_p13 = scmp.lt.s32.totalorder %s11922_s17, %s11917_s10 }
  0x2a   : > { %p11920_p10 = pnand %p11919_p9, %p11918_p2  ;;  %p11925_p3 = por %p11924_p13, %p11923_p12 }
  0x2c   : > { %p11921_p11 = pneg %p11920_p10 }
  0x2e   : > { %p11926_p5 = pnand %p11925_p3, %p11921_p11 }
  0x30   : > { %11929 = shalt.err (!%p11926_p5)
}
  0x31   : > { %s12027_s14 = smov 768   ;;  %s12028_s7 = smov 48  }
  0x32   : > { %11542 = dma.hbm_to_vmem [thread:$0]  (!%p12154_p7), %s241_s30, 12288, %s243_s28, %s230_s6, %s12027_s14, %s12027_s14, %s12028_s7  }
  0x33   : > { %254 = sbr.rel (%p12104_p8) target bundleno = 2537 (0x9e9), region = 40 }
  0x38   : > { %s12174_s1 = sand.u32 1, %s12011_s19  }
  0x39   : > { %s11504_s26 = smul.u32 768, %s12174_s1  ;;  %s257_s27 = scalar_lea.sflag [#allocation3], %s12174_s1 }
  0x3b   : > { %s12180_s8 = scalar_lea.vmem [#allocation2], %s11504_s26 }
  0x3c   : > { %11990 = dma.done.wait (%p12091_p4), %s257_s27, 12288  }
  0x3d   : > { %11992 = vsyncadd (%p12091_p4), %s257_s27, 4294955008 }
  0x3e   : > { %11994 = dma.done.wait (%p44_p1), [#allocation6], 36960  }
  0x3f   : > { %11996 = vsyncadd (%p44_p1), [#allocation6], 4294930336 }
  0x40   : > { %11998 = dma.done.wait (%p44_p1), [#allocation9], 36960  }
  0x41   : > { %12000 = vsyncadd (%p44_p1), [#allocation9], 4294930336  ;;  %v8787_v0 = vld [vmem:[#allocation5 + $0x150] sm:$0xf]  ;;  %v10971_v1 = vld [vmem:[#allocation5 + $0x164] sm:$0xf0] }
  0x42   : > { %v8979_v2 = vld [vmem:[#allocation5 + $0x2d0] sm:$0xf]  ;;  %v8788_v3 = vor.u32 %v10971_v1, %v8787_v0  ;;  %v11019_v4 = vld [vmem:[#allocation5 + $0x2e4] sm:$0xf0]  ;;  %v8763_v11 = vld [vmem:[#allocation5 + $0x120] sm:$0xf] }
  0x43   : > { %v9171_v5 = vld [vmem:[#allocation5 + $0x450] sm:$0xf]  ;;  %v11067_v6 = vld [vmem:[#allocation5 + $0x464] sm:$0xf0]  ;;  %v8980_v7 = vor.u32 %v11019_v4, %v8979_v2  ;;  %v10965_v13 = vld [vmem:[#allocation5 + $0x134] sm:$0xf0] }
  0x44   : > { %v9172_v8 = vor.u32 %v11067_v6, %v9171_v5  ;;  %v9363_v9 = vld [vmem:[#allocation5 + $0x5d0] sm:$0xf]  ;;  %v11115_v10 = vld [vmem:[#allocation5 + $0x5e4] sm:$0xf0]  ;;  %2196 = vmatpush.bf16.msra.mxu0 %v8788_v3  ;;  %v8955_v14 = vld [vmem:[#allocation5 + $0x2a0] sm:$0xf]  ;;  %v8764_v16 = vor.u32 %v10965_v13, %v8763_v11 }
  0x45   : > { %v9364_v12 = vor.u32 %v11115_v10, %v9363_v9  ;;  %v11013_v15 = vld [vmem:[#allocation5 + $0x2b4] sm:$0xf0]  ;;  %2245 = vmatpush.bf16.msra.mxu1 %v8980_v7  ;;  %v9147_v18 = vld [vmem:[#allocation5 + $0x420] sm:$0xf]  ;;  %v8739_v23 = vld [vmem:[#allocation5 + $0xf0] sm:$0xf] }
  0x46   : > { %2294 = vmatpush.bf16.msra.mxu2 %v9172_v8  ;;  %v8956_v17 = vor.u32 %v11013_v15, %v8955_v14  ;;  %v11061_v19 = vld [vmem:[#allocation5 + $0x434] sm:$0xf0]  ;;  %v9339_v20 = vld [vmem:[#allocation5 + $0x5a0] sm:$0xf]  ;;  %v10959_v24 = vld [vmem:[#allocation5 + $0x104] sm:$0xf0] }
  0x47   : > { %2343 = vmatpush.bf16.msra.mxu3 %v9364_v12  ;;  %v9148_v21 = vor.u32 %v11061_v19, %v9147_v18  ;;  %v11109_v22 = vld [vmem:[#allocation5 + $0x5b4] sm:$0xf0]  ;;  %v8931_v26 = vld [vmem:[#allocation5 + $0x270] sm:$0xf]  ;;  %v11007_v27 = vld [vmem:[#allocation5 + $0x284] sm:$0xf0]  ;;  %v8740_v29 = vor.u32 %v10959_v24, %v8739_v23 }
  0x48   : > { %v9340_v25 = vor.u32 %v11109_v22, %v9339_v20  ;;  %v9123_v28 = vld [vmem:[#allocation5 + $0x3f0] sm:$0xf]  ;;  %2197 = vmatpush.bf16.msra.mxu0 %v8764_v16  ;;  %v11055_v30 = vld [vmem:[#allocation5 + $0x404] sm:$0xf0]  ;;  %v8932_v33 = vor.u32 %v11007_v27, %v8931_v26  ;;  %v8715_v35 = vld [vmem:[#allocation5 + $0xc0] sm:$0xf] }
  0x49   : > { %v9315_v31 = vld [vmem:[#allocation5 + $0x570] sm:$0xf]  ;;  %v11103_v32 = vld [vmem:[#allocation5 + $0x584] sm:$0xf0]  ;;  %2246 = vmatpush.bf16.msra.mxu1 %v8956_v17  ;;  %v9124_v34 = vor.u32 %v11055_v30, %v9123_v28  ;;  %v10953_v36 = vld [vmem:[#allocation5 + $0xd4] sm:$0xf0] }
  0x4a   : > { %2295 = vmatpush.bf16.msra.mxu2 %v9148_v21  ;;  %v8907_v37 = vld [vmem:[#allocation5 + $0x240] sm:$0xf]  ;;  %v9316_v38 = vor.u32 %v11103_v32, %v9315_v31  ;;  %v11001_v39 = vld [vmem:[#allocation5 + $0x254] sm:$0xf0]  ;;  %v8716_v44 = vor.u32 %v10953_v36, %v8715_v35  ;;  %v8691_v47 = vld [vmem:[#allocation5 + $0x90] sm:$0xf] }
  0x4b   : > { %2344 = vmatpush.bf16.msra.mxu3 %v9340_v25  ;;  %v9099_v40 = vld [vmem:[#allocation5 + $0x3c0] sm:$0xf]  ;;  %v11049_v41 = vld [vmem:[#allocation5 + $0x3d4] sm:$0xf0]  ;;  %v8908_v45 = vor.u32 %v11001_v39, %v8907_v37  ;;  %v10947_v48 = vld [vmem:[#allocation5 + $0xa4] sm:$0xf0] }
  0x4c   : > { %v9291_v42 = vld [vmem:[#allocation5 + $0x540] sm:$0xf]  ;;  %v11097_v43 = vld [vmem:[#allocation5 + $0x554] sm:$0xf0]  ;;  %2198 = vmatpush.bf16.msra.mxu0 %v8740_v29  ;;  %v9100_v46 = vor.u32 %v11049_v41, %v9099_v40  ;;  %v8883_v49 = vld [vmem:[#allocation5 + $0x210] sm:$0xf]  ;;  %v8692_v56 = vor.u32 %v10947_v48, %v8691_v47 }
  0x4d   : > { %2247 = vmatpush.bf16.msra.mxu1 %v8932_v33  ;;  %v9292_v50 = vor.u32 %v11097_v43, %v9291_v42  ;;  %v10995_v51 = vld [vmem:[#allocation5 + $0x224] sm:$0xf0]  ;;  %v9075_v52 = vld [vmem:[#allocation5 + $0x390] sm:$0xf]  ;;  %v8667_v59 = vld [vmem:[#allocation5 + $0x60] sm:$0xf] }
  0x4e   : > { %2296 = vmatpush.bf16.msra.mxu2 %v9124_v34  ;;  %v11043_v53 = vld [vmem:[#allocation5 + $0x3a4] sm:$0xf0]  ;;  %v9267_v54 = vld [vmem:[#allocation5 + $0x510] sm:$0xf]  ;;  %v8884_v57 = vor.u32 %v10995_v51, %v8883_v49  ;;  %v10941_v60 = vld [vmem:[#allocation5 + $0x74] sm:$0xf0] }
  0x4f   : > { %2345 = vmatpush.bf16.msra.mxu3 %v9316_v38  ;;  %v11091_v55 = vld [vmem:[#allocation5 + $0x524] sm:$0xf0]  ;;  %v9076_v58 = vor.u32 %v11043_v53, %v9075_v52  ;;  %v8859_v61 = vld [vmem:[#allocation5 + $0x1e0] sm:$0xf]  ;;  %v10989_v63 = vld [vmem:[#allocation5 + $0x1f4] sm:$0xf0]  ;;  %v8668_v4 = vor.u32 %v10941_v60, %v8667_v59 }
  0x50   : > { %2199 = vmatpush.bf16.msra.mxu0 %v8716_v44  ;;  %v9268_v62 = vor.u32 %v11091_v55, %v9267_v54  ;;  %v9051_v0 = vld [vmem:[#allocation5 + $0x360] sm:$0xf]  ;;  %v11037_v1 = vld [vmem:[#allocation5 + $0x374] sm:$0xf0]  ;;  %v8860_v5 = vor.u32 %v10989_v63, %v8859_v61  ;;  %v8643_v7 = vld [vmem:[#allocation5 + $0x30] sm:$0xf] }
  0x51   : > { %2248 = vmatpush.bf16.msra.mxu1 %v8908_v45  ;;  %v9243_v2 = vld [vmem:[#allocation5 + $0x4e0] sm:$0xf]  ;;  %v11085_v3 = vld [vmem:[#allocation5 + $0x4f4] sm:$0xf0]  ;;  %v9052_v6 = vor.u32 %v11037_v1, %v9051_v0  ;;  %v10935_v8 = vld [vmem:[#allocation5 + $0x44] sm:$0xf0] }
  0x52   : > { %2297 = vmatpush.bf16.msra.mxu2 %v9100_v46  ;;  %v8835_v9 = vld [vmem:[#allocation5 + $0x1b0] sm:$0xf]  ;;  %v9244_v10 = vor.u32 %v11085_v3, %v9243_v2  ;;  %v10983_v11 = vld [vmem:[#allocation5 + $0x1c4] sm:$0xf0]  ;;  %v8619_v16 = vld [vmem:[#allocation5] sm:$0xf]  ;;  %v8644_v17 = vor.u32 %v10935_v8, %v8643_v7 }
  0x53   : > { %2346 = vmatpush.bf16.msra.mxu3 %v9292_v50  ;;  %v9027_v12 = vld [vmem:[#allocation5 + $0x330] sm:$0xf]  ;;  %v11031_v13 = vld [vmem:[#allocation5 + $0x344] sm:$0xf0]  ;;  %v10929_v18 = vld [vmem:[#allocation5 + $0x14] sm:$0xf0]  ;;  %v8836_v21 = vor.u32 %v10983_v11, %v8835_v9 }
  0x54   : > { %2200 = vmatpush.bf16.msra.mxu0 %v8692_v56  ;;  %v9219_v14 = vld [vmem:[#allocation5 + $0x4b0] sm:$0xf]  ;;  %v11079_v15 = vld [vmem:[#allocation5 + $0x4c4] sm:$0xf0]  ;;  %v8811_v19 = vld [vmem:[#allocation5 + $0x180] sm:$0xf]  ;;  %v9028_v22 = vor.u32 %v11031_v13, %v9027_v12  ;;  %v8620_v34 = vor.u32 %v10929_v18, %v8619_v16 }
  0x55   : > { %2249 = vmatpush.bf16.msra.mxu1 %v8884_v57  ;;  %v10977_v20 = vld [vmem:[#allocation5 + $0x194] sm:$0xf0]  ;;  %v9003_v23 = vld [vmem:[#allocation5 + $0x300] sm:$0xf]  ;;  %v9220_v26 = vor.u32 %v11079_v15, %v9219_v14  ;;  %v316_v29 = vld [vmem:[%s12180_s8 + $0x30] sm:$0xff]  ;;  %s13850_s24 = scalar_lea.vmem [#allocation11], %s11504_s26 }
  0x56   : > { %2298 = vmatpush.bf16.msra.mxu2 %v9076_v58  ;;  %v11025_v24 = vld [vmem:[#allocation5 + $0x314] sm:$0xf0]  ;;  %v9195_v25 = vld [vmem:[#allocation5 + $0x480] sm:$0xf]  ;;  %v311_v30 = vld [vmem:[%s12180_s8 + $0x8] sm:$0xff]  ;;  %v8812_v38 = vor.u32 %v10977_v20, %v8811_v19  ;;  %s11505_s29 = smul.u32 768, %s12082_s22 }
  0x57   : > { %2347 = vmatpush.bf16.msra.mxu3 %v9268_v62  ;;  %v11073_v27 = vld [vmem:[#allocation5 + $0x494] sm:$0xf0]  ;;  %v310_v28 = vld [vmem:[%s12180_s8] sm:$0xff]  ;;  %v10968_v32 = vld [vmem:[#allocation5 + $0x154] sm:$0xf]  ;;  %v9004_v39 = vor.u32 %v11025_v24, %v9003_v23  ;;  %s8488_s6 = sshll.u32 %s13850_s24, 4  ;;  %s8489_s6 = int_to_ptr.vmem [resolvable:$true] %s8488_s6 }
  0x58   : > { %2201 = vmatpush.bf16.msra.mxu0 %v8668_v4  ;;  %v317_v31 = vld [vmem:[%s12180_s8 + $0x38] sm:$0xff]  ;;  %v8789_v33 = vld [vmem:[#allocation5 + $0x168] sm:$0xf0]  ;;  %v312_v35 = vld [vmem:[%s12180_s8 + $0x10] sm:$0xff]  ;;  %v9196_v43 = vor.u32 %v11073_v27, %v9195_v25  ;;  %v12202_v48 = vpack.c.bf16 %v316_v29, %v310_v28  ;;  %s8487_s30 = scalar_lea.hbm %s14558_s5, %s11505_s29  ;;  %s8475_s22 = scalar_lea.sflag [#allocation4], %s12174_s1 }
  0x59   : > { %2250 = vmatpush.bf16.msra.mxu1 %v8860_v5  ;;  %v11016_v36 = vld [vmem:[#allocation5 + $0x2d4] sm:$0xf]  ;;  %v8981_v37 = vld [vmem:[#allocation5 + $0x2e8] sm:$0xf0]  ;;  %v318_v40 = vld [vmem:[%s12180_s8 + $0x40] sm:$0xff]  ;;  %v8792_v44 = vor.u32 %v10968_v32, %v8789_v33  ;;  %v12204_v53 = vpack.c.bf16 %v317_v31, %v311_v30  ;;  %s8490_s10 = sshll.u32 %s8487_s30, 4  ;;  %s8491_s10 = int_to_ptr.hbm [resolvable:$true] %s8490_s10 }
  0x5a   : > { %2299 = vmatpush.bf16.msra.mxu2 %v9052_v6  ;;  %v313_v41 = vld [vmem:[%s12180_s8 + $0x18] sm:$0xff]  ;;  %v319_v42 = vld [vmem:[%s12180_s8 + $0x48] sm:$0xff]  ;;  %v9555_v45 = vld [vmem:[#allocation5 + $0x750] sm:$0xf]  ;;  %14744 = vst [vmem:[#allocation16_spill] sm:$0xff] %v12202_v48  ;;  %v8984_v49 = vor.u32 %v11016_v36, %v8981_v37  ;;  %v12206_v54 = vpack.c.bf16 %v318_v40, %v312_v35  ;;  %s11959_s11 = sshra.s32 %s8491_s10, 4  ;;  %s11960_s11 = int_to_ptr.hbm [resolvable:$true] %s11959_s11 }
  0x5b   : > { %2348 = vmatpush.bf16.msra.mxu3 %v9244_v10  ;;  %v11163_v46 = vld [vmem:[#allocation5 + $0x764] sm:$0xf0]  ;;  %v9747_v47 = vld [vmem:[#allocation5 + $0x8d0] sm:$0xf]  ;;  %v10962_v51 = vld [vmem:[#allocation5 + $0x124] sm:$0xf]  ;;  %v12208_v57 = vpack.c.bf16 %v319_v42, %v313_v41  ;;  %p11966_p7 = scmp.lt.s32.totalorder %s11960_s11, %s14558_s5 }
  0x5c   : > { %2202 = vmatpush.bf16.msra.mxu0 %v8644_v17  ;;  %v11211_v50 = vld [vmem:[#allocation5 + $0x8e4] sm:$0xf0]  ;;  %v8765_v52 = vld [vmem:[#allocation5 + $0x138] sm:$0xf0]  ;;  %14745 = vst [vmem:[#allocation17_spill] sm:$0xff] %v12204_v53  ;;  %v9556_v58 = vor.u32 %v11163_v46, %v9555_v45  ;;  %v322_v16 = vld [vmem:[%s12180_s8 + $0x60] sm:$0xff] }
  0x5d   : > { %2251 = vmatpush.bf16.msra.mxu1 %v8836_v21  ;;  %v11010_v55 = vld [vmem:[#allocation5 + $0x2a4] sm:$0xf]  ;;  %v8957_v56 = vld [vmem:[#allocation5 + $0x2b8] sm:$0xf0]  ;;  %v9748_v59 = vor.u32 %v11211_v50, %v9747_v47  ;;  %v8768_v60 = vor.u32 %v10962_v51, %v8765_v52  ;;  %v9531_v61 = vld [vmem:[#allocation5 + $0x720] sm:$0xf] }
  0x5e   : > { %2300 = vmatpush.bf16.msra.mxu2 %v9028_v22  ;;  %v11157_v62 = vld [vmem:[#allocation5 + $0x734] sm:$0xf0]  ;;  %v8960_v63 = vor.u32 %v11010_v55, %v8957_v56  ;;  %v9723_v0 = vld [vmem:[#allocation5 + $0x8a0] sm:$0xf]  ;;  %v10956_v3 = vld [vmem:[#allocation5 + $0xf4] sm:$0xf] }
  0x5f   : > { %2349 = vmatpush.bf16.msra.mxu3 %v9220_v26  ;;  %v11205_v1 = vld [vmem:[#allocation5 + $0x8b4] sm:$0xf0]  ;;  %v9532_v2 = vor.u32 %v11157_v62, %v9531_v61  ;;  %v8741_v4 = vld [vmem:[#allocation5 + $0x108] sm:$0xf0]  ;;  %v9507_v5 = vld [vmem:[#allocation5 + $0x6f0] sm:$0xf] }
  0x60   : > { %2203 = vmatpush.bf16.msra.mxu0 %v8620_v34  ;;  %v9724_v6 = vor.u32 %v11205_v1, %v9723_v0  ;;  %v8744_v7 = vor.u32 %v10956_v3, %v8741_v4  ;;  %v11151_v8 = vld [vmem:[#allocation5 + $0x704] sm:$0xf0]  ;;  %v11004_v9 = vld [vmem:[#allocation5 + $0x274] sm:$0xf]  ;;  %v8933_v10 = vld [vmem:[#allocation5 + $0x288] sm:$0xf0] }
  0x61   : > { %2252 = vmatpush.bf16.msra.mxu1 %v8812_v38  ;;  %v8936_v11 = vor.u32 %v11004_v9, %v8933_v10  ;;  %v9699_v12 = vld [vmem:[#allocation5 + $0x870] sm:$0xf]  ;;  %v11199_v13 = vld [vmem:[#allocation5 + $0x884] sm:$0xf0]  ;;  %v9508_v14 = vor.u32 %v11151_v8, %v9507_v5  ;;  %v329_v19 = vld [vmem:[%s12180_s8 + $0x98] sm:$0xff]  ;;  %s11961_s17 = scalar_lea.hbm %s11960_s11, 768 }
  0x62   : > { %2301 = vmatpush.bf16.msra.mxu2 %v9004_v39  ;;  %v9700_v15 = vor.u32 %v11199_v13, %v9699_v12  ;;  %v328_v17 = vld [vmem:[%s12180_s8 + $0x90] sm:$0xff]  ;;  %v323_v18 = vld [vmem:[%s12180_s8 + $0x68] sm:$0xff]  ;;  %v330_v21 = vld [vmem:[%s12180_s8 + $0xa0] sm:$0xff]  ;;  %p11962_p1 = scmp.ne.s32.totalorder %s11960_s11, %s11961_s17  ;;  %s11965_s14 = scalar_lea.hbm %s14558_s5, 3840 }
  0x63   : > { %2350 = vmatpush.bf16.msra.mxu3 %v9196_v43  ;;  %2204 = vmatmul.bf16.vlgmr.msra.gmra.mxu0 %v12202_v48  ;;  %v324_v20 = vld [vmem:[%s12180_s8 + $0x70] sm:$0xff]  ;;  %v325_v22 = vld [vmem:[%s12180_s8 + $0x78] sm:$0xff]  ;;  %v331_v23 = vld [vmem:[%s12180_s8 + $0xa8] sm:$0xff]  ;;  %v12222_v24 = vpack.c.bf16 %v328_v17, %v322_v16  ;;  %v12224_v25 = vpack.c.bf16 %v329_v19, %v323_v18  ;;  %p11967_p2 = scmp.lt.s32.totalorder %s11965_s14, %s11961_s17 }
  0x64   : > { %2253 = vmatmul.bf16.vlgmr.msra.gmra.mxu1 %v12204_v53  ;;  %2392 = vmatpush.bf16.msrb.mxu0 %v9556_v58  ;;  %v12226_v26 = vpack.c.bf16 %v330_v21, %v324_v20  ;;  %v12228_v27 = vpack.c.bf16 %v331_v23, %v325_v22  ;;  %v10950_v28 = vld [vmem:[#allocation5 + $0xc4] sm:$0xf]  ;;  %v8717_v29 = vld [vmem:[#allocation5 + $0xd8] sm:$0xf0]  ;;  %v9483_v30 = vld [vmem:[#allocation5 + $0x6c0] sm:$0xf]  ;;  %p11963_p4 = pnand %p11962_p1, %p12144_p0 }
  0x65   : > { %2302 = vmatmul.bf16.vlgmr.msra.gmra.mxu2 %v12206_v54  ;;  %2441 = vmatpush.bf16.msrb.mxu1 %v9748_v59  ;;  %14746 = vst [vmem:[#allocation18_spill] sm:$0xff] %v12222_v24  ;;  %v8720_v31 = vor.u32 %v10950_v28, %v8717_v29  ;;  %v11145_v32 = vld [vmem:[#allocation5 + $0x6d4] sm:$0xf0]  ;;  %v10998_v33 = vld [vmem:[#allocation5 + $0x244] sm:$0xf]  ;;  %v340_v41 = vld [vmem:[%s12180_s8 + $0xf0] sm:$0xff]  ;;  %p11968_p9 = por %p11967_p2, %p11966_p7 }
  0x66   : > { %2490 = vmatpush.bf16.msrb.mxu2 %v8792_v44  ;;  %2351 = vmatmul.bf16.vlgmr.msra.gmra.mxu3 %v12208_v57  ;;  %14747 = vst [vmem:[#allocation19_spill] sm:$0xff] %v12224_v25  ;;  %v8909_v34 = vld [vmem:[#allocation5 + $0x258] sm:$0xf0]  ;;  %v9484_v35 = vor.u32 %v11145_v32, %v9483_v30  ;;  %v9675_v37 = vld [vmem:[#allocation5 + $0x840] sm:$0xf]  ;;  %v335_v42 = vld [vmem:[%s12180_s8 + $0xc8] sm:$0xff]  ;;  %p11964_p8 = pneg %p11963_p4 }
  0x67   : > { %2539 = vmatpush.bf16.msrb.mxu3 %v8984_v49  ;;  %v8912_v36 = vor.u32 %v10998_v33, %v8909_v34  ;;  %v11193_v38 = vld [vmem:[#allocation5 + $0x854] sm:$0xf0]  ;;  %v334_v40 = vld [vmem:[%s12180_s8 + $0xc0] sm:$0xff]  ;;  %v336_v44 = vld [vmem:[%s12180_s8 + $0xd0] sm:$0xff] }
  0x68   : > { %2393 = vmatpush.bf16.msrb.mxu0 %v9532_v2  ;;  %v9676_v39 = vor.u32 %v11193_v38, %v9675_v37  ;;  %v341_v43 = vld [vmem:[%s12180_s8 + $0xf8] sm:$0xff]  ;;  %v342_v45 = vld [vmem:[%s12180_s8 + $0x100] sm:$0xff]  ;;  %v343_v47 = vld [vmem:[%s12180_s8 + $0x108] sm:$0xff]  ;;  %v12242_v49 = vpack.c.bf16 %v340_v41, %v334_v40  ;;  %p11969_p10 = pnand %p11968_p9, %p11964_p8 }
  0x69   : > { %2442 = vmatpush.bf16.msrb.mxu1 %v9724_v6  ;;  %v337_v46 = vld [vmem:[%s12180_s8 + $0xd8] sm:$0xff]  ;;  %v12244_v50 = vpack.c.bf16 %v341_v43, %v335_v42  ;;  %v12246_v51 = vpack.c.bf16 %v342_v45, %v336_v44  ;;  %v10944_v55 = vld [vmem:[#allocation5 + $0x94] sm:$0xf]  ;;  %v8693_v56 = vld [vmem:[#allocation5 + $0xa8] sm:$0xf0] }
  0x6a   : > { %2491 = vmatpush.bf16.msrb.mxu2 %v8768_v60  ;;  %14748 = vst [vmem:[#allocation20_spill] sm:$0xff] %v12242_v49  ;;  %v12248_v52 = vpack.c.bf16 %v343_v47, %v337_v46  ;;  %v9459_v58 = vld [vmem:[#allocation5 + $0x690] sm:$0xf]  ;;  %v8696_v59 = vor.u32 %v10944_v55, %v8693_v56  ;;  %v11139_v60 = vld [vmem:[#allocation5 + $0x6a4] sm:$0xf0]  ;;  %v346_v4 = vld [vmem:[%s12180_s8 + $0x120] sm:$0xff] }
  0x6b   : > { %2540 = vmatpush.bf16.msrb.mxu3 %v8960_v63  ;;  %14749 = vst [vmem:[#allocation21_spill] sm:$0xff] %v12244_v50  ;;  %v10992_v61 = vld [vmem:[#allocation5 + $0x214] sm:$0xf]  ;;  %v8885_v62 = vld [vmem:[#allocation5 + $0x228] sm:$0xf0]  ;;  %v9460_v63 = vor.u32 %v11139_v60, %v9459_v58  ;;  %v354_v9 = vld [vmem:[%s12180_s8 + $0x160] sm:$0xff] }
  0x6c   : > { %2394 = vmatpush.bf16.msrb.mxu0 %v9508_v14  ;;  %v8888_v0 = vor.u32 %v10992_v61, %v8885_v62  ;;  %v9651_v1 = vld [vmem:[#allocation5 + $0x810] sm:$0xf]  ;;  %v11187_v2 = vld [vmem:[#allocation5 + $0x824] sm:$0xf0]  ;;  %v349_v10 = vld [vmem:[%s12180_s8 + $0x138] sm:$0xff] }
  0x6d   : > { %2443 = vmatpush.bf16.msrb.mxu1 %v9700_v15  ;;  %v9652_v3 = vor.u32 %v11187_v2, %v9651_v1  ;;  %v352_v5 = vld [vmem:[%s12180_s8 + $0x150] sm:$0xff]  ;;  %v347_v6 = vld [vmem:[%s12180_s8 + $0x128] sm:$0xff]  ;;  %v10938_v16 = vld [vmem:[#allocation5 + $0x64] sm:$0xf] }
  0x6e   : > { %2492 = vmatpush.bf16.msrb.mxu2 %v8744_v7  ;;  %v353_v7 = vld [vmem:[%s12180_s8 + $0x158] sm:$0xff]  ;;  %v348_v8 = vld [vmem:[%s12180_s8 + $0x130] sm:$0xff]  ;;  %v12262_v12 = vpack.c.bf16 %v352_v5, %v346_v4  ;;  %v9435_v18 = vld [vmem:[#allocation5 + $0x660] sm:$0xf] }
  0x6f   : > { %2541 = vmatpush.bf16.msrb.mxu3 %v8936_v11  ;;  %v355_v11 = vld [vmem:[%s12180_s8 + $0x168] sm:$0xff]  ;;  %v12264_v13 = vpack.c.bf16 %v353_v7, %v347_v6  ;;  %v12266_v14 = vpack.c.bf16 %v354_v9, %v348_v8  ;;  %v8669_v17 = vld [vmem:[#allocation5 + $0x78] sm:$0xf0]  ;;  %v11133_v20 = vld [vmem:[#allocation5 + $0x674] sm:$0xf0] }
  0x70   : > { %2395 = vmatpush.bf16.msrb.mxu0 %v9484_v35  ;;  %14750 = vst [vmem:[#allocation22_spill] sm:$0xff] %v12262_v12  ;;  %v12268_v15 = vpack.c.bf16 %v355_v11, %v349_v10  ;;  %v8672_v19 = vor.u32 %v10938_v16, %v8669_v17  ;;  %v10986_v21 = vld [vmem:[#allocation5 + $0x1e4] sm:$0xf]  ;;  %v8861_v22 = vld [vmem:[#allocation5 + $0x1f8] sm:$0xf0]  ;;  %v9436_v23 = vor.u32 %v11133_v20, %v9435_v18  ;;  %v364_v33 = vld [vmem:[%s12180_s8 + $0x1b0] sm:$0xff] }
  0x71   : > { %2444 = vmatpush.bf16.msrb.mxu1 %v9676_v39  ;;  %14751 = vst [vmem:[#allocation23_spill] sm:$0xff] %v12264_v13  ;;  %v8864_v28 = vor.u32 %v10986_v21, %v8861_v22  ;;  %v9627_v29 = vld [vmem:[#allocation5 + $0x7e0] sm:$0xf]  ;;  %v11181_v30 = vld [vmem:[#allocation5 + $0x7f4] sm:$0xf0]  ;;  %v359_v34 = vld [vmem:[%s12180_s8 + $0x188] sm:$0xff] }
  0x72   : > { %2493 = vmatpush.bf16.msrb.mxu2 %v8720_v31  ;;  %v9628_v31 = vor.u32 %v11181_v30, %v9627_v29  ;;  %v358_v32 = vld [vmem:[%s12180_s8 + $0x180] sm:$0xff]  ;;  %v365_v35 = vld [vmem:[%s12180_s8 + $0x1b8] sm:$0xff]  ;;  %v367_v39 = vld [vmem:[%s12180_s8 + $0x1c8] sm:$0xff] }
  0x73   : > { %2209 = vmatmul.bf16.gmra.mxu0 %v12222_v24  ;;  %2542 = vmatpush.bf16.msrb.mxu3 %v8912_v36  ;;  %v360_v36 = vld [vmem:[%s12180_s8 + $0x190] sm:$0xff]  ;;  %v366_v37 = vld [vmem:[%s12180_s8 + $0x1c0] sm:$0xff]  ;;  %v361_v38 = vld [vmem:[%s12180_s8 + $0x198] sm:$0xff]  ;;  %v12282_v40 = vpack.c.bf16 %v364_v33, %v358_v32  ;;  %v12284_v41 = vpack.c.bf16 %v365_v35, %v359_v34 }
  0x74   : > { %2258 = vmatmul.bf16.gmra.mxu1 %v12224_v25  ;;  %2396 = vmatpush.bf16.msrb.mxu0 %v9460_v63  ;;  %v12286_v42 = vpack.c.bf16 %v366_v37, %v360_v36  ;;  %v12288_v43 = vpack.c.bf16 %v367_v39, %v361_v38  ;;  %v10932_v44 = vld [vmem:[#allocation5 + $0x34] sm:$0xf]  ;;  %v8645_v45 = vld [vmem:[#allocation5 + $0x48] sm:$0xf0]  ;;  %v9411_v46 = vld [vmem:[#allocation5 + $0x630] sm:$0xf] }
  0x75   : > { %2307 = vmatmul.bf16.gmra.mxu2 %v12226_v26  ;;  %2445 = vmatpush.bf16.msrb.mxu1 %v9652_v3  ;;  %14752 = vst [vmem:[#allocation24_spill] sm:$0xff] %v12282_v40  ;;  %v8648_v47 = vor.u32 %v10932_v44, %v8645_v45  ;;  %v11127_v55 = vld [vmem:[#allocation5 + $0x644] sm:$0xf0]  ;;  %v10980_v56 = vld [vmem:[#allocation5 + $0x1b4] sm:$0xf]  ;;  %v377_v3 = vld [vmem:[%s12180_s8 + $0x218] sm:$0xff] }
  0x76   : > { %2356 = vmatmul.bf16.gmra.mxu3 %v12228_v27  ;;  %2494 = vmatpush.bf16.msrb.mxu2 %v8696_v59  ;;  %14753 = vst [vmem:[#allocation25_spill] sm:$0xff] %v12284_v41  ;;  %v8837_v58 = vld [vmem:[#allocation5 + $0x1c8] sm:$0xf0]  ;;  %v9412_v59 = vor.u32 %v11127_v55, %v9411_v46  ;;  %v9603_v61 = vld [vmem:[#allocation5 + $0x7b0] sm:$0xf]  ;;  %v378_v5 = vld [vmem:[%s12180_s8 + $0x220] sm:$0xff] }
  0x77   : > { %2543 = vmatpush.bf16.msrb.mxu3 %v8888_v0  ;;  %v8840_v60 = vor.u32 %v10980_v56, %v8837_v58  ;;  %v11175_v62 = vld [vmem:[#allocation5 + $0x7c4] sm:$0xf0]  ;;  %v370_v0 = vld [vmem:[%s12180_s8 + $0x1e0] sm:$0xff]  ;;  %v376_v1 = vld [vmem:[%s12180_s8 + $0x210] sm:$0xff] }
  0x78   : > { %2397 = vmatpush.bf16.msrb.mxu0 %v9436_v23  ;;  %v9604_v63 = vor.u32 %v11175_v62, %v9603_v61  ;;  %v371_v2 = vld [vmem:[%s12180_s8 + $0x1e8] sm:$0xff]  ;;  %v372_v4 = vld [vmem:[%s12180_s8 + $0x1f0] sm:$0xff]  ;;  %v373_v6 = vld [vmem:[%s12180_s8 + $0x1f8] sm:$0xff]  ;;  %v12302_v8 = vpack.c.bf16 %v376_v1, %v370_v0 }
  0x79   : > { %2446 = vmatpush.bf16.msrb.mxu1 %v9628_v31  ;;  %v379_v7 = vld [vmem:[%s12180_s8 + $0x228] sm:$0xff]  ;;  %v12304_v9 = vpack.c.bf16 %v377_v3, %v371_v2  ;;  %v12306_v10 = vpack.c.bf16 %v378_v5, %v372_v4  ;;  %v10926_v16 = vld [vmem:[#allocation5 + $0x4] sm:$0xf]  ;;  %v8621_v17 = vld [vmem:[#allocation5 + $0x18] sm:$0xf0] }
  0x7a   : > { %2495 = vmatpush.bf16.msrb.mxu2 %v8672_v19  ;;  %14754 = vst [vmem:[#allocation26_spill] sm:$0xff] %v12302_v8  ;;  %v12308_v11 = vpack.c.bf16 %v379_v7, %v373_v6  ;;  %v9387_v18 = vld [vmem:[#allocation5 + $0x600] sm:$0xf]  ;;  %v8624_v19 = vor.u32 %v10926_v16, %v8621_v17  ;;  %v11121_v20 = vld [vmem:[#allocation5 + $0x614] sm:$0xf0]  ;;  %v388_v33 = vld [vmem:[%s12180_s8 + $0x270] sm:$0xff] }
  0x7b   : > { %2544 = vmatpush.bf16.msrb.mxu3 %v8864_v28  ;;  %14755 = vst [vmem:[#allocation27_spill] sm:$0xff] %v12304_v9  ;;  %v10974_v21 = vld [vmem:[#allocation5 + $0x184] sm:$0xf]  ;;  %v8813_v22 = vld [vmem:[#allocation5 + $0x198] sm:$0xf0]  ;;  %v9388_v23 = vor.u32 %v11121_v20, %v9387_v18  ;;  %v383_v34 = vld [vmem:[%s12180_s8 + $0x248] sm:$0xff] }
  0x7c   : > { %2398 = vmatpush.bf16.msrb.mxu0 %v9412_v59  ;;  %14756 = vst [vmem:[#allocation28_spill] sm:$0xff] %v12306_v10  ;;  %v8816_v28 = vor.u32 %v10974_v21, %v8813_v22  ;;  %v9579_v29 = vld [vmem:[#allocation5 + $0x780] sm:$0xf]  ;;  %v11169_v30 = vld [vmem:[#allocation5 + $0x794] sm:$0xf0]  ;;  %v384_v36 = vld [vmem:[%s12180_s8 + $0x250] sm:$0xff] }
  0x7d   : > { %2447 = vmatpush.bf16.msrb.mxu1 %v9604_v63  ;;  %14757 = vst [vmem:[#allocation29_spill] sm:$0xff] %v12308_v11  ;;  %v9580_v31 = vor.u32 %v11169_v30, %v9579_v29  ;;  %v382_v32 = vld [vmem:[%s12180_s8 + $0x240] sm:$0xff]  ;;  %v389_v35 = vld [vmem:[%s12180_s8 + $0x278] sm:$0xff]  ;;  %v391_v39 = vld [vmem:[%s12180_s8 + $0x288] sm:$0xff] }
  0x7e   : > { %2496 = vmatpush.bf16.msrb.mxu2 %v8648_v47  ;;  %v390_v37 = vld [vmem:[%s12180_s8 + $0x280] sm:$0xff]  ;;  %v385_v38 = vld [vmem:[%s12180_s8 + $0x258] sm:$0xff]  ;;  %v12322_v44 = vpack.c.bf16 %v388_v33, %v382_v32  ;;  %v12324_v45 = vpack.c.bf16 %v389_v35, %v383_v34  ;;  %v11160_v55 = vld [vmem:[#allocation5 + $0x754] sm:$0xf] }
  0x7f   : > { %2545 = vmatpush.bf16.msrb.mxu3 %v8840_v60  ;;  %v12326_v46 = vpack.c.bf16 %v390_v37, %v384_v36  ;;  %v12328_v47 = vpack.c.bf16 %v391_v39, %v385_v38  ;;  %v9557_v56 = vld [vmem:[#allocation5 + $0x768] sm:$0xf0]  ;;  %v11064_v58 = vld [vmem:[#allocation5 + $0x454] sm:$0xf]  ;;  %v394_v4 = vld [vmem:[%s12180_s8 + $0x2a0] sm:$0xff] }
  0x80   : > { %2399 = vmatpush.bf16.msrb.mxu0 %v9388_v23  ;;  %14758 = vst [vmem:[#allocation30_spill] sm:$0xff] %v12322_v44  ;;  %v9560_v59 = vor.u32 %v11160_v55, %v9557_v56  ;;  %v9173_v60 = vld [vmem:[#allocation5 + $0x468] sm:$0xf0]  ;;  %v11208_v61 = vld [vmem:[#allocation5 + $0x8d4] sm:$0xf]  ;;  %v401_v7 = vld [vmem:[%s12180_s8 + $0x2d8] sm:$0xff] }
  0x81   : > { %2448 = vmatpush.bf16.msrb.mxu1 %v9580_v31  ;;  %14759 = vst [vmem:[#allocation31_spill] sm:$0xff] %v12324_v45  ;;  %v9749_v62 = vld [vmem:[#allocation5 + $0x8e8] sm:$0xf0]  ;;  %v9176_v63 = vor.u32 %v11064_v58, %v9173_v60  ;;  %v11112_v1 = vld [vmem:[#allocation5 + $0x5d4] sm:$0xf]  ;;  %v402_v17 = vld [vmem:[%s12180_s8 + $0x2e0] sm:$0xff] }
  0x82   : > { %2497 = vmatpush.bf16.msrb.mxu2 %v8624_v19  ;;  %v9752_v0 = vor.u32 %v11208_v61, %v9749_v62  ;;  %v9365_v2 = vld [vmem:[#allocation5 + $0x5e8] sm:$0xf0]  ;;  %v400_v5 = vld [vmem:[%s12180_s8 + $0x2d0] sm:$0xff]  ;;  %v397_v18 = vld [vmem:[%s12180_s8 + $0x2b8] sm:$0xff] }
  0x83   : > { %2214 = vmatmul.bf16.gmra.mxu0 %v12242_v49  ;;  %2546 = vmatpush.bf16.msrb.mxu3 %v8816_v28  ;;  %v9368_v3 = vor.u32 %v11112_v1, %v9365_v2  ;;  %v395_v6 = vld [vmem:[%s12180_s8 + $0x2a8] sm:$0xff]  ;;  %v396_v16 = vld [vmem:[%s12180_s8 + $0x2b0] sm:$0xff]  ;;  %v12342_v20 = vpack.c.bf16 %v400_v5, %v394_v4  ;;  %v11154_v28 = vld [vmem:[#allocation5 + $0x724] sm:$0xf] }
  0x84   : > { %2263 = vmatmul.bf16.gmra.mxu1 %v12244_v50  ;;  %2588 = vmatpush.bf16.msra.mxu0 %v9176_v63  ;;  %v403_v19 = vld [vmem:[%s12180_s8 + $0x2e8] sm:$0xff]  ;;  %v12344_v21 = vpack.c.bf16 %v401_v7, %v395_v6  ;;  %v12346_v22 = vpack.c.bf16 %v402_v17, %v396_v16  ;;  %v9533_v29 = vld [vmem:[#allocation5 + $0x738] sm:$0xf0]  ;;  %v11058_v30 = vld [vmem:[#allocation5 + $0x424] sm:$0xf] }
  0x85   : > { %2312 = vmatmul.bf16.gmra.mxu2 %v12246_v51  ;;  %2637 = vmatpush.bf16.msra.mxu1 %v9368_v3  ;;  %14760 = vst [vmem:[#allocation32_spill] sm:$0xff] %v12342_v20  ;;  %v12348_v23 = vpack.c.bf16 %v403_v19, %v397_v18  ;;  %v9536_v31 = vor.u32 %v11154_v28, %v9533_v29  ;;  %v9149_v32 = vld [vmem:[#allocation5 + $0x438] sm:$0xf0]  ;;  %v11202_v33 = vld [vmem:[#allocation5 + $0x8a4] sm:$0xf]  ;;  %v320_v58 = vld [vmem:[%s12180_s8 + $0x50] sm:$0xff] }
  0x86   : > { %2361 = vmatmul.bf16.gmra.mxu3 %v12248_v52  ;;  %2686 = vmatpush.bf16.msra.mxu2 %v9560_v59  ;;  %14761 = vst [vmem:[#allocation33_spill] sm:$0xff] %v12344_v21  ;;  %v9725_v34 = vld [vmem:[#allocation5 + $0x8b8] sm:$0xf0]  ;;  %v9152_v35 = vor.u32 %v11058_v30, %v9149_v32  ;;  %v12354_v37 = vld [vmem:[#allocation7] sm:$0x3f]  ;;  %v315_v60 = vld [vmem:[%s12180_s8 + $0x28] sm:$0xff] }
  0x87   : > { %2735 = vmatpush.bf16.msra.mxu3 %v9752_v0  ;;  %14762 = vst [vmem:[#allocation34_spill] sm:$0xff] %v12346_v22  ;;  %v9728_v36 = vor.u32 %v11202_v33, %v9725_v34  ;;  %v11106_v38 = vld [vmem:[#allocation5 + $0x5a4] sm:$0xf]  ;;  %v9341_v39 = vld [vmem:[#allocation5 + $0x5b8] sm:$0xf0]  ;;  %v12359_v59 = vperm.slane %v12354_v37, 0 }
  0x88   : > { %14763 = vst [vmem:[#allocation35_spill] sm:$0xff] %v12348_v23  ;;  %2589 = vmatpush.bf16.msra.mxu0 %v9152_v35  ;;  %v9344_v55 = vor.u32 %v11106_v38, %v9341_v39  ;;  %v314_v56 = vld [vmem:[%s12180_s8 + $0x20] sm:$0xff]  ;;  %v321_v61 = vld [vmem:[%s12180_s8 + $0x58] sm:$0xff]  ;;  %v11148_v4 = vld [vmem:[#allocation5 + $0x6f4] sm:$0xf] }
  0x89   : > { %v12363_v62 = vpack.c.bf16 %v320_v58, %v314_v56  ;;  %v12365_v0 = vpack.c.bf16 %v321_v61, %v315_v60  ;;  %v9509_v5 = vld [vmem:[#allocation5 + $0x708] sm:$0xf0]  ;;  %v11052_v6 = vld [vmem:[#allocation5 + $0x3f4] sm:$0xf]  ;;  %v326_v56 = vld [vmem:[%s12180_s8 + $0x80] sm:$0xff] }
  0x8a   : > { %2687 = vmatpush.bf16.msra.mxu2 %v9536_v31  ;;  %2638 = vmatpush.bf16.msra.mxu1 %v9344_v55  ;;  %v9512_v7 = vor.u32 %v11148_v4, %v9509_v5  ;;  %v9125_v16 = vld [vmem:[#allocation5 + $0x408] sm:$0xf0]  ;;  %v11196_v17 = vld [vmem:[#allocation5 + $0x874] sm:$0xf]  ;;  %v333_v61 = vld [vmem:[%s12180_s8 + $0xb8] sm:$0xff] }
  0x8b   : > { %2736 = vmatpush.bf16.msra.mxu3 %v9728_v36  ;;  %14764 = vst [vmem:[#allocation36_spill] sm:$0xff] %v12363_v62  ;;  %v9701_v18 = vld [vmem:[#allocation5 + $0x888] sm:$0xf0]  ;;  %v9128_v28 = vor.u32 %v11052_v6, %v9125_v16  ;;  %v11100_v36 = vld [vmem:[#allocation5 + $0x574] sm:$0xf] }
  0x8c   : > { %14765 = vst [vmem:[#allocation37_spill] sm:$0xff] %v12365_v0  ;;  %v9704_v29 = vor.u32 %v11196_v17, %v9701_v18  ;;  %v9317_v38 = vld [vmem:[#allocation5 + $0x588] sm:$0xf0]  ;;  %v332_v58 = vld [vmem:[%s12180_s8 + $0xb0] sm:$0xff]  ;;  %v11142_v18 = vld [vmem:[#allocation5 + $0x6c4] sm:$0xf] }
  0x8d   : > { %2590 = vmatpush.bf16.msra.mxu0 %v9128_v28  ;;  %v9320_v55 = vor.u32 %v11100_v36, %v9317_v38  ;;  %v327_v60 = vld [vmem:[%s12180_s8 + $0x88] sm:$0xff]  ;;  %v11046_v28 = vld [vmem:[#allocation5 + $0x3c4] sm:$0xf] }
  0x8e   : > { %2688 = vmatpush.bf16.msra.mxu2 %v9512_v7  ;;  %v12381_v5 = vpack.c.bf16 %v333_v61, %v327_v60  ;;  %v11094_v61 = vld [vmem:[#allocation5 + $0x544] sm:$0xf] }
  0x8f   : > { %2737 = vmatpush.bf16.msra.mxu3 %v9704_v29  ;;  %2639 = vmatpush.bf16.msra.mxu1 %v9320_v55 }
  0x90   : > { %14767 = vst [vmem:[#allocation39_spill] sm:$0xff] %v12381_v5 }
  0x93   : > { %2219 = vmatmul.bf16.gmra.mxu0 %v12262_v12 }
  0x94   : > { %2268 = vmatmul.bf16.gmra.mxu1 %v12264_v13 }
  0x95   : > { %2317 = vmatmul.bf16.gmra.mxu2 %v12266_v14 }
  0x96   : > { %2366 = vmatmul.bf16.gmra.mxu3 %v12268_v15 }
  0xa3   : > { %2224 = vmatmul.bf16.gmra.mxu0 %v12282_v40 }
  0xa4   : > { %2273 = vmatmul.bf16.gmra.mxu1 %v12284_v41 }
  0xa5   : > { %2322 = vmatmul.bf16.gmra.mxu2 %v12286_v42 }
  0xa6   : > { %2371 = vmatmul.bf16.gmra.mxu3 %v12288_v43 }
  0xb3   : > { %2229 = vmatmul.bf16.gmra.mxu0 %v12302_v8 }
  0xb4   : > { %2278 = vmatmul.bf16.gmra.mxu1 %v12304_v9 }
  0xb5   : > { %2327 = vmatmul.bf16.gmra.mxu2 %v12306_v10 }
  0xb6   : > { %2376 = vmatmul.bf16.gmra.mxu3 %v12308_v11 }
  0xc3   : > { %2234 = vmatmul.bf16.gmra.mxu0 %v12322_v44 }
  0xc4   : > { %2283 = vmatmul.bf16.gmra.mxu1 %v12324_v45 }
  0xc5   : > { %2332 = vmatmul.bf16.gmra.mxu2 %v12326_v46 }
  0xc6   : > { %2381 = vmatmul.bf16.gmra.mxu3 %v12328_v47 }
  0xd3   : > { %2239 = vmatmul.bf16.gmra.mxu0 %v12342_v20 }
  0xd4   : > { %2288 = vmatmul.bf16.gmra.mxu1 %v12344_v21 }
  0xd5   : > { %2337 = vmatmul.bf16.gmra.mxu2 %v12346_v22 }
  0xd6   : > { %2386 = vmatmul.bf16.gmra.mxu3 %v12348_v23 }
  0xe0   : > { %v2205_v63 = vpop.f32.mrf.mxu0 }
  0xe1   : > { %v2206_v1 = vadd.f32 %v2205_v63, %v12359_v59  ;;  %v2254_v2 = vpop.f32.mrf.mxu1 }
  0xe3   : > { %v2255_v3 = vadd.f32 %v2254_v2, %v2206_v1  ;;  %2400 = vmatmul.bf16.vlgmr.msrb.gmra.mxu0 %v12363_v62  ;;  %v12379_v1 = vpack.c.bf16 %v332_v58, %v326_v56 }
  0xe4   : > { %2449 = vmatmul.bf16.vlgmr.msrb.gmra.mxu1 %v12365_v0 }
  0xe5   : > { %2498 = vmatmul.bf16.vlgmr.msrb.gmra.mxu2 %v12202_v48  ;;  %14766 = vst [vmem:[#allocation38_spill] sm:$0xff] %v12379_v1 }
  0xe6   : > { %2547 = vmatmul.bf16.vlgmr.msrb.gmra.mxu3 %v12204_v53 }
  0xe8   : > { %v2303_v19 = vpop.f32.mrf.mxu2  ;;  %v2207_v32 = vpop.f32.mrf.mxu0 }
  0xe9   : > { %v2304_v30 = vadd.f32 %v2303_v19, %v2255_v3  ;;  %v2352_v31 = vpop.f32.mrf.mxu3  ;;  %v2208_v33 = vadd.f32 %v2207_v32, %v12359_v59  ;;  %v2256_v34 = vpop.f32.mrf.mxu1  ;;  %v9485_v19 = vld [vmem:[#allocation5 + $0x6d8] sm:$0xf0] }
  0xea   : > { %v9488_v29 = vor.u32 %v11142_v18, %v9485_v19  ;;  %v9677_v32 = vld [vmem:[#allocation5 + $0x858] sm:$0xf0] }
  0xeb   : > { %v12373_v35 = vadd.f32 %v2352_v31, %v2304_v30  ;;  %v2257_v39 = vadd.f32 %v2256_v34, %v2208_v33  ;;  %v9101_v30 = vld [vmem:[#allocation5 + $0x3d8] sm:$0xf0]  ;;  %v11190_v31 = vld [vmem:[#allocation5 + $0x844] sm:$0xf] }
  0xec   : > { %v9104_v34 = vor.u32 %v11046_v28, %v9101_v30  ;;  %v9680_v36 = vor.u32 %v11190_v31, %v9677_v32  ;;  %2689 = vmatpush.bf16.msra.mxu2 %v9488_v29  ;;  %v345_v18 = vld [vmem:[%s12180_s8 + $0x118] sm:$0xff] }
  0xee   : > { %2591 = vmatpush.bf16.msra.mxu0 %v9104_v34  ;;  %2738 = vmatpush.bf16.msra.mxu3 %v9680_v36 }
  0xf0   : > { %v2305_v63 = vpop.f32.mrf.mxu2  ;;  %v2210_v4 = vpop.f32.mrf.mxu0 }
  0xf1   : > { %v2306_v2 = vadd.f32 %v2305_v63, %v2257_v39  ;;  %v2354_v3 = vpop.f32.mrf.mxu3  ;;  %v2211_v6 = vadd.f32 %v2210_v4, %v12359_v59  ;;  %v2259_v7 = vpop.f32.mrf.mxu1  ;;  %v9293_v63 = vld [vmem:[#allocation5 + $0x558] sm:$0xf0]  ;;  %v338_v4 = vld [vmem:[%s12180_s8 + $0xe0] sm:$0xff] }
  0xf3   : > { %v12384_v16 = vadd.f32 %v2354_v3, %v2306_v2  ;;  %v2260_v17 = vadd.f32 %v2259_v7, %v2211_v6  ;;  %2405 = vmatmul.bf16.gmra.mxu0 %v12379_v1  ;;  %v9296_v3 = vor.u32 %v11094_v61, %v9293_v63  ;;  %v344_v6 = vld [vmem:[%s12180_s8 + $0x110] sm:$0xff]  ;;  %v339_v7 = vld [vmem:[%s12180_s8 + $0xe8] sm:$0xff] }
  0xf4   : > { %2454 = vmatmul.bf16.gmra.mxu1 %v12381_v5  ;;  %v12397_v19 = vpack.c.bf16 %v344_v6, %v338_v4  ;;  %v12399_v31 = vpack.c.bf16 %v345_v18, %v339_v7  ;;  %v11184_v61 = vld [vmem:[#allocation5 + $0x814] sm:$0xf]  ;;  %v9653_v63 = vld [vmem:[#allocation5 + $0x828] sm:$0xf0] }
  0xf5   : > { %2503 = vmatmul.bf16.gmra.mxu2 %v12222_v24  ;;  %2640 = vmatpush.bf16.msra.mxu1 %v9296_v3  ;;  %v9656_v4 = vor.u32 %v11184_v61, %v9653_v63  ;;  %v357_v61 = vld [vmem:[%s12180_s8 + $0x178] sm:$0xff] }
  0xf6   : > { %2552 = vmatmul.bf16.gmra.mxu3 %v12224_v25 }
  0xf7   : > { %2739 = vmatpush.bf16.msra.mxu3 %v9656_v4 }
  0xf8   : > { %v2308_v33 = vpop.f32.mrf.mxu2  ;;  %v2212_v55 = vpop.f32.mrf.mxu0 }
  0xf9   : > { %v2309_v38 = vadd.f32 %v2308_v33, %v2260_v17  ;;  %v2357_v39 = vpop.f32.mrf.mxu3  ;;  %v2213_v56 = vadd.f32 %v2212_v55, %v12359_v59  ;;  %v2261_v58 = vpop.f32.mrf.mxu1  ;;  %v11040_v55 = vld [vmem:[#allocation5 + $0x394] sm:$0xf] }
  0xfb   : > { %v12391_v60 = vadd.f32 %v2357_v39, %v2309_v38  ;;  %v2262_v2 = vadd.f32 %v2261_v58, %v2213_v56  ;;  %v11136_v38 = vld [vmem:[#allocation5 + $0x694] sm:$0xf]  ;;  %v9461_v39 = vld [vmem:[#allocation5 + $0x6a8] sm:$0xf0] }
  0xfc   : > { %v9464_v56 = vor.u32 %v11136_v38, %v9461_v39  ;;  %v9077_v58 = vld [vmem:[#allocation5 + $0x3a8] sm:$0xf0]  ;;  %v350_v39 = vld [vmem:[%s12180_s8 + $0x140] sm:$0xff] }
  0xfd   : > { %v9080_v3 = vor.u32 %v11040_v55, %v9077_v58  ;;  %v356_v55 = vld [vmem:[%s12180_s8 + $0x170] sm:$0xff]  ;;  %v351_v58 = vld [vmem:[%s12180_s8 + $0x148] sm:$0xff] }
  0xfe   : > { %2690 = vmatpush.bf16.msra.mxu2 %v9464_v56  ;;  %v12415_v63 = vpack.c.bf16 %v356_v55, %v350_v39  ;;  %v9629_v39 = vld [vmem:[#allocation5 + $0x7f8] sm:$0xf0] }
  0xff   : > { %2592 = vmatpush.bf16.msra.mxu0 %v9080_v3 }
 0x100   : > { %v2310_v17 = vpop.f32.mrf.mxu2  ;;  %v2215_v30 = vpop.f32.mrf.mxu0 }
 0x101   : > { %v2311_v28 = vadd.f32 %v2310_v17, %v2262_v2  ;;  %v2359_v29 = vpop.f32.mrf.mxu3  ;;  %v2216_v32 = vadd.f32 %v2215_v30, %v12359_v59  ;;  %v2264_v33 = vpop.f32.mrf.mxu1  ;;  %v11088_v30 = vld [vmem:[#allocation5 + $0x514] sm:$0xf] }
 0x103   : > { %v12402_v34 = vadd.f32 %v2359_v29, %v2311_v28  ;;  %v2265_v36 = vadd.f32 %v2264_v33, %v2216_v32  ;;  %2410 = vmatmul.bf16.gmra.mxu0 %v12397_v19  ;;  %v9269_v32 = vld [vmem:[#allocation5 + $0x528] sm:$0xf0] }
 0x104   : > { %2459 = vmatmul.bf16.gmra.mxu1 %v12399_v31  ;;  %v9272_v38 = vor.u32 %v11088_v30, %v9269_v32  ;;  %v11034_v30 = vld [vmem:[#allocation5 + $0x364] sm:$0xf] }
 0x105   : > { %2508 = vmatmul.bf16.gmra.mxu2 %v12242_v49 }
 0x106   : > { %2557 = vmatmul.bf16.gmra.mxu3 %v12244_v50  ;;  %2641 = vmatpush.bf16.msra.mxu1 %v9272_v38  ;;  %v12417_v50 = vpack.c.bf16 %v357_v61, %v351_v58  ;;  %v11178_v38 = vld [vmem:[#allocation5 + $0x7e4] sm:$0xf] }
 0x107   : > { %v9632_v61 = vor.u32 %v11178_v38, %v9629_v39  ;;  %v363_v38 = vld [vmem:[%s12180_s8 + $0x1a8] sm:$0xff]  ;;  %v369_v39 = vld [vmem:[%s12180_s8 + $0x1d8] sm:$0xff] }
 0x108   : > { %v2313_v2 = vpop.f32.mrf.mxu2  ;;  %v2217_v18 = vpop.f32.mrf.mxu0  ;;  %14768 = vst [vmem:[#allocation40_spill] sm:$0xff] %v12417_v50  ;;  %v12435_v25 = vpack.c.bf16 %v369_v39, %v363_v38 }
 0x109   : > { %v2314_v6 = vadd.f32 %v2313_v2, %v2265_v36  ;;  %v2362_v7 = vpop.f32.mrf.mxu3  ;;  %v2218_v17 = vadd.f32 %v2217_v18, %v12359_v59  ;;  %v2266_v28 = vpop.f32.mrf.mxu1  ;;  %2740 = vmatpush.bf16.msra.mxu3 %v9632_v61 }
 0x10a   : > { %14770 = vst [vmem:[#allocation42_spill] sm:$0xff] %v12435_v25 }
 0x10b   : > { %v12409_v29 = vadd.f32 %v2362_v7, %v2314_v6  ;;  %v2267_v33 = vadd.f32 %v2266_v28, %v2218_v17  ;;  %v11130_v17 = vld [vmem:[#allocation5 + $0x664] sm:$0xf]  ;;  %v9437_v28 = vld [vmem:[#allocation5 + $0x678] sm:$0xf0] }
 0x10c   : > { %v9440_v32 = vor.u32 %v11130_v17, %v9437_v28  ;;  %v11082_v17 = vld [vmem:[#allocation5 + $0x4e4] sm:$0xf]  ;;  %v9245_v28 = vld [vmem:[#allocation5 + $0x4f8] sm:$0xf0] }
 0x10e   : > { %2691 = vmatpush.bf16.msra.mxu2 %v9440_v32 }
 0x110   : > { %v2315_v36 = vpop.f32.mrf.mxu2  ;;  %v2220_v18 = vpop.f32.mrf.mxu0 }
 0x111   : > { %v2316_v56 = vadd.f32 %v2315_v36, %v2267_v33  ;;  %v2364_v2 = vpop.f32.mrf.mxu3  ;;  %v2221_v3 = vadd.f32 %v2220_v18, %v12359_v59  ;;  %v2269_v4 = vpop.f32.mrf.mxu1  ;;  %v9053_v33 = vld [vmem:[#allocation5 + $0x378] sm:$0xf0] }
 0x112   : > { %v9056_v58 = vor.u32 %v11034_v30, %v9053_v33  ;;  %v362_v30 = vld [vmem:[%s12180_s8 + $0x1a0] sm:$0xff]  ;;  %v368_v33 = vld [vmem:[%s12180_s8 + $0x1d0] sm:$0xff] }
 0x113   : > { %v12420_v6 = vadd.f32 %v2364_v2, %v2316_v56  ;;  %v2270_v7 = vadd.f32 %v2269_v4, %v2221_v3  ;;  %2415 = vmatmul.bf16.gmra.mxu0 %v12415_v63 }
 0x114   : > { %2464 = vmatmul.bf16.gmra.mxu1 %v12417_v50  ;;  %2593 = vmatpush.bf16.msra.mxu0 %v9056_v58 }
 0x115   : > { %2513 = vmatmul.bf16.gmra.mxu2 %v12262_v12  ;;  %v9248_v12 = vor.u32 %v11082_v17, %v9245_v28  ;;  %v9029_v17 = vld [vmem:[#allocation5 + $0x348] sm:$0xf0]  ;;  %v11172_v28 = vld [vmem:[#allocation5 + $0x7b4] sm:$0xf] }
 0x116   : > { %2562 = vmatmul.bf16.gmra.mxu3 %v12264_v13 }
 0x117   : > { %2642 = vmatpush.bf16.msra.mxu1 %v9248_v12  ;;  %v11124_v12 = vld [vmem:[#allocation5 + $0x634] sm:$0xf] }
 0x118   : > { %v2318_v55 = vpop.f32.mrf.mxu2  ;;  %v2222_v2 = vpop.f32.mrf.mxu0 }
 0x119   : > { %v2319_v36 = vadd.f32 %v2318_v55, %v2270_v7  ;;  %v2367_v56 = vpop.f32.mrf.mxu3  ;;  %v2223_v18 = vadd.f32 %v2222_v2, %v12359_v59  ;;  %v2271_v3 = vpop.f32.mrf.mxu1  ;;  %v12433_v55 = vpack.c.bf16 %v368_v33, %v362_v30  ;;  %v9605_v30 = vld [vmem:[#allocation5 + $0x7c8] sm:$0xf0] }
 0x11a   : > { %v9608_v38 = vor.u32 %v11172_v28, %v9605_v30  ;;  %v375_v28 = vld [vmem:[%s12180_s8 + $0x208] sm:$0xff]  ;;  %v381_v30 = vld [vmem:[%s12180_s8 + $0x238] sm:$0xff] }
 0x11b   : > { %v12427_v4 = vadd.f32 %v2367_v56, %v2319_v36  ;;  %v2272_v13 = vadd.f32 %v2271_v3, %v2223_v18  ;;  %14769 = vst [vmem:[#allocation41_spill] sm:$0xff] %v12433_v55  ;;  %v11028_v18 = vld [vmem:[#allocation5 + $0x334] sm:$0xf]  ;;  %v12453_v53 = vpack.c.bf16 %v381_v30, %v375_v28 }
 0x11c   : > { %2741 = vmatpush.bf16.msra.mxu3 %v9608_v38 }
 0x11d   : > { %14772 = vst [vmem:[#allocation44_spill] sm:$0xff] %v12453_v53 }
 0x120   : > { %v2320_v7 = vpop.f32.mrf.mxu2  ;;  %v2225_v2 = vpop.f32.mrf.mxu0 }
 0x121   : > { %v2321_v32 = vadd.f32 %v2320_v7, %v2272_v13  ;;  %v2369_v49 = vpop.f32.mrf.mxu3  ;;  %v2226_v58 = vadd.f32 %v2225_v2, %v12359_v59  ;;  %v2274_v61 = vpop.f32.mrf.mxu1  ;;  %v9413_v13 = vld [vmem:[#allocation5 + $0x648] sm:$0xf0] }
 0x122   : > { %v9416_v3 = vor.u32 %v11124_v12, %v9413_v13  ;;  %v11076_v12 = vld [vmem:[#allocation5 + $0x4b4] sm:$0xf]  ;;  %v9221_v13 = vld [vmem:[#allocation5 + $0x4c8] sm:$0xf0] }
 0x123   : > { %v12438_v36 = vadd.f32 %v2369_v49, %v2321_v32  ;;  %v2275_v56 = vadd.f32 %v2274_v61, %v2226_v58  ;;  %2420 = vmatmul.bf16.gmra.mxu0 %v12433_v55  ;;  %v9032_v49 = vor.u32 %v11028_v18, %v9029_v17  ;;  %v374_v18 = vld [vmem:[%s12180_s8 + $0x200] sm:$0xff]  ;;  %v380_v17 = vld [vmem:[%s12180_s8 + $0x230] sm:$0xff] }
 0x124   : > { %2469 = vmatmul.bf16.gmra.mxu1 %v12435_v25  ;;  %2692 = vmatpush.bf16.msra.mxu2 %v9416_v3 }
 0x125   : > { %2518 = vmatmul.bf16.gmra.mxu2 %v12282_v40  ;;  %2594 = vmatpush.bf16.msra.mxu0 %v9032_v49  ;;  %v9224_v40 = vor.u32 %v11076_v12, %v9221_v13  ;;  %v9005_v12 = vld [vmem:[#allocation5 + $0x318] sm:$0xf0]  ;;  %v11166_v13 = vld [vmem:[#allocation5 + $0x784] sm:$0xf] }
 0x126   : > { %2567 = vmatmul.bf16.gmra.mxu3 %v12284_v41 }
 0x127   : > { %2643 = vmatpush.bf16.msra.mxu1 %v9224_v40  ;;  %v11118_v40 = vld [vmem:[#allocation5 + $0x604] sm:$0xf] }
 0x128   : > { %v2323_v33 = vpop.f32.mrf.mxu2  ;;  %v2227_v32 = vpop.f32.mrf.mxu0 }
 0x129   : > { %v2324_v39 = vadd.f32 %v2323_v33, %v2275_v56  ;;  %v2372_v7 = vpop.f32.mrf.mxu3  ;;  %v2228_v2 = vadd.f32 %v2227_v32, %v12359_v59  ;;  %v2276_v58 = vpop.f32.mrf.mxu1  ;;  %v12451_v33 = vpack.c.bf16 %v380_v17, %v374_v18  ;;  %v9581_v18 = vld [vmem:[#allocation5 + $0x798] sm:$0xf0] }
 0x12a   : > { %v9584_v28 = vor.u32 %v11166_v13, %v9581_v18  ;;  %v387_v13 = vld [vmem:[%s12180_s8 + $0x268] sm:$0xff]  ;;  %v393_v18 = vld [vmem:[%s12180_s8 + $0x298] sm:$0xff] }
 0x12b   : > { %v12445_v61 = vadd.f32 %v2372_v7, %v2324_v39  ;;  %v2277_v41 = vadd.f32 %v2276_v58, %v2228_v2  ;;  %14771 = vst [vmem:[#allocation43_spill] sm:$0xff] %v12451_v33  ;;  %v11022_v2 = vld [vmem:[#allocation5 + $0x304] sm:$0xf]  ;;  %v12471_v23 = vpack.c.bf16 %v393_v18, %v387_v13  ;;  %v404_v13 = vld [vmem:[%s12180_s8 + $0x2f0] sm:$0xff]  ;;  %v399_v18 = vld [vmem:[%s12180_s8 + $0x2c8] sm:$0xff] }
 0x12c   : > { %2742 = vmatpush.bf16.msra.mxu3 %v9584_v28 }
 0x12d   : > { %14773 = vst [vmem:[#allocation45_spill] sm:$0xff] %v12471_v23 }
 0x130   : > { %v2325_v56 = vpop.f32.mrf.mxu2  ;;  %v2230_v32 = vpop.f32.mrf.mxu0 }
 0x131   : > { %v2326_v3 = vadd.f32 %v2325_v56, %v2277_v41  ;;  %v2374_v24 = vpop.f32.mrf.mxu3  ;;  %v2231_v49 = vadd.f32 %v2230_v32, %v12359_v59  ;;  %v2279_v38 = vpop.f32.mrf.mxu1  ;;  %v9389_v41 = vld [vmem:[#allocation5 + $0x618] sm:$0xf0] }
 0x132   : > { %v9392_v58 = vor.u32 %v11118_v40, %v9389_v41  ;;  %v11070_v40 = vld [vmem:[#allocation5 + $0x484] sm:$0xf]  ;;  %v9197_v41 = vld [vmem:[#allocation5 + $0x498] sm:$0xf0] }
 0x133   : > { %v12456_v39 = vadd.f32 %v2374_v24, %v2326_v3  ;;  %v2280_v7 = vadd.f32 %v2279_v38, %v2231_v49  ;;  %2425 = vmatmul.bf16.gmra.mxu0 %v12451_v33  ;;  %v9008_v24 = vor.u32 %v11022_v2, %v9005_v12  ;;  %v386_v2 = vld [vmem:[%s12180_s8 + $0x260] sm:$0xff]  ;;  %v392_v12 = vld [vmem:[%s12180_s8 + $0x290] sm:$0xff] }
 0x134   : > { %2474 = vmatmul.bf16.gmra.mxu1 %v12453_v53  ;;  %2693 = vmatpush.bf16.msra.mxu2 %v9392_v58 }
 0x135   : > { %2523 = vmatmul.bf16.gmra.mxu2 %v12302_v8  ;;  %2595 = vmatpush.bf16.msra.mxu0 %v9008_v24  ;;  %v9200_v8 = vor.u32 %v11070_v40, %v9197_v41 }
 0x136   : > { %2572 = vmatmul.bf16.gmra.mxu3 %v12304_v9 }
 0x137   : > { %2644 = vmatpush.bf16.msra.mxu1 %v9200_v8 }
 0x138   : > { %v2328_v17 = vpop.f32.mrf.mxu2  ;;  %v2232_v3 = vpop.f32.mrf.mxu0 }
 0x139   : > { %v2329_v30 = vadd.f32 %v2328_v17, %v2280_v7  ;;  %v2377_v56 = vpop.f32.mrf.mxu3  ;;  %v2233_v32 = vadd.f32 %v2232_v3, %v12359_v59  ;;  %v2281_v49 = vpop.f32.mrf.mxu1  ;;  %v12469_v17 = vpack.c.bf16 %v392_v12, %v386_v2  ;;  %v398_v12 = vld [vmem:[%s12180_s8 + $0x2c0] sm:$0xff] }
 0x13b   : > { %v12463_v38 = vadd.f32 %v2377_v56, %v2329_v30  ;;  %v2282_v9 = vadd.f32 %v2281_v49, %v2233_v32 }
 0x140   : > { %v2330_v7 = vpop.f32.mrf.mxu2  ;;  %v2235_v3 = vpop.f32.mrf.mxu0 }
 0x141   : > { %v2331_v58 = vadd.f32 %v2330_v7, %v2282_v9  ;;  %v2379_v48 = vpop.f32.mrf.mxu3  ;;  %v2236_v24 = vadd.f32 %v2235_v3, %v12359_v59  ;;  %v2284_v28 = vpop.f32.mrf.mxu1  ;;  %v405_v7 = vld [vmem:[%s12180_s8 + $0x2f8] sm:$0xff]  ;;  %v12487_v3 = vpack.c.bf16 %v404_v13, %v398_v12  ;;  %v11068_v13 = vld [vmem:[#allocation5 + $0x46c] sm:$0xf0] }
 0x142   : > { %v9179_v12 = vld [vmem:[#allocation5 + $0x458] sm:$0xf] }
 0x143   : > { %v12474_v30 = vadd.f32 %v2379_v48, %v2331_v58  ;;  %v2285_v56 = vadd.f32 %v2284_v28, %v2236_v24  ;;  %2430 = vmatmul.bf16.gmra.mxu0 %v12469_v17  ;;  %14774 = vst [vmem:[#allocation46_spill] sm:$0xff] %v12487_v3 }
 0x144   : > { %2479 = vmatmul.bf16.gmra.mxu1 %v12471_v23 }
 0x145   : > { %2528 = vmatmul.bf16.gmra.mxu2 %v12322_v44  ;;  %v12489_v44 = vpack.c.bf16 %v405_v7, %v399_v18  ;;  %v8795_v18 = vld [vmem:[#allocation5 + $0x158] sm:$0xf] }
 0x146   : > { %2577 = vmatmul.bf16.gmra.mxu3 %v12324_v45 }
 0x147   : > { %14775 = vst [vmem:[#allocation47_spill] sm:$0xff] %v12489_v44 }
 0x148   : > { %v2333_v8 = vpop.f32.mrf.mxu2  ;;  %v2237_v49 = vpop.f32.mrf.mxu0 }
 0x149   : > { %v2334_v9 = vadd.f32 %v2333_v8, %v2285_v56  ;;  %v2382_v32 = vpop.f32.mrf.mxu3  ;;  %v2238_v40 = vadd.f32 %v2237_v49, %v12359_v59  ;;  %v2286_v41 = vpop.f32.mrf.mxu1 }
 0x14b   : > { %v12481_v48 = vadd.f32 %v2382_v32, %v2334_v9  ;;  %v2287_v2 = vadd.f32 %v2286_v41, %v2238_v40 }
 0x150   : > { %v2335_v58 = vpop.f32.mrf.mxu2  ;;  %v2240_v45 = vpop.f32.mrf.mxu0 }
 0x151   : > { %v2336_v24 = vadd.f32 %v2335_v58, %v2287_v2  ;;  %v2384_v28 = vpop.f32.mrf.mxu3  ;;  %v2241_v56 = vadd.f32 %v2240_v45, %v12359_v59  ;;  %v2289_v8 = vpop.f32.mrf.mxu1  ;;  %v9180_v58 = vor.u32 %v11068_v13, %v9179_v12 }
 0x153   : > { %v12492_v49 = vadd.f32 %v2384_v28, %v2336_v24  ;;  %v2290_v9 = vadd.f32 %v2289_v8, %v2241_v56  ;;  %2435 = vmatmul.bf16.gmra.mxu0 %v12487_v3  ;;  %v10972_v24 = vld [vmem:[#allocation5 + $0x16c] sm:$0xf0]  ;;  %v9371_v28 = vld [vmem:[#allocation5 + $0x5d8] sm:$0xf]  ;;  %2882 = vmatpush.bf16.msrb.mxu2 %v9180_v58 }
 0x154   : > { %2484 = vmatmul.bf16.gmra.mxu1 %v12489_v44  ;;  %v11116_v56 = vld [vmem:[#allocation5 + $0x5ec] sm:$0xf0]  ;;  %v8796_v44 = vor.u32 %v10972_v24, %v8795_v18  ;;  %v8987_v3 = vld [vmem:[#allocation5 + $0x2d8] sm:$0xf]  ;;  %v11062_v18 = vld [vmem:[#allocation5 + $0x43c] sm:$0xf0] }
 0x155   : > { %14776 = vst [vmem:[#allocation48_spill] sm:$0xff] %v12492_v49  ;;  %2533 = vmatmul.bf16.gmra.mxu2 %v12342_v20  ;;  %v9372_v20 = vor.u32 %v11116_v56, %v9371_v28  ;;  %v10966_v28 = vld [vmem:[#allocation5 + $0x13c] sm:$0xf0]  ;;  %v9347_v56 = vld [vmem:[#allocation5 + $0x5a8] sm:$0xf] }
 0x156   : > { %2582 = vmatmul.bf16.gmra.mxu3 %v12344_v21  ;;  %v11020_v21 = vld [vmem:[#allocation5 + $0x2ec] sm:$0xf0]  ;;  %2784 = vmatpush.bf16.msrb.mxu0 %v8796_v44  ;;  %v12510_v44 = vperm.slane %v12354_v37, 1 }
 0x157   : > { %2931 = vmatpush.bf16.msrb.mxu3 %v9372_v20 }
 0x158   : > { %v2338_v32 = vpop.f32.mrf.mxu2  ;;  %v2242_v2 = vpop.f32.mrf.mxu0 }
 0x159   : > { %v2339_v40 = vadd.f32 %v2338_v32, %v2290_v9  ;;  %v2387_v41 = vpop.f32.mrf.mxu3  ;;  %v2243_v45 = vadd.f32 %v2242_v2, %v12359_v59  ;;  %v2291_v7 = vpop.f32.mrf.mxu1  ;;  %v8988_v9 = vor.u32 %v11020_v21, %v8987_v3 }
 0x15b   : > { %v12499_v8 = vadd.f32 %v2387_v41, %v2339_v40  ;;  %v2292_v22 = vadd.f32 %v2291_v7, %v2243_v45  ;;  %2833 = vmatpush.bf16.msrb.mxu1 %v8988_v9  ;;  %v9155_v41 = vld [vmem:[#allocation5 + $0x428] sm:$0xf] }
 0x15c   : > { %v8771_v45 = vld [vmem:[#allocation5 + $0x128] sm:$0xf]  ;;  %v9156_v24 = vor.u32 %v11062_v18, %v9155_v41 }
 0x15e   : > { %2883 = vmatpush.bf16.msrb.mxu2 %v9156_v24 }
 0x160   : > { %v2340_v32 = vpop.f32.mrf.mxu2  ;;  %v2401_v2 = vpop.f32.mrf.mxu0 }
 0x161   : > { %v2341_v49 = vadd.f32 %v2340_v32, %v2292_v22  ;;  %v2389_v59 = vpop.f32.mrf.mxu3  ;;  %v2402_v12 = vadd.f32 %v2401_v2, %v12373_v35  ;;  %v2450_v13 = vpop.f32.mrf.mxu1  ;;  %v8772_v32 = vor.u32 %v10966_v28, %v8771_v45  ;;  %v8963_v2 = vld [vmem:[#allocation5 + $0x2a8] sm:$0xf] }
 0x163   : > { %v12502_v23 = vadd.f32 %v2389_v59, %v2341_v49  ;;  %v12504_v40 = vadd.f32 %v2450_v13, %v2402_v12  ;;  %2596 = vmatmul.bf16.vlgmr.msra.gmra.mxu0 %v12206_v54  ;;  %v11110_v59 = vld [vmem:[#allocation5 + $0x5bc] sm:$0xf0] }
 0x164   : > { %2645 = vmatmul.bf16.vlgmr.msra.gmra.mxu1 %v12208_v57  ;;  %v11014_v12 = vld [vmem:[#allocation5 + $0x2bc] sm:$0xf0]  ;;  %2785 = vmatpush.bf16.msrb.mxu0 %v8772_v32 }
 0x165   : > { %2694 = vmatmul.bf16.vlgmr.msra.gmra.mxu2 %v12363_v62  ;;  %v3960_v20 = vmul.f32 %v12504_v40, %v12504_v40 }
 0x166   : > { %2743 = vmatmul.bf16.vlgmr.msra.gmra.mxu3 %v12365_v0  ;;  %v8964_v0 = vor.u32 %v11014_v12, %v8963_v2  ;;  %v9131_v2 = vld [vmem:[#allocation5 + $0x3f8] sm:$0xf]  ;;  %v11056_v12 = vld [vmem:[#allocation5 + $0x40c] sm:$0xf0] }
 0x167   : > { %v4056_v21 = vmul.f32 %v3960_v20, %v12504_v40 }
 0x168   : > { %v2499_v22 = vpop.f32.mrf.mxu2  ;;  %v2403_v49 = vpop.f32.mrf.mxu0  ;;  %2834 = vmatpush.bf16.msrb.mxu1 %v8964_v0 }
 0x169   : > { %v2500_v35 = vadd.f32 %v2499_v22, %v12510_v44  ;;  %v2548_v3 = vpop.f32.mrf.mxu3  ;;  %v4152_v7 = vmul.f32 0.044715, %v4056_v21  ;;  %v2404_v58 = vadd.f32 %v2403_v49, %v12384_v16  ;;  %v2452_v37 = vpop.f32.mrf.mxu1  ;;  %v9348_v22 = vor.u32 %v11110_v59, %v9347_v56 }
 0x16b   : > { %v12518_v9 = vadd.f32 %v2548_v3, %v2500_v35  ;;  %v4248_v13 = vadd.f32 %v4152_v7, %v12504_v40  ;;  %v2453_v20 = vadd.f32 %v2452_v37, %v2404_v58  ;;  %2932 = vmatpush.bf16.msrb.mxu3 %v9348_v22 }
 0x16d   : > { %v3966_v21 = vmul.f32 %v2453_v20, %v2453_v20  ;;  %v4344_v16 = vmul.f32 0.7978846, %v4248_v13  ;;  %v8747_v13 = vld [vmem:[#allocation5 + $0xf8] sm:$0xf] }
 0x16f   : > { %v4062_v49 = vmul.f32 %v3966_v21, %v2453_v20  ;;  %11599 = vtanh.f32 %v4344_v16 }
 0x170   : > { %v2501_v41 = vpop.f32.mrf.mxu2  ;;  %v2406_v18 = vpop.f32.mrf.mxu0 }
 0x171   : > { %v2502_v35 = vadd.f32 %v2501_v41, %v12510_v44  ;;  %v2550_v3 = vpop.f32.mrf.mxu3  ;;  %v4158_v45 = vmul.f32 0.044715, %v4062_v49  ;;  %v2407_v28 = vadd.f32 %v2406_v18, %v12391_v60  ;;  %v2455_v62 = vpop.f32.mrf.mxu1  ;;  %v9132_v41 = vor.u32 %v11056_v12, %v9131_v2 }
 0x173   : > { %v12523_v7 = vadd.f32 %v2550_v3, %v2502_v35  ;;  %v4254_v58 = vadd.f32 %v4158_v45, %v2453_v20  ;;  %v12525_v37 = vadd.f32 %v2455_v62, %v2407_v28  ;;  %2601 = vmatmul.bf16.gmra.mxu0 %v12226_v26  ;;  %v10960_v35 = vld [vmem:[#allocation5 + $0x10c] sm:$0xf0]  ;;  %v9323_v3 = vld [vmem:[#allocation5 + $0x578] sm:$0xf]  ;;  %2884 = vmatpush.bf16.msrb.mxu2 %v9132_v41 }
 0x174   : > { %2650 = vmatmul.bf16.gmra.mxu1 %v12228_v27  ;;  %v8748_v45 = vor.u32 %v10960_v35, %v8747_v13  ;;  %v11104_v28 = vld [vmem:[#allocation5 + $0x58c] sm:$0xf0] }
 0x175   : > { %2699 = vmatmul.bf16.gmra.mxu2 %v12379_v1  ;;  %v4350_v0 = vmul.f32 0.7978846, %v4254_v58  ;;  %v3972_v24 = vmul.f32 %v12525_v37, %v12525_v37  ;;  %v11600_v22 = vpop.eup %11599  ;;  %v8939_v58 = vld [vmem:[#allocation5 + $0x278] sm:$0xf] }
 0x176   : > { %2748 = vmatmul.bf16.gmra.mxu3 %v12381_v5  ;;  %v9324_v5 = vor.u32 %v11104_v28, %v9323_v3  ;;  %2786 = vmatpush.bf16.msrb.mxu0 %v8748_v45 }
 0x177   : > { %11601 = vtanh.f32 %v4350_v0  ;;  %v4068_v60 = vmul.f32 %v3972_v24, %v12525_v37  ;;  %v11008_v0 = vld [vmem:[#allocation5 + $0x28c] sm:$0xf0] }
 0x178   : > { %v2504_v56 = vpop.f32.mrf.mxu2  ;;  %v2408_v59 = vpop.f32.mrf.mxu0  ;;  %v8940_v1 = vor.u32 %v11008_v0, %v8939_v58  ;;  %2933 = vmatpush.bf16.msrb.mxu3 %v9324_v5 }
 0x179   : > { %v2505_v32 = vadd.f32 %v2504_v56, %v12510_v44  ;;  %v2553_v62 = vpop.f32.mrf.mxu3  ;;  %v4164_v21 = vmul.f32 0.044715, %v4068_v60  ;;  %v2409_v16 = vadd.f32 %v2408_v59, %v12402_v34  ;;  %v2457_v49 = vpop.f32.mrf.mxu1  ;;  %v4632_v60 = vadd.f32 1.0, %v11600_v22 }
 0x17a   : > { %2835 = vmatpush.bf16.msrb.mxu1 %v8940_v1 }
 0x17b   : > { %v12536_v18 = vadd.f32 %v2553_v62, %v2505_v32  ;;  %v4260_v24 = vadd.f32 %v4164_v21, %v12525_v37  ;;  %v12539_v56 = vadd.f32 %v2457_v49, %v2409_v16  ;;  %v4440_v32 = vmul.f32 0.5, %v12504_v40 }
 0x17c   : > { %v4446_v62 = vmul.f32 0.5, %v2453_v20 }
 0x17d   : > { %v11602_v34 = vpop.eup %11601  ;;  %v3978_v59 = vmul.f32 %v12539_v56, %v12539_v56  ;;  %v4356_v12 = vmul.f32 0.7978846, %v4260_v24  ;;  %v4728_v16 = vmul.f32 %v4632_v60, %v4440_v32  ;;  %v9107_v32 = vld [vmem:[#allocation5 + $0x3c8] sm:$0xf] }
 0x17e   : > { %v4638_v2 = vadd.f32 1.0, %v11602_v34 }
 0x17f   : > { %v4074_v13 = vmul.f32 %v3978_v59, %v12539_v56  ;;  %11603 = vtanh.f32 %v4356_v12 }
 0x180   : > { %v2506_v21 = vpop.f32.mrf.mxu2  ;;  %v4734_v49 = vmul.f32 %v4638_v2, %v4446_v62  ;;  %v2411_v35 = vpop.f32.mrf.mxu0  ;;  %v11050_v62 = vld [vmem:[#allocation5 + $0x3dc] sm:$0xf0]  ;;  %v8723_v2 = vld [vmem:[#allocation5 + $0xc8] sm:$0xf] }
 0x181   : > { %v2507_v41 = vadd.f32 %v2506_v21, %v12510_v44  ;;  %v2555_v22 = vpop.f32.mrf.mxu3  ;;  %v4170_v3 = vmul.f32 0.044715, %v4074_v13  ;;  %v2412_v45 = vadd.f32 %v2411_v35, %v12409_v29  ;;  %v2460_v28 = vpop.f32.mrf.mxu1 }
 0x182   : > { %v12547_v5 = vpack.c.bf16 %v4734_v49, %v4728_v16  ;;  %v9108_v49 = vor.u32 %v11050_v62, %v9107_v32 }
 0x183   : > { %v12549_v1 = vadd.f32 %v2555_v22, %v2507_v41  ;;  %v4266_v40 = vadd.f32 %v4170_v3, %v12539_v56  ;;  %v12552_v20 = vadd.f32 %v2460_v28, %v2412_v45  ;;  %2606 = vmatmul.bf16.gmra.mxu0 %v12246_v51  ;;  %v10954_v41 = vld [vmem:[#allocation5 + $0xdc] sm:$0xf0]  ;;  %v9299_v22 = vld [vmem:[#allocation5 + $0x548] sm:$0xf] }
 0x184   : > { %14777 = vst [vmem:[#allocation49_spill] sm:$0xff] %v12547_v5  ;;  %2655 = vmatmul.bf16.gmra.mxu1 %v12248_v52  ;;  %v8724_v3 = vor.u32 %v10954_v41, %v8723_v2  ;;  %v11098_v45 = vld [vmem:[#allocation5 + $0x55c] sm:$0xf0]  ;;  %v8915_v28 = vld [vmem:[#allocation5 + $0x248] sm:$0xf]  ;;  %2885 = vmatpush.bf16.msrb.mxu2 %v9108_v49 }
 0x185   : > { %2704 = vmatmul.bf16.gmra.mxu2 %v12397_v19  ;;  %v4362_v58 = vmul.f32 0.7978846, %v4266_v40  ;;  %v3984_v29 = vmul.f32 %v12552_v20, %v12552_v20  ;;  %v11604_v12 = vpop.eup %11603  ;;  %v11002_v40 = vld [vmem:[#allocation5 + $0x25c] sm:$0xf0] }
 0x186   : > { %2753 = vmatmul.bf16.gmra.mxu3 %v12399_v31  ;;  %v8916_v5 = vor.u32 %v11002_v40, %v8915_v28  ;;  %2787 = vmatpush.bf16.msrb.mxu0 %v8724_v3 }
 0x187   : > { %11605 = vtanh.f32 %v4362_v58  ;;  %v4080_v0 = vmul.f32 %v3984_v29, %v12552_v20 }
 0x188   : > { %v2509_v24 = vpop.f32.mrf.mxu2  ;;  %v2413_v59 = vpop.f32.mrf.mxu0  ;;  %2836 = vmatpush.bf16.msrb.mxu1 %v8916_v5 }
 0x189   : > { %v2510_v60 = vadd.f32 %v2509_v24, %v12510_v44  ;;  %v2558_v34 = vpop.f32.mrf.mxu3  ;;  %v4176_v13 = vmul.f32 0.044715, %v4080_v0  ;;  %v2414_v21 = vadd.f32 %v2413_v59, %v12420_v6  ;;  %v2462_v16 = vpop.f32.mrf.mxu1  ;;  %v9300_v24 = vor.u32 %v11098_v45, %v9299_v22 }
 0x18a   : > { %v4644_v0 = vadd.f32 1.0, %v11604_v12 }
 0x18b   : > { %v12563_v35 = vadd.f32 %v2558_v34, %v2510_v60  ;;  %v4272_v58 = vadd.f32 %v4176_v13, %v12552_v20  ;;  %v12566_v29 = vadd.f32 %v2462_v16, %v2414_v21  ;;  %2934 = vmatpush.bf16.msrb.mxu3 %v9300_v24  ;;  %v4452_v60 = vmul.f32 0.5, %v12525_v37 }
 0x18c   : > { %v4458_v34 = vmul.f32 0.5, %v12539_v56 }
 0x18d   : > { %v11606_v6 = vpop.eup %11605  ;;  %v3990_v59 = vmul.f32 %v12566_v29, %v12566_v29  ;;  %v4368_v62 = vmul.f32 0.7978846, %v4272_v58  ;;  %v4740_v21 = vmul.f32 %v4644_v0, %v4452_v60  ;;  %v9083_v60 = vld [vmem:[#allocation5 + $0x398] sm:$0xf] }
 0x18e   : > { %v4650_v32 = vadd.f32 1.0, %v11606_v6 }
 0x18f   : > { %v4086_v2 = vmul.f32 %v3990_v59, %v12566_v29  ;;  %11607 = vtanh.f32 %v4368_v62 }
 0x190   : > { %v2511_v13 = vpop.f32.mrf.mxu2  ;;  %v4746_v16 = vmul.f32 %v4650_v32, %v4458_v34  ;;  %v2416_v41 = vpop.f32.mrf.mxu0  ;;  %v11044_v34 = vld [vmem:[#allocation5 + $0x3ac] sm:$0xf0]  ;;  %v8699_v32 = vld [vmem:[#allocation5 + $0x98] sm:$0xf] }
 0x191   : > { %v2512_v12 = vadd.f32 %v2511_v13, %v12510_v44  ;;  %v2560_v49 = vpop.f32.mrf.mxu3  ;;  %v4182_v22 = vmul.f32 0.044715, %v4086_v2  ;;  %v2417_v3 = vadd.f32 %v2416_v41, %v12427_v4  ;;  %v2465_v45 = vpop.f32.mrf.mxu1 }
 0x192   : > { %v12575_v5 = vpack.c.bf16 %v4746_v16, %v4740_v21  ;;  %v9084_v16 = vor.u32 %v11044_v34, %v9083_v60 }
 0x193   : > { %v12577_v37 = vadd.f32 %v2560_v49, %v2512_v12  ;;  %v4278_v56 = vadd.f32 %v4182_v22, %v12566_v29  ;;  %v12580_v28 = vadd.f32 %v2465_v45, %v2417_v3  ;;  %2611 = vmatmul.bf16.gmra.mxu0 %v12266_v14  ;;  %v10948_v12 = vld [vmem:[#allocation5 + $0xac] sm:$0xf0]  ;;  %v9275_v49 = vld [vmem:[#allocation5 + $0x518] sm:$0xf] }
 0x194   : > { %14778 = vst [vmem:[#allocation50_spill] sm:$0xff] %v12575_v5  ;;  %2660 = vmatmul.bf16.gmra.mxu1 %v12268_v15  ;;  %v8700_v22 = vor.u32 %v10948_v12, %v8699_v32  ;;  %v11092_v3 = vld [vmem:[#allocation5 + $0x52c] sm:$0xf0]  ;;  %v8891_v45 = vld [vmem:[#allocation5 + $0x218] sm:$0xf]  ;;  %2886 = vmatpush.bf16.msrb.mxu2 %v9084_v16 }
 0x195   : > { %2709 = vmatmul.bf16.gmra.mxu2 %v12415_v63  ;;  %v4374_v40 = vmul.f32 0.7978846, %v4278_v56  ;;  %v3996_v4 = vmul.f32 %v12580_v28, %v12580_v28  ;;  %v11608_v62 = vpop.eup %11607  ;;  %v10996_v56 = vld [vmem:[#allocation5 + $0x22c] sm:$0xf0] }
 0x196   : > { %2758 = vmatmul.bf16.gmra.mxu3 %v12417_v50  ;;  %v8892_v5 = vor.u32 %v10996_v56, %v8891_v45  ;;  %2788 = vmatpush.bf16.msrb.mxu0 %v8700_v22 }
 0x197   : > { %11609 = vtanh.f32 %v4374_v40  ;;  %v4092_v58 = vmul.f32 %v3996_v4, %v12580_v28 }
 0x198   : > { %v2514_v24 = vpop.f32.mrf.mxu2  ;;  %v2418_v59 = vpop.f32.mrf.mxu0  ;;  %2837 = vmatpush.bf16.msrb.mxu1 %v8892_v5 }
 0x199   : > { %v2515_v0 = vadd.f32 %v2514_v24, %v12510_v44  ;;  %v2563_v6 = vpop.f32.mrf.mxu3  ;;  %v4188_v2 = vmul.f32 0.044715, %v4092_v58  ;;  %v2419_v13 = vadd.f32 %v2418_v59, %v12438_v36  ;;  %v2467_v21 = vpop.f32.mrf.mxu1  ;;  %v9276_v24 = vor.u32 %v11092_v3, %v9275_v49 }
 0x19a   : > { %v4656_v58 = vadd.f32 1.0, %v11608_v62 }
 0x19b   : > { %v12591_v41 = vadd.f32 %v2563_v6, %v2515_v0  ;;  %v4284_v40 = vadd.f32 %v4188_v2, %v12580_v28  ;;  %v12594_v4 = vadd.f32 %v2467_v21, %v2419_v13  ;;  %2935 = vmatpush.bf16.msrb.mxu3 %v9276_v24  ;;  %v4464_v0 = vmul.f32 0.5, %v12552_v20 }
 0x19c   : > { %v4470_v6 = vmul.f32 0.5, %v12566_v29 }
 0x19d   : > { %v11610_v36 = vpop.eup %11609  ;;  %v4002_v59 = vmul.f32 %v12594_v4, %v12594_v4  ;;  %v4380_v34 = vmul.f32 0.7978846, %v4284_v40  ;;  %v4752_v13 = vmul.f32 %v4656_v58, %v4464_v0  ;;  %v9059_v0 = vld [vmem:[#allocation5 + $0x368] sm:$0xf] }
 0x19e   : > { %v4662_v60 = vadd.f32 1.0, %v11610_v36 }
 0x19f   : > { %v4098_v32 = vmul.f32 %v4002_v59, %v12594_v4  ;;  %11611 = vtanh.f32 %v4380_v34 }
 0x1a0   : > { %v2516_v2 = vpop.f32.mrf.mxu2  ;;  %v4758_v21 = vmul.f32 %v4662_v60, %v4470_v6  ;;  %v2421_v12 = vpop.f32.mrf.mxu0  ;;  %v11038_v6 = vld [vmem:[#allocation5 + $0x37c] sm:$0xf0]  ;;  %v8675_v60 = vld [vmem:[#allocation5 + $0x68] sm:$0xf] }
 0x1a1   : > { %v2517_v62 = vadd.f32 %v2516_v2, %v12510_v44  ;;  %v2565_v16 = vpop.f32.mrf.mxu3  ;;  %v4194_v49 = vmul.f32 0.044715, %v4098_v32  ;;  %v2422_v22 = vadd.f32 %v2421_v12, %v12445_v61  ;;  %v2470_v3 = vpop.f32.mrf.mxu1 }
 0x1a2   : > { %v12603_v5 = vpack.c.bf16 %v4758_v21, %v4752_v13  ;;  %v9060_v21 = vor.u32 %v11038_v6, %v9059_v0 }
 0x1a3   : > { %v12605_v20 = vadd.f32 %v2565_v16, %v2517_v62  ;;  %v4290_v29 = vadd.f32 %v4194_v49, %v12594_v4  ;;  %v12608_v45 = vadd.f32 %v2470_v3, %v2422_v22  ;;  %2616 = vmatmul.bf16.gmra.mxu0 %v12286_v42  ;;  %v10942_v62 = vld [vmem:[#allocation5 + $0x7c] sm:$0xf0]  ;;  %v9251_v16 = vld [vmem:[#allocation5 + $0x4e8] sm:$0xf] }
 0x1a4   : > { %14779 = vst [vmem:[#allocation51_spill] sm:$0xff] %v12603_v5  ;;  %2665 = vmatmul.bf16.gmra.mxu1 %v12288_v43  ;;  %v8676_v49 = vor.u32 %v10942_v62, %v8675_v60  ;;  %v11086_v22 = vld [vmem:[#allocation5 + $0x4fc] sm:$0xf0]  ;;  %v8867_v3 = vld [vmem:[#allocation5 + $0x1e8] sm:$0xf]  ;;  %2887 = vmatpush.bf16.msrb.mxu2 %v9060_v21 }
 0x1a5   : > { %2714 = vmatmul.bf16.gmra.mxu2 %v12433_v55  ;;  %v4386_v56 = vmul.f32 0.7978846, %v4290_v29  ;;  %v4008_v61 = vmul.f32 %v12608_v45, %v12608_v45  ;;  %v11612_v34 = vpop.eup %11611  ;;  %v10990_v29 = vld [vmem:[#allocation5 + $0x1fc] sm:$0xf0] }
 0x1a6   : > { %2763 = vmatmul.bf16.gmra.mxu3 %v12435_v25  ;;  %v8868_v5 = vor.u32 %v10990_v29, %v8867_v3  ;;  %2789 = vmatpush.bf16.msrb.mxu0 %v8676_v49 }
 0x1a7   : > { %11613 = vtanh.f32 %v4386_v56  ;;  %v4104_v40 = vmul.f32 %v4008_v61, %v12608_v45 }
 0x1a8   : > { %v2519_v24 = vpop.f32.mrf.mxu2  ;;  %v2423_v59 = vpop.f32.mrf.mxu0  ;;  %2838 = vmatpush.bf16.msrb.mxu1 %v8868_v5 }
 0x1a9   : > { %v2520_v58 = vadd.f32 %v2519_v24, %v12510_v44  ;;  %v2568_v36 = vpop.f32.mrf.mxu3  ;;  %v4200_v32 = vmul.f32 0.044715, %v4104_v40  ;;  %v2424_v2 = vadd.f32 %v2423_v59, %v12456_v39  ;;  %v2472_v13 = vpop.f32.mrf.mxu1  ;;  %v9252_v24 = vor.u32 %v11086_v22, %v9251_v16 }
 0x1aa   : > { %v4668_v40 = vadd.f32 1.0, %v11612_v34 }
 0x1ab   : > { %v12619_v12 = vadd.f32 %v2568_v36, %v2520_v58  ;;  %v4296_v56 = vadd.f32 %v4200_v32, %v12608_v45  ;;  %v12622_v61 = vadd.f32 %v2472_v13, %v2424_v2  ;;  %2936 = vmatpush.bf16.msrb.mxu3 %v9252_v24  ;;  %v4476_v58 = vmul.f32 0.5, %v12580_v28 }
 0x1ac   : > { %v4482_v36 = vmul.f32 0.5, %v12594_v4 }
 0x1ad   : > { %v11614_v39 = vpop.eup %11613  ;;  %v4014_v59 = vmul.f32 %v12622_v61, %v12622_v61  ;;  %v4392_v6 = vmul.f32 0.7978846, %v4296_v56  ;;  %v4764_v2 = vmul.f32 %v4668_v40, %v4476_v58  ;;  %v9035_v58 = vld [vmem:[#allocation5 + $0x338] sm:$0xf] }
 0x1ae   : > { %v4674_v0 = vadd.f32 1.0, %v11614_v39 }
 0x1af   : > { %v4110_v60 = vmul.f32 %v4014_v59, %v12622_v61  ;;  %11615 = vtanh.f32 %v4392_v6 }
 0x1b0   : > { %v2521_v32 = vpop.f32.mrf.mxu2  ;;  %v4770_v13 = vmul.f32 %v4674_v0, %v4482_v36  ;;  %v2426_v62 = vpop.f32.mrf.mxu0  ;;  %v11032_v36 = vld [vmem:[#allocation5 + $0x34c] sm:$0xf0]  ;;  %v8651_v0 = vld [vmem:[#allocation5 + $0x38] sm:$0xf] }
 0x1b1   : > { %v2522_v34 = vadd.f32 %v2521_v32, %v12510_v44  ;;  %v2570_v21 = vpop.f32.mrf.mxu3  ;;  %v4206_v16 = vmul.f32 0.044715, %v4110_v60  ;;  %v2427_v49 = vadd.f32 %v2426_v62, %v12463_v38  ;;  %v2475_v22 = vpop.f32.mrf.mxu1 }
 0x1b2   : > { %v12631_v5 = vpack.c.bf16 %v4770_v13, %v4764_v2  ;;  %v9036_v13 = vor.u32 %v11032_v36, %v9035_v58 }
 0x1b3   : > { %v12633_v28 = vadd.f32 %v2570_v21, %v2522_v34  ;;  %v4302_v4 = vadd.f32 %v4206_v16, %v12622_v61  ;;  %v12636_v3 = vadd.f32 %v2475_v22, %v2427_v49  ;;  %2621 = vmatmul.bf16.gmra.mxu0 %v12306_v10  ;;  %v10936_v34 = vld [vmem:[#allocation5 + $0x4c] sm:$0xf0]  ;;  %v9227_v21 = vld [vmem:[#allocation5 + $0x4b8] sm:$0xf] }
 0x1b4   : > { %14780 = vst [vmem:[#allocation52_spill] sm:$0xff] %v12631_v5  ;;  %2670 = vmatmul.bf16.gmra.mxu1 %v12308_v11  ;;  %v8652_v16 = vor.u32 %v10936_v34, %v8651_v0  ;;  %v11080_v49 = vld [vmem:[#allocation5 + $0x4cc] sm:$0xf0]  ;;  %v8843_v22 = vld [vmem:[#allocation5 + $0x1b8] sm:$0xf]  ;;  %2888 = vmatpush.bf16.msrb.mxu2 %v9036_v13 }
 0x1b5   : > { %2719 = vmatmul.bf16.gmra.mxu2 %v12451_v33  ;;  %v4398_v29 = vmul.f32 0.7978846, %v4302_v4  ;;  %v4020_v38 = vmul.f32 %v12636_v3, %v12636_v3  ;;  %v11616_v6 = vpop.eup %11615  ;;  %v10984_v4 = vld [vmem:[#allocation5 + $0x1cc] sm:$0xf0]  ;;  %v8627_v13 = vld [vmem:[#allocation5 + $0x8] sm:$0xf] }
 0x1b6   : > { %2768 = vmatmul.bf16.gmra.mxu3 %v12453_v53  ;;  %v8844_v5 = vor.u32 %v10984_v4, %v8843_v22  ;;  %2790 = vmatpush.bf16.msrb.mxu0 %v8652_v16  ;;  %v9203_v4 = vld [vmem:[#allocation5 + $0x488] sm:$0xf]  ;;  %v10978_v33 = vld [vmem:[#allocation5 + $0x19c] sm:$0xf0] }
 0x1b7   : > { %11617 = vtanh.f32 %v4398_v29  ;;  %v4116_v56 = vmul.f32 %v4020_v38, %v12636_v3  ;;  %v8819_v53 = vld [vmem:[#allocation5 + $0x188] sm:$0xf] }
 0x1b8   : > { %v2524_v24 = vpop.f32.mrf.mxu2  ;;  %v2428_v59 = vpop.f32.mrf.mxu0  ;;  %2839 = vmatpush.bf16.msrb.mxu1 %v8844_v5  ;;  %v10930_v5 = vld [vmem:[#allocation5 + $0x1c] sm:$0xf0] }
 0x1b9   : > { %v2525_v40 = vadd.f32 %v2524_v24, %v12510_v44  ;;  %v2573_v39 = vpop.f32.mrf.mxu3  ;;  %v4212_v60 = vmul.f32 0.044715, %v4116_v56  ;;  %v2429_v32 = vadd.f32 %v2428_v59, %v12474_v30  ;;  %v2477_v2 = vpop.f32.mrf.mxu1  ;;  %v9228_v24 = vor.u32 %v11080_v49, %v9227_v21 }
 0x1ba   : > { %v4680_v56 = vadd.f32 1.0, %v11616_v6 }
 0x1bb   : > { %v12647_v62 = vadd.f32 %v2573_v39, %v2525_v40  ;;  %v4308_v29 = vadd.f32 %v4212_v60, %v12636_v3  ;;  %v12650_v38 = vadd.f32 %v2477_v2, %v2429_v32  ;;  %2937 = vmatpush.bf16.msrb.mxu3 %v9228_v24  ;;  %v4488_v40 = vmul.f32 0.5, %v12608_v45  ;;  %v9011_v32 = vld [vmem:[#allocation5 + $0x308] sm:$0xf]  ;;  %v11026_v2 = vld [vmem:[#allocation5 + $0x31c] sm:$0xf0] }
 0x1bc   : > { %v4494_v39 = vmul.f32 0.5, %v12622_v61  ;;  %v9012_v22 = vor.u32 %v11026_v2, %v9011_v32  ;;  %v11074_v45 = vld [vmem:[#allocation5 + $0x49c] sm:$0xf0] }
 0x1bd   : > { %v11618_v30 = vpop.eup %11617  ;;  %v4026_v59 = vmul.f32 %v12650_v38, %v12650_v38  ;;  %v4404_v36 = vmul.f32 0.7978846, %v4308_v29  ;;  %v4776_v6 = vmul.f32 %v4680_v56, %v4488_v40  ;;  %v8820_v40 = vor.u32 %v10978_v33, %v8819_v53 }
 0x1be   : > { %v4686_v58 = vadd.f32 1.0, %v11618_v30  ;;  %v8628_v30 = vor.u32 %v10930_v5, %v8627_v13  ;;  %2889 = vmatpush.bf16.msrb.mxu2 %v9012_v22 }
 0x1bf   : > { %v4122_v0 = vmul.f32 %v4026_v59, %v12650_v38  ;;  %v9204_v59 = vor.u32 %v11074_v45, %v9203_v4  ;;  %11619 = vtanh.f32 %v4404_v36  ;;  %2840 = vmatpush.bf16.msrb.mxu1 %v8820_v40 }
 0x1c0   : > { %v2526_v60 = vpop.f32.mrf.mxu2  ;;  %v4782_v34 = vmul.f32 %v4686_v58, %v4494_v39  ;;  %v2431_v49 = vpop.f32.mrf.mxu0  ;;  %2791 = vmatpush.bf16.msrb.mxu0 %v8628_v30 }
 0x1c1   : > { %v2527_v21 = vadd.f32 %v2526_v60, %v12510_v44  ;;  %v2575_v16 = vpop.f32.mrf.mxu3  ;;  %v4218_v24 = vmul.f32 0.044715, %v4122_v0  ;;  %v2432_v61 = vadd.f32 %v2431_v49, %v12481_v48  ;;  %v2480_v29 = vpop.f32.mrf.mxu1  ;;  %2938 = vmatpush.bf16.msrb.mxu3 %v9204_v59  ;;  %v14782_v60 = vld [vmem:[#allocation45_spill] sm:$0xff] }
 0x1c2   : > { %v12659_v25 = vpack.c.bf16 %v4782_v34, %v4776_v6  ;;  %v14783_v34 = vld [vmem:[#allocation48_spill] sm:$0xff] }
 0x1c3   : > { %v12661_v56 = vadd.f32 %v2575_v16, %v2527_v21  ;;  %v4314_v39 = vadd.f32 %v4218_v24, %v12650_v38  ;;  %v12664_v58 = vadd.f32 %v2480_v29, %v2432_v61  ;;  %2626 = vmatmul.bf16.gmra.mxu0 %v12326_v46  ;;  %v4500_v61 = vmul.f32 0.5, %v12636_v3  ;;  %v10969_v3 = vld [vmem:[#allocation5 + $0x15c] sm:$0xf] }
 0x1c4   : > { %14781 = vst [vmem:[#allocation53_spill] sm:$0xff] %v12659_v25  ;;  %2675 = vmatmul.bf16.gmra.mxu1 %v12328_v47  ;;  %v4506_v29 = vmul.f32 0.5, %v12650_v38  ;;  %v8797_v38 = vld [vmem:[#allocation5 + $0x170] sm:$0xf0] }
 0x1c5   : > { %2724 = vmatmul.bf16.gmra.mxu2 %v12469_v17  ;;  %v4410_v48 = vmul.f32 0.7978846, %v4314_v39  ;;  %v4032_v0 = vmul.f32 %v12664_v58, %v12664_v58  ;;  %v11620_v13 = vpop.eup %11619 }
 0x1c6   : > { %2773 = vmatmul.bf16.gmra.mxu3 %v14782_v60  ;;  %v4692_v4 = vadd.f32 1.0, %v11620_v13 }
 0x1c7   : > { %11621 = vtanh.f32 %v4410_v48  ;;  %v4128_v53 = vmul.f32 %v4032_v0, %v12664_v58 }
 0x1c8   : > { %v2529_v33 = vpop.f32.mrf.mxu2  ;;  %v2433_v2 = vpop.f32.mrf.mxu0  ;;  %v4788_v48 = vmul.f32 %v4692_v4, %v4500_v61  ;;  %v14785_v4 = vld [vmem:[#allocation34_spill] sm:$0xff] }
 0x1c9   : > { %v2530_v36 = vadd.f32 %v2529_v33, %v12510_v44  ;;  %v2578_v32 = vpop.f32.mrf.mxu3  ;;  %v4224_v6 = vmul.f32 0.044715, %v4128_v53  ;;  %v2434_v21 = vadd.f32 %v2433_v2, %v14783_v34  ;;  %v2482_v16 = vpop.f32.mrf.mxu1  ;;  %v11017_v61 = vld [vmem:[#allocation5 + $0x2dc] sm:$0xf] }
 0x1cb   : > { %v12675_v49 = vadd.f32 %v2578_v32, %v2530_v36  ;;  %v4320_v22 = vadd.f32 %v4224_v6, %v12664_v58  ;;  %v2483_v5 = vadd.f32 %v2482_v16, %v2434_v21  ;;  %v9563_v21 = vld [vmem:[#allocation5 + $0x758] sm:$0xf] }
 0x1cd   : > { %v11622_v45 = vpop.eup %11621  ;;  %v4038_v24 = vmul.f32 %v2483_v5, %v2483_v5  ;;  %v4416_v59 = vmul.f32 0.7978846, %v4320_v22 }
 0x1ce   : > { %v4698_v30 = vadd.f32 1.0, %v11622_v45  ;;  %v8800_v45 = vor.u32 %v10969_v3, %v8797_v38 }
 0x1cf   : > { %v4134_v40 = vmul.f32 %v4038_v24, %v2483_v5  ;;  %11623 = vtanh.f32 %v4416_v59  ;;  %v11164_v24 = vld [vmem:[#allocation5 + $0x76c] sm:$0xf0]  ;;  %v14788_v59 = vld [vmem:[#allocation47_spill] sm:$0xff] }
 0x1d0   : > { %v2531_v39 = vpop.f32.mrf.mxu2  ;;  %v4794_v0 = vmul.f32 %v4698_v30, %v4506_v29  ;;  %v2436_v36 = vpop.f32.mrf.mxu0  ;;  %v8989_v29 = vld [vmem:[#allocation5 + $0x2f0] sm:$0xf0]  ;;  %v14786_v30 = vld [vmem:[#allocation35_spill] sm:$0xff]  ;;  %3078 = vmatpush.bf16.msra.mxu2 %v8800_v45 }
 0x1d1   : > { %v2532_v53 = vadd.f32 %v2531_v39, %v12510_v44  ;;  %v2580_v33 = vpop.f32.mrf.mxu3  ;;  %v4230_v32 = vmul.f32 0.044715, %v4134_v40  ;;  %v2437_v2 = vadd.f32 %v2436_v36, %v12499_v8  ;;  %v2485_v13 = vpop.f32.mrf.mxu1  ;;  %v14787_v8 = vld [vmem:[#allocation46_spill] sm:$0xff]  ;;  %v9564_v40 = vor.u32 %v11164_v24, %v9563_v21 }
 0x1d2   : > { %v12682_v6 = vpack.c.bf16 %v4794_v0, %v4788_v48  ;;  %v8992_v39 = vor.u32 %v11017_v61, %v8989_v29 }
 0x1d3   : > { %v12684_v34 = vadd.f32 %v2580_v33, %v2532_v53  ;;  %v4326_v16 = vadd.f32 %v4230_v32, %v2483_v5  ;;  %v12686_v22 = vadd.f32 %v2485_v13, %v2437_v2  ;;  %2631 = vmatmul.bf16.gmra.mxu0 %v14785_v4 }
 0x1d4   : > { %14784 = vst [vmem:[#allocation48_spill] sm:$0xff] %v12682_v6  ;;  %2680 = vmatmul.bf16.gmra.mxu1 %v14786_v30  ;;  %2980 = vmatpush.bf16.msra.mxu0 %v9564_v40 }
 0x1d5   : > { %2729 = vmatmul.bf16.gmra.mxu2 %v14787_v8  ;;  %v4422_v48 = vmul.f32 0.7978846, %v4326_v16  ;;  %v4044_v0 = vmul.f32 %v12686_v22, %v12686_v22  ;;  %3127 = vmatpush.bf16.msra.mxu3 %v8992_v39  ;;  %v11624_v13 = vpop.eup %11623  ;;  %v4512_v39 = vmul.f32 0.5, %v12664_v58 }
 0x1d6   : > { %2778 = vmatmul.bf16.gmra.mxu3 %v14788_v59  ;;  %v4704_v61 = vadd.f32 1.0, %v11624_v13  ;;  %v9755_v59 = vld [vmem:[#allocation5 + $0x8d8] sm:$0xf] }
 0x1d7   : > { %11625 = vtanh.f32 %v4422_v48  ;;  %v4140_v53 = vmul.f32 %v4044_v0, %v12686_v22  ;;  %v4518_v48 = vmul.f32 0.5, %v2483_v5 }
 0x1d8   : > { %v2534_v33 = vpop.f32.mrf.mxu2  ;;  %v2438_v2 = vpop.f32.mrf.mxu0  ;;  %v4800_v8 = vmul.f32 %v4704_v61, %v4512_v39  ;;  %v14791_v61 = vld [vmem:[#allocation17_spill] sm:$0xff] }
 0x1d9   : > { %v2535_v36 = vadd.f32 %v2534_v33, %v12510_v44  ;;  %v2583_v32 = vpop.f32.mrf.mxu3  ;;  %v4236_v3 = vmul.f32 0.044715, %v4140_v53  ;;  %v2439_v38 = vadd.f32 %v2438_v2, %v12502_v23  ;;  %v2487_v21 = vpop.f32.mrf.mxu1  ;;  %v11212_v53 = vld [vmem:[#allocation5 + $0x8ec] sm:$0xf0] }
 0x1db   : > { %v12697_v16 = vadd.f32 %v2583_v32, %v2535_v36  ;;  %v4332_v24 = vadd.f32 %v4236_v3, %v12686_v22  ;;  %v2488_v45 = vadd.f32 %v2487_v21, %v2439_v38  ;;  %v9756_v3 = vor.u32 %v11212_v53, %v9755_v59 }
 0x1dd   : > { %v11626_v29 = vpop.eup %11625  ;;  %v4050_v40 = vmul.f32 %v2488_v45, %v2488_v45  ;;  %v4428_v33 = vmul.f32 0.7978846, %v4332_v24  ;;  %3029 = vmatpush.bf16.msra.mxu1 %v9756_v3 }
 0x1de   : > { %v4710_v0 = vadd.f32 1.0, %v11626_v29  ;;  %v14790_v29 = vld [vmem:[#allocation16_spill] sm:$0xff] }
 0x1df   : > { %v4146_v6 = vmul.f32 %v4050_v40, %v2488_v45  ;;  %11627 = vtanh.f32 %v4428_v33  ;;  %v9539_v33 = vld [vmem:[#allocation5 + $0x728] sm:$0xf] }
 0x1e0   : > { %v2536_v25 = vpop.f32.mrf.mxu2  ;;  %v4806_v23 = vmul.f32 %v4710_v0, %v4518_v48  ;;  %v2597_v2 = vpop.f32.mrf.mxu0  ;;  %v10963_v48 = vld [vmem:[#allocation5 + $0x12c] sm:$0xf]  ;;  %v8773_v0 = vld [vmem:[#allocation5 + $0x140] sm:$0xf0] }
 0x1e1   : > { %v2537_v36 = vadd.f32 %v2536_v25, %v12510_v44  ;;  %v2585_v32 = vpop.f32.mrf.mxu3  ;;  %v4242_v38 = vmul.f32 0.044715, %v4146_v6  ;;  %v2598_v13 = vadd.f32 %v2597_v2, %v12518_v9  ;;  %v2646_v21 = vpop.f32.mrf.mxu1  ;;  %v8965_v2 = vld [vmem:[#allocation5 + $0x2c0] sm:$0xf0] }
 0x1e2   : > { %v12703_v60 = vpack.c.bf16 %v4806_v23, %v4800_v8  ;;  %v8776_v23 = vor.u32 %v10963_v48, %v8773_v0  ;;  %v9731_v48 = vld [vmem:[#allocation5 + $0x8a8] sm:$0xf] }
 0x1e3   : > { %v12705_v58 = vadd.f32 %v2585_v32, %v2537_v36  ;;  %v4338_v5 = vadd.f32 %v4242_v38, %v2488_v45  ;;  %v2647_v24 = vadd.f32 %v2646_v21, %v2598_v13  ;;  %2792 = vmatmul.bf16.vlgmr.msrb.gmra.mxu0 %v14790_v29  ;;  %v11158_v36 = vld [vmem:[#allocation5 + $0x73c] sm:$0xf0]  ;;  %v11011_v32 = vld [vmem:[#allocation5 + $0x2ac] sm:$0xf] }
 0x1e4   : > { %14789 = vst [vmem:[#allocation54_spill] sm:$0xff] %v12703_v60  ;;  %2841 = vmatmul.bf16.vlgmr.msrb.gmra.mxu1 %v14791_v61  ;;  %v9540_v13 = vor.u32 %v11158_v36, %v9539_v33  ;;  %v8968_v21 = vor.u32 %v11011_v32, %v8965_v2  ;;  %3079 = vmatpush.bf16.msra.mxu2 %v8776_v23 }
 0x1e5   : > { %2890 = vmatmul.bf16.vlgmr.msrb.gmra.mxu2 %v12206_v54  ;;  %v4434_v25 = vmul.f32 0.7978846, %v4338_v5  ;;  %v11628_v9 = vpop.eup %11627 }
 0x1e6   : > { %2939 = vmatmul.bf16.vlgmr.msrb.gmra.mxu3 %v12208_v57  ;;  %v4716_v3 = vadd.f32 1.0, %v11628_v9  ;;  %2981 = vmatpush.bf16.msra.mxu0 %v9540_v13  ;;  %v11206_v9 = vld [vmem:[#allocation5 + $0x8bc] sm:$0xf0] }
 0x1e7   : > { %11629 = vtanh.f32 %v4434_v25  ;;  %3128 = vmatpush.bf16.msra.mxu3 %v8968_v21  ;;  %v4530_v25 = vmul.f32 0.5, %v2488_v45  ;;  %v9732_v32 = vor.u32 %v11206_v9, %v9731_v48  ;;  %v10957_v9 = vld [vmem:[#allocation5 + $0xfc] sm:$0xf] }
 0x1e8   : > { %v2695_v44 = vpop.f32.mrf.mxu2  ;;  %v2599_v59 = vpop.f32.mrf.mxu0 }
 0x1e9   : > { %v2696_v6 = vadd.f32 %v2695_v44, %v2647_v24  ;;  %v2744_v8 = vpop.f32.mrf.mxu3  ;;  %v2600_v40 = vadd.f32 %v2599_v59, %v12523_v7  ;;  %v2648_v39 = vpop.f32.mrf.mxu1  ;;  %v4524_v7 = vmul.f32 0.5, %v12686_v22  ;;  %3030 = vmatpush.bf16.msra.mxu1 %v9732_v32  ;;  %v11152_v32 = vld [vmem:[#allocation5 + $0x70c] sm:$0xf0] }
 0x1eb   : > { %v12712_v53 = vadd.f32 %v2744_v8, %v2696_v6  ;;  %v2649_v38 = vadd.f32 %v2648_v39, %v2600_v40  ;;  %v4812_v8 = vmul.f32 %v4716_v3, %v4524_v7  ;;  %v14793_v3 = vld [vmem:[#allocation18_spill] sm:$0xff] }
 0x1ed   : > { %v3961_v5 = vmul.f32 %v12712_v53, %v12712_v53  ;;  %v11630_v24 = vpop.eup %11629 }
 0x1ee   : > { %v4722_v44 = vadd.f32 1.0, %v11630_v24  ;;  %v14794_v24 = vld [vmem:[#allocation19_spill] sm:$0xff] }
 0x1ef   : > { %v4057_v6 = vmul.f32 %v3961_v5, %v12712_v53 }
 0x1f0   : > { %v2697_v59 = vpop.f32.mrf.mxu2  ;;  %v4818_v40 = vmul.f32 %v4722_v44, %v4530_v25  ;;  %v2602_v36 = vpop.f32.mrf.mxu0 }
 0x1f1   : > { %v4153_v39 = vmul.f32 0.044715, %v4057_v6  ;;  %v2698_v0 = vadd.f32 %v2697_v59, %v2649_v38  ;;  %v2746_v33 = vpop.f32.mrf.mxu3  ;;  %v2603_v23 = vadd.f32 %v2602_v36, %v12536_v18  ;;  %v2651_v2 = vpop.f32.mrf.mxu1 }
 0x1f2   : > { %v12719_v22 = vpack.c.bf16 %v4818_v40, %v4812_v8  ;;  %v8749_v40 = vld [vmem:[#allocation5 + $0x110] sm:$0xf0] }
 0x1f3   : > { %v4249_v45 = vadd.f32 %v4153_v39, %v12712_v53  ;;  %v2747_v13 = vadd.f32 %v2746_v33, %v2698_v0  ;;  %v2652_v21 = vadd.f32 %v2651_v2, %v2603_v23  ;;  %2797 = vmatmul.bf16.gmra.mxu0 %v14793_v3  ;;  %v9515_v39 = vld [vmem:[#allocation5 + $0x6f8] sm:$0xf]  ;;  %v8752_v36 = vor.u32 %v10957_v9, %v8749_v40  ;;  %v11005_v23 = vld [vmem:[#allocation5 + $0x27c] sm:$0xf]  ;;  %v8941_v2 = vld [vmem:[#allocation5 + $0x290] sm:$0xf0] }
 0x1f4   : > { %14792 = vst [vmem:[#allocation55_spill] sm:$0xff] %v12719_v22  ;;  %2846 = vmatmul.bf16.gmra.mxu1 %v14794_v24 }
 0x1f5   : > { %v3967_v5 = vmul.f32 %v2747_v13, %v2747_v13  ;;  %2895 = vmatmul.bf16.gmra.mxu2 %v12226_v26  ;;  %v4345_v38 = vmul.f32 0.7978846, %v4249_v45 }
 0x1f6   : > { %2944 = vmatmul.bf16.gmra.mxu3 %v12228_v27  ;;  %3080 = vmatpush.bf16.msra.mxu2 %v8752_v36 }
 0x1f7   : > { %v4063_v7 = vmul.f32 %v3967_v5, %v2747_v13  ;;  %11631 = vtanh.f32 %v4345_v38  ;;  %v9516_v5 = vor.u32 %v11152_v32, %v9515_v39 }
 0x1f8   : > { %v2700_v18 = vpop.f32.mrf.mxu2  ;;  %v2604_v8 = vpop.f32.mrf.mxu0 }
 0x1f9   : > { %v4159_v25 = vmul.f32 0.044715, %v4063_v7  ;;  %v2701_v44 = vadd.f32 %v2700_v18, %v2652_v21  ;;  %v2749_v6 = vpop.f32.mrf.mxu3  ;;  %v2605_v59 = vadd.f32 %v2604_v8, %v12549_v1  ;;  %v2653_v48 = vpop.f32.mrf.mxu1  ;;  %v8944_v7 = vor.u32 %v11005_v23, %v8941_v2  ;;  %2982 = vmatpush.bf16.msra.mxu0 %v9516_v5  ;;  %v14795_v5 = vld [vmem:[#allocation20_spill] sm:$0xff] }
 0x1fb   : > { %v4255_v0 = vadd.f32 %v4159_v25, %v2747_v13  ;;  %v12727_v33 = vadd.f32 %v2749_v6, %v2701_v44  ;;  %v2654_v45 = vadd.f32 %v2653_v48, %v2605_v59  ;;  %3129 = vmatpush.bf16.msra.mxu3 %v8944_v7  ;;  %v9707_v25 = vld [vmem:[#allocation5 + $0x878] sm:$0xf]  ;;  %v11200_v44 = vld [vmem:[#allocation5 + $0x88c] sm:$0xf0] }
 0x1fc   : > { %v9708_v48 = vor.u32 %v11200_v44, %v9707_v25 }
 0x1fd   : > { %v4351_v21 = vmul.f32 0.7978846, %v4255_v0  ;;  %v3973_v18 = vmul.f32 %v12727_v33, %v12727_v33  ;;  %v11632_v6 = vpop.eup %11631 }
 0x1fe   : > { %3031 = vmatpush.bf16.msra.mxu1 %v9708_v48  ;;  %v4633_v23 = vadd.f32 1.0, %v11632_v6 }
 0x1ff   : > { %11633 = vtanh.f32 %v4351_v21  ;;  %v4069_v1 = vmul.f32 %v3973_v18, %v12727_v33  ;;  %v4447_v18 = vmul.f32 0.5, %v2747_v13  ;;  %v8725_v13 = vld [vmem:[#allocation5 + $0xe0] sm:$0xf0] }
 0x200   : > { %v2702_v38 = vpop.f32.mrf.mxu2  ;;  %v2607_v59 = vpop.f32.mrf.mxu0 }
 0x201   : > { %v4165_v8 = vmul.f32 0.044715, %v4069_v1  ;;  %v2703_v9 = vadd.f32 %v2702_v38, %v2654_v45  ;;  %v2751_v40 = vpop.f32.mrf.mxu3  ;;  %v2608_v39 = vadd.f32 %v2607_v59, %v12563_v35  ;;  %v2656_v0 = vpop.f32.mrf.mxu1  ;;  %v14796_v45 = vld [vmem:[#allocation21_spill] sm:$0xff]  ;;  %v4441_v35 = vmul.f32 0.5, %v12712_v53  ;;  %v10951_v53 = vld [vmem:[#allocation5 + $0xcc] sm:$0xf] }
 0x203   : > { %v4261_v32 = vadd.f32 %v4165_v8, %v12727_v33  ;;  %v12734_v36 = vadd.f32 %v2751_v40, %v2703_v9  ;;  %v2657_v2 = vadd.f32 %v2656_v0, %v2608_v39  ;;  %2802 = vmatmul.bf16.gmra.mxu0 %v14795_v5  ;;  %v4729_v44 = vmul.f32 %v4633_v23, %v4441_v35  ;;  %v10999_v35 = vld [vmem:[#allocation5 + $0x24c] sm:$0xf] }
 0x204   : > { %2851 = vmatmul.bf16.gmra.mxu1 %v14796_v45  ;;  %v8728_v23 = vor.u32 %v10951_v53, %v8725_v13 }
 0x205   : > { %v11634_v7 = vpop.eup %11633  ;;  %v3979_v21 = vmul.f32 %v12734_v36, %v12734_v36  ;;  %2900 = vmatmul.bf16.gmra.mxu2 %v12246_v51  ;;  %v4357_v38 = vmul.f32 0.7978846, %v4261_v32 }
 0x206   : > { %v4639_v1 = vadd.f32 1.0, %v11634_v7  ;;  %2949 = vmatmul.bf16.gmra.mxu3 %v12248_v52  ;;  %v9491_v7 = vld [vmem:[#allocation5 + $0x6c8] sm:$0xf]  ;;  %3081 = vmatpush.bf16.msra.mxu2 %v8728_v23 }
 0x207   : > { %v4075_v25 = vmul.f32 %v3979_v21, %v12734_v36  ;;  %11635 = vtanh.f32 %v4357_v38  ;;  %v11146_v21 = vld [vmem:[#allocation5 + $0x6dc] sm:$0xf0] }
 0x208   : > { %v4735_v6 = vmul.f32 %v4639_v1, %v4447_v18  ;;  %v2705_v8 = vpop.f32.mrf.mxu2  ;;  %v2609_v48 = vpop.f32.mrf.mxu0  ;;  %v8917_v18 = vld [vmem:[#allocation5 + $0x260] sm:$0xf0]  ;;  %v9492_v1 = vor.u32 %v11146_v21, %v9491_v7 }
 0x209   : > { %v4171_v9 = vmul.f32 0.044715, %v4075_v25  ;;  %v2706_v40 = vadd.f32 %v2705_v8, %v2657_v2  ;;  %v2754_v59 = vpop.f32.mrf.mxu3  ;;  %v2610_v0 = vadd.f32 %v2609_v48, %v12577_v37  ;;  %v2658_v22 = vpop.f32.mrf.mxu1  ;;  %v8920_v25 = vor.u32 %v10999_v35, %v8917_v18  ;;  %v9683_v8 = vld [vmem:[#allocation5 + $0x848] sm:$0xf]  ;;  %v14798_v18 = vld [vmem:[#allocation22_spill] sm:$0xff] }
 0x20a   : > { %v12744_v39 = vpack.c.bf16 %v4735_v6, %v4729_v44  ;;  %2983 = vmatpush.bf16.msra.mxu0 %v9492_v1 }
 0x20b   : > { %v4267_v32 = vadd.f32 %v4171_v9, %v12734_v36  ;;  %v12748_v60 = vadd.f32 %v2754_v59, %v2706_v40  ;;  %v2659_v2 = vadd.f32 %v2658_v22, %v2610_v0  ;;  %3130 = vmatpush.bf16.msra.mxu3 %v8920_v25  ;;  %v11194_v9 = vld [vmem:[#allocation5 + $0x85c] sm:$0xf0] }
 0x20c   : > { %14797 = vst [vmem:[#allocation56_spill] sm:$0xff] %v12744_v39  ;;  %v9684_v0 = vor.u32 %v11194_v9, %v9683_v8 }
 0x20d   : > { %v4363_v44 = vmul.f32 0.7978846, %v4267_v32  ;;  %v3985_v37 = vmul.f32 %v12748_v60, %v12748_v60  ;;  %v11636_v40 = vpop.eup %11635 }
 0x20e   : > { %3032 = vmatpush.bf16.msra.mxu1 %v9684_v0  ;;  %v4645_v21 = vadd.f32 1.0, %v11636_v40 }
 0x20f   : > { %11637 = vtanh.f32 %v4363_v44  ;;  %v4081_v38 = vmul.f32 %v3985_v37, %v12748_v60  ;;  %v4459_v44 = vmul.f32 0.5, %v12734_v36  ;;  %v8701_v36 = vld [vmem:[#allocation5 + $0xb0] sm:$0xf0] }
 0x210   : > { %v2707_v6 = vpop.f32.mrf.mxu2  ;;  %v2612_v22 = vpop.f32.mrf.mxu0 }
 0x211   : > { %v4177_v59 = vmul.f32 0.044715, %v4081_v38  ;;  %v2708_v48 = vadd.f32 %v2707_v6, %v2659_v2  ;;  %v2756_v53 = vpop.f32.mrf.mxu3  ;;  %v2613_v13 = vadd.f32 %v2612_v22, %v12591_v41  ;;  %v2661_v7 = vpop.f32.mrf.mxu1  ;;  %v14799_v2 = vld [vmem:[#allocation23_spill] sm:$0xff]  ;;  %v4453_v41 = vmul.f32 0.5, %v12727_v33 }
 0x213   : > { %v4273_v32 = vadd.f32 %v4177_v59, %v12748_v60  ;;  %v12755_v23 = vadd.f32 %v2756_v53, %v2708_v48  ;;  %v2662_v35 = vadd.f32 %v2661_v7, %v2613_v13  ;;  %2807 = vmatmul.bf16.gmra.mxu0 %v14798_v18  ;;  %v4741_v8 = vmul.f32 %v4645_v21, %v4453_v41  ;;  %v10945_v7 = vld [vmem:[#allocation5 + $0x9c] sm:$0xf] }
 0x214   : > { %2856 = vmatmul.bf16.gmra.mxu1 %v14799_v2  ;;  %v8704_v21 = vor.u32 %v10945_v7, %v8701_v36  ;;  %v10993_v41 = vld [vmem:[#allocation5 + $0x21c] sm:$0xf] }
 0x215   : > { %v11638_v1 = vpop.eup %11637  ;;  %v3991_v25 = vmul.f32 %v12755_v23, %v12755_v23  ;;  %2905 = vmatmul.bf16.gmra.mxu2 %v12266_v14  ;;  %v4369_v38 = vmul.f32 0.7978846, %v4273_v32 }
 0x216   : > { %v4651_v37 = vadd.f32 1.0, %v11638_v1  ;;  %2954 = vmatmul.bf16.gmra.mxu3 %v12268_v15  ;;  %v9467_v1 = vld [vmem:[#allocation5 + $0x698] sm:$0xf]  ;;  %3082 = vmatpush.bf16.msra.mxu2 %v8704_v21 }
 0x217   : > { %v4087_v6 = vmul.f32 %v3991_v25, %v12755_v23  ;;  %11639 = vtanh.f32 %v4369_v38  ;;  %v11140_v25 = vld [vmem:[#allocation5 + $0x6ac] sm:$0xf0] }
 0x218   : > { %v4747_v9 = vmul.f32 %v4651_v37, %v4459_v44  ;;  %v2710_v40 = vpop.f32.mrf.mxu2  ;;  %v2614_v22 = vpop.f32.mrf.mxu0  ;;  %v8893_v44 = vld [vmem:[#allocation5 + $0x230] sm:$0xf0]  ;;  %v9468_v37 = vor.u32 %v11140_v25, %v9467_v1 }
 0x219   : > { %v4183_v59 = vmul.f32 0.044715, %v4087_v6  ;;  %v2711_v48 = vadd.f32 %v2710_v40, %v2662_v35  ;;  %v2759_v53 = vpop.f32.mrf.mxu3  ;;  %v2615_v13 = vadd.f32 %v2614_v22, %v12605_v20  ;;  %v2663_v33 = vpop.f32.mrf.mxu1  ;;  %v8896_v6 = vor.u32 %v10993_v41, %v8893_v44  ;;  %v9659_v40 = vld [vmem:[#allocation5 + $0x818] sm:$0xf]  ;;  %v14801_v44 = vld [vmem:[#allocation24_spill] sm:$0xff] }
 0x21a   : > { %v12766_v0 = vpack.c.bf16 %v4747_v9, %v4741_v8  ;;  %2984 = vmatpush.bf16.msra.mxu0 %v9468_v37 }
 0x21b   : > { %v4279_v32 = vadd.f32 %v4183_v59, %v12755_v23  ;;  %v12770_v39 = vadd.f32 %v2759_v53, %v2711_v48  ;;  %v2664_v35 = vadd.f32 %v2663_v33, %v2615_v13  ;;  %3131 = vmatpush.bf16.msra.mxu3 %v8896_v6  ;;  %v11188_v59 = vld [vmem:[#allocation5 + $0x82c] sm:$0xf0] }
 0x21c   : > { %14800 = vst [vmem:[#allocation57_spill] sm:$0xff] %v12766_v0  ;;  %v9660_v33 = vor.u32 %v11188_v59, %v9659_v40 }
 0x21d   : > { %v4375_v8 = vmul.f32 0.7978846, %v4279_v32  ;;  %v3997_v20 = vmul.f32 %v12770_v39, %v12770_v39  ;;  %v11640_v48 = vpop.eup %11639 }
 0x21e   : > { %3033 = vmatpush.bf16.msra.mxu1 %v9660_v33  ;;  %v4657_v25 = vadd.f32 1.0, %v11640_v48 }
 0x21f   : > { %11641 = vtanh.f32 %v4375_v8  ;;  %v4093_v38 = vmul.f32 %v3997_v20, %v12770_v39  ;;  %v4471_v8 = vmul.f32 0.5, %v12755_v23  ;;  %v8677_v23 = vld [vmem:[#allocation5 + $0x80] sm:$0xf0] }
 0x220   : > { %v2712_v9 = vpop.f32.mrf.mxu2  ;;  %v2617_v13 = vpop.f32.mrf.mxu0 }
 0x221   : > { %v4189_v53 = vmul.f32 0.044715, %v4093_v38  ;;  %v2713_v22 = vadd.f32 %v2712_v9, %v2664_v35  ;;  %v2761_v7 = vpop.f32.mrf.mxu3  ;;  %v2618_v36 = vadd.f32 %v2617_v13, %v12619_v12  ;;  %v2666_v1 = vpop.f32.mrf.mxu1  ;;  %v14802_v35 = vld [vmem:[#allocation25_spill] sm:$0xff]  ;;  %v4465_v12 = vmul.f32 0.5, %v12748_v60 }
 0x223   : > { %v4285_v32 = vadd.f32 %v4189_v53, %v12770_v39  ;;  %v12777_v21 = vadd.f32 %v2761_v7, %v2713_v22  ;;  %v2667_v41 = vadd.f32 %v2666_v1, %v2618_v36  ;;  %2812 = vmatmul.bf16.gmra.mxu0 %v14801_v44  ;;  %v4753_v40 = vmul.f32 %v4657_v25, %v4465_v12  ;;  %v10939_v1 = vld [vmem:[#allocation5 + $0x6c] sm:$0xf] }
 0x224   : > { %2861 = vmatmul.bf16.gmra.mxu1 %v14802_v35  ;;  %v8680_v25 = vor.u32 %v10939_v1, %v8677_v23  ;;  %v10987_v12 = vld [vmem:[#allocation5 + $0x1ec] sm:$0xf] }
 0x225   : > { %v11642_v37 = vpop.eup %11641  ;;  %v4003_v6 = vmul.f32 %v12777_v21, %v12777_v21  ;;  %2910 = vmatmul.bf16.gmra.mxu2 %v12286_v42  ;;  %v4381_v38 = vmul.f32 0.7978846, %v4285_v32 }
 0x226   : > { %v4663_v20 = vadd.f32 1.0, %v11642_v37  ;;  %2959 = vmatmul.bf16.gmra.mxu3 %v12288_v43  ;;  %v9443_v37 = vld [vmem:[#allocation5 + $0x668] sm:$0xf]  ;;  %3083 = vmatpush.bf16.msra.mxu2 %v8680_v25 }
 0x227   : > { %v4099_v9 = vmul.f32 %v4003_v6, %v12777_v21  ;;  %11643 = vtanh.f32 %v4381_v38  ;;  %v11134_v6 = vld [vmem:[#allocation5 + $0x67c] sm:$0xf0] }
 0x228   : > { %v4759_v59 = vmul.f32 %v4663_v20, %v4471_v8  ;;  %v2715_v48 = vpop.f32.mrf.mxu2  ;;  %v2619_v13 = vpop.f32.mrf.mxu0  ;;  %v8869_v8 = vld [vmem:[#allocation5 + $0x200] sm:$0xf0]  ;;  %v9444_v20 = vor.u32 %v11134_v6, %v9443_v37 }
 0x229   : > { %v4195_v53 = vmul.f32 0.044715, %v4099_v9  ;;  %v2716_v22 = vadd.f32 %v2715_v48, %v2667_v41  ;;  %v2764_v7 = vpop.f32.mrf.mxu3  ;;  %v2620_v36 = vadd.f32 %v2619_v13, %v12633_v28  ;;  %v2668_v60 = vpop.f32.mrf.mxu1  ;;  %v8872_v9 = vor.u32 %v10987_v12, %v8869_v8  ;;  %v9635_v48 = vld [vmem:[#allocation5 + $0x7e8] sm:$0xf]  ;;  %v14804_v8 = vld [vmem:[#allocation26_spill] sm:$0xff] }
 0x22a   : > { %v12788_v33 = vpack.c.bf16 %v4759_v59, %v4753_v40  ;;  %2985 = vmatpush.bf16.msra.mxu0 %v9444_v20 }
 0x22b   : > { %v4291_v32 = vadd.f32 %v4195_v53, %v12777_v21  ;;  %v12792_v0 = vadd.f32 %v2764_v7, %v2716_v22  ;;  %v2669_v41 = vadd.f32 %v2668_v60, %v2620_v36  ;;  %3132 = vmatpush.bf16.msra.mxu3 %v8872_v9  ;;  %v11182_v53 = vld [vmem:[#allocation5 + $0x7fc] sm:$0xf0] }
 0x22c   : > { %14803 = vst [vmem:[#allocation58_spill] sm:$0xff] %v12788_v33  ;;  %v9636_v60 = vor.u32 %v11182_v53, %v9635_v48 }
 0x22d   : > { %v4387_v40 = vmul.f32 0.7978846, %v4291_v32  ;;  %v4009_v28 = vmul.f32 %v12792_v0, %v12792_v0  ;;  %v11644_v22 = vpop.eup %11643 }
 0x22e   : > { %3034 = vmatpush.bf16.msra.mxu1 %v9636_v60  ;;  %v4669_v6 = vadd.f32 1.0, %v11644_v22 }
 0x22f   : > { %11645 = vtanh.f32 %v4387_v40  ;;  %v4105_v38 = vmul.f32 %v4009_v28, %v12792_v0  ;;  %v4483_v40 = vmul.f32 0.5, %v12777_v21  ;;  %v8653_v21 = vld [vmem:[#allocation5 + $0x50] sm:$0xf0] }
 0x230   : > { %v2717_v59 = vpop.f32.mrf.mxu2  ;;  %v2622_v36 = vpop.f32.mrf.mxu0 }
 0x231   : > { %v4201_v7 = vmul.f32 0.044715, %v4105_v38  ;;  %v2718_v13 = vadd.f32 %v2717_v59, %v2669_v41  ;;  %v2766_v1 = vpop.f32.mrf.mxu3  ;;  %v2623_v23 = vadd.f32 %v2622_v36, %v12647_v62  ;;  %v2671_v37 = vpop.f32.mrf.mxu1  ;;  %v14805_v41 = vld [vmem:[#allocation27_spill] sm:$0xff]  ;;  %v4477_v62 = vmul.f32 0.5, %v12770_v39 }
 0x233   : > { %v4297_v32 = vadd.f32 %v4201_v7, %v12792_v0  ;;  %v12799_v25 = vadd.f32 %v2766_v1, %v2718_v13  ;;  %v2672_v12 = vadd.f32 %v2671_v37, %v2623_v23  ;;  %2817 = vmatmul.bf16.gmra.mxu0 %v14804_v8  ;;  %v4765_v48 = vmul.f32 %v4669_v6, %v4477_v62  ;;  %v10933_v37 = vld [vmem:[#allocation5 + $0x3c] sm:$0xf] }
 0x234   : > { %2866 = vmatmul.bf16.gmra.mxu1 %v14805_v41  ;;  %v8656_v6 = vor.u32 %v10933_v37, %v8653_v21  ;;  %v10981_v62 = vld [vmem:[#allocation5 + $0x1bc] sm:$0xf] }
 0x235   : > { %v11646_v20 = vpop.eup %11645  ;;  %v4015_v9 = vmul.f32 %v12799_v25, %v12799_v25  ;;  %2915 = vmatmul.bf16.gmra.mxu2 %v12306_v10  ;;  %v4393_v38 = vmul.f32 0.7978846, %v4297_v32  ;;  %v14808_v10 = vld [vmem:[#allocation31_spill] sm:$0xff] }
 0x236   : > { %v4675_v28 = vadd.f32 1.0, %v11646_v20  ;;  %2964 = vmatmul.bf16.gmra.mxu3 %v12308_v11  ;;  %v9419_v20 = vld [vmem:[#allocation5 + $0x638] sm:$0xf]  ;;  %3084 = vmatpush.bf16.msra.mxu2 %v8656_v6 }
 0x237   : > { %v4111_v59 = vmul.f32 %v4015_v9, %v12799_v25  ;;  %11647 = vtanh.f32 %v4393_v38  ;;  %v11128_v9 = vld [vmem:[#allocation5 + $0x64c] sm:$0xf0] }
 0x238   : > { %v4771_v53 = vmul.f32 %v4675_v28, %v4483_v40  ;;  %v2720_v22 = vpop.f32.mrf.mxu2  ;;  %v2624_v36 = vpop.f32.mrf.mxu0  ;;  %v8845_v40 = vld [vmem:[#allocation5 + $0x1d0] sm:$0xf0]  ;;  %v9420_v28 = vor.u32 %v11128_v9, %v9419_v20 }
 0x239   : > { %v4207_v7 = vmul.f32 0.044715, %v4111_v59  ;;  %v2721_v13 = vadd.f32 %v2720_v22, %v2672_v12  ;;  %v2769_v1 = vpop.f32.mrf.mxu3  ;;  %v2625_v23 = vadd.f32 %v2624_v36, %v12661_v56  ;;  %v2673_v39 = vpop.f32.mrf.mxu1  ;;  %v8848_v59 = vor.u32 %v10981_v62, %v8845_v40  ;;  %v11122_v62 = vld [vmem:[#allocation5 + $0x61c] sm:$0xf0]  ;;  %v10975_v40 = vld [vmem:[#allocation5 + $0x18c] sm:$0xf] }
 0x23a   : > { %v12810_v60 = vpack.c.bf16 %v4771_v53, %v4765_v48  ;;  %v9611_v48 = vld [vmem:[#allocation5 + $0x7b8] sm:$0xf]  ;;  %v11176_v53 = vld [vmem:[#allocation5 + $0x7cc] sm:$0xf0]  ;;  %2986 = vmatpush.bf16.msra.mxu0 %v9420_v28 }
 0x23b   : > { %v4303_v32 = vadd.f32 %v4207_v7, %v12799_v25  ;;  %v12814_v33 = vadd.f32 %v2769_v1, %v2721_v13  ;;  %v2674_v12 = vadd.f32 %v2673_v39, %v2625_v23  ;;  %v9612_v36 = vor.u32 %v11176_v53, %v9611_v48  ;;  %3133 = vmatpush.bf16.msra.mxu3 %v8848_v59  ;;  %v10927_v13 = vld [vmem:[#allocation5 + $0xc] sm:$0xf]  ;;  %v8629_v1 = vld [vmem:[#allocation5 + $0x20] sm:$0xf0]  ;;  %v9395_v23 = vld [vmem:[#allocation5 + $0x608] sm:$0xf] }
 0x23c   : > { %14806 = vst [vmem:[#allocation59_spill] sm:$0xff] %v12810_v60  ;;  %v8632_v9 = vor.u32 %v10927_v13, %v8629_v1  ;;  %v9396_v59 = vor.u32 %v11122_v62, %v9395_v23  ;;  %v8821_v48 = vld [vmem:[#allocation5 + $0x1a0] sm:$0xf0]  ;;  %v9587_v53 = vld [vmem:[#allocation5 + $0x788] sm:$0xf]  ;;  %v4495_v23 = vmul.f32 0.5, %v12799_v25 }
 0x23d   : > { %v4399_v22 = vmul.f32 0.7978846, %v4303_v32  ;;  %v4021_v56 = vmul.f32 %v12814_v33, %v12814_v33  ;;  %3035 = vmatpush.bf16.msra.mxu1 %v9612_v36  ;;  %v11648_v39 = vpop.eup %11647  ;;  %v8824_v60 = vor.u32 %v10975_v40, %v8821_v48 }
 0x23e   : > { %3085 = vmatpush.bf16.msra.mxu2 %v8632_v9  ;;  %2987 = vmatpush.bf16.msra.mxu0 %v9396_v59 }
 0x23f   : > { %11649 = vtanh.f32 %v4399_v22  ;;  %v4117_v38 = vmul.f32 %v4021_v56, %v12814_v33  ;;  %v11170_v22 = vld [vmem:[#allocation5 + $0x79c] sm:$0xf0]  ;;  %3134 = vmatpush.bf16.msra.mxu3 %v8824_v60 }
 0x240   : > { %v2722_v7 = vpop.f32.mrf.mxu2  ;;  %v2627_v32 = vpop.f32.mrf.mxu0  ;;  %v9588_v11 = vor.u32 %v11170_v22, %v9587_v53 }
 0x241   : > { %v4213_v37 = vmul.f32 0.044715, %v4117_v38  ;;  %v2723_v21 = vadd.f32 %v2722_v7, %v2674_v12  ;;  %v2771_v20 = vpop.f32.mrf.mxu3  ;;  %v2628_v6 = vadd.f32 %v2627_v32, %v12675_v49  ;;  %v2676_v28 = vpop.f32.mrf.mxu1  ;;  %v4681_v38 = vadd.f32 1.0, %v11648_v39  ;;  %v14807_v7 = vld [vmem:[#allocation30_spill] sm:$0xff] }
 0x242   : > { %v4489_v49 = vmul.f32 0.5, %v12792_v0  ;;  %3036 = vmatpush.bf16.msra.mxu1 %v9588_v11 }
 0x243   : > { %v4309_v56 = vadd.f32 %v4213_v37, %v12814_v33  ;;  %v2772_v36 = vadd.f32 %v2771_v20, %v2723_v21  ;;  %v2677_v12 = vadd.f32 %v2676_v28, %v2628_v6  ;;  %2822 = vmatmul.bf16.gmra.mxu0 %v14807_v7 }
 0x244   : > { %2871 = vmatmul.bf16.gmra.mxu1 %v14808_v10  ;;  %v4777_v39 = vmul.f32 %v4681_v38, %v4489_v49 }
 0x245   : > { %v11650_v13 = vpop.eup %11649  ;;  %v4027_v1 = vmul.f32 %v2772_v36, %v2772_v36  ;;  %2920 = vmatmul.bf16.gmra.mxu2 %v12326_v46  ;;  %v4405_v37 = vmul.f32 0.7978846, %v4309_v56 }
 0x246   : > { %v4687_v32 = vadd.f32 1.0, %v11650_v13  ;;  %2969 = vmatmul.bf16.gmra.mxu3 %v12328_v47 }
 0x247   : > { %v4123_v21 = vmul.f32 %v4027_v1, %v2772_v36  ;;  %11651 = vtanh.f32 %v4405_v37 }
 0x248   : > { %v4783_v20 = vmul.f32 %v4687_v32, %v4495_v23  ;;  %v2725_v9 = vpop.f32.mrf.mxu2  ;;  %v2629_v28 = vpop.f32.mrf.mxu0 }
 0x249   : > { %v4219_v62 = vmul.f32 0.044715, %v4123_v21  ;;  %v2726_v40 = vadd.f32 %v2725_v9, %v2677_v12  ;;  %v2774_v6 = vpop.f32.mrf.mxu3  ;;  %v2630_v0 = vadd.f32 %v2629_v28, %v12684_v34  ;;  %v2678_v25 = vpop.f32.mrf.mxu1  ;;  %v14810_v9 = vld [vmem:[#allocation32_spill] sm:$0xff]  ;;  %v4501_v28 = vmul.f32 0.5, %v12814_v33  ;;  %v11161_v33 = vld [vmem:[#allocation5 + $0x75c] sm:$0xf] }
 0x24a   : > { %v12827_v48 = vpack.c.bf16 %v4783_v20, %v4777_v39 }
 0x24b   : > { %v4315_v53 = vadd.f32 %v4219_v62, %v2772_v36  ;;  %v12830_v22 = vadd.f32 %v2774_v6, %v2726_v40  ;;  %v2679_v59 = vadd.f32 %v2678_v25, %v2630_v0  ;;  %v14811_v6 = vld [vmem:[#allocation33_spill] sm:$0xff] }
 0x24c   : > { %14809 = vst [vmem:[#allocation60_spill] sm:$0xff] %v12827_v48 }
 0x24d   : > { %v4411_v56 = vmul.f32 0.7978846, %v4315_v53  ;;  %v4033_v11 = vmul.f32 %v12830_v22, %v12830_v22  ;;  %v11652_v12 = vpop.eup %11651 }
 0x24e   : > { %v4693_v39 = vadd.f32 1.0, %v11652_v12 }
 0x24f   : > { %11653 = vtanh.f32 %v4411_v56  ;;  %v4129_v60 = vmul.f32 %v4033_v11, %v12830_v22 }
 0x250   : > { %v2727_v38 = vpop.f32.mrf.mxu2  ;;  %v2632_v23 = vpop.f32.mrf.mxu0 }
 0x251   : > { %v4225_v13 = vmul.f32 0.044715, %v4129_v60  ;;  %v2728_v1 = vadd.f32 %v2727_v38, %v2679_v59  ;;  %v2776_v49 = vpop.f32.mrf.mxu3  ;;  %v2633_v34 = vadd.f32 %v2632_v23, %v12697_v16  ;;  %v2681_v32 = vpop.f32.mrf.mxu1  ;;  %v4507_v16 = vmul.f32 0.5, %v2772_v36  ;;  %v9565_v36 = vld [vmem:[#allocation5 + $0x770] sm:$0xf0] }
 0x252   : > { %v4789_v59 = vmul.f32 %v4693_v39, %v4501_v28  ;;  %v9568_v39 = vor.u32 %v11161_v33, %v9565_v36  ;;  %v9757_v28 = vld [vmem:[#allocation5 + $0x8f0] sm:$0xf0] }
 0x253   : > { %v4321_v37 = vadd.f32 %v4225_v13, %v12830_v22  ;;  %v12837_v21 = vadd.f32 %v2776_v49, %v2728_v1  ;;  %v2682_v20 = vadd.f32 %v2681_v32, %v2633_v34  ;;  %2827 = vmatmul.bf16.gmra.mxu0 %v14810_v9  ;;  %v11065_v34 = vld [vmem:[#allocation5 + $0x45c] sm:$0xf] }
 0x254   : > { %2876 = vmatmul.bf16.gmra.mxu1 %v14811_v6  ;;  %3274 = vmatpush.bf16.msrb.mxu2 %v9568_v39  ;;  %v11107_v39 = vld [vmem:[#allocation5 + $0x5ac] sm:$0xf] }
 0x255   : > { %v11654_v62 = vpop.eup %11653  ;;  %v4039_v40 = vmul.f32 %v12837_v21, %v12837_v21  ;;  %2925 = vmatmul.bf16.gmra.mxu2 %v14785_v4  ;;  %v4417_v25 = vmul.f32 0.7978846, %v4321_v37 }
 0x256   : > { %v4699_v0 = vadd.f32 1.0, %v11654_v62  ;;  %2974 = vmatmul.bf16.gmra.mxu3 %v14786_v30  ;;  %v9181_v62 = vld [vmem:[#allocation5 + $0x470] sm:$0xf0] }
 0x257   : > { %v4135_v53 = vmul.f32 %v4039_v40, %v12837_v21  ;;  %11655 = vtanh.f32 %v4417_v25  ;;  %v11209_v40 = vld [vmem:[#allocation5 + $0x8dc] sm:$0xf] }
 0x258   : > { %v4795_v56 = vmul.f32 %v4699_v0, %v4507_v16  ;;  %v2730_v11 = vpop.f32.mrf.mxu2  ;;  %v2634_v13 = vpop.f32.mrf.mxu0  ;;  %v9184_v16 = vor.u32 %v11065_v34, %v9181_v62  ;;  %v9760_v0 = vor.u32 %v11209_v40, %v9757_v28  ;;  %v11203_v34 = vld [vmem:[#allocation5 + $0x8ac] sm:$0xf]  ;;  %v9349_v28 = vld [vmem:[#allocation5 + $0x5c0] sm:$0xf0] }
 0x259   : > { %v4231_v60 = vmul.f32 0.044715, %v4135_v53  ;;  %v2731_v38 = vadd.f32 %v2730_v11, %v2682_v20  ;;  %v2779_v12 = vpop.f32.mrf.mxu3  ;;  %v2635_v49 = vadd.f32 %v2634_v13, %v12705_v58  ;;  %v2683_v23 = vpop.f32.mrf.mxu1  ;;  %v11113_v53 = vld [vmem:[#allocation5 + $0x5dc] sm:$0xf]  ;;  %v9541_v13 = vld [vmem:[#allocation5 + $0x740] sm:$0xf0] }
 0x25a   : > { %v12847_v1 = vpack.c.bf16 %v4795_v56, %v4789_v59  ;;  %v9373_v59 = vld [vmem:[#allocation5 + $0x5f0] sm:$0xf0]  ;;  %v11155_v56 = vld [vmem:[#allocation5 + $0x72c] sm:$0xf]  ;;  %3176 = vmatpush.bf16.msrb.mxu0 %v9184_v16  ;;  %3323 = vmatpush.bf16.msrb.mxu3 %v9760_v0  ;;  %v9352_v0 = vor.u32 %v11107_v39, %v9349_v28  ;;  %v11053_v28 = vld [vmem:[#allocation5 + $0x3fc] sm:$0xf] }
 0x25b   : > { %v4327_v32 = vadd.f32 %v4231_v60, %v12837_v21  ;;  %v12851_v37 = vadd.f32 %v2779_v12, %v2731_v38  ;;  %v2684_v20 = vadd.f32 %v2683_v23, %v2635_v49  ;;  %v9376_v25 = vor.u32 %v11113_v53, %v9373_v59  ;;  %v12855_v60 = vld [vmem:[#allocation7] sm:$0x3f]  ;;  %v11059_v49 = vld [vmem:[#allocation5 + $0x42c] sm:$0xf] }
 0x25c   : > { %14812 = vst [vmem:[#allocation61_spill] sm:$0xff] %v12847_v1  ;;  %v12858_v38 = vperm.slane %v12855_v60, 2  ;;  %v9544_v12 = vor.u32 %v11155_v56, %v9541_v13  ;;  %v9157_v23 = vld [vmem:[#allocation5 + $0x440] sm:$0xf0] }
 0x25d   : > { %v4423_v58 = vmul.f32 0.7978846, %v4327_v32  ;;  %v4045_v11 = vmul.f32 %v12851_v37, %v12851_v37  ;;  %3225 = vmatpush.bf16.msrb.mxu1 %v9376_v25  ;;  %v9160_v36 = vor.u32 %v11059_v49, %v9157_v23  ;;  %v9733_v32 = vld [vmem:[#allocation5 + $0x8c0] sm:$0xf0]  ;;  %v11656_v53 = vpop.eup %11655  ;;  %v14813_v23 = vld [vmem:[#allocation36_spill] sm:$0xff] }
 0x25e   : > { %v9736_v40 = vor.u32 %v11203_v34, %v9733_v32  ;;  %3275 = vmatpush.bf16.msrb.mxu2 %v9544_v12  ;;  %v4705_v13 = vadd.f32 1.0, %v11656_v53  ;;  %v14814_v12 = vld [vmem:[#allocation37_spill] sm:$0xff] }
 0x25f   : > { %11657 = vtanh.f32 %v4423_v58  ;;  %v4141_v33 = vmul.f32 %v4045_v11, %v12851_v37  ;;  %3177 = vmatpush.bf16.msrb.mxu0 %v9160_v36  ;;  %v4519_v36 = vmul.f32 0.5, %v12837_v21  ;;  %v9133_v53 = vld [vmem:[#allocation5 + $0x410] sm:$0xf0] }
 0x260   : > { %v2732_v62 = vpop.f32.mrf.mxu2  ;;  %v2793_v16 = vpop.f32.mrf.mxu0  ;;  %3324 = vmatpush.bf16.msrb.mxu3 %v9736_v40 }
 0x261   : > { %v4237_v59 = vmul.f32 0.044715, %v4141_v33  ;;  %v2733_v1 = vadd.f32 %v2732_v62, %v2684_v20  ;;  %v2781_v48 = vpop.f32.mrf.mxu3  ;;  %v2794_v56 = vadd.f32 %v2793_v16, %v12858_v38  ;;  %v2842_v58 = vpop.f32.mrf.mxu1  ;;  %3226 = vmatpush.bf16.msrb.mxu1 %v9352_v0  ;;  %v4513_v20 = vmul.f32 0.5, %v12830_v22 }
 0x263   : > { %v4333_v11 = vadd.f32 %v4237_v59, %v12851_v37  ;;  %v2782_v25 = vadd.f32 %v2781_v48, %v2733_v1  ;;  %v2843_v49 = vadd.f32 %v2842_v58, %v2794_v56  ;;  %2988 = vmatmul.bf16.vlgmr.msra.gmra.mxu0 %v14813_v23  ;;  %v11149_v48 = vld [vmem:[#allocation5 + $0x6fc] sm:$0xf]  ;;  %v9517_v1 = vld [vmem:[#allocation5 + $0x710] sm:$0xf0]  ;;  %v4801_v16 = vmul.f32 %v4705_v13, %v4513_v20 }
 0x264   : > { %3037 = vmatmul.bf16.vlgmr.msra.gmra.mxu1 %v14814_v12  ;;  %v9520_v40 = vor.u32 %v11149_v48, %v9517_v1  ;;  %v11197_v59 = vld [vmem:[#allocation5 + $0x87c] sm:$0xf]  ;;  %v9136_v56 = vor.u32 %v11053_v28, %v9133_v53  ;;  %v9709_v58 = vld [vmem:[#allocation5 + $0x890] sm:$0xf0] }
 0x265   : > { %v11658_v34 = vpop.eup %11657  ;;  %v4429_v33 = vmul.f32 0.7978846, %v4333_v11  ;;  %v4051_v32 = vmul.f32 %v2782_v25, %v2782_v25  ;;  %3086 = vmatmul.bf16.vlgmr.msra.gmra.mxu2 %v14790_v29  ;;  %v9712_v21 = vor.u32 %v11197_v59, %v9709_v58  ;;  %v11101_v13 = vld [vmem:[#allocation5 + $0x57c] sm:$0xf]  ;;  %v9325_v20 = vld [vmem:[#allocation5 + $0x590] sm:$0xf0] }
 0x266   : > { %v4711_v39 = vadd.f32 1.0, %v11658_v34  ;;  %3135 = vmatmul.bf16.vlgmr.msra.gmra.mxu3 %v14791_v61  ;;  %3276 = vmatpush.bf16.msrb.mxu2 %v9520_v40  ;;  %v4531_v58 = vmul.f32 0.5, %v2782_v25 }
 0x267   : > { %v4147_v62 = vmul.f32 %v4051_v32, %v2782_v25  ;;  %3178 = vmatpush.bf16.msrb.mxu0 %v9136_v56  ;;  %11659 = vtanh.f32 %v4429_v33  ;;  %3325 = vmatpush.bf16.msrb.mxu3 %v9712_v21  ;;  %v14817_v56 = vld [vmem:[#allocation39_spill] sm:$0xff]  ;;  %v11143_v21 = vld [vmem:[#allocation5 + $0x6cc] sm:$0xf] }
 0x268   : > { %v4807_v22 = vmul.f32 %v4711_v39, %v4519_v36  ;;  %v2891_v0 = vpop.f32.mrf.mxu2  ;;  %v2795_v4 = vpop.f32.mrf.mxu0  ;;  %v9328_v39 = vor.u32 %v11101_v13, %v9325_v20  ;;  %v11047_v13 = vld [vmem:[#allocation5 + $0x3cc] sm:$0xf]  ;;  %v9109_v20 = vld [vmem:[#allocation5 + $0x3e0] sm:$0xf0] }
 0x269   : > { %v4243_v11 = vmul.f32 0.044715, %v4147_v62  ;;  %v2892_v30 = vadd.f32 %v2891_v0, %v2843_v49  ;;  %v2940_v29 = vpop.f32.mrf.mxu3  ;;  %v2796_v61 = vadd.f32 %v2795_v4, %v12858_v38  ;;  %v2844_v32 = vpop.f32.mrf.mxu1 }
 0x26a   : > { %v12869_v34 = vpack.c.bf16 %v4807_v22, %v4801_v16  ;;  %3227 = vmatpush.bf16.msrb.mxu1 %v9328_v39  ;;  %v14816_v22 = vld [vmem:[#allocation38_spill] sm:$0xff] }
 0x26b   : > { %v4339_v48 = vadd.f32 %v4243_v11, %v2782_v25  ;;  %v12872_v1 = vadd.f32 %v2940_v29, %v2892_v30  ;;  %v2845_v36 = vadd.f32 %v2844_v32, %v2796_v61  ;;  %v4525_v61 = vmul.f32 0.5, %v12851_v37  ;;  %v9493_v32 = vld [vmem:[#allocation5 + $0x6e0] sm:$0xf0] }
 0x26c   : > { %14815 = vst [vmem:[#allocation62_spill] sm:$0xff] %v12869_v34 }
 0x26d   : > { %v4435_v49 = vmul.f32 0.7978846, %v4339_v48  ;;  %v11660_v40 = vpop.eup %11659  ;;  %v9496_v48 = vor.u32 %v11143_v21, %v9493_v32  ;;  %v11095_v32 = vld [vmem:[#allocation5 + $0x54c] sm:$0xf] }
 0x26e   : > { %v4717_v30 = vadd.f32 1.0, %v11660_v40  ;;  %v9112_v40 = vor.u32 %v11047_v13, %v9109_v20 }
 0x26f   : > { %11661 = vtanh.f32 %v4435_v49  ;;  %3277 = vmatpush.bf16.msrb.mxu2 %v9496_v48 }
 0x270   : > { %v2893_v62 = vpop.f32.mrf.mxu2  ;;  %v2798_v59 = vpop.f32.mrf.mxu0  ;;  %v4813_v39 = vmul.f32 %v4717_v30, %v4525_v61  ;;  %3179 = vmatpush.bf16.msrb.mxu0 %v9112_v40  ;;  %v9301_v30 = vld [vmem:[#allocation5 + $0x560] sm:$0xf0]  ;;  %v9469_v40 = vld [vmem:[#allocation5 + $0x6b0] sm:$0xf0] }
 0x271   : > { %v2894_v28 = vadd.f32 %v2893_v62, %v2845_v36  ;;  %v2942_v53 = vpop.f32.mrf.mxu3  ;;  %v2799_v4 = vadd.f32 %v2798_v59, %v12858_v38  ;;  %v2847_v16 = vpop.f32.mrf.mxu1  ;;  %v11191_v36 = vld [vmem:[#allocation5 + $0x84c] sm:$0xf] }
 0x273   : > { %v12875_v33 = vadd.f32 %v2942_v53, %v2894_v28  ;;  %v2848_v29 = vadd.f32 %v2847_v16, %v2799_v4  ;;  %2993 = vmatmul.bf16.gmra.mxu0 %v14816_v22  ;;  %v9685_v28 = vld [vmem:[#allocation5 + $0x860] sm:$0xf0] }
 0x274   : > { %3042 = vmatmul.bf16.gmra.mxu1 %v14817_v56  ;;  %v9688_v4 = vor.u32 %v11191_v36, %v9685_v28  ;;  %v11041_v28 = vld [vmem:[#allocation5 + $0x39c] sm:$0xf] }
 0x275   : > { %v11662_v0 = vpop.eup %11661  ;;  %3091 = vmatmul.bf16.gmra.mxu2 %v14793_v3 }
 0x276   : > { %v4723_v11 = vadd.f32 1.0, %v11662_v0  ;;  %3140 = vmatmul.bf16.gmra.mxu3 %v14794_v24  ;;  %v8995_v24 = vld [vmem:[#allocation5 + $0x2e0] sm:$0xf] }
 0x277   : > { %3326 = vmatpush.bf16.msrb.mxu3 %v9688_v4  ;;  %v9661_v4 = vld [vmem:[#allocation5 + $0x830] sm:$0xf0] }
 0x278   : > { %v4819_v49 = vmul.f32 %v4723_v11, %v4531_v58  ;;  %v2896_v62 = vpop.f32.mrf.mxu2  ;;  %v2800_v59 = vpop.f32.mrf.mxu0  ;;  %v9304_v58 = vor.u32 %v11095_v32, %v9301_v30 }
 0x279   : > { %v2897_v37 = vadd.f32 %v2896_v62, %v2848_v29  ;;  %v2945_v53 = vpop.f32.mrf.mxu3  ;;  %v2801_v16 = vadd.f32 %v2800_v59, %v12858_v38  ;;  %v2849_v0 = vpop.f32.mrf.mxu1  ;;  %v11137_v62 = vld [vmem:[#allocation5 + $0x69c] sm:$0xf] }
 0x27a   : > { %v12882_v25 = vpack.c.bf16 %v4819_v49, %v4813_v39  ;;  %3228 = vmatpush.bf16.msrb.mxu1 %v9304_v58  ;;  %v11185_v59 = vld [vmem:[#allocation5 + $0x81c] sm:$0xf] }
 0x27b   : > { %v12885_v21 = vadd.f32 %v2945_v53, %v2897_v37  ;;  %v2850_v61 = vadd.f32 %v2849_v0, %v2801_v16  ;;  %v9472_v37 = vor.u32 %v11137_v62, %v9469_v40  ;;  %v9085_v53 = vld [vmem:[#allocation5 + $0x3b0] sm:$0xf0]  ;;  %v9664_v32 = vor.u32 %v11185_v59, %v9661_v4 }
 0x27c   : > { %14818 = vst [vmem:[#allocation63_spill] sm:$0xff] %v12882_v25  ;;  %v9088_v0 = vor.u32 %v11041_v28, %v9085_v53 }
 0x27d   : > { %3278 = vmatpush.bf16.msrb.mxu2 %v9472_v37  ;;  %3327 = vmatpush.bf16.msrb.mxu3 %v9664_v32  ;;  %v11035_v32 = vld [vmem:[#allocation5 + $0x36c] sm:$0xf] }
 0x27e   : > { %3180 = vmatpush.bf16.msrb.mxu0 %v9088_v0  ;;  %v9445_v0 = vld [vmem:[#allocation5 + $0x680] sm:$0xf0] }
 0x280   : > { %v2898_v11 = vpop.f32.mrf.mxu2  ;;  %v2803_v20 = vpop.f32.mrf.mxu0 }
 0x281   : > { %v2899_v29 = vadd.f32 %v2898_v11, %v2850_v61  ;;  %v2947_v13 = vpop.f32.mrf.mxu3  ;;  %v2804_v48 = vadd.f32 %v2803_v20, %v12858_v38  ;;  %v2852_v36 = vpop.f32.mrf.mxu1  ;;  %v11089_v20 = vld [vmem:[#allocation5 + $0x51c] sm:$0xf] }
 0x283   : > { %v12888_v39 = vadd.f32 %v2947_v13, %v2899_v29  ;;  %v2853_v49 = vadd.f32 %v2852_v36, %v2804_v48  ;;  %2998 = vmatmul.bf16.gmra.mxu0 %v12397_v19  ;;  %v9277_v48 = vld [vmem:[#allocation5 + $0x530] sm:$0xf0] }
 0x284   : > { %3047 = vmatmul.bf16.gmra.mxu1 %v12399_v31  ;;  %v9280_v62 = vor.u32 %v11089_v20, %v9277_v48 }
 0x285   : > { %3096 = vmatmul.bf16.gmra.mxu2 %v14795_v5 }
 0x286   : > { %3145 = vmatmul.bf16.gmra.mxu3 %v14796_v45  ;;  %3229 = vmatpush.bf16.msrb.mxu1 %v9280_v62 }
 0x288   : > { %v2901_v16 = vpop.f32.mrf.mxu2  ;;  %v2805_v58 = vpop.f32.mrf.mxu0 }
 0x289   : > { %v2902_v30 = vadd.f32 %v2901_v16, %v2853_v49  ;;  %v2950_v61 = vpop.f32.mrf.mxu3  ;;  %v2806_v11 = vadd.f32 %v2805_v58, %v12858_v38  ;;  %v2854_v29 = vpop.f32.mrf.mxu1  ;;  %v11131_v16 = vld [vmem:[#allocation5 + $0x66c] sm:$0xf] }
 0x28a   : > { %v11179_v58 = vld [vmem:[#allocation5 + $0x7ec] sm:$0xf] }
 0x28b   : > { %v12895_v13 = vadd.f32 %v2950_v61, %v2902_v30  ;;  %v2855_v36 = vadd.f32 %v2854_v29, %v2806_v11  ;;  %v9448_v30 = vor.u32 %v11131_v16, %v9445_v0  ;;  %v9061_v61 = vld [vmem:[#allocation5 + $0x380] sm:$0xf0] }
 0x28c   : > { %v9637_v11 = vld [vmem:[#allocation5 + $0x800] sm:$0xf0]  ;;  %v9064_v20 = vor.u32 %v11035_v32, %v9061_v61 }
 0x28d   : > { %3279 = vmatpush.bf16.msrb.mxu2 %v9448_v30 }
 0x28e   : > { %3181 = vmatpush.bf16.msrb.mxu0 %v9064_v20  ;;  %v11125_v20 = vld [vmem:[#allocation5 + $0x63c] sm:$0xf] }
 0x290   : > { %v2903_v40 = vpop.f32.mrf.mxu2  ;;  %v2808_v53 = vpop.f32.mrf.mxu0 }
 0x291   : > { %v2904_v25 = vadd.f32 %v2903_v40, %v2855_v36  ;;  %v2952_v28 = vpop.f32.mrf.mxu3  ;;  %v2809_v49 = vadd.f32 %v2808_v53, %v12858_v38  ;;  %v2857_v59 = vpop.f32.mrf.mxu1 }
 0x293   : > { %v12898_v37 = vadd.f32 %v2952_v28, %v2904_v25  ;;  %v2858_v4 = vadd.f32 %v2857_v59, %v2809_v49  ;;  %3003 = vmatmul.bf16.gmra.mxu0 %v12415_v63  ;;  %v9640_v25 = vor.u32 %v11179_v58, %v9637_v11  ;;  %v11083_v49 = vld [vmem:[#allocation5 + $0x4ec] sm:$0xf]  ;;  %v9253_v59 = vld [vmem:[#allocation5 + $0x500] sm:$0xf0] }
 0x294   : > { %3052 = vmatmul.bf16.gmra.mxu1 %v12417_v50  ;;  %v9256_v0 = vor.u32 %v11083_v49, %v9253_v59 }
 0x295   : > { %3101 = vmatmul.bf16.gmra.mxu2 %v14798_v18  ;;  %3328 = vmatpush.bf16.msrb.mxu3 %v9640_v25  ;;  %v9421_v25 = vld [vmem:[#allocation5 + $0x650] sm:$0xf0] }
 0x296   : > { %3150 = vmatmul.bf16.gmra.mxu3 %v14799_v2  ;;  %3230 = vmatpush.bf16.msrb.mxu1 %v9256_v0 }
 0x298   : > { %v2906_v29 = vpop.f32.mrf.mxu2  ;;  %v2810_v62 = vpop.f32.mrf.mxu0 }
 0x299   : > { %v2907_v48 = vadd.f32 %v2906_v29, %v2858_v4  ;;  %v2955_v36 = vpop.f32.mrf.mxu3  ;;  %v2811_v40 = vadd.f32 %v2810_v62, %v12858_v38  ;;  %v2859_v28 = vpop.f32.mrf.mxu1  ;;  %v14819_v29 = vld [vmem:[#allocation42_spill] sm:$0xff] }
 0x29a   : > { %v11173_v62 = vld [vmem:[#allocation5 + $0x7bc] sm:$0xf] }
 0x29b   : > { %v12905_v53 = vadd.f32 %v2955_v36, %v2907_v48  ;;  %v2860_v16 = vadd.f32 %v2859_v28, %v2811_v40  ;;  %v11029_v48 = vld [vmem:[#allocation5 + $0x33c] sm:$0xf]  ;;  %v9037_v36 = vld [vmem:[#allocation5 + $0x350] sm:$0xf0] }
 0x29c   : > { %v9613_v40 = vld [vmem:[#allocation5 + $0x7d0] sm:$0xf0]  ;;  %v9040_v49 = vor.u32 %v11029_v48, %v9037_v36 }
 0x29e   : > { %3182 = vmatpush.bf16.msrb.mxu0 %v9040_v49  ;;  %v14821_v49 = vld [vmem:[#allocation44_spill] sm:$0xff] }
 0x2a0   : > { %v2908_v34 = vpop.f32.mrf.mxu2  ;;  %v2813_v61 = vpop.f32.mrf.mxu0 }
 0x2a1   : > { %v2909_v2 = vadd.f32 %v2908_v34, %v2860_v16  ;;  %v2957_v32 = vpop.f32.mrf.mxu3  ;;  %v2814_v4 = vadd.f32 %v2813_v61, %v12858_v38  ;;  %v2862_v58 = vpop.f32.mrf.mxu1  ;;  %v9424_v34 = vor.u32 %v11125_v20, %v9421_v25 }
 0x2a3   : > { %v12908_v30 = vadd.f32 %v2957_v32, %v2909_v2  ;;  %v2863_v11 = vadd.f32 %v2862_v58, %v2814_v4  ;;  %3008 = vmatmul.bf16.gmra.mxu0 %v12433_v55  ;;  %v9616_v2 = vor.u32 %v11173_v62, %v9613_v40  ;;  %3280 = vmatpush.bf16.msrb.mxu2 %v9424_v34  ;;  %v11077_v58 = vld [vmem:[#allocation5 + $0x4bc] sm:$0xf] }
 0x2a4   : > { %3057 = vmatmul.bf16.gmra.mxu1 %v14819_v29 }
 0x2a5   : > { %3106 = vmatmul.bf16.gmra.mxu2 %v14801_v44  ;;  %3329 = vmatpush.bf16.msrb.mxu3 %v9616_v2  ;;  %v9397_v2 = vld [vmem:[#allocation5 + $0x620] sm:$0xf0] }
 0x2a6   : > { %3155 = vmatmul.bf16.gmra.mxu3 %v14802_v35  ;;  %v9229_v35 = vld [vmem:[#allocation5 + $0x4d0] sm:$0xf0] }
 0x2a7   : > { %v9232_v25 = vor.u32 %v11077_v58, %v9229_v35  ;;  %v11119_v35 = vld [vmem:[#allocation5 + $0x60c] sm:$0xf] }
 0x2a8   : > { %v2911_v28 = vpop.f32.mrf.mxu2  ;;  %v2815_v0 = vpop.f32.mrf.mxu0 }
 0x2a9   : > { %v2912_v59 = vadd.f32 %v2911_v28, %v2863_v11  ;;  %v2960_v16 = vpop.f32.mrf.mxu3  ;;  %v2816_v32 = vadd.f32 %v2815_v0, %v12858_v38  ;;  %v2864_v61 = vpop.f32.mrf.mxu1  ;;  %3231 = vmatpush.bf16.msrb.mxu1 %v9232_v25  ;;  %v14820_v28 = vld [vmem:[#allocation43_spill] sm:$0xff]  ;;  %v11167_v0 = vld [vmem:[#allocation5 + $0x78c] sm:$0xf] }
 0x2ab   : > { %v12915_v4 = vadd.f32 %v2960_v16, %v2912_v59  ;;  %v2865_v20 = vadd.f32 %v2864_v61, %v2816_v32  ;;  %v11023_v59 = vld [vmem:[#allocation5 + $0x30c] sm:$0xf]  ;;  %v9013_v16 = vld [vmem:[#allocation5 + $0x320] sm:$0xf0] }
 0x2ac   : > { %v9589_v32 = vld [vmem:[#allocation5 + $0x7a0] sm:$0xf0]  ;;  %v9016_v58 = vor.u32 %v11023_v59, %v9013_v16 }
 0x2ae   : > { %3183 = vmatpush.bf16.msrb.mxu0 %v9016_v58 }
 0x2b0   : > { %v2913_v44 = vpop.f32.mrf.mxu2  ;;  %v2818_v36 = vpop.f32.mrf.mxu0 }
 0x2b1   : > { %v2914_v18 = vadd.f32 %v2913_v44, %v2865_v20  ;;  %v2962_v48 = vpop.f32.mrf.mxu3  ;;  %v2819_v11 = vadd.f32 %v2818_v36, %v12858_v38  ;;  %v2867_v62 = vpop.f32.mrf.mxu1  ;;  %v9400_v44 = vor.u32 %v11119_v35, %v9397_v2 }
 0x2b3   : > { %v12918_v34 = vadd.f32 %v2962_v48, %v2914_v18  ;;  %v2868_v40 = vadd.f32 %v2867_v62, %v2819_v11  ;;  %3013 = vmatmul.bf16.gmra.mxu0 %v14820_v28  ;;  %v9592_v18 = vor.u32 %v11167_v0, %v9589_v32  ;;  %3281 = vmatpush.bf16.msrb.mxu2 %v9400_v44 }
 0x2b4   : > { %3062 = vmatmul.bf16.gmra.mxu1 %v14821_v49 }
 0x2b5   : > { %3111 = vmatmul.bf16.gmra.mxu2 %v14804_v8  ;;  %3330 = vmatpush.bf16.msrb.mxu3 %v9592_v18  ;;  %v9205_v8 = vld [vmem:[#allocation5 + $0x4a0] sm:$0xf0] }
 0x2b6   : > { %3160 = vmatmul.bf16.gmra.mxu3 %v14805_v41  ;;  %v11071_v41 = vld [vmem:[#allocation5 + $0x48c] sm:$0xf] }
 0x2b7   : > { %v9208_v2 = vor.u32 %v11071_v41, %v9205_v8 }
 0x2b8   : > { %v2916_v61 = vpop.f32.mrf.mxu2  ;;  %v2820_v48 = vpop.f32.mrf.mxu0 }
 0x2b9   : > { %v2917_v20 = vadd.f32 %v2916_v61, %v2868_v40  ;;  %v2965_v25 = vpop.f32.mrf.mxu3  ;;  %v2821_v36 = vadd.f32 %v2820_v48, %v12858_v38  ;;  %v2869_v11 = vpop.f32.mrf.mxu1  ;;  %3232 = vmatpush.bf16.msrb.mxu1 %v9208_v2  ;;  %v14822_v61 = vld [vmem:[#allocation45_spill] sm:$0xff] }
 0x2bb   : > { %v12925_v62 = vadd.f32 %v2965_v25, %v2917_v20  ;;  %v2870_v35 = vadd.f32 %v2869_v11, %v2821_v36 }
 0x2c0   : > { %v2918_v45 = vpop.f32.mrf.mxu2  ;;  %v2823_v16 = vpop.f32.mrf.mxu0 }
 0x2c1   : > { %v2919_v5 = vadd.f32 %v2918_v45, %v2870_v35  ;;  %v2967_v59 = vpop.f32.mrf.mxu3  ;;  %v2824_v40 = vadd.f32 %v2823_v16, %v12858_v38  ;;  %v2872_v0 = vpop.f32.mrf.mxu1 }
 0x2c3   : > { %v12928_v44 = vadd.f32 %v2967_v59, %v2919_v5  ;;  %v2873_v32 = vadd.f32 %v2872_v0, %v2824_v40  ;;  %3018 = vmatmul.bf16.gmra.mxu0 %v12469_v17  ;;  %v14823_v0 = vld [vmem:[#allocation46_spill] sm:$0xff] }
 0x2c4   : > { %3067 = vmatmul.bf16.gmra.mxu1 %v14822_v61 }
 0x2c5   : > { %3116 = vmatmul.bf16.gmra.mxu2 %v14807_v7 }
 0x2c6   : > { %3165 = vmatmul.bf16.gmra.mxu3 %v14808_v10 }
 0x2c8   : > { %v2921_v8 = vpop.f32.mrf.mxu2  ;;  %v2825_v45 = vpop.f32.mrf.mxu0 }
 0x2c9   : > { %v2922_v41 = vadd.f32 %v2921_v8, %v2873_v32  ;;  %v2970_v58 = vpop.f32.mrf.mxu3  ;;  %v2826_v18 = vadd.f32 %v2825_v45, %v12858_v38  ;;  %v2874_v20 = vpop.f32.mrf.mxu1  ;;  %v14824_v32 = vld [vmem:[#allocation47_spill] sm:$0xff] }
 0x2cb   : > { %v12935_v25 = vadd.f32 %v2970_v58, %v2922_v41  ;;  %v2875_v5 = vadd.f32 %v2874_v20, %v2826_v18  ;;  %v9187_v18 = vld [vmem:[#allocation5 + $0x460] sm:$0xf]  ;;  %v11069_v20 = vld [vmem:[#allocation5 + $0x474] sm:$0xf0] }
 0x2d0   : > { %v2923_v48 = vpop.f32.mrf.mxu2  ;;  %v2828_v35 = vpop.f32.mrf.mxu0 }
 0x2d1   : > { %v2924_v36 = vadd.f32 %v2923_v48, %v2875_v5  ;;  %v2972_v11 = vpop.f32.mrf.mxu3  ;;  %v2829_v2 = vadd.f32 %v2828_v35, %v12858_v38  ;;  %v2877_v59 = vpop.f32.mrf.mxu1  ;;  %v8803_v5 = vld [vmem:[#allocation5 + $0x160] sm:$0xf]  ;;  %v10973_v35 = vld [vmem:[#allocation5 + $0x174] sm:$0xf0] }
 0x2d2   : > { %v8804_v7 = vor.u32 %v10973_v35, %v8803_v5  ;;  %v11063_v5 = vld [vmem:[#allocation5 + $0x444] sm:$0xf0] }
 0x2d3   : > { %v12938_v16 = vadd.f32 %v2972_v11, %v2924_v36  ;;  %v2878_v40 = vadd.f32 %v2877_v59, %v2829_v2  ;;  %3023 = vmatmul.bf16.gmra.mxu0 %v14823_v0  ;;  %v9188_v11 = vor.u32 %v11069_v20, %v9187_v18  ;;  %v9379_v2 = vld [vmem:[#allocation5 + $0x5e0] sm:$0xf]  ;;  %v11117_v59 = vld [vmem:[#allocation5 + $0x5f4] sm:$0xf0] }
 0x2d4   : > { %3072 = vmatmul.bf16.gmra.mxu1 %v14824_v32  ;;  %3372 = vmatpush.bf16.msra.mxu0 %v8804_v7 }
 0x2d5   : > { %3121 = vmatmul.bf16.gmra.mxu2 %v14810_v9  ;;  %v9380_v9 = vor.u32 %v11117_v59, %v9379_v2  ;;  %v10967_v2 = vld [vmem:[#allocation5 + $0x144] sm:$0xf0]  ;;  %v9355_v59 = vld [vmem:[#allocation5 + $0x5b0] sm:$0xf] }
 0x2d6   : > { %3170 = vmatmul.bf16.gmra.mxu3 %v14811_v6  ;;  %v11021_v6 = vld [vmem:[#allocation5 + $0x2f4] sm:$0xf0]  ;;  %3470 = vmatpush.bf16.msra.mxu2 %v9188_v11 }
 0x2d7   : > { %3519 = vmatpush.bf16.msra.mxu3 %v9380_v9 }
 0x2d8   : > { %v2926_v8 = vpop.f32.mrf.mxu2  ;;  %v2830_v45 = vpop.f32.mrf.mxu0 }
 0x2d9   : > { %v2927_v41 = vadd.f32 %v2926_v8, %v2878_v40  ;;  %v2975_v58 = vpop.f32.mrf.mxu3  ;;  %v2831_v48 = vadd.f32 %v2830_v45, %v12858_v38  ;;  %v2879_v36 = vpop.f32.mrf.mxu1  ;;  %v8996_v40 = vor.u32 %v11021_v6, %v8995_v24  ;;  %v12956_v24 = vperm.slane %v12855_v60, 3 }
 0x2db   : > { %v12945_v10 = vadd.f32 %v2975_v58, %v2927_v41  ;;  %v2880_v3 = vadd.f32 %v2879_v36, %v2831_v48  ;;  %3421 = vmatpush.bf16.msra.mxu1 %v8996_v40  ;;  %v9163_v58 = vld [vmem:[#allocation5 + $0x430] sm:$0xf] }
 0x2dc   : > { %v8779_v48 = vld [vmem:[#allocation5 + $0x130] sm:$0xf]  ;;  %v9164_v35 = vor.u32 %v11063_v5, %v9163_v58 }
 0x2de   : > { %3471 = vmatpush.bf16.msra.mxu2 %v9164_v35 }
 0x2e0   : > { %v2928_v8 = vpop.f32.mrf.mxu2  ;;  %v2989_v45 = vpop.f32.mrf.mxu0 }
 0x2e1   : > { %v2929_v32 = vadd.f32 %v2928_v8, %v2880_v3  ;;  %v2977_v38 = vpop.f32.mrf.mxu3  ;;  %v2990_v18 = vadd.f32 %v2989_v45, %v12872_v1  ;;  %v3038_v20 = vpop.f32.mrf.mxu1  ;;  %v8780_v8 = vor.u32 %v10967_v2, %v8779_v48  ;;  %v8971_v45 = vld [vmem:[#allocation5 + $0x2b0] sm:$0xf] }
 0x2e3   : > { %v12948_v0 = vadd.f32 %v2977_v38, %v2929_v32  ;;  %v12950_v41 = vadd.f32 %v3038_v20, %v2990_v18  ;;  %3184 = vmatmul.bf16.vlgmr.msrb.gmra.mxu0 %v12206_v54  ;;  %v11111_v38 = vld [vmem:[#allocation5 + $0x5c4] sm:$0xf0] }
 0x2e4   : > { %3233 = vmatmul.bf16.vlgmr.msrb.gmra.mxu1 %v12208_v57  ;;  %v11015_v18 = vld [vmem:[#allocation5 + $0x2c4] sm:$0xf0]  ;;  %3373 = vmatpush.bf16.msra.mxu0 %v8780_v8 }
 0x2e5   : > { %3282 = vmatmul.bf16.vlgmr.msrb.gmra.mxu2 %v14813_v23  ;;  %v3962_v3 = vmul.f32 %v12950_v41, %v12950_v41 }
 0x2e6   : > { %3331 = vmatmul.bf16.vlgmr.msrb.gmra.mxu3 %v14814_v12  ;;  %v8972_v12 = vor.u32 %v11015_v18, %v8971_v45  ;;  %v9139_v45 = vld [vmem:[#allocation5 + $0x400] sm:$0xf]  ;;  %v11057_v18 = vld [vmem:[#allocation5 + $0x414] sm:$0xf0] }
 0x2e7   : > { %v4058_v7 = vmul.f32 %v3962_v3, %v12950_v41 }
 0x2e8   : > { %v3087_v9 = vpop.f32.mrf.mxu2  ;;  %v2991_v32 = vpop.f32.mrf.mxu0  ;;  %3422 = vmatpush.bf16.msra.mxu1 %v8972_v12 }
 0x2e9   : > { %v3088_v6 = vadd.f32 %v3087_v9, %v12956_v24  ;;  %v3136_v1 = vpop.f32.mrf.mxu3  ;;  %v4154_v36 = vmul.f32 0.044715, %v4058_v7  ;;  %v2992_v11 = vadd.f32 %v2991_v32, %v12875_v33  ;;  %v3040_v60 = vpop.f32.mrf.mxu1  ;;  %v9356_v9 = vor.u32 %v11111_v38, %v9355_v59 }
 0x2eb   : > { %v12964_v40 = vadd.f32 %v3136_v1, %v3088_v6  ;;  %v4250_v20 = vadd.f32 %v4154_v36, %v12950_v41  ;;  %v3041_v3 = vadd.f32 %v3040_v60, %v2992_v11  ;;  %3520 = vmatpush.bf16.msra.mxu3 %v9356_v9 }
 0x2ed   : > { %v3968_v7 = vmul.f32 %v3041_v3, %v3041_v3  ;;  %v4346_v33 = vmul.f32 0.7978846, %v4250_v20  ;;  %v8755_v20 = vld [vmem:[#allocation5 + $0x100] sm:$0xf] }
 0x2ef   : > { %v4064_v32 = vmul.f32 %v3968_v7, %v3041_v3  ;;  %11663 = vtanh.f32 %v4346_v33 }
 0x2f0   : > { %v3089_v58 = vpop.f32.mrf.mxu2  ;;  %v2994_v5 = vpop.f32.mrf.mxu0 }
 0x2f1   : > { %v3090_v6 = vadd.f32 %v3089_v58, %v12956_v24  ;;  %v3138_v1 = vpop.f32.mrf.mxu3  ;;  %v4160_v48 = vmul.f32 0.044715, %v4064_v32  ;;  %v2995_v2 = vadd.f32 %v2994_v5, %v12885_v21  ;;  %v3043_v23 = vpop.f32.mrf.mxu1  ;;  %v9140_v58 = vor.u32 %v11057_v18, %v9139_v45 }
 0x2f3   : > { %v12969_v36 = vadd.f32 %v3138_v1, %v3090_v6  ;;  %v4256_v11 = vadd.f32 %v4160_v48, %v3041_v3  ;;  %v12971_v60 = vadd.f32 %v3043_v23, %v2995_v2  ;;  %3189 = vmatmul.bf16.gmra.mxu0 %v12226_v26  ;;  %v10961_v6 = vld [vmem:[#allocation5 + $0x114] sm:$0xf0]  ;;  %v9331_v1 = vld [vmem:[#allocation5 + $0x580] sm:$0xf]  ;;  %3472 = vmatpush.bf16.msra.mxu2 %v9140_v58 }
 0x2f4   : > { %3238 = vmatmul.bf16.gmra.mxu1 %v12228_v27  ;;  %v8756_v48 = vor.u32 %v10961_v6, %v8755_v20  ;;  %v11105_v2 = vld [vmem:[#allocation5 + $0x594] sm:$0xf0] }
 0x2f5   : > { %3287 = vmatmul.bf16.gmra.mxu2 %v14816_v22  ;;  %v4352_v12 = vmul.f32 0.7978846, %v4256_v11  ;;  %v3974_v35 = vmul.f32 %v12971_v60, %v12971_v60  ;;  %v11664_v9 = vpop.eup %11663  ;;  %v8947_v11 = vld [vmem:[#allocation5 + $0x280] sm:$0xf] }
 0x2f6   : > { %3336 = vmatmul.bf16.gmra.mxu3 %v14817_v56  ;;  %v9332_v56 = vor.u32 %v11105_v2, %v9331_v1  ;;  %3374 = vmatpush.bf16.msra.mxu0 %v8756_v48 }
 0x2f7   : > { %11665 = vtanh.f32 %v4352_v12  ;;  %v4070_v21 = vmul.f32 %v3974_v35, %v12971_v60  ;;  %v11009_v12 = vld [vmem:[#allocation5 + $0x294] sm:$0xf0] }
 0x2f8   : > { %v3092_v59 = vpop.f32.mrf.mxu2  ;;  %v2996_v38 = vpop.f32.mrf.mxu0  ;;  %v8948_v22 = vor.u32 %v11009_v12, %v8947_v11  ;;  %3521 = vmatpush.bf16.msra.mxu3 %v9332_v56 }
 0x2f9   : > { %v3093_v8 = vadd.f32 %v3092_v59, %v12956_v24  ;;  %v3141_v23 = vpop.f32.mrf.mxu3  ;;  %v4166_v7 = vmul.f32 0.044715, %v4070_v21  ;;  %v2997_v33 = vadd.f32 %v2996_v38, %v12888_v39  ;;  %v3045_v32 = vpop.f32.mrf.mxu1  ;;  %v4634_v21 = vadd.f32 1.0, %v11664_v9 }
 0x2fa   : > { %3423 = vmatpush.bf16.msra.mxu1 %v8948_v22 }
 0x2fb   : > { %v12982_v5 = vadd.f32 %v3141_v23, %v3093_v8  ;;  %v4262_v35 = vadd.f32 %v4166_v7, %v12971_v60  ;;  %v12985_v59 = vadd.f32 %v3045_v32, %v2997_v33  ;;  %v4442_v8 = vmul.f32 0.5, %v12950_v41 }
 0x2fc   : > { %v4448_v23 = vmul.f32 0.5, %v3041_v3 }
 0x2fd   : > { %v11666_v39 = vpop.eup %11665  ;;  %v3980_v38 = vmul.f32 %v12985_v59, %v12985_v59  ;;  %v4358_v18 = vmul.f32 0.7978846, %v4262_v35  ;;  %v4730_v33 = vmul.f32 %v4634_v21, %v4442_v8  ;;  %v9115_v8 = vld [vmem:[#allocation5 + $0x3d0] sm:$0xf] }
 0x2fe   : > { %v4640_v45 = vadd.f32 1.0, %v11666_v39 }
 0x2ff   : > { %v4076_v20 = vmul.f32 %v3980_v38, %v12985_v59  ;;  %11667 = vtanh.f32 %v4358_v18 }
 0x300   : > { %v3094_v7 = vpop.f32.mrf.mxu2  ;;  %v4736_v32 = vmul.f32 %v4640_v45, %v4448_v23  ;;  %v2999_v6 = vpop.f32.mrf.mxu0  ;;  %v11051_v23 = vld [vmem:[#allocation5 + $0x3e4] sm:$0xf0]  ;;  %v8731_v45 = vld [vmem:[#allocation5 + $0xd0] sm:$0xf] }
 0x301   : > { %v3095_v58 = vadd.f32 %v3094_v7, %v12956_v24  ;;  %v3143_v9 = vpop.f32.mrf.mxu3  ;;  %v4172_v1 = vmul.f32 0.044715, %v4076_v20  ;;  %v3000_v48 = vadd.f32 %v2999_v6, %v12895_v13  ;;  %v3048_v2 = vpop.f32.mrf.mxu1 }
 0x302   : > { %v12993_v56 = vpack.c.bf16 %v4736_v32, %v4730_v33  ;;  %v9116_v32 = vor.u32 %v11051_v23, %v9115_v8 }
 0x303   : > { %v12995_v22 = vadd.f32 %v3143_v9, %v3095_v58  ;;  %v4268_v41 = vadd.f32 %v4172_v1, %v12985_v59  ;;  %v12998_v3 = vadd.f32 %v3048_v2, %v3000_v48  ;;  %3194 = vmatmul.bf16.gmra.mxu0 %v12246_v51  ;;  %v10955_v58 = vld [vmem:[#allocation5 + $0xe4] sm:$0xf0]  ;;  %v9307_v9 = vld [vmem:[#allocation5 + $0x550] sm:$0xf] }
 0x304   : > { %14825 = vst [vmem:[#allocation45_spill] sm:$0xff] %v12993_v56  ;;  %3243 = vmatmul.bf16.gmra.mxu1 %v12248_v52  ;;  %v8732_v1 = vor.u32 %v10955_v58, %v8731_v45  ;;  %v11099_v48 = vld [vmem:[#allocation5 + $0x564] sm:$0xf0]  ;;  %v8923_v2 = vld [vmem:[#allocation5 + $0x250] sm:$0xf]  ;;  %3473 = vmatpush.bf16.msra.mxu2 %v9116_v32 }
 0x305   : > { %3292 = vmatmul.bf16.gmra.mxu2 %v12397_v19  ;;  %v4364_v11 = vmul.f32 0.7978846, %v4268_v41  ;;  %v3986_v13 = vmul.f32 %v12998_v3, %v12998_v3  ;;  %v11668_v18 = vpop.eup %11667  ;;  %v11003_v41 = vld [vmem:[#allocation5 + $0x264] sm:$0xf0] }
 0x306   : > { %3341 = vmatmul.bf16.gmra.mxu3 %v12399_v31  ;;  %v8924_v56 = vor.u32 %v11003_v41, %v8923_v2  ;;  %3375 = vmatpush.bf16.msra.mxu0 %v8732_v1 }
 0x307   : > { %11669 = vtanh.f32 %v4364_v11  ;;  %v4082_v12 = vmul.f32 %v3986_v13, %v12998_v3 }
 0x308   : > { %v3097_v35 = vpop.f32.mrf.mxu2  ;;  %v3001_v38 = vpop.f32.mrf.mxu0  ;;  %3424 = vmatpush.bf16.msra.mxu1 %v8924_v56 }
 0x309   : > { %v3098_v21 = vadd.f32 %v3097_v35, %v12956_v24  ;;  %v3146_v39 = vpop.f32.mrf.mxu3  ;;  %v4178_v20 = vmul.f32 0.044715, %v4082_v12  ;;  %v3002_v7 = vadd.f32 %v3001_v38, %v12898_v37  ;;  %v3050_v33 = vpop.f32.mrf.mxu1  ;;  %v9308_v35 = vor.u32 %v11099_v48, %v9307_v9 }
 0x30a   : > { %v4646_v12 = vadd.f32 1.0, %v11668_v18 }
 0x30b   : > { %v13009_v6 = vadd.f32 %v3146_v39, %v3098_v21  ;;  %v4274_v11 = vadd.f32 %v4178_v20, %v12998_v3  ;;  %v13012_v13 = vadd.f32 %v3050_v33, %v3002_v7  ;;  %3522 = vmatpush.bf16.msra.mxu3 %v9308_v35  ;;  %v4454_v21 = vmul.f32 0.5, %v12971_v60 }
 0x30c   : > { %v4460_v39 = vmul.f32 0.5, %v12985_v59 }
 0x30d   : > { %v11670_v37 = vpop.eup %11669  ;;  %v3992_v38 = vmul.f32 %v13012_v13, %v13012_v13  ;;  %v4370_v23 = vmul.f32 0.7978846, %v4274_v11  ;;  %v4742_v7 = vmul.f32 %v4646_v12, %v4454_v21  ;;  %v9091_v21 = vld [vmem:[#allocation5 + $0x3a0] sm:$0xf] }
 0x30e   : > { %v4652_v8 = vadd.f32 1.0, %v11670_v37 }
 0x30f   : > { %v4088_v45 = vmul.f32 %v3992_v38, %v13012_v13  ;;  %11671 = vtanh.f32 %v4370_v23 }
 0x310   : > { %v3099_v20 = vpop.f32.mrf.mxu2  ;;  %v4748_v33 = vmul.f32 %v4652_v8, %v4460_v39  ;;  %v3004_v58 = vpop.f32.mrf.mxu0  ;;  %v11045_v39 = vld [vmem:[#allocation5 + $0x3b4] sm:$0xf0]  ;;  %v8707_v8 = vld [vmem:[#allocation5 + $0xa0] sm:$0xf] }
 0x311   : > { %v3100_v18 = vadd.f32 %v3099_v20, %v12956_v24  ;;  %v3148_v32 = vpop.f32.mrf.mxu3  ;;  %v4184_v9 = vmul.f32 0.044715, %v4088_v45  ;;  %v3005_v1 = vadd.f32 %v3004_v58, %v12905_v53  ;;  %v3053_v48 = vpop.f32.mrf.mxu1 }
 0x312   : > { %v13021_v56 = vpack.c.bf16 %v4748_v33, %v4742_v7  ;;  %v9092_v33 = vor.u32 %v11045_v39, %v9091_v21 }
 0x313   : > { %v13023_v60 = vadd.f32 %v3148_v32, %v3100_v18  ;;  %v4280_v59 = vadd.f32 %v4184_v9, %v13012_v13  ;;  %v13026_v2 = vadd.f32 %v3053_v48, %v3005_v1  ;;  %3199 = vmatmul.bf16.gmra.mxu0 %v12266_v14  ;;  %v10949_v18 = vld [vmem:[#allocation5 + $0xb4] sm:$0xf0]  ;;  %v9283_v32 = vld [vmem:[#allocation5 + $0x520] sm:$0xf] }
 0x314   : > { %14826 = vst [vmem:[#allocation64_spill] sm:$0xff] %v13021_v56  ;;  %3248 = vmatmul.bf16.gmra.mxu1 %v12268_v15  ;;  %v8708_v9 = vor.u32 %v10949_v18, %v8707_v8  ;;  %v11093_v1 = vld [vmem:[#allocation5 + $0x534] sm:$0xf0]  ;;  %v8899_v48 = vld [vmem:[#allocation5 + $0x220] sm:$0xf]  ;;  %3474 = vmatpush.bf16.msra.mxu2 %v9092_v33 }
 0x315   : > { %3297 = vmatmul.bf16.gmra.mxu2 %v12415_v63  ;;  %v4376_v41 = vmul.f32 0.7978846, %v4280_v59  ;;  %v3998_v53 = vmul.f32 %v13026_v2, %v13026_v2  ;;  %v11672_v23 = vpop.eup %11671  ;;  %v10997_v59 = vld [vmem:[#allocation5 + $0x234] sm:$0xf0] }
 0x316   : > { %3346 = vmatmul.bf16.gmra.mxu3 %v12417_v50  ;;  %v8900_v56 = vor.u32 %v10997_v59, %v8899_v48  ;;  %3376 = vmatpush.bf16.msra.mxu0 %v8708_v9 }
 0x317   : > { %11673 = vtanh.f32 %v4376_v41  ;;  %v4094_v11 = vmul.f32 %v3998_v53, %v13026_v2 }
 0x318   : > { %v3102_v35 = vpop.f32.mrf.mxu2  ;;  %v3006_v38 = vpop.f32.mrf.mxu0  ;;  %3425 = vmatpush.bf16.msra.mxu1 %v8900_v56 }
 0x319   : > { %v3103_v12 = vadd.f32 %v3102_v35, %v12956_v24  ;;  %v3151_v37 = vpop.f32.mrf.mxu3  ;;  %v4190_v45 = vmul.f32 0.044715, %v4094_v11  ;;  %v3007_v20 = vadd.f32 %v3006_v38, %v12908_v30  ;;  %v3055_v7 = vpop.f32.mrf.mxu1  ;;  %v9284_v35 = vor.u32 %v11093_v1, %v9283_v32 }
 0x31a   : > { %v4658_v11 = vadd.f32 1.0, %v11672_v23 }
 0x31b   : > { %v13037_v58 = vadd.f32 %v3151_v37, %v3103_v12  ;;  %v4286_v41 = vadd.f32 %v4190_v45, %v13026_v2  ;;  %v13040_v53 = vadd.f32 %v3055_v7, %v3007_v20  ;;  %3523 = vmatpush.bf16.msra.mxu3 %v9284_v35  ;;  %v4466_v12 = vmul.f32 0.5, %v12998_v3 }
 0x31c   : > { %v4472_v37 = vmul.f32 0.5, %v13012_v13 }
 0x31d   : > { %v11674_v30 = vpop.eup %11673  ;;  %v4004_v38 = vmul.f32 %v13040_v53, %v13040_v53  ;;  %v4382_v39 = vmul.f32 0.7978846, %v4286_v41  ;;  %v4754_v20 = vmul.f32 %v4658_v11, %v4466_v12  ;;  %v9067_v12 = vld [vmem:[#allocation5 + $0x370] sm:$0xf] }
 0x31e   : > { %v4664_v21 = vadd.f32 1.0, %v11674_v30 }
 0x31f   : > { %v4100_v8 = vmul.f32 %v4004_v38, %v13040_v53  ;;  %11675 = vtanh.f32 %v4382_v39 }
 0x320   : > { %v3104_v45 = vpop.f32.mrf.mxu2  ;;  %v4760_v7 = vmul.f32 %v4664_v21, %v4472_v37  ;;  %v3009_v18 = vpop.f32.mrf.mxu0  ;;  %v11039_v37 = vld [vmem:[#allocation5 + $0x384] sm:$0xf0]  ;;  %v8683_v21 = vld [vmem:[#allocation5 + $0x70] sm:$0xf] }
 0x321   : > { %v3105_v23 = vadd.f32 %v3104_v45, %v12956_v24  ;;  %v3153_v33 = vpop.f32.mrf.mxu3  ;;  %v4196_v32 = vmul.f32 0.044715, %v4100_v8  ;;  %v3010_v9 = vadd.f32 %v3009_v18, %v12915_v4  ;;  %v3058_v1 = vpop.f32.mrf.mxu1 }
 0x322   : > { %v13049_v56 = vpack.c.bf16 %v4760_v7, %v4754_v20  ;;  %v9068_v7 = vor.u32 %v11039_v37, %v9067_v12 }
 0x323   : > { %v13051_v3 = vadd.f32 %v3153_v33, %v3105_v23  ;;  %v4292_v13 = vadd.f32 %v4196_v32, %v13040_v53  ;;  %v13054_v48 = vadd.f32 %v3058_v1, %v3010_v9  ;;  %3204 = vmatmul.bf16.gmra.mxu0 %v12286_v42  ;;  %v10943_v23 = vld [vmem:[#allocation5 + $0x84] sm:$0xf0]  ;;  %v9259_v33 = vld [vmem:[#allocation5 + $0x4f0] sm:$0xf] }
 0x324   : > { %14827 = vst [vmem:[#allocation65_spill] sm:$0xff] %v13049_v56  ;;  %3253 = vmatmul.bf16.gmra.mxu1 %v12288_v43  ;;  %v8684_v32 = vor.u32 %v10943_v23, %v8683_v21  ;;  %v11087_v9 = vld [vmem:[#allocation5 + $0x504] sm:$0xf0]  ;;  %v8875_v1 = vld [vmem:[#allocation5 + $0x1f0] sm:$0xf]  ;;  %3475 = vmatpush.bf16.msra.mxu2 %v9068_v7 }
 0x325   : > { %3302 = vmatmul.bf16.gmra.mxu2 %v12433_v55  ;;  %v4388_v59 = vmul.f32 0.7978846, %v4292_v13  ;;  %v4010_v4 = vmul.f32 %v13054_v48, %v13054_v48  ;;  %v11676_v39 = vpop.eup %11675  ;;  %v10991_v13 = vld [vmem:[#allocation5 + $0x204] sm:$0xf0] }
 0x326   : > { %3351 = vmatmul.bf16.gmra.mxu3 %v14819_v29  ;;  %v8876_v56 = vor.u32 %v10991_v13, %v8875_v1  ;;  %3377 = vmatpush.bf16.msra.mxu0 %v8684_v32  ;;  %v14829_v13 = vld [vmem:[#allocation28_spill] sm:$0xff]  ;;  %v10979_v55 = vld [vmem:[#allocation5 + $0x1a4] sm:$0xf0] }
 0x327   : > { %11677 = vtanh.f32 %v4388_v59  ;;  %v4106_v41 = vmul.f32 %v4010_v4, %v13054_v48  ;;  %v8827_v29 = vld [vmem:[#allocation5 + $0x190] sm:$0xf] }
 0x328   : > { %v3107_v35 = vpop.f32.mrf.mxu2  ;;  %v3011_v38 = vpop.f32.mrf.mxu0  ;;  %3426 = vmatpush.bf16.msra.mxu1 %v8876_v56 }
 0x329   : > { %v3108_v11 = vadd.f32 %v3107_v35, %v12956_v24  ;;  %v3156_v30 = vpop.f32.mrf.mxu3  ;;  %v4202_v8 = vmul.f32 0.044715, %v4106_v41  ;;  %v3012_v45 = vadd.f32 %v3011_v38, %v12918_v34  ;;  %v3060_v20 = vpop.f32.mrf.mxu1  ;;  %v9260_v35 = vor.u32 %v11087_v9, %v9259_v33 }
 0x32a   : > { %v4670_v41 = vadd.f32 1.0, %v11676_v39 }
 0x32b   : > { %v13065_v18 = vadd.f32 %v3156_v30, %v3108_v11  ;;  %v4298_v59 = vadd.f32 %v4202_v8, %v13054_v48  ;;  %v13068_v4 = vadd.f32 %v3060_v20, %v3012_v45  ;;  %3524 = vmatpush.bf16.msra.mxu3 %v9260_v35  ;;  %v4478_v11 = vmul.f32 0.5, %v13026_v2 }
 0x32c   : > { %v4484_v30 = vmul.f32 0.5, %v13040_v53 }
 0x32d   : > { %v11678_v34 = vpop.eup %11677  ;;  %v4016_v38 = vmul.f32 %v13068_v4, %v13068_v4  ;;  %v4394_v37 = vmul.f32 0.7978846, %v4298_v59  ;;  %v4766_v45 = vmul.f32 %v4670_v41, %v4478_v11  ;;  %v14830_v59 = vld [vmem:[#allocation29_spill] sm:$0xff] }
 0x32e   : > { %v4676_v12 = vadd.f32 1.0, %v11678_v34 }
 0x32f   : > { %v4112_v21 = vmul.f32 %v4016_v38, %v13068_v4  ;;  %11679 = vtanh.f32 %v4394_v37  ;;  %v11033_v37 = vld [vmem:[#allocation5 + $0x354] sm:$0xf0] }
 0x330   : > { %v3109_v8 = vpop.f32.mrf.mxu2  ;;  %v4772_v20 = vmul.f32 %v4676_v12, %v4484_v30  ;;  %v3014_v23 = vpop.f32.mrf.mxu0  ;;  %v9043_v12 = vld [vmem:[#allocation5 + $0x340] sm:$0xf] }
 0x331   : > { %v3110_v39 = vadd.f32 %v3109_v8, %v12956_v24  ;;  %v3158_v7 = vpop.f32.mrf.mxu3  ;;  %v4208_v33 = vmul.f32 0.044715, %v4112_v21  ;;  %v3015_v32 = vadd.f32 %v3014_v23, %v12925_v62  ;;  %v3063_v9 = vpop.f32.mrf.mxu1  ;;  %v8659_v21 = vld [vmem:[#allocation5 + $0x40] sm:$0xf]  ;;  %v10937_v23 = vld [vmem:[#allocation5 + $0x54] sm:$0xf0] }
 0x332   : > { %v13077_v56 = vpack.c.bf16 %v4772_v20, %v4766_v45 }
 0x333   : > { %v13079_v2 = vadd.f32 %v3158_v7, %v3110_v39  ;;  %v4304_v53 = vadd.f32 %v4208_v33, %v13068_v4  ;;  %v13082_v1 = vadd.f32 %v3063_v9, %v3015_v32  ;;  %3209 = vmatmul.bf16.gmra.mxu0 %v14829_v13  ;;  %v9044_v7 = vor.u32 %v11033_v37, %v9043_v12  ;;  %v9235_v33 = vld [vmem:[#allocation5 + $0x4c0] sm:$0xf] }
 0x334   : > { %14828 = vst [vmem:[#allocation66_spill] sm:$0xff] %v13077_v56  ;;  %3258 = vmatmul.bf16.gmra.mxu1 %v14830_v59  ;;  %v8660_v9 = vor.u32 %v10937_v23, %v8659_v21 }
 0x335   : > { %3307 = vmatmul.bf16.gmra.mxu2 %v14820_v28  ;;  %v4400_v35 = vmul.f32 0.7978846, %v4304_v53  ;;  %v4022_v62 = vmul.f32 %v13082_v1, %v13082_v1  ;;  %v11680_v8 = vpop.eup %11679  ;;  %v11081_v53 = vld [vmem:[#allocation5 + $0x4d4] sm:$0xf0] }
 0x336   : > { %3356 = vmatmul.bf16.gmra.mxu3 %v14821_v49  ;;  %3476 = vmatpush.bf16.msra.mxu2 %v9044_v7  ;;  %v9236_v49 = vor.u32 %v11081_v53, %v9235_v33  ;;  %v8635_v7 = vld [vmem:[#allocation5 + $0x10] sm:$0xf] }
 0x337   : > { %11681 = vtanh.f32 %v4400_v35  ;;  %v4118_v41 = vmul.f32 %v4022_v62, %v13082_v1  ;;  %v8851_v35 = vld [vmem:[#allocation5 + $0x1c0] sm:$0xf]  ;;  %v10985_v62 = vld [vmem:[#allocation5 + $0x1d4] sm:$0xf0]  ;;  %3378 = vmatpush.bf16.msra.mxu0 %v8660_v9 }
 0x338   : > { %v3112_v34 = vpop.f32.mrf.mxu2  ;;  %v3016_v30 = vpop.f32.mrf.mxu0  ;;  %v8852_v28 = vor.u32 %v10985_v62, %v8851_v35  ;;  %3525 = vmatpush.bf16.msra.mxu3 %v9236_v49  ;;  %v9211_v35 = vld [vmem:[#allocation5 + $0x490] sm:$0xf] }
 0x339   : > { %v3113_v38 = vadd.f32 %v3112_v34, %v12956_v24  ;;  %v3161_v11 = vpop.f32.mrf.mxu3  ;;  %v4214_v45 = vmul.f32 0.044715, %v4118_v41  ;;  %v3017_v20 = vadd.f32 %v3016_v30, %v12928_v44  ;;  %v3065_v39 = vpop.f32.mrf.mxu1  ;;  %v4682_v41 = vadd.f32 1.0, %v11680_v8 }
 0x33a   : > { %3427 = vmatpush.bf16.msra.mxu1 %v8852_v28  ;;  %v10931_v28 = vld [vmem:[#allocation5 + $0x24] sm:$0xf0] }
 0x33b   : > { %v13093_v32 = vadd.f32 %v3161_v11, %v3113_v38  ;;  %v4310_v34 = vadd.f32 %v4214_v45, %v13082_v1  ;;  %v13096_v56 = vadd.f32 %v3065_v39, %v3017_v20  ;;  %v4490_v38 = vmul.f32 0.5, %v13054_v48  ;;  %v9019_v20 = vld [vmem:[#allocation5 + $0x310] sm:$0xf]  ;;  %v11027_v39 = vld [vmem:[#allocation5 + $0x324] sm:$0xf0] }
 0x33c   : > { %v4496_v11 = vmul.f32 0.5, %v13068_v4  ;;  %v9020_v49 = vor.u32 %v11027_v39, %v9019_v20  ;;  %v11075_v48 = vld [vmem:[#allocation5 + $0x4a4] sm:$0xf0] }
 0x33d   : > { %v11682_v44 = vpop.eup %11681  ;;  %v4028_v30 = vmul.f32 %v13096_v56, %v13096_v56  ;;  %v4406_v37 = vmul.f32 0.7978846, %v4310_v34  ;;  %v4778_v8 = vmul.f32 %v4682_v41, %v4490_v38  ;;  %v8828_v38 = vor.u32 %v10979_v55, %v8827_v29 }
 0x33e   : > { %v4688_v12 = vadd.f32 1.0, %v11682_v44  ;;  %v8636_v44 = vor.u32 %v10931_v28, %v8635_v7  ;;  %3477 = vmatpush.bf16.msra.mxu2 %v9020_v49 }
 0x33f   : > { %v4124_v21 = vmul.f32 %v4028_v30, %v13096_v56  ;;  %v9212_v30 = vor.u32 %v11075_v48, %v9211_v35  ;;  %11683 = vtanh.f32 %v4406_v37  ;;  %3428 = vmatpush.bf16.msra.mxu1 %v8828_v38  ;;  %v4502_v48 = vmul.f32 0.5, %v13082_v1  ;;  %v10970_v1 = vld [vmem:[#allocation5 + $0x164] sm:$0xf] }
 0x340   : > { %v3114_v45 = vpop.f32.mrf.mxu2  ;;  %v4784_v23 = vmul.f32 %v4688_v12, %v4496_v11  ;;  %v3019_v53 = vpop.f32.mrf.mxu0  ;;  %3379 = vmatpush.bf16.msra.mxu0 %v8636_v44 }
 0x341   : > { %v3115_v33 = vadd.f32 %v3114_v45, %v12956_v24  ;;  %v3163_v9 = vpop.f32.mrf.mxu3  ;;  %v4220_v62 = vmul.f32 0.044715, %v4124_v21  ;;  %v3020_v4 = vadd.f32 %v3019_v53, %v12935_v25  ;;  %v3068_v34 = vpop.f32.mrf.mxu1  ;;  %3526 = vmatpush.bf16.msra.mxu3 %v9212_v30 }
 0x342   : > { %v13105_v50 = vpack.c.bf16 %v4784_v23, %v4778_v8 }
 0x343   : > { %v13107_v41 = vadd.f32 %v3163_v9, %v3115_v33  ;;  %v4316_v11 = vadd.f32 %v4220_v62, %v13096_v56  ;;  %v13110_v12 = vadd.f32 %v3068_v34, %v3020_v4  ;;  %3214 = vmatmul.bf16.gmra.mxu0 %v12326_v46  ;;  %v4508_v62 = vmul.f32 0.5, %v13096_v56  ;;  %v8805_v56 = vld [vmem:[#allocation5 + $0x178] sm:$0xf0] }
 0x344   : > { %14831 = vst [vmem:[#allocation67_spill] sm:$0xff] %v13105_v50  ;;  %3263 = vmatmul.bf16.gmra.mxu1 %v12328_v47 }
 0x345   : > { %3312 = vmatmul.bf16.gmra.mxu2 %v12469_v17  ;;  %v4412_v25 = vmul.f32 0.7978846, %v4316_v11  ;;  %v4034_v21 = vmul.f32 %v13110_v12, %v13110_v12  ;;  %v11684_v39 = vpop.eup %11683 }
 0x346   : > { %3361 = vmatmul.bf16.gmra.mxu3 %v14822_v61  ;;  %v4694_v49 = vadd.f32 1.0, %v11684_v39  ;;  %v9571_v39 = vld [vmem:[#allocation5 + $0x760] sm:$0xf] }
 0x347   : > { %11685 = vtanh.f32 %v4412_v25  ;;  %v4130_v55 = vmul.f32 %v4034_v21, %v13110_v12 }
 0x348   : > { %v3117_v29 = vpop.f32.mrf.mxu2  ;;  %v3021_v20 = vpop.f32.mrf.mxu0  ;;  %v4790_v38 = vmul.f32 %v4694_v49, %v4502_v48  ;;  %v11165_v49 = vld [vmem:[#allocation5 + $0x774] sm:$0xf0]  ;;  %v14834_v48 = vld [vmem:[#allocation35_spill] sm:$0xff] }
 0x349   : > { %v3118_v37 = vadd.f32 %v3117_v29, %v12956_v24  ;;  %v3166_v45 = vpop.f32.mrf.mxu3  ;;  %v4226_v7 = vmul.f32 0.044715, %v4130_v55  ;;  %v3022_v8 = vadd.f32 %v3021_v20, %v12938_v16  ;;  %v3070_v23 = vpop.f32.mrf.mxu1 }
 0x34b   : > { %v13121_v33 = vadd.f32 %v3166_v45, %v3118_v37  ;;  %v4322_v9 = vadd.f32 %v4226_v7, %v13110_v12  ;;  %v3071_v53 = vadd.f32 %v3070_v23, %v3022_v8  ;;  %v14833_v23 = vld [vmem:[#allocation34_spill] sm:$0xff] }
 0x34d   : > { %v11686_v28 = vpop.eup %11685  ;;  %v4040_v35 = vmul.f32 %v3071_v53, %v3071_v53  ;;  %v4418_v34 = vmul.f32 0.7978846, %v4322_v9  ;;  %v8808_v9 = vor.u32 %v10970_v1, %v8805_v56 }
 0x34e   : > { %v4700_v4 = vadd.f32 1.0, %v11686_v28  ;;  %v11018_v28 = vld [vmem:[#allocation5 + $0x2e4] sm:$0xf] }
 0x34f   : > { %v4136_v44 = vmul.f32 %v4040_v35, %v3071_v53  ;;  %11687 = vtanh.f32 %v4418_v34  ;;  %v8997_v35 = vld [vmem:[#allocation5 + $0x2f8] sm:$0xf0]  ;;  %v14836_v34 = vld [vmem:[#allocation47_spill] sm:$0xff]  ;;  %3666 = vmatpush.bf16.msrb.mxu2 %v8808_v9 }
 0x350   : > { %v3119_v30 = vpop.f32.mrf.mxu2  ;;  %v4796_v11 = vmul.f32 %v4700_v4, %v4508_v62  ;;  %v3024_v21 = vpop.f32.mrf.mxu0  ;;  %v9572_v62 = vor.u32 %v11165_v49, %v9571_v39  ;;  %v9000_v4 = vor.u32 %v11018_v28, %v8997_v35  ;;  %v4514_v35 = vmul.f32 0.5, %v13110_v12 }
 0x351   : > { %v3120_v16 = vadd.f32 %v3119_v30, %v12956_v24  ;;  %v3168_v25 = vpop.f32.mrf.mxu3  ;;  %v4232_v55 = vmul.f32 0.044715, %v4136_v44  ;;  %v3025_v29 = vadd.f32 %v3024_v21, %v12945_v10  ;;  %v3073_v37 = vpop.f32.mrf.mxu1  ;;  %v14835_v10 = vld [vmem:[#allocation46_spill] sm:$0xff] }
 0x352   : > { %v13128_v45 = vpack.c.bf16 %v4796_v11, %v4790_v38  ;;  %3568 = vmatpush.bf16.msrb.mxu0 %v9572_v62  ;;  %3715 = vmatpush.bf16.msrb.mxu3 %v9000_v4  ;;  %v4520_v62 = vmul.f32 0.5, %v3071_v53 }
 0x353   : > { %v13130_v20 = vadd.f32 %v3168_v25, %v3120_v16  ;;  %v4328_v7 = vadd.f32 %v4232_v55, %v3071_v53  ;;  %v13132_v8 = vadd.f32 %v3073_v37, %v3025_v29  ;;  %3219 = vmatmul.bf16.gmra.mxu0 %v14833_v23 }
 0x354   : > { %14832 = vst [vmem:[#allocation68_spill] sm:$0xff] %v13128_v45  ;;  %3268 = vmatmul.bf16.gmra.mxu1 %v14834_v48  ;;  %v9763_v45 = vld [vmem:[#allocation5 + $0x8e0] sm:$0xf] }
 0x355   : > { %3317 = vmatmul.bf16.gmra.mxu2 %v14835_v10  ;;  %v4424_v44 = vmul.f32 0.7978846, %v4328_v7  ;;  %v4046_v30 = vmul.f32 %v13132_v8, %v13132_v8  ;;  %v11688_v55 = vpop.eup %11687 }
 0x356   : > { %3366 = vmatmul.bf16.gmra.mxu3 %v14836_v34  ;;  %v4706_v9 = vadd.f32 1.0, %v11688_v55 }
 0x357   : > { %11689 = vtanh.f32 %v4424_v44  ;;  %v4142_v38 = vmul.f32 %v4046_v30, %v13132_v8 }
 0x358   : > { %v3122_v11 = vpop.f32.mrf.mxu2  ;;  %v3026_v21 = vpop.f32.mrf.mxu0  ;;  %v4802_v50 = vmul.f32 %v4706_v9, %v4514_v35  ;;  %v14839_v9 = vld [vmem:[#allocation17_spill] sm:$0xff] }
 0x359   : > { %v3123_v16 = vadd.f32 %v3122_v11, %v12956_v24  ;;  %v3171_v25 = vpop.f32.mrf.mxu3  ;;  %v4238_v29 = vmul.f32 0.044715, %v4142_v38  ;;  %v3027_v37 = vadd.f32 %v3026_v21, %v12948_v0  ;;  %v3075_v1 = vpop.f32.mrf.mxu1  ;;  %v11213_v38 = vld [vmem:[#allocation5 + $0x8f4] sm:$0xf0] }
 0x35b   : > { %v13143_v56 = vadd.f32 %v3171_v25, %v3123_v16  ;;  %v4334_v39 = vadd.f32 %v4238_v29, %v13132_v8  ;;  %v3076_v7 = vadd.f32 %v3075_v1, %v3027_v37  ;;  %v9764_v29 = vor.u32 %v11213_v38, %v9763_v45 }
 0x35d   : > { %v11690_v49 = vpop.eup %11689  ;;  %v4052_v28 = vmul.f32 %v3076_v7, %v3076_v7  ;;  %v4430_v44 = vmul.f32 0.7978846, %v4334_v39  ;;  %3617 = vmatpush.bf16.msrb.mxu1 %v9764_v29 }
 0x35e   : > { %v4712_v4 = vadd.f32 1.0, %v11690_v49  ;;  %v14838_v49 = vld [vmem:[#allocation16_spill] sm:$0xff] }
 0x35f   : > { %v4148_v30 = vmul.f32 %v4052_v28, %v3076_v7  ;;  %11691 = vtanh.f32 %v4430_v44  ;;  %v10964_v44 = vld [vmem:[#allocation5 + $0x134] sm:$0xf] }
 0x360   : > { %v3124_v11 = vpop.f32.mrf.mxu2  ;;  %v4808_v0 = vmul.f32 %v4712_v4, %v4520_v62  ;;  %v3185_v21 = vpop.f32.mrf.mxu0 }
 0x361   : > { %v3125_v16 = vadd.f32 %v3124_v11, %v12956_v24  ;;  %v3173_v25 = vpop.f32.mrf.mxu3  ;;  %v4244_v37 = vmul.f32 0.044715, %v4148_v30  ;;  %v3186_v55 = vadd.f32 %v3185_v21, %v12964_v40  ;;  %v3234_v1 = vpop.f32.mrf.mxu1  ;;  %v8781_v30 = vld [vmem:[#allocation5 + $0x148] sm:$0xf0]  ;;  %v9547_v11 = vld [vmem:[#allocation5 + $0x730] sm:$0xf] }
 0x362   : > { %v13149_v34 = vpack.c.bf16 %v4808_v0, %v4802_v50  ;;  %v8784_v0 = vor.u32 %v10964_v44, %v8781_v30  ;;  %v8973_v21 = vld [vmem:[#allocation5 + $0x2c8] sm:$0xf0]  ;;  %v9739_v44 = vld [vmem:[#allocation5 + $0x8b0] sm:$0xf] }
 0x363   : > { %v13151_v12 = vadd.f32 %v3173_v25, %v3125_v16  ;;  %v4340_v53 = vadd.f32 %v4244_v37, %v3076_v7  ;;  %v3235_v39 = vadd.f32 %v3234_v1, %v3186_v55  ;;  %3380 = vmatmul.bf16.vlgmr.msra.gmra.mxu0 %v14838_v49  ;;  %v11159_v16 = vld [vmem:[#allocation5 + $0x744] sm:$0xf0]  ;;  %v11012_v25 = vld [vmem:[#allocation5 + $0x2b4] sm:$0xf] }
 0x364   : > { %14837 = vst [vmem:[#allocation69_spill] sm:$0xff] %v13149_v34  ;;  %3429 = vmatmul.bf16.vlgmr.msra.gmra.mxu1 %v14839_v9  ;;  %v9548_v55 = vor.u32 %v11159_v16, %v9547_v11  ;;  %v8976_v1 = vor.u32 %v11012_v25, %v8973_v21  ;;  %3667 = vmatpush.bf16.msrb.mxu2 %v8784_v0 }
 0x365   : > { %3478 = vmatmul.bf16.vlgmr.msra.gmra.mxu2 %v12206_v54  ;;  %v4436_v24 = vmul.f32 0.7978846, %v4340_v53  ;;  %v11692_v45 = vpop.eup %11691 }
 0x366   : > { %3527 = vmatmul.bf16.vlgmr.msra.gmra.mxu3 %v12208_v57  ;;  %v4718_v29 = vadd.f32 1.0, %v11692_v45  ;;  %3569 = vmatpush.bf16.msrb.mxu0 %v9548_v55  ;;  %v11207_v45 = vld [vmem:[#allocation5 + $0x8c4] sm:$0xf0] }
 0x367   : > { %11693 = vtanh.f32 %v4436_v24  ;;  %3716 = vmatpush.bf16.msrb.mxu3 %v8976_v1  ;;  %v4532_v24 = vmul.f32 0.5, %v3076_v7  ;;  %v9740_v25 = vor.u32 %v11207_v45, %v9739_v44  ;;  %v10958_v45 = vld [vmem:[#allocation5 + $0x104] sm:$0xf] }
 0x368   : > { %v3283_v40 = vpop.f32.mrf.mxu2  ;;  %v3187_v35 = vpop.f32.mrf.mxu0 }
 0x369   : > { %v3284_v50 = vadd.f32 %v3283_v40, %v3235_v39  ;;  %v3332_v28 = vpop.f32.mrf.mxu3  ;;  %v3188_v62 = vadd.f32 %v3187_v35, %v12969_v36  ;;  %v3236_v4 = vpop.f32.mrf.mxu1  ;;  %v4526_v36 = vmul.f32 0.5, %v13132_v8  ;;  %3618 = vmatpush.bf16.msrb.mxu1 %v9740_v25  ;;  %v11153_v25 = vld [vmem:[#allocation5 + $0x714] sm:$0xf0] }
 0x36b   : > { %v13158_v38 = vadd.f32 %v3332_v28, %v3284_v50  ;;  %v3237_v37 = vadd.f32 %v3236_v4, %v3188_v62  ;;  %v4814_v28 = vmul.f32 %v4718_v29, %v4526_v36  ;;  %v14841_v29 = vld [vmem:[#allocation18_spill] sm:$0xff] }
 0x36d   : > { %v3963_v53 = vmul.f32 %v13158_v38, %v13158_v38  ;;  %v11694_v39 = vpop.eup %11693 }
 0x36e   : > { %v4724_v40 = vadd.f32 1.0, %v11694_v39  ;;  %v14842_v39 = vld [vmem:[#allocation19_spill] sm:$0xff] }
 0x36f   : > { %v4059_v50 = vmul.f32 %v3963_v53, %v13158_v38 }
 0x370   : > { %v3285_v35 = vpop.f32.mrf.mxu2  ;;  %v4820_v62 = vmul.f32 %v4724_v40, %v4532_v24  ;;  %v3190_v16 = vpop.f32.mrf.mxu0 }
 0x371   : > { %v4155_v4 = vmul.f32 0.044715, %v4059_v50  ;;  %v3286_v30 = vadd.f32 %v3285_v35, %v3237_v37  ;;  %v3334_v11 = vpop.f32.mrf.mxu3  ;;  %v3191_v0 = vadd.f32 %v3190_v16, %v12982_v5  ;;  %v3239_v21 = vpop.f32.mrf.mxu1 }
 0x372   : > { %v13165_v8 = vpack.c.bf16 %v4820_v62, %v4814_v28  ;;  %v8757_v62 = vld [vmem:[#allocation5 + $0x118] sm:$0xf0] }
 0x373   : > { %v4251_v7 = vadd.f32 %v4155_v4, %v13158_v38  ;;  %v3335_v55 = vadd.f32 %v3334_v11, %v3286_v30  ;;  %v3240_v1 = vadd.f32 %v3239_v21, %v3191_v0  ;;  %3385 = vmatmul.bf16.gmra.mxu0 %v14841_v29  ;;  %v9523_v4 = vld [vmem:[#allocation5 + $0x700] sm:$0xf]  ;;  %v8760_v16 = vor.u32 %v10958_v45, %v8757_v62  ;;  %v11006_v0 = vld [vmem:[#allocation5 + $0x284] sm:$0xf]  ;;  %v8949_v21 = vld [vmem:[#allocation5 + $0x298] sm:$0xf0] }
 0x374   : > { %14840 = vst [vmem:[#allocation16_spill] sm:$0xff] %v13165_v8  ;;  %3434 = vmatmul.bf16.gmra.mxu1 %v14842_v39 }
 0x375   : > { %v3969_v53 = vmul.f32 %v3335_v55, %v3335_v55  ;;  %3483 = vmatmul.bf16.gmra.mxu2 %v12226_v26  ;;  %v4347_v37 = vmul.f32 0.7978846, %v4251_v7 }
 0x376   : > { %3532 = vmatmul.bf16.gmra.mxu3 %v12228_v27  ;;  %3668 = vmatpush.bf16.msrb.mxu2 %v8760_v16 }
 0x377   : > { %v4065_v36 = vmul.f32 %v3969_v53, %v3335_v55  ;;  %11695 = vtanh.f32 %v4347_v37  ;;  %v9524_v53 = vor.u32 %v11153_v25, %v9523_v4 }
 0x378   : > { %v3288_v5 = vpop.f32.mrf.mxu2  ;;  %v3192_v28 = vpop.f32.mrf.mxu0 }
 0x379   : > { %v4161_v24 = vmul.f32 0.044715, %v4065_v36  ;;  %v3289_v40 = vadd.f32 %v3288_v5, %v3240_v1  ;;  %v3337_v50 = vpop.f32.mrf.mxu3  ;;  %v3193_v35 = vadd.f32 %v3192_v28, %v12995_v22  ;;  %v3241_v44 = vpop.f32.mrf.mxu1  ;;  %v8952_v36 = vor.u32 %v11006_v0, %v8949_v21  ;;  %3570 = vmatpush.bf16.msrb.mxu0 %v9524_v53  ;;  %v14843_v53 = vld [vmem:[#allocation20_spill] sm:$0xff] }
 0x37b   : > { %v4257_v30 = vadd.f32 %v4161_v24, %v3335_v55  ;;  %v13173_v11 = vadd.f32 %v3337_v50, %v3289_v40  ;;  %v3242_v7 = vadd.f32 %v3241_v44, %v3193_v35  ;;  %3717 = vmatpush.bf16.msrb.mxu3 %v8952_v36  ;;  %v9715_v24 = vld [vmem:[#allocation5 + $0x880] sm:$0xf]  ;;  %v11201_v40 = vld [vmem:[#allocation5 + $0x894] sm:$0xf0] }
 0x37c   : > { %v9716_v44 = vor.u32 %v11201_v40, %v9715_v24 }
 0x37d   : > { %v4353_v1 = vmul.f32 0.7978846, %v4257_v30  ;;  %v3975_v5 = vmul.f32 %v13173_v11, %v13173_v11  ;;  %v11696_v50 = vpop.eup %11695 }
 0x37e   : > { %3619 = vmatpush.bf16.msrb.mxu1 %v9716_v44  ;;  %v4635_v0 = vadd.f32 1.0, %v11696_v50 }
 0x37f   : > { %11697 = vtanh.f32 %v4353_v1  ;;  %v4071_v22 = vmul.f32 %v3975_v5, %v13173_v11  ;;  %v4449_v5 = vmul.f32 0.5, %v3335_v55  ;;  %v8733_v55 = vld [vmem:[#allocation5 + $0xe8] sm:$0xf0] }
 0x380   : > { %v3290_v37 = vpop.f32.mrf.mxu2  ;;  %v3195_v35 = vpop.f32.mrf.mxu0 }
 0x381   : > { %v4167_v28 = vmul.f32 0.044715, %v4071_v22  ;;  %v3291_v45 = vadd.f32 %v3290_v37, %v3242_v7  ;;  %v3339_v62 = vpop.f32.mrf.mxu3  ;;  %v3196_v4 = vadd.f32 %v3195_v35, %v13009_v6  ;;  %v3244_v30 = vpop.f32.mrf.mxu1  ;;  %v14844_v7 = vld [vmem:[#allocation21_spill] sm:$0xff]  ;;  %v4443_v6 = vmul.f32 0.5, %v13158_v38 }
 0x382   : > { %v10952_v38 = vld [vmem:[#allocation5 + $0xd4] sm:$0xf] }
 0x383   : > { %v4263_v25 = vadd.f32 %v4167_v28, %v13173_v11  ;;  %v13180_v16 = vadd.f32 %v3339_v62, %v3291_v45  ;;  %v3245_v21 = vadd.f32 %v3244_v30, %v3196_v4  ;;  %3390 = vmatmul.bf16.gmra.mxu0 %v14843_v53  ;;  %v4731_v40 = vmul.f32 %v4635_v0, %v4443_v6  ;;  %v11000_v6 = vld [vmem:[#allocation5 + $0x254] sm:$0xf] }
 0x384   : > { %3439 = vmatmul.bf16.gmra.mxu1 %v14844_v7  ;;  %v8736_v0 = vor.u32 %v10952_v38, %v8733_v55 }
 0x385   : > { %v11698_v36 = vpop.eup %11697  ;;  %v3981_v1 = vmul.f32 %v13180_v16, %v13180_v16  ;;  %3488 = vmatmul.bf16.gmra.mxu2 %v12246_v51  ;;  %v4359_v37 = vmul.f32 0.7978846, %v4263_v25 }
 0x386   : > { %v4641_v22 = vadd.f32 1.0, %v11698_v36  ;;  %3537 = vmatmul.bf16.gmra.mxu3 %v12248_v52  ;;  %v9499_v36 = vld [vmem:[#allocation5 + $0x6d0] sm:$0xf]  ;;  %3669 = vmatpush.bf16.msrb.mxu2 %v8736_v0 }
 0x387   : > { %v4077_v24 = vmul.f32 %v3981_v1, %v13180_v16  ;;  %11699 = vtanh.f32 %v4359_v37  ;;  %v11147_v1 = vld [vmem:[#allocation5 + $0x6e4] sm:$0xf0] }
 0x388   : > { %v4737_v50 = vmul.f32 %v4641_v22, %v4449_v5  ;;  %v3293_v28 = vpop.f32.mrf.mxu2  ;;  %v3197_v44 = vpop.f32.mrf.mxu0  ;;  %v8925_v5 = vld [vmem:[#allocation5 + $0x268] sm:$0xf0]  ;;  %v9500_v22 = vor.u32 %v11147_v1, %v9499_v36 }
 0x389   : > { %v4173_v45 = vmul.f32 0.044715, %v4077_v24  ;;  %v3294_v62 = vadd.f32 %v3293_v28, %v3245_v21  ;;  %v3342_v35 = vpop.f32.mrf.mxu3  ;;  %v3198_v30 = vadd.f32 %v3197_v44, %v13023_v60  ;;  %v3246_v8 = vpop.f32.mrf.mxu1  ;;  %v8928_v24 = vor.u32 %v11000_v6, %v8925_v5  ;;  %v9691_v28 = vld [vmem:[#allocation5 + $0x850] sm:$0xf]  ;;  %v14846_v5 = vld [vmem:[#allocation22_spill] sm:$0xff] }
 0x38a   : > { %v13190_v4 = vpack.c.bf16 %v4737_v50, %v4731_v40  ;;  %3571 = vmatpush.bf16.msrb.mxu0 %v9500_v22 }
 0x38b   : > { %v4269_v25 = vadd.f32 %v4173_v45, %v13180_v16  ;;  %v13194_v34 = vadd.f32 %v3342_v35, %v3294_v62  ;;  %v3247_v21 = vadd.f32 %v3246_v8, %v3198_v30  ;;  %3718 = vmatpush.bf16.msrb.mxu3 %v8928_v24  ;;  %v11195_v45 = vld [vmem:[#allocation5 + $0x864] sm:$0xf0] }
 0x38c   : > { %14845 = vst [vmem:[#allocation17_spill] sm:$0xff] %v13190_v4  ;;  %v9692_v30 = vor.u32 %v11195_v45, %v9691_v28 }
 0x38d   : > { %v4365_v40 = vmul.f32 0.7978846, %v4269_v25  ;;  %v3987_v60 = vmul.f32 %v13194_v34, %v13194_v34  ;;  %v11700_v62 = vpop.eup %11699 }
 0x38e   : > { %3620 = vmatpush.bf16.msrb.mxu1 %v9692_v30  ;;  %v4647_v1 = vadd.f32 1.0, %v11700_v62 }
 0x38f   : > { %11701 = vtanh.f32 %v4365_v40  ;;  %v4083_v37 = vmul.f32 %v3987_v60, %v13194_v34  ;;  %v4461_v40 = vmul.f32 0.5, %v13180_v16  ;;  %v8709_v16 = vld [vmem:[#allocation5 + $0xb8] sm:$0xf0] }
 0x390   : > { %v3295_v50 = vpop.f32.mrf.mxu2  ;;  %v3200_v8 = vpop.f32.mrf.mxu0 }
 0x391   : > { %v4179_v35 = vmul.f32 0.044715, %v4083_v37  ;;  %v3296_v44 = vadd.f32 %v3295_v50, %v3247_v21  ;;  %v3344_v38 = vpop.f32.mrf.mxu3  ;;  %v3201_v55 = vadd.f32 %v3200_v8, %v13037_v58  ;;  %v3249_v36 = vpop.f32.mrf.mxu1  ;;  %v14847_v21 = vld [vmem:[#allocation23_spill] sm:$0xff]  ;;  %v4455_v58 = vmul.f32 0.5, %v13173_v11 }
 0x393   : > { %v4275_v25 = vadd.f32 %v4179_v35, %v13194_v34  ;;  %v13201_v0 = vadd.f32 %v3344_v38, %v3296_v44  ;;  %v3250_v6 = vadd.f32 %v3249_v36, %v3201_v55  ;;  %3395 = vmatmul.bf16.gmra.mxu0 %v14846_v5  ;;  %v4743_v28 = vmul.f32 %v4647_v1, %v4455_v58  ;;  %v10946_v36 = vld [vmem:[#allocation5 + $0xa4] sm:$0xf] }
 0x394   : > { %3444 = vmatmul.bf16.gmra.mxu1 %v14847_v21  ;;  %v8712_v1 = vor.u32 %v10946_v36, %v8709_v16  ;;  %v10994_v58 = vld [vmem:[#allocation5 + $0x224] sm:$0xf] }
 0x395   : > { %v11702_v22 = vpop.eup %11701  ;;  %v3993_v24 = vmul.f32 %v13201_v0, %v13201_v0  ;;  %3493 = vmatmul.bf16.gmra.mxu2 %v12266_v14  ;;  %v4371_v37 = vmul.f32 0.7978846, %v4275_v25 }
 0x396   : > { %v4653_v60 = vadd.f32 1.0, %v11702_v22  ;;  %3542 = vmatmul.bf16.gmra.mxu3 %v12268_v15  ;;  %v9475_v22 = vld [vmem:[#allocation5 + $0x6a0] sm:$0xf]  ;;  %3670 = vmatpush.bf16.msrb.mxu2 %v8712_v1 }
 0x397   : > { %v4089_v50 = vmul.f32 %v3993_v24, %v13201_v0  ;;  %11703 = vtanh.f32 %v4371_v37  ;;  %v11141_v24 = vld [vmem:[#allocation5 + $0x6b4] sm:$0xf0] }
 0x398   : > { %v4749_v45 = vmul.f32 %v4653_v60, %v4461_v40  ;;  %v3298_v62 = vpop.f32.mrf.mxu2  ;;  %v3202_v8 = vpop.f32.mrf.mxu0  ;;  %v8901_v40 = vld [vmem:[#allocation5 + $0x238] sm:$0xf0]  ;;  %v9476_v60 = vor.u32 %v11141_v24, %v9475_v22 }
 0x399   : > { %v4185_v35 = vmul.f32 0.044715, %v4089_v50  ;;  %v3299_v44 = vadd.f32 %v3298_v62, %v3250_v6  ;;  %v3347_v38 = vpop.f32.mrf.mxu3  ;;  %v3203_v55 = vadd.f32 %v3202_v8, %v13051_v3  ;;  %v3251_v11 = vpop.f32.mrf.mxu1  ;;  %v8904_v50 = vor.u32 %v10994_v58, %v8901_v40  ;;  %v9667_v62 = vld [vmem:[#allocation5 + $0x820] sm:$0xf]  ;;  %v14849_v40 = vld [vmem:[#allocation24_spill] sm:$0xff] }
 0x39a   : > { %v13212_v30 = vpack.c.bf16 %v4749_v45, %v4743_v28  ;;  %3572 = vmatpush.bf16.msrb.mxu0 %v9476_v60 }
 0x39b   : > { %v4281_v25 = vadd.f32 %v4185_v35, %v13201_v0  ;;  %v13216_v4 = vadd.f32 %v3347_v38, %v3299_v44  ;;  %v3252_v6 = vadd.f32 %v3251_v11, %v3203_v55  ;;  %3719 = vmatpush.bf16.msrb.mxu3 %v8904_v50  ;;  %v11189_v35 = vld [vmem:[#allocation5 + $0x834] sm:$0xf0] }
 0x39c   : > { %14848 = vst [vmem:[#allocation18_spill] sm:$0xff] %v13212_v30  ;;  %v9668_v11 = vor.u32 %v11189_v35, %v9667_v62 }
 0x39d   : > { %v4377_v28 = vmul.f32 0.7978846, %v4281_v25  ;;  %v3999_v3 = vmul.f32 %v13216_v4, %v13216_v4  ;;  %v11704_v44 = vpop.eup %11703 }
 0x39e   : > { %3621 = vmatpush.bf16.msrb.mxu1 %v9668_v11  ;;  %v4659_v24 = vadd.f32 1.0, %v11704_v44 }
 0x39f   : > { %11705 = vtanh.f32 %v4377_v28  ;;  %v4095_v37 = vmul.f32 %v3999_v3, %v13216_v4  ;;  %v4473_v28 = vmul.f32 0.5, %v13201_v0  ;;  %v8685_v0 = vld [vmem:[#allocation5 + $0x88] sm:$0xf0] }
 0x3a0   : > { %v3300_v45 = vpop.f32.mrf.mxu2  ;;  %v3205_v55 = vpop.f32.mrf.mxu0 }
 0x3a1   : > { %v4191_v38 = vmul.f32 0.044715, %v4095_v37  ;;  %v3301_v8 = vadd.f32 %v3300_v45, %v3252_v6  ;;  %v3349_v36 = vpop.f32.mrf.mxu3  ;;  %v3206_v16 = vadd.f32 %v3205_v55, %v13065_v18  ;;  %v3254_v22 = vpop.f32.mrf.mxu1  ;;  %v14850_v6 = vld [vmem:[#allocation25_spill] sm:$0xff]  ;;  %v4467_v18 = vmul.f32 0.5, %v13194_v34 }
 0x3a3   : > { %v4287_v25 = vadd.f32 %v4191_v38, %v13216_v4  ;;  %v13223_v1 = vadd.f32 %v3349_v36, %v3301_v8  ;;  %v3255_v58 = vadd.f32 %v3254_v22, %v3206_v16  ;;  %3400 = vmatmul.bf16.gmra.mxu0 %v14849_v40  ;;  %v4755_v62 = vmul.f32 %v4659_v24, %v4467_v18  ;;  %v10940_v22 = vld [vmem:[#allocation5 + $0x74] sm:$0xf] }
 0x3a4   : > { %3449 = vmatmul.bf16.gmra.mxu1 %v14850_v6  ;;  %v8688_v24 = vor.u32 %v10940_v22, %v8685_v0  ;;  %v10988_v18 = vld [vmem:[#allocation5 + $0x1f4] sm:$0xf] }
 0x3a5   : > { %v11706_v60 = vpop.eup %11705  ;;  %v4005_v50 = vmul.f32 %v13223_v1, %v13223_v1  ;;  %3498 = vmatmul.bf16.gmra.mxu2 %v12286_v42  ;;  %v4383_v37 = vmul.f32 0.7978846, %v4287_v25 }
 0x3a6   : > { %v4665_v3 = vadd.f32 1.0, %v11706_v60  ;;  %3547 = vmatmul.bf16.gmra.mxu3 %v12288_v43  ;;  %v9451_v60 = vld [vmem:[#allocation5 + $0x670] sm:$0xf]  ;;  %3671 = vmatpush.bf16.msrb.mxu2 %v8688_v24 }
 0x3a7   : > { %v4101_v45 = vmul.f32 %v4005_v50, %v13223_v1  ;;  %11707 = vtanh.f32 %v4383_v37  ;;  %v11135_v50 = vld [vmem:[#allocation5 + $0x684] sm:$0xf0] }
 0x3a8   : > { %v4761_v35 = vmul.f32 %v4665_v3, %v4473_v28  ;;  %v3303_v44 = vpop.f32.mrf.mxu2  ;;  %v3207_v55 = vpop.f32.mrf.mxu0  ;;  %v8877_v28 = vld [vmem:[#allocation5 + $0x208] sm:$0xf0]  ;;  %v9452_v3 = vor.u32 %v11135_v50, %v9451_v60 }
 0x3a9   : > { %v4197_v38 = vmul.f32 0.044715, %v4101_v45  ;;  %v3304_v8 = vadd.f32 %v3303_v44, %v3255_v58  ;;  %v3352_v36 = vpop.f32.mrf.mxu3  ;;  %v3208_v16 = vadd.f32 %v3207_v55, %v13079_v2  ;;  %v3256_v34 = vpop.f32.mrf.mxu1  ;;  %v8880_v45 = vor.u32 %v10988_v18, %v8877_v28  ;;  %v9643_v44 = vld [vmem:[#allocation5 + $0x7f0] sm:$0xf]  ;;  %v14852_v28 = vld [vmem:[#allocation26_spill] sm:$0xff] }
 0x3aa   : > { %v13234_v11 = vpack.c.bf16 %v4761_v35, %v4755_v62  ;;  %3573 = vmatpush.bf16.msrb.mxu0 %v9452_v3 }
 0x3ab   : > { %v4293_v25 = vadd.f32 %v4197_v38, %v13223_v1  ;;  %v13238_v30 = vadd.f32 %v3352_v36, %v3304_v8  ;;  %v3257_v58 = vadd.f32 %v3256_v34, %v3208_v16  ;;  %3720 = vmatpush.bf16.msrb.mxu3 %v8880_v45  ;;  %v11183_v38 = vld [vmem:[#allocation5 + $0x804] sm:$0xf0] }
 0x3ac   : > { %14851 = vst [vmem:[#allocation19_spill] sm:$0xff] %v13234_v11  ;;  %v9644_v34 = vor.u32 %v11183_v38, %v9643_v44 }
 0x3ad   : > { %v4389_v62 = vmul.f32 0.7978846, %v4293_v25  ;;  %v4011_v2 = vmul.f32 %v13238_v30, %v13238_v30  ;;  %v11708_v8 = vpop.eup %11707 }
 0x3ae   : > { %3622 = vmatpush.bf16.msrb.mxu1 %v9644_v34  ;;  %v4671_v50 = vadd.f32 1.0, %v11708_v8 }
 0x3af   : > { %11709 = vtanh.f32 %v4389_v62  ;;  %v4107_v37 = vmul.f32 %v4011_v2, %v13238_v30  ;;  %v4485_v62 = vmul.f32 0.5, %v13223_v1  ;;  %v8661_v1 = vld [vmem:[#allocation5 + $0x58] sm:$0xf0] }
 0x3b0   : > { %v3305_v35 = vpop.f32.mrf.mxu2  ;;  %v3210_v16 = vpop.f32.mrf.mxu0 }
 0x3b1   : > { %v4203_v36 = vmul.f32 0.044715, %v4107_v37  ;;  %v3306_v55 = vadd.f32 %v3305_v35, %v3257_v58  ;;  %v3354_v22 = vpop.f32.mrf.mxu3  ;;  %v3211_v0 = vadd.f32 %v3210_v16, %v13093_v32  ;;  %v3259_v60 = vpop.f32.mrf.mxu1  ;;  %v14853_v58 = vld [vmem:[#allocation27_spill] sm:$0xff]  ;;  %v4479_v32 = vmul.f32 0.5, %v13216_v4 }
 0x3b3   : > { %v4299_v25 = vadd.f32 %v4203_v36, %v13238_v30  ;;  %v13245_v24 = vadd.f32 %v3354_v22, %v3306_v55  ;;  %v3260_v18 = vadd.f32 %v3259_v60, %v3211_v0  ;;  %3405 = vmatmul.bf16.gmra.mxu0 %v14852_v28  ;;  %v4767_v44 = vmul.f32 %v4671_v50, %v4479_v32  ;;  %v10934_v60 = vld [vmem:[#allocation5 + $0x44] sm:$0xf] }
 0x3b4   : > { %3454 = vmatmul.bf16.gmra.mxu1 %v14853_v58  ;;  %v8664_v50 = vor.u32 %v10934_v60, %v8661_v1  ;;  %v10982_v32 = vld [vmem:[#allocation5 + $0x1c4] sm:$0xf] }
 0x3b5   : > { %v11710_v3 = vpop.eup %11709  ;;  %v4017_v45 = vmul.f32 %v13245_v24, %v13245_v24  ;;  %3503 = vmatmul.bf16.gmra.mxu2 %v14829_v13  ;;  %v4395_v37 = vmul.f32 0.7978846, %v4299_v25  ;;  %v14856_v13 = vld [vmem:[#allocation31_spill] sm:$0xff] }
 0x3b6   : > { %v4677_v2 = vadd.f32 1.0, %v11710_v3  ;;  %3552 = vmatmul.bf16.gmra.mxu3 %v14830_v59  ;;  %v9427_v3 = vld [vmem:[#allocation5 + $0x640] sm:$0xf]  ;;  %3672 = vmatpush.bf16.msrb.mxu2 %v8664_v50 }
 0x3b7   : > { %v4113_v35 = vmul.f32 %v4017_v45, %v13245_v24  ;;  %11711 = vtanh.f32 %v4395_v37  ;;  %v11129_v45 = vld [vmem:[#allocation5 + $0x654] sm:$0xf0] }
 0x3b8   : > { %v4773_v38 = vmul.f32 %v4677_v2, %v4485_v62  ;;  %v3308_v8 = vpop.f32.mrf.mxu2  ;;  %v3212_v16 = vpop.f32.mrf.mxu0  ;;  %v8853_v62 = vld [vmem:[#allocation5 + $0x1d8] sm:$0xf0]  ;;  %v9428_v2 = vor.u32 %v11129_v45, %v9427_v3 }
 0x3b9   : > { %v4209_v36 = vmul.f32 0.044715, %v4113_v35  ;;  %v3309_v55 = vadd.f32 %v3308_v8, %v3260_v18  ;;  %v3357_v22 = vpop.f32.mrf.mxu3  ;;  %v3213_v0 = vadd.f32 %v3212_v16, %v13107_v41  ;;  %v3261_v4 = vpop.f32.mrf.mxu1  ;;  %v8856_v35 = vor.u32 %v10982_v32, %v8853_v62  ;;  %v11123_v32 = vld [vmem:[#allocation5 + $0x624] sm:$0xf0]  ;;  %v10976_v62 = vld [vmem:[#allocation5 + $0x194] sm:$0xf] }
 0x3ba   : > { %v13256_v34 = vpack.c.bf16 %v4773_v38, %v4767_v44  ;;  %v9619_v44 = vld [vmem:[#allocation5 + $0x7c0] sm:$0xf]  ;;  %v11177_v38 = vld [vmem:[#allocation5 + $0x7d4] sm:$0xf0]  ;;  %3574 = vmatpush.bf16.msrb.mxu0 %v9428_v2 }
 0x3bb   : > { %v4305_v25 = vadd.f32 %v4209_v36, %v13245_v24  ;;  %v13260_v11 = vadd.f32 %v3357_v22, %v3309_v55  ;;  %v3262_v18 = vadd.f32 %v3261_v4, %v3213_v0  ;;  %v9620_v16 = vor.u32 %v11177_v38, %v9619_v44  ;;  %3721 = vmatpush.bf16.msrb.mxu3 %v8856_v35  ;;  %v10928_v55 = vld [vmem:[#allocation5 + $0x14] sm:$0xf]  ;;  %v8637_v22 = vld [vmem:[#allocation5 + $0x28] sm:$0xf0]  ;;  %v9403_v0 = vld [vmem:[#allocation5 + $0x610] sm:$0xf] }
 0x3bc   : > { %14854 = vst [vmem:[#allocation20_spill] sm:$0xff] %v13256_v34  ;;  %v8640_v45 = vor.u32 %v10928_v55, %v8637_v22  ;;  %v9404_v35 = vor.u32 %v11123_v32, %v9403_v0  ;;  %v8829_v44 = vld [vmem:[#allocation5 + $0x1a8] sm:$0xf0]  ;;  %v9595_v38 = vld [vmem:[#allocation5 + $0x790] sm:$0xf]  ;;  %v4497_v0 = vmul.f32 0.5, %v13245_v24 }
 0x3bd   : > { %v4401_v8 = vmul.f32 0.7978846, %v4305_v25  ;;  %v4023_v41 = vmul.f32 %v13260_v11, %v13260_v11  ;;  %3623 = vmatpush.bf16.msrb.mxu1 %v9620_v16  ;;  %v11712_v4 = vpop.eup %11711  ;;  %v8832_v34 = vor.u32 %v10976_v62, %v8829_v44 }
 0x3be   : > { %3673 = vmatpush.bf16.msrb.mxu2 %v8640_v45  ;;  %3575 = vmatpush.bf16.msrb.mxu0 %v9404_v35 }
 0x3bf   : > { %11713 = vtanh.f32 %v4401_v8  ;;  %v4119_v37 = vmul.f32 %v4023_v41, %v13260_v11  ;;  %v11171_v8 = vld [vmem:[#allocation5 + $0x7a4] sm:$0xf0]  ;;  %3722 = vmatpush.bf16.msrb.mxu3 %v8832_v34 }
 0x3c0   : > { %v3310_v36 = vpop.f32.mrf.mxu2  ;;  %v3215_v25 = vpop.f32.mrf.mxu0  ;;  %v9596_v59 = vor.u32 %v11171_v8, %v9595_v38 }
 0x3c1   : > { %v4215_v60 = vmul.f32 0.044715, %v4119_v37  ;;  %v3311_v1 = vadd.f32 %v3310_v36, %v3262_v18  ;;  %v3359_v3 = vpop.f32.mrf.mxu3  ;;  %v3216_v50 = vadd.f32 %v3215_v25, %v13121_v33  ;;  %v3264_v2 = vpop.f32.mrf.mxu1  ;;  %v4683_v37 = vadd.f32 1.0, %v11712_v4  ;;  %v14855_v36 = vld [vmem:[#allocation30_spill] sm:$0xff] }
 0x3c2   : > { %v4491_v33 = vmul.f32 0.5, %v13238_v30  ;;  %3624 = vmatpush.bf16.msrb.mxu1 %v9596_v59 }
 0x3c3   : > { %v4311_v41 = vadd.f32 %v4215_v60, %v13260_v11  ;;  %v3360_v16 = vadd.f32 %v3359_v3, %v3311_v1  ;;  %v3265_v18 = vadd.f32 %v3264_v2, %v3216_v50  ;;  %3410 = vmatmul.bf16.gmra.mxu0 %v14855_v36 }
 0x3c4   : > { %3459 = vmatmul.bf16.gmra.mxu1 %v14856_v13  ;;  %v4779_v4 = vmul.f32 %v4683_v37, %v4491_v33 }
 0x3c5   : > { %v11714_v55 = vpop.eup %11713  ;;  %v4029_v22 = vmul.f32 %v3360_v16, %v3360_v16  ;;  %3508 = vmatmul.bf16.gmra.mxu2 %v12326_v46  ;;  %v4407_v60 = vmul.f32 0.7978846, %v4311_v41 }
 0x3c6   : > { %v4689_v25 = vadd.f32 1.0, %v11714_v55  ;;  %3557 = vmatmul.bf16.gmra.mxu3 %v12328_v47 }
 0x3c7   : > { %v4125_v1 = vmul.f32 %v4029_v22, %v3360_v16  ;;  %11715 = vtanh.f32 %v4407_v60 }
 0x3c8   : > { %v4785_v3 = vmul.f32 %v4689_v25, %v4497_v0  ;;  %v3313_v45 = vpop.f32.mrf.mxu2  ;;  %v3217_v2 = vpop.f32.mrf.mxu0 }
 0x3c9   : > { %v4221_v32 = vmul.f32 0.044715, %v4125_v1  ;;  %v3314_v62 = vadd.f32 %v3313_v45, %v3265_v18  ;;  %v3362_v50 = vpop.f32.mrf.mxu3  ;;  %v3218_v30 = vadd.f32 %v3217_v2, %v13130_v20  ;;  %v3266_v24 = vpop.f32.mrf.mxu1  ;;  %v14858_v45 = vld [vmem:[#allocation32_spill] sm:$0xff]  ;;  %v4503_v2 = vmul.f32 0.5, %v13260_v11  ;;  %v11162_v11 = vld [vmem:[#allocation5 + $0x764] sm:$0xf] }
 0x3ca   : > { %v13273_v44 = vpack.c.bf16 %v4785_v3, %v4779_v4 }
 0x3cb   : > { %v4317_v38 = vadd.f32 %v4221_v32, %v3360_v16  ;;  %v13276_v8 = vadd.f32 %v3362_v50, %v3314_v62  ;;  %v3267_v35 = vadd.f32 %v3266_v24, %v3218_v30  ;;  %v14859_v50 = vld [vmem:[#allocation33_spill] sm:$0xff] }
 0x3cc   : > { %14857 = vst [vmem:[#allocation21_spill] sm:$0xff] %v13273_v44 }
 0x3cd   : > { %v4413_v41 = vmul.f32 0.7978846, %v4317_v38  ;;  %v4035_v59 = vmul.f32 %v13276_v8, %v13276_v8  ;;  %v11716_v18 = vpop.eup %11715 }
 0x3ce   : > { %v4695_v4 = vadd.f32 1.0, %v11716_v18 }
 0x3cf   : > { %11717 = vtanh.f32 %v4413_v41  ;;  %v4131_v34 = vmul.f32 %v4035_v59, %v13276_v8 }
 0x3d0   : > { %v3315_v37 = vpop.f32.mrf.mxu2  ;;  %v3220_v0 = vpop.f32.mrf.mxu0 }
 0x3d1   : > { %v4227_v55 = vmul.f32 0.044715, %v4131_v34  ;;  %v3316_v22 = vadd.f32 %v3315_v37, %v3267_v35  ;;  %v3364_v33 = vpop.f32.mrf.mxu3  ;;  %v3221_v20 = vadd.f32 %v3220_v0, %v13143_v56  ;;  %v3269_v25 = vpop.f32.mrf.mxu1  ;;  %v4509_v56 = vmul.f32 0.5, %v3360_v16  ;;  %v9573_v16 = vld [vmem:[#allocation5 + $0x778] sm:$0xf0] }
 0x3d2   : > { %v4791_v35 = vmul.f32 %v4695_v4, %v4503_v2  ;;  %v9576_v4 = vor.u32 %v11162_v11, %v9573_v16  ;;  %v9765_v2 = vld [vmem:[#allocation5 + $0x8f8] sm:$0xf0] }
 0x3d3   : > { %v4323_v60 = vadd.f32 %v4227_v55, %v13276_v8  ;;  %v13283_v1 = vadd.f32 %v3364_v33, %v3316_v22  ;;  %v3270_v3 = vadd.f32 %v3269_v25, %v3221_v20  ;;  %3415 = vmatmul.bf16.gmra.mxu0 %v14858_v45  ;;  %v11066_v20 = vld [vmem:[#allocation5 + $0x464] sm:$0xf] }
 0x3d4   : > { %3464 = vmatmul.bf16.gmra.mxu1 %v14859_v50  ;;  %3862 = vmatpush.bf16.msra.mxu2 %v9576_v4  ;;  %v11108_v4 = vld [vmem:[#allocation5 + $0x5b4] sm:$0xf] }
 0x3d5   : > { %v11718_v32 = vpop.eup %11717  ;;  %v4041_v62 = vmul.f32 %v13283_v1, %v13283_v1  ;;  %3513 = vmatmul.bf16.gmra.mxu2 %v14833_v23  ;;  %v4419_v24 = vmul.f32 0.7978846, %v4323_v60 }
 0x3d6   : > { %v4701_v30 = vadd.f32 1.0, %v11718_v32  ;;  %3562 = vmatmul.bf16.gmra.mxu3 %v14834_v48  ;;  %v9189_v32 = vld [vmem:[#allocation5 + $0x478] sm:$0xf0] }
 0x3d7   : > { %v4137_v38 = vmul.f32 %v4041_v62, %v13283_v1  ;;  %11719 = vtanh.f32 %v4419_v24  ;;  %v11210_v62 = vld [vmem:[#allocation5 + $0x8e4] sm:$0xf] }
 0x3d8   : > { %v4797_v41 = vmul.f32 %v4701_v30, %v4509_v56  ;;  %v3318_v59 = vpop.f32.mrf.mxu2  ;;  %v3222_v55 = vpop.f32.mrf.mxu0  ;;  %v9192_v56 = vor.u32 %v11066_v20, %v9189_v32  ;;  %v9768_v30 = vor.u32 %v11210_v62, %v9765_v2  ;;  %v11204_v20 = vld [vmem:[#allocation5 + $0x8b4] sm:$0xf]  ;;  %v9357_v2 = vld [vmem:[#allocation5 + $0x5c8] sm:$0xf0] }
 0x3d9   : > { %v4233_v34 = vmul.f32 0.044715, %v4137_v38  ;;  %v3319_v37 = vadd.f32 %v3318_v59, %v3270_v3  ;;  %v3367_v18 = vpop.f32.mrf.mxu3  ;;  %v3223_v33 = vadd.f32 %v3222_v55, %v13151_v12  ;;  %v3271_v0 = vpop.f32.mrf.mxu1  ;;  %v11114_v38 = vld [vmem:[#allocation5 + $0x5e4] sm:$0xf]  ;;  %v9549_v55 = vld [vmem:[#allocation5 + $0x748] sm:$0xf0] }
 0x3da   : > { %v13293_v22 = vpack.c.bf16 %v4797_v41, %v4791_v35  ;;  %v9381_v35 = vld [vmem:[#allocation5 + $0x5f8] sm:$0xf0]  ;;  %v11156_v41 = vld [vmem:[#allocation5 + $0x734] sm:$0xf]  ;;  %3764 = vmatpush.bf16.msra.mxu0 %v9192_v56  ;;  %3911 = vmatpush.bf16.msra.mxu3 %v9768_v30  ;;  %v9360_v30 = vor.u32 %v11108_v4, %v9357_v2  ;;  %v11054_v2 = vld [vmem:[#allocation5 + $0x404] sm:$0xf] }
 0x3db   : > { %v4329_v25 = vadd.f32 %v4233_v34, %v13283_v1  ;;  %v13297_v60 = vadd.f32 %v3367_v18, %v3319_v37  ;;  %v3272_v3 = vadd.f32 %v3271_v0, %v3223_v33  ;;  %v9384_v24 = vor.u32 %v11114_v38, %v9381_v35  ;;  %v13301_v34 = vld [vmem:[#allocation7] sm:$0x3f]  ;;  %v11060_v33 = vld [vmem:[#allocation5 + $0x434] sm:$0xf]  ;;  %v9165_v0 = vld [vmem:[#allocation5 + $0x448] sm:$0xf0] }
 0x3dc   : > { %14860 = vst [vmem:[#allocation22_spill] sm:$0xff] %v13293_v22  ;;  %v13304_v37 = vperm.slane %v13301_v34, 4  ;;  %v9552_v18 = vor.u32 %v11156_v41, %v9549_v55  ;;  %v9168_v16 = vor.u32 %v11060_v33, %v9165_v0  ;;  %v14861_v0 = vld [vmem:[#allocation36_spill] sm:$0xff] }
 0x3dd   : > { %v4425_v12 = vmul.f32 0.7978846, %v4329_v25  ;;  %v4047_v59 = vmul.f32 %v13297_v60, %v13297_v60  ;;  %3813 = vmatpush.bf16.msra.mxu1 %v9384_v24  ;;  %v9741_v25 = vld [vmem:[#allocation5 + $0x8c8] sm:$0xf0]  ;;  %v11720_v38 = vpop.eup %11719 }
 0x3de   : > { %v9744_v62 = vor.u32 %v11204_v20, %v9741_v25  ;;  %3863 = vmatpush.bf16.msra.mxu2 %v9552_v18  ;;  %3765 = vmatpush.bf16.msra.mxu0 %v9168_v16  ;;  %v4707_v55 = vadd.f32 1.0, %v11720_v38  ;;  %v14862_v18 = vld [vmem:[#allocation37_spill] sm:$0xff]  ;;  %v4521_v16 = vmul.f32 0.5, %v13283_v1  ;;  %v9141_v38 = vld [vmem:[#allocation5 + $0x418] sm:$0xf0] }
 0x3df   : > { %11721 = vtanh.f32 %v4425_v12  ;;  %v4143_v11 = vmul.f32 %v4047_v59, %v13297_v60 }
 0x3e0   : > { %v3320_v32 = vpop.f32.mrf.mxu2  ;;  %v3381_v56 = vpop.f32.mrf.mxu0  ;;  %3912 = vmatpush.bf16.msra.mxu3 %v9744_v62 }
 0x3e1   : > { %v4239_v35 = vmul.f32 0.044715, %v4143_v11  ;;  %v3321_v22 = vadd.f32 %v3320_v32, %v3272_v3  ;;  %v3369_v44 = vpop.f32.mrf.mxu3  ;;  %v3382_v41 = vadd.f32 %v3381_v56, %v13304_v37  ;;  %v3430_v12 = vpop.f32.mrf.mxu1  ;;  %3814 = vmatpush.bf16.msra.mxu1 %v9360_v30  ;;  %v4515_v3 = vmul.f32 0.5, %v13276_v8 }
 0x3e3   : > { %v4335_v59 = vadd.f32 %v4239_v35, %v13297_v60  ;;  %v3370_v24 = vadd.f32 %v3369_v44, %v3321_v22  ;;  %v3431_v33 = vadd.f32 %v3430_v12, %v3382_v41  ;;  %3576 = vmatmul.bf16.vlgmr.msrb.gmra.mxu0 %v14861_v0  ;;  %v11150_v44 = vld [vmem:[#allocation5 + $0x704] sm:$0xf]  ;;  %v9525_v22 = vld [vmem:[#allocation5 + $0x718] sm:$0xf0]  ;;  %v4803_v56 = vmul.f32 %v4707_v55, %v4515_v3 }
 0x3e4   : > { %3625 = vmatmul.bf16.vlgmr.msrb.gmra.mxu1 %v14862_v18  ;;  %v9528_v62 = vor.u32 %v11150_v44, %v9525_v22  ;;  %v11198_v35 = vld [vmem:[#allocation5 + $0x884] sm:$0xf]  ;;  %v9144_v41 = vor.u32 %v11054_v2, %v9141_v38  ;;  %v9717_v12 = vld [vmem:[#allocation5 + $0x898] sm:$0xf0] }
 0x3e5   : > { %v11722_v20 = vpop.eup %11721  ;;  %v4431_v11 = vmul.f32 0.7978846, %v4335_v59  ;;  %v4053_v25 = vmul.f32 %v3370_v24, %v3370_v24  ;;  %3674 = vmatmul.bf16.vlgmr.msrb.gmra.mxu2 %v14838_v49  ;;  %v9720_v1 = vor.u32 %v11198_v35, %v9717_v12  ;;  %v11102_v55 = vld [vmem:[#allocation5 + $0x584] sm:$0xf]  ;;  %v9333_v3 = vld [vmem:[#allocation5 + $0x598] sm:$0xf0] }
 0x3e6   : > { %v4713_v4 = vadd.f32 1.0, %v11722_v20  ;;  %3723 = vmatmul.bf16.vlgmr.msrb.gmra.mxu3 %v14839_v9  ;;  %3864 = vmatpush.bf16.msra.mxu2 %v9528_v62  ;;  %v4527_v12 = vmul.f32 0.5, %v13297_v60 }
 0x3e7   : > { %v4149_v32 = vmul.f32 %v4053_v25, %v3370_v24  ;;  %3766 = vmatpush.bf16.msra.mxu0 %v9144_v41  ;;  %11723 = vtanh.f32 %v4431_v11  ;;  %3913 = vmatpush.bf16.msra.mxu3 %v9720_v1 }
 0x3e8   : > { %v4809_v8 = vmul.f32 %v4713_v4, %v4521_v16  ;;  %v3479_v30 = vpop.f32.mrf.mxu2  ;;  %v3383_v23 = vpop.f32.mrf.mxu0  ;;  %v9336_v4 = vor.u32 %v11102_v55, %v9333_v3  ;;  %v11048_v55 = vld [vmem:[#allocation5 + $0x3d4] sm:$0xf]  ;;  %v9117_v3 = vld [vmem:[#allocation5 + $0x3e8] sm:$0xf0] }
 0x3e9   : > { %v4245_v59 = vmul.f32 0.044715, %v4149_v32  ;;  %v3480_v48 = vadd.f32 %v3479_v30, %v3431_v33  ;;  %v3528_v49 = vpop.f32.mrf.mxu3  ;;  %v3384_v9 = vadd.f32 %v3383_v23, %v13304_v37  ;;  %v3432_v25 = vpop.f32.mrf.mxu1  ;;  %v14864_v30 = vld [vmem:[#allocation38_spill] sm:$0xff] }
 0x3ea   : > { %v13315_v20 = vpack.c.bf16 %v4809_v8, %v4803_v56  ;;  %3815 = vmatpush.bf16.msra.mxu1 %v9336_v4 }
 0x3eb   : > { %v4341_v44 = vadd.f32 %v4245_v59, %v3370_v24  ;;  %v13318_v22 = vadd.f32 %v3528_v49, %v3480_v48  ;;  %v3433_v16 = vadd.f32 %v3432_v25, %v3384_v9  ;;  %v14865_v59 = vld [vmem:[#allocation39_spill] sm:$0xff]  ;;  %v4533_v49 = vmul.f32 0.5, %v3370_v24  ;;  %v11144_v9 = vld [vmem:[#allocation5 + $0x6d4] sm:$0xf]  ;;  %v9501_v25 = vld [vmem:[#allocation5 + $0x6e8] sm:$0xf0] }
 0x3ec   : > { %14863 = vst [vmem:[#allocation23_spill] sm:$0xff] %v13315_v20 }
 0x3ed   : > { %v4437_v33 = vmul.f32 0.7978846, %v4341_v44  ;;  %v11724_v62 = vpop.eup %11723  ;;  %v9504_v44 = vor.u32 %v11144_v9, %v9501_v25 }
 0x3ee   : > { %v4719_v48 = vadd.f32 1.0, %v11724_v62  ;;  %v9120_v62 = vor.u32 %v11048_v55, %v9117_v3 }
 0x3ef   : > { %11725 = vtanh.f32 %v4437_v33  ;;  %3865 = vmatpush.bf16.msra.mxu2 %v9504_v44 }
 0x3f0   : > { %v3481_v32 = vpop.f32.mrf.mxu2  ;;  %v3386_v35 = vpop.f32.mrf.mxu0  ;;  %v4815_v4 = vmul.f32 %v4719_v48, %v4527_v12  ;;  %3767 = vmatpush.bf16.msra.mxu0 %v9120_v62  ;;  %v9309_v48 = vld [vmem:[#allocation5 + $0x568] sm:$0xf0] }
 0x3f1   : > { %v3482_v2 = vadd.f32 %v3481_v32, %v3433_v16  ;;  %v3530_v38 = vpop.f32.mrf.mxu3  ;;  %v3387_v23 = vadd.f32 %v3386_v35, %v13304_v37  ;;  %v3435_v56 = vpop.f32.mrf.mxu1  ;;  %v11192_v16 = vld [vmem:[#allocation5 + $0x854] sm:$0xf] }
 0x3f3   : > { %v13321_v11 = vadd.f32 %v3530_v38, %v3482_v2  ;;  %v3436_v8 = vadd.f32 %v3435_v56, %v3387_v23  ;;  %3581 = vmatmul.bf16.gmra.mxu0 %v14864_v30  ;;  %v9693_v2 = vld [vmem:[#allocation5 + $0x868] sm:$0xf0] }
 0x3f4   : > { %3630 = vmatmul.bf16.gmra.mxu1 %v14865_v59 }
 0x3f5   : > { %v11726_v41 = vpop.eup %11725  ;;  %3679 = vmatmul.bf16.gmra.mxu2 %v14841_v29  ;;  %v9696_v29 = vor.u32 %v11192_v16, %v9693_v2  ;;  %v9093_v2 = vld [vmem:[#allocation5 + $0x3b8] sm:$0xf0] }
 0x3f6   : > { %v4725_v1 = vadd.f32 1.0, %v11726_v41  ;;  %3728 = vmatmul.bf16.gmra.mxu3 %v14842_v39  ;;  %v11096_v41 = vld [vmem:[#allocation5 + $0x554] sm:$0xf] }
 0x3f7   : > { %3914 = vmatpush.bf16.msra.mxu3 %v9696_v29 }
 0x3f8   : > { %v4821_v33 = vmul.f32 %v4725_v1, %v4533_v49  ;;  %v3484_v32 = vpop.f32.mrf.mxu2  ;;  %v3388_v35 = vpop.f32.mrf.mxu0  ;;  %v9312_v49 = vor.u32 %v11096_v41, %v9309_v48 }
 0x3f9   : > { %v3485_v60 = vadd.f32 %v3484_v32, %v3436_v8  ;;  %v3533_v38 = vpop.f32.mrf.mxu3  ;;  %v3389_v39 = vadd.f32 %v3388_v35, %v13304_v37  ;;  %v3437_v23 = vpop.f32.mrf.mxu1  ;;  %v11042_v32 = vld [vmem:[#allocation5 + $0x3a4] sm:$0xf] }
 0x3fa   : > { %v13328_v24 = vpack.c.bf16 %v4821_v33, %v4815_v4  ;;  %3816 = vmatpush.bf16.msra.mxu1 %v9312_v49  ;;  %v11138_v4 = vld [vmem:[#allocation5 + $0x6a4] sm:$0xf]  ;;  %v9477_v33 = vld [vmem:[#allocation5 + $0x6b8] sm:$0xf0]  ;;  %v9096_v29 = vor.u32 %v11042_v32, %v9093_v2  ;;  %v14867_v2 = vld [vmem:[#allocation40_spill] sm:$0xff] }
 0x3fb   : > { %v13331_v56 = vadd.f32 %v3533_v38, %v3485_v60  ;;  %v3438_v12 = vadd.f32 %v3437_v23, %v3389_v39  ;;  %v9480_v62 = vor.u32 %v11138_v4, %v9477_v33  ;;  %v11186_v60 = vld [vmem:[#allocation5 + $0x824] sm:$0xf]  ;;  %v9669_v38 = vld [vmem:[#allocation5 + $0x838] sm:$0xf0] }
 0x3fc   : > { %14866 = vst [vmem:[#allocation24_spill] sm:$0xff] %v13328_v24  ;;  %v9672_v39 = vor.u32 %v11186_v60, %v9669_v38  ;;  %3768 = vmatpush.bf16.msra.mxu0 %v9096_v29  ;;  %v11132_v60 = vld [vmem:[#allocation5 + $0x674] sm:$0xf]  ;;  %v9453_v38 = vld [vmem:[#allocation5 + $0x688] sm:$0xf0] }
 0x3fd   : > { %3866 = vmatpush.bf16.msra.mxu2 %v9480_v62  ;;  %v9456_v29 = vor.u32 %v11132_v60, %v9453_v38 }
 0x3fe   : > { %3915 = vmatpush.bf16.msra.mxu3 %v9672_v39  ;;  %v9069_v39 = vld [vmem:[#allocation5 + $0x388] sm:$0xf0] }
 0x400   : > { %v3486_v1 = vpop.f32.mrf.mxu2  ;;  %v3391_v25 = vpop.f32.mrf.mxu0 }
 0x401   : > { %v3487_v8 = vadd.f32 %v3486_v1, %v3438_v12  ;;  %v3535_v9 = vpop.f32.mrf.mxu3  ;;  %v3392_v44 = vadd.f32 %v3391_v25, %v13304_v37  ;;  %v3440_v55 = vpop.f32.mrf.mxu1  ;;  %v9285_v1 = vld [vmem:[#allocation5 + $0x538] sm:$0xf0]  ;;  %3867 = vmatpush.bf16.msra.mxu2 %v9456_v29 }
 0x403   : > { %v13334_v3 = vadd.f32 %v3535_v9, %v3487_v8  ;;  %v3441_v16 = vadd.f32 %v3440_v55, %v3392_v44  ;;  %3586 = vmatmul.bf16.gmra.mxu0 %v12397_v19 }
 0x404   : > { %3635 = vmatmul.bf16.gmra.mxu1 %v12399_v31 }
 0x405   : > { %3684 = vmatmul.bf16.gmra.mxu2 %v14843_v53 }
 0x406   : > { %3733 = vmatmul.bf16.gmra.mxu3 %v14844_v7  ;;  %v11090_v7 = vld [vmem:[#allocation5 + $0x524] sm:$0xf] }
 0x407   : > { %v9288_v9 = vor.u32 %v11090_v7, %v9285_v1 }
 0x408   : > { %v3489_v35 = vpop.f32.mrf.mxu2  ;;  %v3393_v48 = vpop.f32.mrf.mxu0 }
 0x409   : > { %v3490_v23 = vadd.f32 %v3489_v35, %v3441_v16  ;;  %v3538_v41 = vpop.f32.mrf.mxu3  ;;  %v3394_v12 = vadd.f32 %v3393_v48, %v13304_v37  ;;  %v3442_v49 = vpop.f32.mrf.mxu1  ;;  %3817 = vmatpush.bf16.msra.mxu1 %v9288_v9  ;;  %v11036_v35 = vld [vmem:[#allocation5 + $0x374] sm:$0xf] }
 0x40b   : > { %v13341_v53 = vadd.f32 %v3538_v41, %v3490_v23  ;;  %v3443_v8 = vadd.f32 %v3442_v49, %v3394_v12  ;;  %v11180_v23 = vld [vmem:[#allocation5 + $0x7f4] sm:$0xf]  ;;  %v9645_v41 = vld [vmem:[#allocation5 + $0x808] sm:$0xf0]  ;;  %v9072_v12 = vor.u32 %v11036_v35, %v9069_v39 }
 0x40c   : > { %v9648_v49 = vor.u32 %v11180_v23, %v9645_v41  ;;  %v14868_v23 = vld [vmem:[#allocation41_spill] sm:$0xff]  ;;  %v14869_v41 = vld [vmem:[#allocation42_spill] sm:$0xff] }
 0x40d   : > { %3769 = vmatpush.bf16.msra.mxu0 %v9072_v12  ;;  %v9429_v12 = vld [vmem:[#allocation5 + $0x658] sm:$0xf0] }
 0x40e   : > { %3916 = vmatpush.bf16.msra.mxu3 %v9648_v49  ;;  %v11030_v49 = vld [vmem:[#allocation5 + $0x344] sm:$0xf] }
 0x410   : > { %v3491_v25 = vpop.f32.mrf.mxu2  ;;  %v3396_v4 = vpop.f32.mrf.mxu0 }
 0x411   : > { %v3492_v44 = vadd.f32 %v3491_v25, %v3443_v8  ;;  %v3540_v55 = vpop.f32.mrf.mxu3  ;;  %v3397_v16 = vadd.f32 %v3396_v4, %v13304_v37  ;;  %v3445_v33 = vpop.f32.mrf.mxu1 }
 0x413   : > { %v13344_v32 = vadd.f32 %v3540_v55, %v3492_v44  ;;  %v3446_v62 = vadd.f32 %v3445_v33, %v3397_v16  ;;  %3591 = vmatmul.bf16.gmra.mxu0 %v12415_v63  ;;  %v9261_v44 = vld [vmem:[#allocation5 + $0x508] sm:$0xf0] }
 0x414   : > { %3640 = vmatmul.bf16.gmra.mxu1 %v14867_v2 }
 0x415   : > { %3689 = vmatmul.bf16.gmra.mxu2 %v14846_v5 }
 0x416   : > { %3738 = vmatmul.bf16.gmra.mxu3 %v14847_v21  ;;  %v11084_v21 = vld [vmem:[#allocation5 + $0x4f4] sm:$0xf] }
 0x417   : > { %v9264_v4 = vor.u32 %v11084_v21, %v9261_v44 }
 0x418   : > { %v3494_v48 = vpop.f32.mrf.mxu2  ;;  %v3398_v8 = vpop.f32.mrf.mxu0 }
 0x419   : > { %v3495_v7 = vadd.f32 %v3494_v48, %v3446_v62  ;;  %v3543_v1 = vpop.f32.mrf.mxu3  ;;  %v3399_v9 = vadd.f32 %v3398_v8, %v13304_v37  ;;  %v3447_v25 = vpop.f32.mrf.mxu1  ;;  %3818 = vmatpush.bf16.msra.mxu1 %v9264_v4  ;;  %v11126_v48 = vld [vmem:[#allocation5 + $0x644] sm:$0xf] }
 0x41a   : > { %v11174_v8 = vld [vmem:[#allocation5 + $0x7c4] sm:$0xf] }
 0x41b   : > { %v13351_v5 = vadd.f32 %v3543_v1, %v3495_v7  ;;  %v3448_v55 = vadd.f32 %v3447_v25, %v3399_v9  ;;  %v9432_v7 = vor.u32 %v11126_v48, %v9429_v12  ;;  %v9045_v1 = vld [vmem:[#allocation5 + $0x358] sm:$0xf0] }
 0x41c   : > { %v9621_v9 = vld [vmem:[#allocation5 + $0x7d8] sm:$0xf0]  ;;  %v9048_v21 = vor.u32 %v11030_v49, %v9045_v1 }
 0x41d   : > { %v9624_v44 = vor.u32 %v11174_v8, %v9621_v9  ;;  %3868 = vmatpush.bf16.msra.mxu2 %v9432_v7 }
 0x41e   : > { %3770 = vmatpush.bf16.msra.mxu0 %v9048_v21  ;;  %v14871_v21 = vld [vmem:[#allocation44_spill] sm:$0xff] }
 0x41f   : > { %3917 = vmatpush.bf16.msra.mxu3 %v9624_v44  ;;  %v11120_v44 = vld [vmem:[#allocation5 + $0x614] sm:$0xf] }
 0x420   : > { %v3496_v16 = vpop.f32.mrf.mxu2  ;;  %v3401_v38 = vpop.f32.mrf.mxu0 }
 0x421   : > { %v3497_v33 = vadd.f32 %v3496_v16, %v3448_v55  ;;  %v3545_v60 = vpop.f32.mrf.mxu3  ;;  %v3402_v62 = vadd.f32 %v3401_v38, %v13304_v37  ;;  %v3450_v35 = vpop.f32.mrf.mxu1  ;;  %v9237_v38 = vld [vmem:[#allocation5 + $0x4d8] sm:$0xf0] }
 0x423   : > { %v13354_v29 = vadd.f32 %v3545_v60, %v3497_v33  ;;  %v3451_v39 = vadd.f32 %v3450_v35, %v3402_v62  ;;  %3596 = vmatmul.bf16.gmra.mxu0 %v14868_v23 }
 0x424   : > { %3645 = vmatmul.bf16.gmra.mxu1 %v14869_v41 }
 0x425   : > { %3694 = vmatmul.bf16.gmra.mxu2 %v14849_v40 }
 0x426   : > { %3743 = vmatmul.bf16.gmra.mxu3 %v14850_v6  ;;  %v11078_v6 = vld [vmem:[#allocation5 + $0x4c4] sm:$0xf] }
 0x427   : > { %v9240_v35 = vor.u32 %v11078_v6, %v9237_v38  ;;  %v9597_v6 = vld [vmem:[#allocation5 + $0x7a8] sm:$0xf0] }
 0x428   : > { %v3499_v25 = vpop.f32.mrf.mxu2  ;;  %v3403_v16 = vpop.f32.mrf.mxu0 }
 0x429   : > { %v3500_v55 = vadd.f32 %v3499_v25, %v3451_v39  ;;  %v3548_v4 = vpop.f32.mrf.mxu3  ;;  %v3404_v33 = vadd.f32 %v3403_v16, %v13304_v37  ;;  %v3452_v60 = vpop.f32.mrf.mxu1  ;;  %3819 = vmatpush.bf16.msra.mxu1 %v9240_v35  ;;  %v14870_v25 = vld [vmem:[#allocation43_spill] sm:$0xff] }
 0x42b   : > { %v13361_v40 = vadd.f32 %v3548_v4, %v3500_v55  ;;  %v3453_v62 = vadd.f32 %v3452_v60, %v3404_v33  ;;  %v9405_v55 = vld [vmem:[#allocation5 + $0x628] sm:$0xf0]  ;;  %v11024_v4 = vld [vmem:[#allocation5 + $0x314] sm:$0xf] }
 0x42c   : > { %v9408_v16 = vor.u32 %v11120_v44, %v9405_v55  ;;  %v9021_v33 = vld [vmem:[#allocation5 + $0x328] sm:$0xf0]  ;;  %v11168_v60 = vld [vmem:[#allocation5 + $0x794] sm:$0xf] }
 0x42d   : > { %v9600_v35 = vor.u32 %v11168_v60, %v9597_v6 }
 0x42e   : > { %3869 = vmatpush.bf16.msra.mxu2 %v9408_v16 }
 0x42f   : > { %3918 = vmatpush.bf16.msra.mxu3 %v9600_v35 }
 0x430   : > { %v3501_v48 = vpop.f32.mrf.mxu2  ;;  %v3406_v1 = vpop.f32.mrf.mxu0 }
 0x431   : > { %v3502_v12 = vadd.f32 %v3501_v48, %v3453_v62  ;;  %v3550_v49 = vpop.f32.mrf.mxu3  ;;  %v3407_v39 = vadd.f32 %v3406_v1, %v13304_v37  ;;  %v3455_v8 = vpop.f32.mrf.mxu1  ;;  %v9024_v62 = vor.u32 %v11024_v4, %v9021_v33 }
 0x433   : > { %v13364_v7 = vadd.f32 %v3550_v49, %v3502_v12  ;;  %v3456_v9 = vadd.f32 %v3455_v8, %v3407_v39  ;;  %3601 = vmatmul.bf16.gmra.mxu0 %v14870_v25  ;;  %v9213_v8 = vld [vmem:[#allocation5 + $0x4a8] sm:$0xf0] }
 0x434   : > { %3650 = vmatmul.bf16.gmra.mxu1 %v14871_v21  ;;  %3771 = vmatpush.bf16.msra.mxu0 %v9024_v62 }
 0x435   : > { %3699 = vmatmul.bf16.gmra.mxu2 %v14852_v28 }
 0x436   : > { %3748 = vmatmul.bf16.gmra.mxu3 %v14853_v58  ;;  %v11072_v58 = vld [vmem:[#allocation5 + $0x494] sm:$0xf] }
 0x437   : > { %v9216_v55 = vor.u32 %v11072_v58, %v9213_v8 }
 0x438   : > { %v3504_v38 = vpop.f32.mrf.mxu2  ;;  %v3408_v49 = vpop.f32.mrf.mxu0 }
 0x439   : > { %v3505_v48 = vadd.f32 %v3504_v38, %v3456_v9  ;;  %v3553_v12 = vpop.f32.mrf.mxu3  ;;  %v3409_v1 = vadd.f32 %v3408_v49, %v13304_v37  ;;  %v3457_v39 = vpop.f32.mrf.mxu1  ;;  %3820 = vmatpush.bf16.msra.mxu1 %v9216_v55 }
 0x43b   : > { %v13371_v28 = vadd.f32 %v3553_v12, %v3505_v48  ;;  %v3458_v44 = vadd.f32 %v3457_v39, %v3409_v1 }
 0x440   : > { %v3506_v24 = vpop.f32.mrf.mxu2  ;;  %v3411_v33 = vpop.f32.mrf.mxu0 }
 0x441   : > { %v3507_v20 = vadd.f32 %v3506_v24, %v3458_v44  ;;  %v3555_v4 = vpop.f32.mrf.mxu3  ;;  %v3412_v9 = vadd.f32 %v3411_v33, %v13304_v37  ;;  %v3460_v60 = vpop.f32.mrf.mxu1 }
 0x443   : > { %v13374_v16 = vadd.f32 %v3555_v4, %v3507_v20  ;;  %v3461_v6 = vadd.f32 %v3460_v60, %v3412_v9  ;;  %3606 = vmatmul.bf16.gmra.mxu0 %v12469_v17  ;;  %v14872_v4 = vld [vmem:[#allocation47_spill] sm:$0xff] }
 0x444   : > { %3655 = vmatmul.bf16.gmra.mxu1 %v14822_v61 }
 0x445   : > { %3704 = vmatmul.bf16.gmra.mxu2 %v14855_v36 }
 0x446   : > { %3753 = vmatmul.bf16.gmra.mxu3 %v14856_v13 }
 0x448   : > { %v3509_v38 = vpop.f32.mrf.mxu2  ;;  %v3413_v24 = vpop.f32.mrf.mxu0 }
 0x449   : > { %v3510_v62 = vadd.f32 %v3509_v38, %v3461_v6  ;;  %v3558_v35 = vpop.f32.mrf.mxu3  ;;  %v3414_v48 = vadd.f32 %v3413_v24, %v13304_v37  ;;  %v3462_v12 = vpop.f32.mrf.mxu1  ;;  %v10323_v38 = vld [vmem:[#allocation8 + $0x450] sm:$0xf] }
 0x44b   : > { %v13381_v49 = vadd.f32 %v3558_v35, %v3510_v62  ;;  %v3463_v20 = vadd.f32 %v3462_v12, %v3414_v48  ;;  %v11355_v62 = vld [vmem:[#allocation8 + $0x464] sm:$0xf0]  ;;  %v9939_v35 = vld [vmem:[#allocation8 + $0x150] sm:$0xf] }
 0x44c   : > { %v10324_v12 = vor.u32 %v11355_v62, %v10323_v38 }
 0x44e   : > { %6712 = vmatpush.bf16.msrb.mxu2 %v10324_v12 }
 0x450   : > { %v3511_v1 = vpop.f32.mrf.mxu2  ;;  %v3416_v8 = vpop.f32.mrf.mxu0 }
 0x451   : > { %v3512_v39 = vadd.f32 %v3511_v1, %v3463_v20  ;;  %v3560_v58 = vpop.f32.mrf.mxu3  ;;  %v3417_v44 = vadd.f32 %v3416_v8, %v13304_v37  ;;  %v3465_v55 = vpop.f32.mrf.mxu1  ;;  %v11259_v20 = vld [vmem:[#allocation8 + $0x164] sm:$0xf0]  ;;  %v10515_v1 = vld [vmem:[#allocation8 + $0x5d0] sm:$0xf] }
 0x452   : > { %v9940_v8 = vor.u32 %v11259_v20, %v9939_v35  ;;  %v11349_v20 = vld [vmem:[#allocation8 + $0x434] sm:$0xf0] }
 0x453   : > { %v13384_v36 = vadd.f32 %v3560_v58, %v3512_v39  ;;  %v3466_v13 = vadd.f32 %v3465_v55, %v3417_v44  ;;  %3611 = vmatmul.bf16.gmra.mxu0 %v14835_v10  ;;  %v11403_v39 = vld [vmem:[#allocation8 + $0x5e4] sm:$0xf0]  ;;  %v10131_v44 = vld [vmem:[#allocation8 + $0x2d0] sm:$0xf] }
 0x454   : > { %3660 = vmatmul.bf16.gmra.mxu1 %v14872_v4  ;;  %6614 = vmatpush.bf16.msrb.mxu0 %v9940_v8  ;;  %v11253_v8 = vld [vmem:[#allocation8 + $0x134] sm:$0xf0] }
 0x455   : > { %3709 = vmatmul.bf16.gmra.mxu2 %v14858_v45  ;;  %v10516_v45 = vor.u32 %v11403_v39, %v10515_v1 }
 0x456   : > { %3758 = vmatmul.bf16.gmra.mxu3 %v14859_v50  ;;  %v11307_v50 = vld [vmem:[#allocation8 + $0x2e4] sm:$0xf0] }
 0x457   : > { %6761 = vmatpush.bf16.msrb.mxu3 %v10516_v45  ;;  %v10491_v45 = vld [vmem:[#allocation8 + $0x5a0] sm:$0xf] }
 0x458   : > { %v3514_v33 = vpop.f32.mrf.mxu2  ;;  %v3418_v6 = vpop.f32.mrf.mxu0 }
 0x459   : > { %v3515_v9 = vadd.f32 %v3514_v33, %v3466_v13  ;;  %v3563_v60 = vpop.f32.mrf.mxu3  ;;  %v3419_v24 = vadd.f32 %v3418_v6, %v13304_v37  ;;  %v3467_v48 = vpop.f32.mrf.mxu1  ;;  %v10132_v13 = vor.u32 %v11307_v50, %v10131_v44  ;;  %v11397_v50 = vld [vmem:[#allocation8 + $0x5b4] sm:$0xf0] }
 0x45b   : > { %v13391_v58 = vadd.f32 %v3563_v60, %v3515_v9  ;;  %v3468_v55 = vadd.f32 %v3467_v48, %v3419_v24  ;;  %6663 = vmatpush.bf16.msrb.mxu1 %v10132_v13  ;;  %v13402_v60 = vperm.slane %v13301_v34, 5  ;;  %v11301_v13 = vld [vmem:[#allocation8 + $0x2b4] sm:$0xf0] }
 0x460   : > { %v3516_v33 = vpop.f32.mrf.mxu2  ;;  %v3577_v6 = vpop.f32.mrf.mxu0 }
 0x461   : > { %v3517_v4 = vadd.f32 %v3516_v33, %v3468_v55  ;;  %v3565_v37 = vpop.f32.mrf.mxu3  ;;  %v3578_v38 = vadd.f32 %v3577_v6, %v13318_v22  ;;  %v3626_v62 = vpop.f32.mrf.mxu1  ;;  %v10107_v55 = vld [vmem:[#allocation8 + $0x2a0] sm:$0xf]  ;;  %v10492_v6 = vor.u32 %v11397_v50, %v10491_v45 }
 0x463   : > { %v13394_v10 = vadd.f32 %v3565_v37, %v3517_v4  ;;  %v13396_v9 = vadd.f32 %v3626_v62, %v3578_v38  ;;  %3772 = vmatmul.bf16.vlgmr.msra.gmra.mxu0 %v12206_v54  ;;  %v10299_v54 = vld [vmem:[#allocation8 + $0x420] sm:$0xf]  ;;  %v10108_v38 = vor.u32 %v11301_v13, %v10107_v55  ;;  %6762 = vmatpush.bf16.msrb.mxu3 %v10492_v6  ;;  %v10275_v55 = vld [vmem:[#allocation8 + $0x3f0] sm:$0xf] }
 0x464   : > { %3821 = vmatmul.bf16.vlgmr.msra.gmra.mxu1 %v12208_v57  ;;  %v9915_v57 = vld [vmem:[#allocation8 + $0x120] sm:$0xf]  ;;  %v10300_v39 = vor.u32 %v11349_v20, %v10299_v54  ;;  %v9891_v13 = vld [vmem:[#allocation8 + $0xf0] sm:$0xf] }
 0x465   : > { %3870 = vmatmul.bf16.vlgmr.msra.gmra.mxu2 %v14861_v0  ;;  %v3964_v35 = vmul.f32 %v13396_v9, %v13396_v9  ;;  %6664 = vmatpush.bf16.msrb.mxu1 %v10108_v38 }
 0x466   : > { %3919 = vmatmul.bf16.vlgmr.msra.gmra.mxu3 %v14862_v18  ;;  %v9916_v18 = vor.u32 %v11253_v8, %v9915_v57  ;;  %6713 = vmatpush.bf16.msrb.mxu2 %v10300_v39 }
 0x467   : > { %v4060_v22 = vmul.f32 %v3964_v35, %v13396_v9 }
 0x468   : > { %v3675_v4 = vpop.f32.mrf.mxu2  ;;  %v3579_v12 = vpop.f32.mrf.mxu0  ;;  %6615 = vmatpush.bf16.msrb.mxu0 %v9916_v18 }
 0x469   : > { %v3676_v24 = vadd.f32 %v3675_v4, %v13402_v60  ;;  %v3724_v48 = vpop.f32.mrf.mxu3  ;;  %v4156_v1 = vmul.f32 0.044715, %v4060_v22  ;;  %v3580_v0 = vadd.f32 %v3579_v12, %v13321_v11  ;;  %v3628_v34 = vpop.f32.mrf.mxu1 }
 0x46b   : > { %v13410_v44 = vadd.f32 %v3724_v48, %v3676_v24  ;;  %v4252_v33 = vadd.f32 %v4156_v1, %v13396_v9  ;;  %v3629_v37 = vadd.f32 %v3628_v34, %v3580_v0 }
 0x46d   : > { %v3970_v62 = vmul.f32 %v3629_v37, %v3629_v37  ;;  %v4348_v11 = vmul.f32 0.7978846, %v4252_v33 }
 0x46f   : > { %v4066_v35 = vmul.f32 %v3970_v62, %v3629_v37  ;;  %11727 = vtanh.f32 %v4348_v11  ;;  %v11247_v62 = vld [vmem:[#allocation8 + $0x104] sm:$0xf0]  ;;  %v10467_v11 = vld [vmem:[#allocation8 + $0x570] sm:$0xf] }
 0x470   : > { %v3677_v22 = vpop.f32.mrf.mxu2  ;;  %v3582_v48 = vpop.f32.mrf.mxu0 }
 0x471   : > { %v3678_v4 = vadd.f32 %v3677_v22, %v13402_v60  ;;  %v3726_v24 = vpop.f32.mrf.mxu3  ;;  %v4162_v12 = vmul.f32 0.044715, %v4066_v35  ;;  %v3583_v54 = vadd.f32 %v3582_v48, %v13331_v56  ;;  %v3631_v20 = vpop.f32.mrf.mxu1  ;;  %v9892_v35 = vor.u32 %v11247_v62, %v9891_v13  ;;  %v11391_v22 = vld [vmem:[#allocation8 + $0x584] sm:$0xf0] }
 0x473   : > { %v13415_v57 = vadd.f32 %v3726_v24, %v3678_v4  ;;  %v4258_v1 = vadd.f32 %v4162_v12, %v3629_v37  ;;  %v13417_v0 = vadd.f32 %v3631_v20, %v3583_v54  ;;  %3777 = vmatmul.bf16.gmra.mxu0 %v12226_v26  ;;  %v11343_v26 = vld [vmem:[#allocation8 + $0x404] sm:$0xf0]  ;;  %v10083_v4 = vld [vmem:[#allocation8 + $0x270] sm:$0xf]  ;;  %v10468_v54 = vor.u32 %v11391_v22, %v10467_v11 }
 0x474   : > { %3826 = vmatmul.bf16.gmra.mxu1 %v12228_v27  ;;  %v10276_v38 = vor.u32 %v11343_v26, %v10275_v55  ;;  %v11295_v24 = vld [vmem:[#allocation8 + $0x284] sm:$0xf0]  ;;  %6616 = vmatpush.bf16.msrb.mxu0 %v9892_v35 }
 0x475   : > { %3875 = vmatmul.bf16.gmra.mxu2 %v14864_v30  ;;  %v4354_v34 = vmul.f32 0.7978846, %v4258_v1  ;;  %v3976_v39 = vmul.f32 %v13417_v0, %v13417_v0  ;;  %v11728_v27 = vpop.eup %11727  ;;  %v10084_v20 = vor.u32 %v11295_v24, %v10083_v4  ;;  %6763 = vmatpush.bf16.msrb.mxu3 %v10468_v54 }
 0x476   : > { %3924 = vmatmul.bf16.gmra.mxu3 %v14865_v59  ;;  %6714 = vmatpush.bf16.msrb.mxu2 %v10276_v38  ;;  %v4636_v1 = vadd.f32 1.0, %v11728_v27 }
 0x477   : > { %11729 = vtanh.f32 %v4354_v34  ;;  %v4072_v56 = vmul.f32 %v3976_v39, %v13417_v0  ;;  %6665 = vmatpush.bf16.msrb.mxu1 %v10084_v20  ;;  %v4444_v39 = vmul.f32 0.5, %v13396_v9  ;;  %v10251_v20 = vld [vmem:[#allocation8 + $0x3c0] sm:$0xf] }
 0x478   : > { %v3680_v8 = vpop.f32.mrf.mxu2  ;;  %v3584_v50 = vpop.f32.mrf.mxu0 }
 0x479   : > { %v3681_v45 = vadd.f32 %v3680_v8, %v13402_v60  ;;  %v3729_v18 = vpop.f32.mrf.mxu3  ;;  %v4168_v33 = vmul.f32 0.044715, %v4072_v56  ;;  %v3585_v30 = vadd.f32 %v3584_v50, %v13334_v3  ;;  %v3633_v6 = vpop.f32.mrf.mxu1  ;;  %v4450_v56 = vmul.f32 0.5, %v3629_v37 }
 0x47a   : > { %v4732_v55 = vmul.f32 %v4636_v1, %v4444_v39  ;;  %v9867_v1 = vld [vmem:[#allocation8 + $0xc0] sm:$0xf] }
 0x47b   : > { %v13428_v59 = vadd.f32 %v3729_v18, %v3681_v45  ;;  %v4264_v48 = vadd.f32 %v4168_v33, %v13417_v0  ;;  %v13431_v12 = vadd.f32 %v3633_v6, %v3585_v30 }
 0x47d   : > { %v11730_v3 = vpop.eup %11729  ;;  %v3982_v34 = vmul.f32 %v13431_v12, %v13431_v12  ;;  %v4360_v45 = vmul.f32 0.7978846, %v4264_v48 }
 0x47e   : > { %v4642_v8 = vadd.f32 1.0, %v11730_v3 }
 0x47f   : > { %v4078_v18 = vmul.f32 %v3982_v34, %v13431_v12  ;;  %11731 = vtanh.f32 %v4360_v45 }
 0x480   : > { %v3682_v50 = vpop.f32.mrf.mxu2  ;;  %v4738_v26 = vmul.f32 %v4642_v8, %v4450_v56  ;;  %v3587_v33 = vpop.f32.mrf.mxu0  ;;  %v11241_v56 = vld [vmem:[#allocation8 + $0xd4] sm:$0xf0]  ;;  %v10443_v8 = vld [vmem:[#allocation8 + $0x540] sm:$0xf] }
 0x481   : > { %v3683_v13 = vadd.f32 %v3682_v50, %v13402_v60  ;;  %v3731_v27 = vpop.f32.mrf.mxu3  ;;  %v4174_v30 = vmul.f32 0.044715, %v4078_v18  ;;  %v3588_v6 = vadd.f32 %v3587_v33, %v13341_v53  ;;  %v3636_v38 = vpop.f32.mrf.mxu1  ;;  %v9868_v45 = vor.u32 %v11241_v56, %v9867_v1  ;;  %v11385_v18 = vld [vmem:[#allocation8 + $0x554] sm:$0xf0]  ;;  %v10059_v50 = vld [vmem:[#allocation8 + $0x240] sm:$0xf] }
 0x482   : > { %v13439_v62 = vpack.c.bf16 %v4738_v26, %v4732_v55  ;;  %v11289_v55 = vld [vmem:[#allocation8 + $0x254] sm:$0xf0] }
 0x483   : > { %v13441_v11 = vadd.f32 %v3731_v27, %v3683_v13  ;;  %v4270_v9 = vadd.f32 %v4174_v30, %v13431_v12  ;;  %v13444_v37 = vadd.f32 %v3636_v38, %v3588_v6  ;;  %3782 = vmatmul.bf16.gmra.mxu0 %v12246_v51  ;;  %v11337_v51 = vld [vmem:[#allocation8 + $0x3d4] sm:$0xf0]  ;;  %v10444_v27 = vor.u32 %v11385_v18, %v10443_v8 }
 0x484   : > { %3831 = vmatmul.bf16.gmra.mxu1 %v12248_v52  ;;  %v10252_v39 = vor.u32 %v11337_v51, %v10251_v20  ;;  %v10060_v33 = vor.u32 %v11289_v55, %v10059_v50  ;;  %6617 = vmatpush.bf16.msrb.mxu0 %v9868_v45  ;;  %v4456_v38 = vmul.f32 0.5, %v13417_v0  ;;  %v10227_v55 = vld [vmem:[#allocation8 + $0x390] sm:$0xf] }
 0x485   : > { %3880 = vmatmul.bf16.gmra.mxu2 %v12397_v19  ;;  %v4366_v35 = vmul.f32 0.7978846, %v4270_v9  ;;  %v3988_v53 = vmul.f32 %v13444_v37, %v13444_v37  ;;  %v11732_v52 = vpop.eup %11731  ;;  %6764 = vmatpush.bf16.msrb.mxu3 %v10444_v27  ;;  %v4462_v9 = vmul.f32 0.5, %v13431_v12 }
 0x486   : > { %3929 = vmatmul.bf16.gmra.mxu3 %v12399_v31  ;;  %6715 = vmatpush.bf16.msrb.mxu2 %v10252_v39  ;;  %v4648_v30 = vadd.f32 1.0, %v11732_v52 }
 0x487   : > { %11733 = vtanh.f32 %v4366_v35  ;;  %v4084_v22 = vmul.f32 %v3988_v53, %v13444_v37  ;;  %6666 = vmatpush.bf16.msrb.mxu1 %v10060_v33 }
 0x488   : > { %v3685_v4 = vpop.f32.mrf.mxu2  ;;  %v3589_v54 = vpop.f32.mrf.mxu0 }
 0x489   : > { %v3686_v24 = vadd.f32 %v3685_v4, %v13402_v60  ;;  %v3734_v48 = vpop.f32.mrf.mxu3  ;;  %v4180_v3 = vmul.f32 0.044715, %v4084_v22  ;;  %v3590_v19 = vadd.f32 %v3589_v54, %v13344_v32  ;;  %v3638_v34 = vpop.f32.mrf.mxu1 }
 0x48b   : > { %v13455_v31 = vadd.f32 %v3734_v48, %v3686_v24  ;;  %v4276_v26 = vadd.f32 %v4180_v3, %v13444_v37  ;;  %v13458_v13 = vadd.f32 %v3638_v34, %v3590_v19  ;;  %v4744_v24 = vmul.f32 %v4648_v30, %v4456_v38 }
 0x48d   : > { %v11734_v32 = vpop.eup %11733  ;;  %v3994_v6 = vmul.f32 %v13458_v13, %v13458_v13  ;;  %v4372_v53 = vmul.f32 0.7978846, %v4276_v26  ;;  %v9843_v26 = vld [vmem:[#allocation8 + $0x90] sm:$0xf] }
 0x48e   : > { %v4654_v35 = vadd.f32 1.0, %v11734_v32  ;;  %v11235_v32 = vld [vmem:[#allocation8 + $0xa4] sm:$0xf0] }
 0x48f   : > { %v4090_v22 = vmul.f32 %v3994_v6, %v13458_v13  ;;  %11735 = vtanh.f32 %v4372_v53  ;;  %v10419_v6 = vld [vmem:[#allocation8 + $0x510] sm:$0xf]  ;;  %v9844_v38 = vor.u32 %v11235_v32, %v9843_v26  ;;  %v11283_v53 = vld [vmem:[#allocation8 + $0x224] sm:$0xf0] }
 0x490   : > { %v3687_v4 = vpop.f32.mrf.mxu2  ;;  %v4750_v48 = vmul.f32 %v4654_v35, %v4462_v9  ;;  %v3592_v51 = vpop.f32.mrf.mxu0  ;;  %v11379_v9 = vld [vmem:[#allocation8 + $0x524] sm:$0xf0]  ;;  %v10035_v35 = vld [vmem:[#allocation8 + $0x210] sm:$0xf] }
 0x491   : > { %v3688_v54 = vadd.f32 %v3687_v4, %v13402_v60  ;;  %v3736_v20 = vpop.f32.mrf.mxu3  ;;  %v4186_v1 = vmul.f32 0.044715, %v4090_v22  ;;  %v3593_v52 = vadd.f32 %v3592_v51, %v13351_v5  ;;  %v3641_v3 = vpop.f32.mrf.mxu1  ;;  %6618 = vmatpush.bf16.msrb.mxu0 %v9844_v38  ;;  %v4468_v51 = vmul.f32 0.5, %v13444_v37  ;;  %v10203_v38 = vld [vmem:[#allocation8 + $0x360] sm:$0xf] }
 0x492   : > { %v13467_v19 = vpack.c.bf16 %v4750_v48, %v4744_v24  ;;  %v10420_v24 = vor.u32 %v11379_v9, %v10419_v6  ;;  %v10036_v48 = vor.u32 %v11283_v53, %v10035_v35  ;;  %v9819_v9 = vld [vmem:[#allocation8 + $0x60] sm:$0xf] }
 0x493   : > { %v13469_v0 = vadd.f32 %v3736_v20, %v3688_v54  ;;  %v4282_v12 = vadd.f32 %v4186_v1, %v13458_v13  ;;  %v13472_v34 = vadd.f32 %v3641_v3, %v3593_v52  ;;  %3787 = vmatmul.bf16.gmra.mxu0 %v12266_v14  ;;  %v11331_v14 = vld [vmem:[#allocation8 + $0x3a4] sm:$0xf0]  ;;  %v4474_v1 = vmul.f32 0.5, %v13458_v13 }
 0x494   : > { %3836 = vmatmul.bf16.gmra.mxu1 %v12268_v15  ;;  %v10228_v30 = vor.u32 %v11331_v14, %v10227_v55  ;;  %6765 = vmatpush.bf16.msrb.mxu3 %v10420_v24  ;;  %v11229_v24 = vld [vmem:[#allocation8 + $0x74] sm:$0xf0] }
 0x495   : > { %3885 = vmatmul.bf16.gmra.mxu2 %v12415_v63  ;;  %v4378_v39 = vmul.f32 0.7978846, %v4282_v12  ;;  %v4000_v5 = vmul.f32 %v13472_v34, %v13472_v34  ;;  %v11736_v15 = vpop.eup %11735  ;;  %6667 = vmatpush.bf16.msrb.mxu1 %v10036_v48  ;;  %v10395_v48 = vld [vmem:[#allocation8 + $0x4e0] sm:$0xf] }
 0x496   : > { %3934 = vmatmul.bf16.gmra.mxu3 %v14867_v2  ;;  %6716 = vmatpush.bf16.msrb.mxu2 %v10228_v30  ;;  %v4660_v54 = vadd.f32 1.0, %v11736_v15 }
 0x497   : > { %11737 = vtanh.f32 %v4378_v39  ;;  %v4096_v56 = vmul.f32 %v4000_v5, %v13472_v34 }
 0x498   : > { %v3690_v8 = vpop.f32.mrf.mxu2  ;;  %v3594_v50 = vpop.f32.mrf.mxu0  ;;  %v4756_v5 = vmul.f32 %v4660_v54, %v4468_v51  ;;  %v9820_v54 = vor.u32 %v11229_v24, %v9819_v9  ;;  %v11277_v51 = vld [vmem:[#allocation8 + $0x1f4] sm:$0xf0]  ;;  %v14874_v9 = vld [vmem:[#allocation29_spill] sm:$0xff] }
 0x499   : > { %v3691_v45 = vadd.f32 %v3690_v8, %v13402_v60  ;;  %v3739_v18 = vpop.f32.mrf.mxu3  ;;  %v4192_v27 = vmul.f32 0.044715, %v4096_v56  ;;  %v3595_v63 = vadd.f32 %v3594_v50, %v13354_v29  ;;  %v3643_v33 = vpop.f32.mrf.mxu1 }
 0x49a   : > { %6619 = vmatpush.bf16.msrb.mxu0 %v9820_v54  ;;  %v11319_v54 = vld [vmem:[#allocation8 + $0x344] sm:$0xf0] }
 0x49b   : > { %v13483_v2 = vadd.f32 %v3739_v18, %v3691_v45  ;;  %v4288_v22 = vadd.f32 %v4192_v27, %v13472_v34  ;;  %v13486_v4 = vadd.f32 %v3643_v33, %v3595_v63 }
 0x49d   : > { %v11738_v29 = vpop.eup %11737  ;;  %v4006_v20 = vmul.f32 %v13486_v4, %v13486_v4  ;;  %v4384_v3 = vmul.f32 0.7978846, %v4288_v22 }
 0x49e   : > { %v4666_v52 = vadd.f32 1.0, %v11738_v29  ;;  %v11373_v29 = vld [vmem:[#allocation8 + $0x4f4] sm:$0xf0] }
 0x49f   : > { %v4102_v12 = vmul.f32 %v4006_v20, %v13486_v4  ;;  %11739 = vtanh.f32 %v4384_v3  ;;  %v10011_v20 = vld [vmem:[#allocation8 + $0x1e0] sm:$0xf]  ;;  %v10396_v3 = vor.u32 %v11373_v29, %v10395_v48  ;;  %v10179_v48 = vld [vmem:[#allocation8 + $0x330] sm:$0xf] }
 0x4a0   : > { %v3692_v39 = vpop.f32.mrf.mxu2  ;;  %v4762_v56 = vmul.f32 %v4666_v52, %v4474_v1  ;;  %v3597_v18 = vpop.f32.mrf.mxu0  ;;  %v9795_v29 = vld [vmem:[#allocation8 + $0x30] sm:$0xf] }
 0x4a1   : > { %v3693_v8 = vadd.f32 %v3692_v39, %v13402_v60  ;;  %v3741_v45 = vpop.f32.mrf.mxu3  ;;  %v4198_v50 = vmul.f32 0.044715, %v4102_v12  ;;  %v3598_v55 = vadd.f32 %v3597_v18, %v13361_v40  ;;  %v3646_v14 = vpop.f32.mrf.mxu1  ;;  %v10012_v12 = vor.u32 %v11277_v51, %v10011_v20  ;;  %6766 = vmatpush.bf16.msrb.mxu3 %v10396_v3 }
 0x4a2   : > { %v13495_v26 = vpack.c.bf16 %v4762_v56, %v4756_v5  ;;  %v4480_v56 = vmul.f32 0.5, %v13472_v34  ;;  %v10180_v3 = vor.u32 %v11319_v54, %v10179_v48  ;;  %v10347_v48 = vld [vmem:[#allocation8 + $0x480] sm:$0xf] }
 0x4a3   : > { %v13497_v37 = vadd.f32 %v3741_v45, %v3693_v8  ;;  %v4294_v13 = vadd.f32 %v4198_v50, %v13486_v4  ;;  %v13500_v15 = vadd.f32 %v3646_v14, %v3598_v55  ;;  %3792 = vmatmul.bf16.gmra.mxu0 %v12286_v42  ;;  %v11325_v42 = vld [vmem:[#allocation8 + $0x374] sm:$0xf0]  ;;  %6668 = vmatpush.bf16.msrb.mxu1 %v10012_v12  ;;  %v4486_v8 = vmul.f32 0.5, %v13486_v4  ;;  %v11223_v12 = vld [vmem:[#allocation8 + $0x44] sm:$0xf0] }
 0x4a4   : > { %3841 = vmatmul.bf16.gmra.mxu1 %v12288_v43  ;;  %v10204_v22 = vor.u32 %v11325_v42, %v10203_v38  ;;  %v14873_v42 = vld [vmem:[#allocation28_spill] sm:$0xff] }
 0x4a5   : > { %3890 = vmatmul.bf16.gmra.mxu2 %v14868_v23  ;;  %v4390_v27 = vmul.f32 0.7978846, %v4294_v13  ;;  %v4012_v40 = vmul.f32 %v13500_v15, %v13500_v15  ;;  %v11740_v43 = vpop.eup %11739 }
 0x4a6   : > { %3939 = vmatmul.bf16.gmra.mxu3 %v14869_v41  ;;  %6717 = vmatpush.bf16.msrb.mxu2 %v10204_v22  ;;  %v4672_v39 = vadd.f32 1.0, %v11740_v43 }
 0x4a7   : > { %11741 = vtanh.f32 %v4390_v27  ;;  %v4108_v63 = vmul.f32 %v4012_v40, %v13500_v15 }
 0x4a8   : > { %v3695_v33 = vpop.f32.mrf.mxu2  ;;  %v3599_v6 = vpop.f32.mrf.mxu0  ;;  %v4768_v14 = vmul.f32 %v4672_v39, %v4480_v56  ;;  %v10371_v39 = vld [vmem:[#allocation8 + $0x4b0] sm:$0xf] }
 0x4a9   : > { %v3696_v30 = vadd.f32 %v3695_v33, %v13402_v60  ;;  %v3744_v32 = vpop.f32.mrf.mxu3  ;;  %v4204_v35 = vmul.f32 0.044715, %v4108_v63  ;;  %v3600_v23 = vadd.f32 %v3599_v6, %v13364_v7  ;;  %v3648_v53 = vpop.f32.mrf.mxu1  ;;  %v9987_v56 = vld [vmem:[#allocation8 + $0x1b0] sm:$0xf] }
 0x4aa   : > { %6718 = vmatpush.bf16.msrb.mxu2 %v10180_v3 }
 0x4ab   : > { %v13511_v41 = vadd.f32 %v3744_v32, %v3696_v30  ;;  %v4300_v1 = vadd.f32 %v4204_v35, %v13500_v15  ;;  %v13514_v52 = vadd.f32 %v3648_v53, %v3600_v23 }
 0x4ad   : > { %v11742_v7 = vpop.eup %11741  ;;  %v4018_v5 = vmul.f32 %v13514_v52, %v13514_v52  ;;  %v4396_v18 = vmul.f32 0.7978846, %v4300_v1 }
 0x4ae   : > { %v4678_v45 = vadd.f32 1.0, %v11742_v7  ;;  %v9796_v7 = vor.u32 %v11223_v12, %v9795_v29 }
 0x4af   : > { %v4114_v50 = vmul.f32 %v4018_v5, %v13514_v52  ;;  %11743 = vtanh.f32 %v4396_v18  ;;  %v11367_v5 = vld [vmem:[#allocation8 + $0x4c4] sm:$0xf0] }
 0x4b0   : > { %v3697_v55 = vpop.f32.mrf.mxu2  ;;  %v4774_v13 = vmul.f32 %v4678_v45, %v4486_v8  ;;  %v3602_v63 = vpop.f32.mrf.mxu0  ;;  %v11271_v8 = vld [vmem:[#allocation8 + $0x1c4] sm:$0xf0]  ;;  %6620 = vmatpush.bf16.msrb.mxu0 %v9796_v7 }
 0x4b1   : > { %v3698_v27 = vadd.f32 %v3697_v55, %v13402_v60  ;;  %v3746_v40 = vpop.f32.mrf.mxu3  ;;  %v4210_v33 = vmul.f32 0.044715, %v4114_v50  ;;  %v3603_v30 = vadd.f32 %v3602_v63, %v13371_v28  ;;  %v3651_v32 = vpop.f32.mrf.mxu1  ;;  %v10372_v50 = vor.u32 %v11367_v5, %v10371_v39 }
 0x4b2   : > { %v13523_v6 = vpack.c.bf16 %v4774_v13, %v4768_v14  ;;  %v9988_v55 = vor.u32 %v11271_v8, %v9987_v56 }
 0x4b3   : > { %v13525_v34 = vadd.f32 %v3746_v40, %v3698_v27  ;;  %v4306_v4 = vadd.f32 %v4210_v33, %v13514_v52  ;;  %v13528_v38 = vadd.f32 %v3651_v32, %v3603_v30  ;;  %3797 = vmatmul.bf16.gmra.mxu0 %v14873_v42  ;;  %6767 = vmatpush.bf16.msrb.mxu3 %v10372_v50  ;;  %v4492_v27 = vmul.f32 0.5, %v13500_v15  ;;  %v11313_v42 = vld [vmem:[#allocation8 + $0x314] sm:$0xf0] }
 0x4b4   : > { %3846 = vmatmul.bf16.gmra.mxu1 %v14874_v9  ;;  %v4498_v40 = vmul.f32 0.5, %v13514_v52  ;;  %v9771_v9 = vld [vmem:[#allocation8] sm:$0xf]  ;;  %v11361_v15 = vld [vmem:[#allocation8 + $0x494] sm:$0xf0] }
 0x4b5   : > { %3895 = vmatmul.bf16.gmra.mxu2 %v14870_v25  ;;  %v4402_v43 = vmul.f32 0.7978846, %v4306_v4  ;;  %v4024_v28 = vmul.f32 %v13528_v38, %v13528_v38  ;;  %v11744_v20 = vpop.eup %11743  ;;  %6669 = vmatpush.bf16.msrb.mxu1 %v9988_v55  ;;  %v10155_v4 = vld [vmem:[#allocation8 + $0x300] sm:$0xf] }
 0x4b6   : > { %3944 = vmatmul.bf16.gmra.mxu3 %v14871_v21  ;;  %v4684_v14 = vadd.f32 1.0, %v11744_v20 }
 0x4b7   : > { %11745 = vtanh.f32 %v4402_v43  ;;  %v4120_v35 = vmul.f32 %v4024_v28, %v13528_v38 }
 0x4b8   : > { %v3700_v23 = vpop.f32.mrf.mxu2  ;;  %v3604_v24 = vpop.f32.mrf.mxu0  ;;  %v4780_v43 = vmul.f32 %v4684_v14, %v4492_v27 }
 0x4b9   : > { %v3701_v53 = vadd.f32 %v3700_v23, %v13402_v60  ;;  %v3749_v22 = vpop.f32.mrf.mxu3  ;;  %v4216_v51 = vmul.f32 0.044715, %v4120_v35  ;;  %v3605_v25 = vadd.f32 %v3604_v24, %v13374_v16  ;;  %v3653_v1 = vpop.f32.mrf.mxu1  ;;  %v11217_v24 = vld [vmem:[#allocation8 + $0x14] sm:$0xf0] }
 0x4ba   : > { %v9772_v20 = vor.u32 %v11217_v24, %v9771_v9 }
 0x4bb   : > { %v13539_v21 = vadd.f32 %v3749_v22, %v3701_v53  ;;  %v4312_v45 = vadd.f32 %v4216_v51, %v13528_v38  ;;  %v13542_v18 = vadd.f32 %v3653_v1, %v3605_v25  ;;  %v10156_v22 = vor.u32 %v11313_v42, %v10155_v4  ;;  %v9963_v25 = vld [vmem:[#allocation8 + $0x180] sm:$0xf]  ;;  %v11265_v1 = vld [vmem:[#allocation8 + $0x194] sm:$0xf0] }
 0x4bc   : > { %v10348_v51 = vor.u32 %v11361_v15, %v10347_v48  ;;  %v9964_v39 = vor.u32 %v11265_v1, %v9963_v25  ;;  %6621 = vmatpush.bf16.msrb.mxu0 %v9772_v20  ;;  %v11451_v1 = vld [vmem:[#allocation8 + $0x764] sm:$0xf0] }
 0x4bd   : > { %v11746_v16 = vpop.eup %11745  ;;  %v4030_v13 = vmul.f32 %v13542_v18, %v13542_v18  ;;  %v4408_v33 = vmul.f32 0.7978846, %v4312_v45  ;;  %6719 = vmatpush.bf16.msrb.mxu2 %v10156_v22 }
 0x4be   : > { %v4690_v63 = vadd.f32 1.0, %v11746_v16  ;;  %6768 = vmatpush.bf16.msrb.mxu3 %v10348_v51  ;;  %6670 = vmatpush.bf16.msrb.mxu1 %v9964_v39  ;;  %v14877_v51 = vld [vmem:[#allocation34_spill] sm:$0xff] }
 0x4bf   : > { %v4126_v30 = vmul.f32 %v4030_v13, %v13542_v18  ;;  %11747 = vtanh.f32 %v4408_v33  ;;  %v11304_v39 = vld [vmem:[#allocation8 + $0x2d4] sm:$0xf] }
 0x4c0   : > { %v3702_v32 = vpop.f32.mrf.mxu2  ;;  %v4786_v28 = vmul.f32 %v4690_v63, %v4498_v40  ;;  %v3607_v53 = vpop.f32.mrf.mxu0 }
 0x4c1   : > { %v3703_v35 = vadd.f32 %v3702_v32, %v13402_v60  ;;  %v3751_v23 = vpop.f32.mrf.mxu3  ;;  %v4222_v54 = vmul.f32 0.044715, %v4126_v30  ;;  %v3608_v52 = vadd.f32 %v3607_v53, %v13381_v49  ;;  %v3656_v29 = vpop.f32.mrf.mxu1  ;;  %v4504_v30 = vmul.f32 0.5, %v13528_v38  ;;  %v11256_v38 = vld [vmem:[#allocation8 + $0x154] sm:$0xf] }
 0x4c2   : > { %v13551_v3 = vpack.c.bf16 %v4786_v28, %v4780_v43  ;;  %v4510_v32 = vmul.f32 0.5, %v13542_v18 }
 0x4c3   : > { %v13553_v12 = vadd.f32 %v3751_v23, %v3703_v35  ;;  %v4318_v7 = vadd.f32 %v4222_v54, %v13542_v18  ;;  %v13556_v5 = vadd.f32 %v3656_v29, %v3608_v52  ;;  %3802 = vmatmul.bf16.gmra.mxu0 %v12326_v46  ;;  %v9941_v18 = vld [vmem:[#allocation8 + $0x168] sm:$0xf0]  ;;  %v10707_v52 = vld [vmem:[#allocation8 + $0x750] sm:$0xf] }
 0x4c4   : > { %14875 = vst [vmem:[#allocation25_spill] sm:$0xff] %v13551_v3  ;;  %3851 = vmatmul.bf16.gmra.mxu1 %v12328_v47  ;;  %v9944_v25 = vor.u32 %v11256_v38, %v9941_v18 }
 0x4c5   : > { %3900 = vmatmul.bf16.gmra.mxu2 %v12469_v17  ;;  %v4414_v49 = vmul.f32 0.7978846, %v4318_v7  ;;  %v4036_v56 = vmul.f32 %v13556_v5, %v13556_v5  ;;  %v11748_v14 = vpop.eup %11747  ;;  %v10133_v7 = vld [vmem:[#allocation8 + $0x2e8] sm:$0xf0] }
 0x4c6   : > { %3949 = vmatmul.bf16.gmra.mxu3 %v14822_v61  ;;  %v4696_v40 = vadd.f32 1.0, %v11748_v14  ;;  %6908 = vmatpush.bf16.msra.mxu2 %v9944_v25 }
 0x4c7   : > { %11749 = vtanh.f32 %v4414_v49  ;;  %v4132_v8 = vmul.f32 %v4036_v56, %v13556_v5  ;;  %v14878_v49 = vld [vmem:[#allocation35_spill] sm:$0xff]  ;;  %v10708_v56 = vor.u32 %v11451_v1, %v10707_v52 }
 0x4c8   : > { %v3705_v45 = vpop.f32.mrf.mxu2  ;;  %v3609_v55 = vpop.f32.mrf.mxu0  ;;  %v4792_v28 = vmul.f32 %v4696_v40, %v4504_v30 }
 0x4c9   : > { %v3706_v50 = vadd.f32 %v3705_v45, %v13402_v60  ;;  %v3754_v46 = vpop.f32.mrf.mxu3  ;;  %v4228_v47 = vmul.f32 0.044715, %v4132_v8  ;;  %v3610_v17 = vadd.f32 %v3609_v55, %v13384_v36  ;;  %v3658_v16 = vpop.f32.mrf.mxu1  ;;  %v10136_v8 = vor.u32 %v11304_v39, %v10133_v7  ;;  %6810 = vmatpush.bf16.msra.mxu0 %v10708_v56  ;;  %v14883_v56 = vld [vmem:[#allocation56_spill] sm:$0xff] }
 0x4cb   : > { %v13567_v13 = vadd.f32 %v3754_v46, %v3706_v50  ;;  %v4324_v27 = vadd.f32 %v4228_v47, %v13556_v5  ;;  %v3659_v61 = vadd.f32 %v3658_v16, %v3610_v17  ;;  %v14880_v46 = vld [vmem:[#allocation47_spill] sm:$0xff]  ;;  %6957 = vmatpush.bf16.msra.mxu3 %v10136_v8 }
 0x4cd   : > { %v11750_v63 = vpop.eup %11749  ;;  %v4042_v33 = vmul.f32 %v3659_v61, %v3659_v61  ;;  %v4420_v42 = vmul.f32 0.7978846, %v4324_v27 }
 0x4ce   : > { %v4702_v4 = vadd.f32 1.0, %v11750_v63 }
 0x4cf   : > { %v4138_v9 = vmul.f32 %v4042_v33, %v3659_v61  ;;  %11751 = vtanh.f32 %v4420_v42 }
 0x4d0   : > { %v3707_v43 = vpop.f32.mrf.mxu2  ;;  %v4798_v35 = vmul.f32 %v4702_v4, %v4510_v32  ;;  %v3612_v53 = vpop.f32.mrf.mxu0 }
 0x4d1   : > { %v3708_v36 = vadd.f32 %v3707_v43, %v13402_v60  ;;  %v3756_v23 = vpop.f32.mrf.mxu3  ;;  %v4234_v22 = vmul.f32 0.044715, %v4138_v9  ;;  %v3613_v24 = vadd.f32 %v3612_v53, %v13391_v58  ;;  %v3661_v48 = vpop.f32.mrf.mxu1  ;;  %v14879_v58 = vld [vmem:[#allocation46_spill] sm:$0xff] }
 0x4d2   : > { %v13574_v15 = vpack.c.bf16 %v4798_v35, %v4792_v28  ;;  %v4516_v28 = vmul.f32 0.5, %v13556_v5  ;;  %v4522_v35 = vmul.f32 0.5, %v3659_v61 }
 0x4d3   : > { %v13576_v54 = vadd.f32 %v3756_v23, %v3708_v36  ;;  %v4330_v29 = vadd.f32 %v4234_v22, %v3659_v61  ;;  %v13578_v20 = vadd.f32 %v3661_v48, %v3613_v24  ;;  %3807 = vmatmul.bf16.gmra.mxu0 %v14877_v51  ;;  %v10899_v24 = vld [vmem:[#allocation8 + $0x8d0] sm:$0xf]  ;;  %v11499_v48 = vld [vmem:[#allocation8 + $0x8e4] sm:$0xf0] }
 0x4d4   : > { %14876 = vst [vmem:[#allocation26_spill] sm:$0xff] %v13574_v15  ;;  %3856 = vmatmul.bf16.gmra.mxu1 %v14878_v49  ;;  %v10900_v51 = vor.u32 %v11499_v48, %v10899_v24 }
 0x4d5   : > { %3905 = vmatmul.bf16.gmra.mxu2 %v14879_v58  ;;  %v4426_v45 = vmul.f32 0.7978846, %v4330_v29  ;;  %v4048_v50 = vmul.f32 %v13578_v20, %v13578_v20  ;;  %v11752_v27 = vpop.eup %11751  ;;  %v14882_v58 = vld [vmem:[#allocation49_spill] sm:$0xff] }
 0x4d6   : > { %3954 = vmatmul.bf16.gmra.mxu3 %v14880_v46  ;;  %v4708_v42 = vadd.f32 1.0, %v11752_v27  ;;  %6859 = vmatpush.bf16.msra.mxu1 %v10900_v51  ;;  %v9917_v27 = vld [vmem:[#allocation8 + $0x138] sm:$0xf0] }
 0x4d7   : > { %11753 = vtanh.f32 %v4426_v45  ;;  %v4144_v55 = vmul.f32 %v4048_v50, %v13578_v20  ;;  %v14885_v45 = vld [vmem:[#allocation17_spill] sm:$0xff] }
 0x4d8   : > { %v3710_v14 = vpop.f32.mrf.mxu2  ;;  %v3614_v16 = vpop.f32.mrf.mxu0  ;;  %v4804_v38 = vmul.f32 %v4708_v42, %v4516_v28  ;;  %v11298_v42 = vld [vmem:[#allocation8 + $0x2a4] sm:$0xf] }
 0x4d9   : > { %v3711_v47 = vadd.f32 %v3710_v14, %v13402_v60  ;;  %v3759_v17 = vpop.f32.mrf.mxu3  ;;  %v4240_v40 = vmul.f32 0.044715, %v4144_v55  ;;  %v3615_v63 = vadd.f32 %v3614_v16, %v13394_v10  ;;  %v3663_v33 = vpop.f32.mrf.mxu1  ;;  %v11250_v16 = vld [vmem:[#allocation8 + $0x124] sm:$0xf] }
 0x4db   : > { %v13589_v30 = vadd.f32 %v3759_v17, %v3711_v47  ;;  %v4336_v32 = vadd.f32 %v4240_v40, %v13578_v20  ;;  %v3664_v4 = vadd.f32 %v3663_v33, %v3615_v63  ;;  %v10683_v40 = vld [vmem:[#allocation8 + $0x720] sm:$0xf]  ;;  %v9920_v33 = vor.u32 %v11250_v16, %v9917_v27 }
 0x4dd   : > { %v11754_v9 = vpop.eup %11753  ;;  %v4054_v43 = vmul.f32 %v3664_v4, %v3664_v4  ;;  %v4432_v23 = vmul.f32 0.7978846, %v4336_v32  ;;  %v11445_v32 = vld [vmem:[#allocation8 + $0x734] sm:$0xf0]  ;;  %6909 = vmatpush.bf16.msra.mxu2 %v9920_v33 }
 0x4de   : > { %v4714_v36 = vadd.f32 1.0, %v11754_v9  ;;  %v10109_v9 = vld [vmem:[#allocation8 + $0x2b8] sm:$0xf0] }
 0x4df   : > { %v4150_v53 = vmul.f32 %v4054_v43, %v3664_v4  ;;  %11755 = vtanh.f32 %v4432_v23 }
 0x4e0   : > { %v3712_v22 = vpop.f32.mrf.mxu2  ;;  %v4810_v10 = vmul.f32 %v4714_v36, %v4522_v35  ;;  %v3773_v29 = vpop.f32.mrf.mxu0  ;;  %v10684_v35 = vor.u32 %v11445_v32, %v10683_v40  ;;  %v10112_v36 = vor.u32 %v11298_v42, %v10109_v9 }
 0x4e1   : > { %v3713_v18 = vadd.f32 %v3712_v22, %v13402_v60  ;;  %v3761_v52 = vpop.f32.mrf.mxu3  ;;  %v4246_v25 = vmul.f32 0.044715, %v4150_v53  ;;  %v3774_v1 = vadd.f32 %v3773_v29, %v13410_v44  ;;  %v3822_v39 = vpop.f32.mrf.mxu1  ;;  %v14884_v60 = vld [vmem:[#allocation45_spill] sm:$0xff]  ;;  %v4534_v22 = vmul.f32 0.5, %v3664_v4 }
 0x4e2   : > { %v13595_v7 = vpack.c.bf16 %v4810_v10, %v4804_v38  ;;  %6811 = vmatpush.bf16.msra.mxu0 %v10684_v35  ;;  %6958 = vmatpush.bf16.msra.mxu3 %v10112_v36  ;;  %v9893_v35 = vld [vmem:[#allocation8 + $0x108] sm:$0xf0]  ;;  %v10659_v36 = vld [vmem:[#allocation8 + $0x6f0] sm:$0xf] }
 0x4e3   : > { %v13597_v5 = vadd.f32 %v3761_v52, %v3713_v18  ;;  %v4342_v61 = vadd.f32 %v4246_v25, %v3664_v4  ;;  %v3823_v49 = vadd.f32 %v3822_v39, %v3774_v1  ;;  %6622 = vmatmul.bf16.vlgmr.msrb.gmra.mxu0 %v14882_v58  ;;  %v10875_v18 = vld [vmem:[#allocation8 + $0x8a0] sm:$0xf]  ;;  %v11493_v52 = vld [vmem:[#allocation8 + $0x8b4] sm:$0xf0] }
 0x4e4   : > { %14881 = vst [vmem:[#allocation27_spill] sm:$0xff] %v13595_v7  ;;  %6671 = vmatmul.bf16.vlgmr.msrb.gmra.mxu1 %v14883_v56 }
 0x4e5   : > { %6720 = vmatmul.bf16.vlgmr.msrb.gmra.mxu2 %v14884_v60  ;;  %v4438_v8 = vmul.f32 0.7978846, %v4342_v61  ;;  %v11756_v50 = vpop.eup %11755  ;;  %v10876_v61 = vor.u32 %v11493_v52, %v10875_v18 }
 0x4e6   : > { %6769 = vmatmul.bf16.vlgmr.msrb.gmra.mxu3 %v14885_v45  ;;  %v4720_v43 = vadd.f32 1.0, %v11756_v50 }
 0x4e7   : > { %11757 = vtanh.f32 %v4438_v8  ;;  %6860 = vmatpush.bf16.msra.mxu1 %v10876_v61 }
 0x4e8   : > { %v3871_v44 = vpop.f32.mrf.mxu2  ;;  %v3775_v14 = vpop.f32.mrf.mxu0 }
 0x4e9   : > { %v3872_v46 = vadd.f32 %v3871_v44, %v3823_v49  ;;  %v3920_v55 = vpop.f32.mrf.mxu3  ;;  %v3776_v47 = vadd.f32 %v3775_v14, %v13415_v57  ;;  %v3824_v17 = vpop.f32.mrf.mxu1  ;;  %v4528_v57 = vmul.f32 0.5, %v13578_v20  ;;  %v14888_v14 = vld [vmem:[#allocation57_spill] sm:$0xff] }
 0x4eb   : > { %v13604_v63 = vadd.f32 %v3920_v55, %v3872_v46  ;;  %v3825_v28 = vadd.f32 %v3824_v17, %v3776_v47  ;;  %v4816_v38 = vmul.f32 %v4720_v43, %v4528_v57  ;;  %v14887_v46 = vld [vmem:[#allocation50_spill] sm:$0xff]  ;;  %v14889_v47 = vld [vmem:[#allocation64_spill] sm:$0xff] }
 0x4ec   : > { %v14890_v17 = vld [vmem:[#allocation18_spill] sm:$0xff] }
 0x4ed   : > { %v3965_v23 = vmul.f32 %v13604_v63, %v13604_v63  ;;  %v11758_v53 = vpop.eup %11757 }
 0x4ee   : > { %v4726_v24 = vadd.f32 1.0, %v11758_v53 }
 0x4ef   : > { %v4061_v48 = vmul.f32 %v3965_v23, %v13604_v63 }
 0x4f0   : > { %v3873_v10 = vpop.f32.mrf.mxu2  ;;  %v4822_v29 = vmul.f32 %v4726_v24, %v4534_v22  ;;  %v3778_v39 = vpop.f32.mrf.mxu0  ;;  %v11439_v22 = vld [vmem:[#allocation8 + $0x704] sm:$0xf0]  ;;  %v11292_v24 = vld [vmem:[#allocation8 + $0x274] sm:$0xf] }
 0x4f1   : > { %v4157_v51 = vmul.f32 0.044715, %v4061_v48  ;;  %v3874_v25 = vadd.f32 %v3873_v10, %v3825_v28  ;;  %v3922_v1 = vpop.f32.mrf.mxu3  ;;  %v3779_v49 = vadd.f32 %v3778_v39, %v13428_v59  ;;  %v3827_v8 = vpop.f32.mrf.mxu1  ;;  %v11244_v28 = vld [vmem:[#allocation8 + $0xf4] sm:$0xf]  ;;  %v10085_v48 = vld [vmem:[#allocation8 + $0x288] sm:$0xf0]  ;;  %v10660_v10 = vor.u32 %v11439_v22, %v10659_v36 }
 0x4f2   : > { %v13611_v20 = vpack.c.bf16 %v4822_v29, %v4816_v38  ;;  %v9896_v57 = vor.u32 %v11244_v28, %v9893_v35  ;;  %v10088_v18 = vor.u32 %v11292_v24, %v10085_v48  ;;  %v14893_v28 = vld [vmem:[#allocation65_spill] sm:$0xff] }
 0x4f3   : > { %v4253_v4 = vadd.f32 %v4157_v51, %v13604_v63  ;;  %v3923_v44 = vadd.f32 %v3922_v1, %v3874_v25  ;;  %v3828_v50 = vadd.f32 %v3827_v8, %v3779_v49  ;;  %6627 = vmatmul.bf16.gmra.mxu0 %v14887_v46  ;;  %v10851_v25 = vld [vmem:[#allocation8 + $0x870] sm:$0xf]  ;;  %v11487_v1 = vld [vmem:[#allocation8 + $0x884] sm:$0xf0] }
 0x4f4   : > { %14886 = vst [vmem:[#allocation30_spill] sm:$0xff] %v13611_v20  ;;  %6676 = vmatmul.bf16.gmra.mxu1 %v14888_v14  ;;  %6910 = vmatpush.bf16.msra.mxu2 %v9896_v57 }
 0x4f5   : > { %v3971_v55 = vmul.f32 %v3923_v44, %v3923_v44  ;;  %6725 = vmatmul.bf16.gmra.mxu2 %v14889_v47  ;;  %v4349_v16 = vmul.f32 0.7978846, %v4253_v4  ;;  %6812 = vmatpush.bf16.msra.mxu0 %v10660_v10  ;;  %v4451_v35 = vmul.f32 0.5, %v3923_v44 }
 0x4f6   : > { %6774 = vmatmul.bf16.gmra.mxu3 %v14890_v17 }
 0x4f7   : > { %v4067_v27 = vmul.f32 %v3971_v55, %v3923_v44  ;;  %11759 = vtanh.f32 %v4349_v16  ;;  %6959 = vmatpush.bf16.msra.mxu3 %v10088_v18 }
 0x4f8   : > { %v3876_v59 = vpop.f32.mrf.mxu2  ;;  %v3780_v42 = vpop.f32.mrf.mxu0 }
 0x4f9   : > { %v4163_v40 = vmul.f32 0.044715, %v4067_v27  ;;  %v3877_v33 = vadd.f32 %v3876_v59, %v3828_v50  ;;  %v3925_v32 = vpop.f32.mrf.mxu3  ;;  %v3781_v9 = vadd.f32 %v3780_v42, %v13441_v11  ;;  %v3829_v43 = vpop.f32.mrf.mxu1  ;;  %v10852_v50 = vor.u32 %v11487_v1, %v10851_v25  ;;  %v10635_v1 = vld [vmem:[#allocation8 + $0x6c0] sm:$0xf] }
 0x4fb   : > { %v4259_v23 = vadd.f32 %v4163_v40, %v3923_v44  ;;  %v13619_v53 = vadd.f32 %v3925_v32, %v3877_v33  ;;  %v3830_v38 = vadd.f32 %v3829_v43, %v3781_v9  ;;  %6861 = vmatpush.bf16.msra.mxu1 %v10852_v50  ;;  %v14891_v32 = vld [vmem:[#allocation51_spill] sm:$0xff]  ;;  %v14892_v43 = vld [vmem:[#allocation58_spill] sm:$0xff] }
 0x4fc   : > { %v9869_v44 = vld [vmem:[#allocation8 + $0xd8] sm:$0xf0] }
 0x4fd   : > { %v4355_v52 = vmul.f32 0.7978846, %v4259_v23  ;;  %v3977_v29 = vmul.f32 %v13619_v53, %v13619_v53  ;;  %v11760_v39 = vpop.eup %11759  ;;  %v14894_v23 = vld [vmem:[#allocation19_spill] sm:$0xff] }
 0x4fe   : > { %v4637_v40 = vadd.f32 1.0, %v11760_v39  ;;  %v10061_v50 = vld [vmem:[#allocation8 + $0x258] sm:$0xf0] }
 0x4ff   : > { %11761 = vtanh.f32 %v4355_v52  ;;  %v4073_v11 = vmul.f32 %v3977_v29, %v13619_v53 }
 0x500   : > { %v3878_v51 = vpop.f32.mrf.mxu2  ;;  %v3783_v4 = vpop.f32.mrf.mxu0 }
 0x501   : > { %v4169_v61 = vmul.f32 0.044715, %v4073_v11  ;;  %v3879_v49 = vadd.f32 %v3878_v51, %v3830_v38  ;;  %v3927_v8 = vpop.f32.mrf.mxu3  ;;  %v3784_v55 = vadd.f32 %v3783_v4, %v13455_v31  ;;  %v3832_v16 = vpop.f32.mrf.mxu1  ;;  %v4445_v31 = vmul.f32 0.5, %v13604_v63  ;;  %v11238_v63 = vld [vmem:[#allocation8 + $0xc4] sm:$0xf] }
 0x502   : > { %v11286_v4 = vld [vmem:[#allocation8 + $0x244] sm:$0xf] }
 0x503   : > { %v4265_v27 = vadd.f32 %v4169_v61, %v13619_v53  ;;  %v13626_v59 = vadd.f32 %v3927_v8, %v3879_v49  ;;  %v3833_v33 = vadd.f32 %v3832_v16, %v3784_v55  ;;  %6632 = vmatmul.bf16.gmra.mxu0 %v14891_v32  ;;  %v4733_v24 = vmul.f32 %v4637_v40, %v4445_v31  ;;  %v11433_v8 = vld [vmem:[#allocation8 + $0x6d4] sm:$0xf0] }
 0x504   : > { %6681 = vmatmul.bf16.gmra.mxu1 %v14892_v43  ;;  %v9872_v49 = vor.u32 %v11238_v63, %v9869_v44  ;;  %v10636_v16 = vor.u32 %v11433_v8, %v10635_v1  ;;  %v11481_v31 = vld [vmem:[#allocation8 + $0x854] sm:$0xf0]  ;;  %v14896_v1 = vld [vmem:[#allocation59_spill] sm:$0xff] }
 0x505   : > { %v11762_v42 = vpop.eup %11761  ;;  %v3983_v9 = vmul.f32 %v13626_v59, %v13626_v59  ;;  %6730 = vmatmul.bf16.gmra.mxu2 %v14893_v28  ;;  %v4361_v57 = vmul.f32 0.7978846, %v4265_v27  ;;  %v10064_v27 = vor.u32 %v11286_v4, %v10061_v50  ;;  %v14898_v4 = vld [vmem:[#allocation20_spill] sm:$0xff] }
 0x506   : > { %v4643_v36 = vadd.f32 1.0, %v11762_v42  ;;  %6779 = vmatmul.bf16.gmra.mxu3 %v14894_v23  ;;  %6911 = vmatpush.bf16.msra.mxu2 %v9872_v49  ;;  %v4463_v49 = vmul.f32 0.5, %v13626_v59 }
 0x507   : > { %v4079_v22 = vmul.f32 %v3983_v9, %v13626_v59  ;;  %11763 = vtanh.f32 %v4361_v57  ;;  %6813 = vmatpush.bf16.msra.mxu0 %v10636_v16  ;;  %6960 = vmatpush.bf16.msra.mxu3 %v10064_v27  ;;  %v10827_v9 = vld [vmem:[#allocation8 + $0x840] sm:$0xf] }
 0x508   : > { %v4739_v48 = vmul.f32 %v4643_v36, %v4451_v35  ;;  %v3881_v38 = vpop.f32.mrf.mxu2  ;;  %v3785_v29 = vpop.f32.mrf.mxu0 }
 0x509   : > { %v4175_v10 = vmul.f32 0.044715, %v4079_v22  ;;  %v3882_v18 = vadd.f32 %v3881_v38, %v3833_v33  ;;  %v3930_v52 = vpop.f32.mrf.mxu3  ;;  %v3786_v51 = vadd.f32 %v3785_v29, %v13469_v0  ;;  %v3834_v25 = vpop.f32.mrf.mxu1 }
 0x50a   : > { %v13636_v11 = vpack.c.bf16 %v4739_v48, %v4733_v24  ;;  %v10828_v48 = vor.u32 %v11481_v31, %v10827_v9 }
 0x50b   : > { %v4271_v39 = vadd.f32 %v4175_v10, %v13626_v59  ;;  %v13640_v61 = vadd.f32 %v3930_v52, %v3882_v18  ;;  %v3835_v55 = vadd.f32 %v3834_v25, %v3786_v51  ;;  %v14895_v25 = vld [vmem:[#allocation52_spill] sm:$0xff] }
 0x50c   : > { %6862 = vmatpush.bf16.msra.mxu1 %v10828_v48  ;;  %v9845_v59 = vld [vmem:[#allocation8 + $0xa8] sm:$0xf0] }
 0x50d   : > { %v4367_v40 = vmul.f32 0.7978846, %v4271_v39  ;;  %v3989_v0 = vmul.f32 %v13640_v61, %v13640_v61  ;;  %v11764_v35 = vpop.eup %11763  ;;  %v14897_v39 = vld [vmem:[#allocation66_spill] sm:$0xff] }
 0x50e   : > { %v4649_v29 = vadd.f32 1.0, %v11764_v35 }
 0x50f   : > { %11765 = vtanh.f32 %v4367_v40  ;;  %v4085_v33 = vmul.f32 %v3989_v0, %v13640_v61 }
 0x510   : > { %v3883_v42 = vpop.f32.mrf.mxu2  ;;  %v3788_v24 = vpop.f32.mrf.mxu0 }
 0x511   : > { %v4181_v36 = vmul.f32 0.044715, %v4085_v33  ;;  %v3884_v57 = vadd.f32 %v3883_v42, %v3835_v55  ;;  %v3932_v22 = vpop.f32.mrf.mxu3  ;;  %v3789_v38 = vadd.f32 %v3788_v24, %v13483_v2  ;;  %v3837_v10 = vpop.f32.mrf.mxu1  ;;  %v4457_v2 = vmul.f32 0.5, %v13619_v53 }
 0x513   : > { %v4277_v18 = vadd.f32 %v4181_v36, %v13640_v61  ;;  %v13647_v52 = vadd.f32 %v3932_v22, %v3884_v57  ;;  %v3838_v51 = vadd.f32 %v3837_v10, %v3789_v38  ;;  %6637 = vmatmul.bf16.gmra.mxu0 %v14895_v25  ;;  %v4745_v16 = vmul.f32 %v4649_v29, %v4457_v2  ;;  %v11232_v36 = vld [vmem:[#allocation8 + $0x94] sm:$0xf]  ;;  %v10611_v57 = vld [vmem:[#allocation8 + $0x690] sm:$0xf]  ;;  %v11427_v38 = vld [vmem:[#allocation8 + $0x6a4] sm:$0xf0] }
 0x514   : > { %6686 = vmatmul.bf16.gmra.mxu1 %v14896_v1  ;;  %v9848_v48 = vor.u32 %v11232_v36, %v9845_v59  ;;  %v11280_v10 = vld [vmem:[#allocation8 + $0x214] sm:$0xf] }
 0x515   : > { %v11766_v63 = vpop.eup %11765  ;;  %v3995_v44 = vmul.f32 %v13647_v52, %v13647_v52  ;;  %6735 = vmatmul.bf16.gmra.mxu2 %v14897_v39  ;;  %v4373_v50 = vmul.f32 0.7978846, %v4277_v18  ;;  %v10037_v18 = vld [vmem:[#allocation8 + $0x228] sm:$0xf0] }
 0x516   : > { %v4655_v8 = vadd.f32 1.0, %v11766_v63  ;;  %6784 = vmatmul.bf16.gmra.mxu3 %v14898_v4  ;;  %v10040_v63 = vor.u32 %v11280_v10, %v10037_v18  ;;  %6912 = vmatpush.bf16.msra.mxu2 %v9848_v48  ;;  %v14901_v10 = vld [vmem:[#allocation67_spill] sm:$0xff]  ;;  %v4475_v18 = vmul.f32 0.5, %v13647_v52 }
 0x517   : > { %v4091_v55 = vmul.f32 %v3995_v44, %v13647_v52  ;;  %11767 = vtanh.f32 %v4373_v50  ;;  %v11475_v50 = vld [vmem:[#allocation8 + $0x824] sm:$0xf0]  ;;  %v10685_v4 = vld [vmem:[#allocation8 + $0x738] sm:$0xf0] }
 0x518   : > { %v4751_v27 = vmul.f32 %v4655_v8, %v4463_v49  ;;  %v3886_v40 = vpop.f32.mrf.mxu2  ;;  %v3790_v9 = vpop.f32.mrf.mxu0  ;;  %6961 = vmatpush.bf16.msra.mxu3 %v10040_v63  ;;  %v10803_v8 = vld [vmem:[#allocation8 + $0x810] sm:$0xf] }
 0x519   : > { %v4187_v0 = vmul.f32 0.044715, %v4091_v55  ;;  %v3887_v33 = vadd.f32 %v3886_v40, %v3838_v51  ;;  %v3935_v42 = vpop.f32.mrf.mxu3  ;;  %v3791_v35 = vadd.f32 %v3790_v9, %v13497_v37  ;;  %v3839_v53 = vpop.f32.mrf.mxu1  ;;  %v10612_v51 = vor.u32 %v11427_v38, %v10611_v57  ;;  %v14899_v57 = vld [vmem:[#allocation53_spill] sm:$0xff]  ;;  %v14900_v38 = vld [vmem:[#allocation60_spill] sm:$0xff] }
 0x51a   : > { %v13658_v31 = vpack.c.bf16 %v4751_v27, %v4745_v16 }
 0x51b   : > { %v4283_v22 = vadd.f32 %v4187_v0, %v13647_v52  ;;  %v13662_v24 = vadd.f32 %v3935_v42, %v3887_v33  ;;  %v3840_v29 = vadd.f32 %v3839_v53, %v3791_v35  ;;  %6814 = vmatpush.bf16.msra.mxu0 %v10612_v51  ;;  %v10804_v33 = vor.u32 %v11475_v50, %v10803_v8  ;;  %v14902_v51 = vld [vmem:[#allocation21_spill] sm:$0xff]  ;;  %v9821_v52 = vld [vmem:[#allocation8 + $0x78] sm:$0xf0] }
 0x51d   : > { %v4379_v44 = vmul.f32 0.7978846, %v4283_v22  ;;  %v4001_v37 = vmul.f32 %v13662_v24, %v13662_v24  ;;  %v11768_v55 = vpop.eup %11767  ;;  %6863 = vmatpush.bf16.msra.mxu1 %v10804_v33  ;;  %v10587_v33 = vld [vmem:[#allocation8 + $0x660] sm:$0xf] }
 0x51e   : > { %v4661_v36 = vadd.f32 1.0, %v11768_v55 }
 0x51f   : > { %11769 = vtanh.f32 %v4379_v44  ;;  %v4097_v2 = vmul.f32 %v4001_v37, %v13662_v24 }
 0x520   : > { %v3888_v49 = vpop.f32.mrf.mxu2  ;;  %v3793_v0 = vpop.f32.mrf.mxu0 }
 0x521   : > { %v4193_v16 = vmul.f32 0.044715, %v4097_v2  ;;  %v3889_v27 = vadd.f32 %v3888_v49, %v3840_v29  ;;  %v3937_v40 = vpop.f32.mrf.mxu3  ;;  %v3794_v42 = vadd.f32 %v3793_v0, %v13511_v41  ;;  %v3842_v9 = vpop.f32.mrf.mxu1  ;;  %v4469_v41 = vmul.f32 0.5, %v13640_v61  ;;  %v11226_v0 = vld [vmem:[#allocation8 + $0x64] sm:$0xf] }
 0x523   : > { %v4289_v35 = vadd.f32 %v4193_v16, %v13662_v24  ;;  %v13669_v53 = vadd.f32 %v3937_v40, %v3889_v27  ;;  %v3843_v59 = vadd.f32 %v3842_v9, %v3794_v42  ;;  %6642 = vmatmul.bf16.gmra.mxu0 %v14899_v57  ;;  %v4757_v37 = vmul.f32 %v4661_v36, %v4469_v41  ;;  %v11421_v36 = vld [vmem:[#allocation8 + $0x674] sm:$0xf0] }
 0x524   : > { %6691 = vmatmul.bf16.gmra.mxu1 %v14900_v38  ;;  %v10588_v41 = vor.u32 %v11421_v36, %v10587_v33  ;;  %v14903_v36 = vld [vmem:[#allocation48_spill] sm:$0xff] }
 0x525   : > { %v11770_v22 = vpop.eup %11769  ;;  %v4007_v48 = vmul.f32 %v13669_v53, %v13669_v53  ;;  %6740 = vmatmul.bf16.gmra.mxu2 %v14901_v10  ;;  %v4385_v63 = vmul.f32 0.7978846, %v4289_v35  ;;  %v9824_v35 = vor.u32 %v11226_v0, %v9821_v52  ;;  %v14909_v10 = vld [vmem:[#allocation62_spill] sm:$0xff] }
 0x526   : > { %v4667_v29 = vadd.f32 1.0, %v11770_v22  ;;  %6789 = vmatmul.bf16.gmra.mxu3 %v14902_v51  ;;  %v11274_v22 = vld [vmem:[#allocation8 + $0x1e4] sm:$0xf]  ;;  %6815 = vmatpush.bf16.msra.mxu0 %v10588_v41 }
 0x527   : > { %v4103_v44 = vmul.f32 %v4007_v48, %v13669_v53  ;;  %11771 = vtanh.f32 %v4385_v63  ;;  %v10013_v48 = vld [vmem:[#allocation8 + $0x1f8] sm:$0xf0]  ;;  %6913 = vmatpush.bf16.msra.mxu2 %v9824_v35  ;;  %v14905_v41 = vld [vmem:[#allocation68_spill] sm:$0xff] }
 0x528   : > { %v4763_v2 = vmul.f32 %v4667_v29, %v4475_v18  ;;  %v3891_v49 = vpop.f32.mrf.mxu2  ;;  %v3795_v16 = vpop.f32.mrf.mxu0  ;;  %v10016_v18 = vor.u32 %v11274_v22, %v10013_v48 }
 0x529   : > { %v4199_v8 = vmul.f32 0.044715, %v4103_v44  ;;  %v3892_v50 = vadd.f32 %v3891_v49, %v3843_v59  ;;  %v3940_v55 = vpop.f32.mrf.mxu3  ;;  %v3796_v40 = vadd.f32 %v3795_v16, %v13525_v34  ;;  %v3844_v61 = vpop.f32.mrf.mxu1 }
 0x52a   : > { %v13680_v27 = vpack.c.bf16 %v4763_v2, %v4757_v37  ;;  %6962 = vmatpush.bf16.msra.mxu3 %v10016_v18  ;;  %v10779_v37 = vld [vmem:[#allocation8 + $0x7e0] sm:$0xf]  ;;  %v11469_v2 = vld [vmem:[#allocation8 + $0x7f4] sm:$0xf0]  ;;  %v4487_v18 = vmul.f32 0.5, %v13669_v53 }
 0x52b   : > { %v4295_v42 = vadd.f32 %v4199_v8, %v13669_v53  ;;  %v13684_v9 = vadd.f32 %v3940_v55, %v3892_v50  ;;  %v3845_v59 = vadd.f32 %v3844_v61, %v3796_v40  ;;  %v10780_v40 = vor.u32 %v11469_v2, %v10779_v37  ;;  %v9797_v53 = vld [vmem:[#allocation8 + $0x48] sm:$0xf0] }
 0x52d   : > { %v4391_v29 = vmul.f32 0.7978846, %v4295_v42  ;;  %v4013_v34 = vmul.f32 %v13684_v9, %v13684_v9  ;;  %v11772_v49 = vpop.eup %11771  ;;  %6864 = vmatpush.bf16.msra.mxu1 %v10780_v40 }
 0x52e   : > { %v4673_v42 = vadd.f32 1.0, %v11772_v49 }
 0x52f   : > { %11773 = vtanh.f32 %v4391_v29  ;;  %v4109_v63 = vmul.f32 %v4013_v34, %v13684_v9  ;;  %v14906_v34 = vld [vmem:[#allocation22_spill] sm:$0xff] }
 0x530   : > { %v3893_v44 = vpop.f32.mrf.mxu2  ;;  %v3798_v16 = vpop.f32.mrf.mxu0 }
 0x531   : > { %v4205_v8 = vmul.f32 0.044715, %v4109_v63  ;;  %v3894_v50 = vadd.f32 %v3893_v44, %v3845_v59  ;;  %v3942_v55 = vpop.f32.mrf.mxu3  ;;  %v3799_v61 = vadd.f32 %v3798_v16, %v13539_v21  ;;  %v3847_v0 = vpop.f32.mrf.mxu1  ;;  %v14904_v59 = vld [vmem:[#allocation61_spill] sm:$0xff]  ;;  %v4481_v21 = vmul.f32 0.5, %v13662_v24 }
 0x533   : > { %v4301_v52 = vadd.f32 %v4205_v8, %v13684_v9  ;;  %v13691_v33 = vadd.f32 %v3942_v55, %v3894_v50  ;;  %v3848_v35 = vadd.f32 %v3847_v0, %v3799_v61  ;;  %6647 = vmatmul.bf16.gmra.mxu0 %v14903_v36  ;;  %v4769_v37 = vmul.f32 %v4673_v42, %v4481_v21  ;;  %v11220_v0 = vld [vmem:[#allocation8 + $0x34] sm:$0xf] }
 0x534   : > { %6696 = vmatmul.bf16.gmra.mxu1 %v14904_v59  ;;  %v9800_v42 = vor.u32 %v11220_v0, %v9797_v53  ;;  %v11268_v21 = vld [vmem:[#allocation8 + $0x1b4] sm:$0xf] }
 0x535   : > { %v11774_v22 = vpop.eup %11773  ;;  %v4019_v48 = vmul.f32 %v13691_v33, %v13691_v33  ;;  %6745 = vmatmul.bf16.gmra.mxu2 %v14905_v41  ;;  %v4397_v63 = vmul.f32 0.7978846, %v4301_v52 }
 0x536   : > { %v4679_v29 = vadd.f32 1.0, %v11774_v22  ;;  %6794 = vmatmul.bf16.gmra.mxu3 %v14906_v34  ;;  %v10563_v22 = vld [vmem:[#allocation8 + $0x630] sm:$0xf]  ;;  %6914 = vmatpush.bf16.msra.mxu2 %v9800_v42 }
 0x537   : > { %v4115_v44 = vmul.f32 %v4019_v48, %v13691_v33  ;;  %11775 = vtanh.f32 %v4397_v63  ;;  %v11415_v48 = vld [vmem:[#allocation8 + $0x644] sm:$0xf0] }
 0x538   : > { %v4775_v2 = vmul.f32 %v4679_v29, %v4487_v18  ;;  %v3896_v49 = vpop.f32.mrf.mxu2  ;;  %v3800_v16 = vpop.f32.mrf.mxu0  ;;  %v9989_v18 = vld [vmem:[#allocation8 + $0x1c8] sm:$0xf0]  ;;  %v10564_v29 = vor.u32 %v11415_v48, %v10563_v22 }
 0x539   : > { %v4211_v8 = vmul.f32 0.044715, %v4115_v44  ;;  %v3897_v50 = vadd.f32 %v3896_v49, %v3848_v35  ;;  %v3945_v55 = vpop.f32.mrf.mxu3  ;;  %v3801_v61 = vadd.f32 %v3800_v16, %v13553_v12  ;;  %v3849_v24 = vpop.f32.mrf.mxu1  ;;  %v9992_v44 = vor.u32 %v11268_v21, %v9989_v18  ;;  %v11409_v21 = vld [vmem:[#allocation8 + $0x614] sm:$0xf0]  ;;  %v11262_v18 = vld [vmem:[#allocation8 + $0x184] sm:$0xf] }
 0x53a   : > { %v13702_v40 = vpack.c.bf16 %v4775_v2, %v4769_v37  ;;  %v10755_v37 = vld [vmem:[#allocation8 + $0x7b0] sm:$0xf]  ;;  %v11463_v2 = vld [vmem:[#allocation8 + $0x7c4] sm:$0xf0]  ;;  %6816 = vmatpush.bf16.msra.mxu0 %v10564_v29 }
 0x53b   : > { %v4307_v52 = vadd.f32 %v4211_v8, %v13691_v33  ;;  %v13706_v34 = vadd.f32 %v3945_v55, %v3897_v50  ;;  %v3850_v35 = vadd.f32 %v3849_v24, %v3801_v61  ;;  %v10756_v16 = vor.u32 %v11463_v2, %v10755_v37  ;;  %6963 = vmatpush.bf16.msra.mxu3 %v9992_v44  ;;  %v11214_v50 = vld [vmem:[#allocation8 + $0x4] sm:$0xf]  ;;  %v9773_v55 = vld [vmem:[#allocation8 + $0x18] sm:$0xf0]  ;;  %v10539_v61 = vld [vmem:[#allocation8 + $0x600] sm:$0xf] }
 0x53c   : > { %14907 = vst [vmem:[#allocation31_spill] sm:$0xff] %v13702_v40  ;;  %v9776_v48 = vor.u32 %v11214_v50, %v9773_v55  ;;  %v10540_v44 = vor.u32 %v11409_v21, %v10539_v61  ;;  %v9965_v37 = vld [vmem:[#allocation8 + $0x198] sm:$0xf0]  ;;  %v10731_v2 = vld [vmem:[#allocation8 + $0x780] sm:$0xf]  ;;  %v4493_v61 = vmul.f32 0.5, %v13684_v9 }
 0x53d   : > { %v4403_v49 = vmul.f32 0.7978846, %v4307_v52  ;;  %v4025_v12 = vmul.f32 %v13706_v34, %v13706_v34  ;;  %6865 = vmatpush.bf16.msra.mxu1 %v10756_v16  ;;  %v11776_v24 = vpop.eup %11775  ;;  %v9968_v41 = vor.u32 %v11262_v18, %v9965_v37 }
 0x53e   : > { %6915 = vmatpush.bf16.msra.mxu2 %v9776_v48  ;;  %6817 = vmatpush.bf16.msra.mxu0 %v10540_v44 }
 0x53f   : > { %11777 = vtanh.f32 %v4403_v49  ;;  %v4121_v63 = vmul.f32 %v4025_v12, %v13706_v34  ;;  %v11457_v49 = vld [vmem:[#allocation8 + $0x794] sm:$0xf0]  ;;  %6964 = vmatpush.bf16.msra.mxu3 %v9968_v41 }
 0x540   : > { %v3898_v8 = vpop.f32.mrf.mxu2  ;;  %v3803_v52 = vpop.f32.mrf.mxu0  ;;  %v10732_v51 = vor.u32 %v11457_v49, %v10731_v2 }
 0x541   : > { %v4217_v0 = vmul.f32 0.044715, %v4121_v63  ;;  %v3899_v53 = vadd.f32 %v3898_v8, %v3850_v35  ;;  %v3947_v22 = vpop.f32.mrf.mxu3  ;;  %v3804_v42 = vadd.f32 %v3803_v52, %v13567_v13  ;;  %v3852_v29 = vpop.f32.mrf.mxu1  ;;  %v4685_v63 = vadd.f32 1.0, %v11776_v24  ;;  %v14908_v8 = vld [vmem:[#allocation54_spill] sm:$0xff]  ;;  %v14910_v13 = vld [vmem:[#allocation69_spill] sm:$0xff] }
 0x542   : > { %v4499_v52 = vmul.f32 0.5, %v13691_v33  ;;  %6866 = vmatpush.bf16.msra.mxu1 %v10732_v51 }
 0x543   : > { %v4313_v12 = vadd.f32 %v4217_v0, %v13706_v34  ;;  %v3948_v16 = vadd.f32 %v3947_v22, %v3899_v53  ;;  %v3853_v35 = vadd.f32 %v3852_v29, %v3804_v42  ;;  %6652 = vmatmul.bf16.gmra.mxu0 %v14908_v8  ;;  %v14911_v0 = vld [vmem:[#allocation23_spill] sm:$0xff]  ;;  %v4781_v24 = vmul.f32 %v4685_v63, %v4493_v61 }
 0x544   : > { %6701 = vmatmul.bf16.gmra.mxu1 %v14909_v10 }
 0x545   : > { %v11778_v50 = vpop.eup %11777  ;;  %v4031_v55 = vmul.f32 %v3948_v16, %v3948_v16  ;;  %6750 = vmatmul.bf16.gmra.mxu2 %v14910_v13  ;;  %v4409_v53 = vmul.f32 0.7978846, %v4313_v12  ;;  %v11442_v13 = vld [vmem:[#allocation8 + $0x724] sm:$0xf] }
 0x546   : > { %v4691_v21 = vadd.f32 1.0, %v11778_v50  ;;  %6799 = vmatmul.bf16.gmra.mxu3 %v14911_v0 }
 0x547   : > { %v4127_v22 = vmul.f32 %v4031_v55, %v3948_v16  ;;  %11779 = vtanh.f32 %v4409_v53 }
 0x548   : > { %v4787_v48 = vmul.f32 %v4691_v21, %v4499_v52  ;;  %v3901_v18 = vpop.f32.mrf.mxu2  ;;  %v3805_v2 = vpop.f32.mrf.mxu0 }
 0x549   : > { %v4223_v42 = vmul.f32 0.044715, %v4127_v22  ;;  %v3902_v29 = vadd.f32 %v3901_v18, %v3853_v35  ;;  %v3950_v37 = vpop.f32.mrf.mxu3  ;;  %v3806_v9 = vadd.f32 %v3805_v2, %v13576_v54  ;;  %v3854_v33 = vpop.f32.mrf.mxu1  ;;  %v14914_v2 = vld [vmem:[#allocation63_spill] sm:$0xff] }
 0x54a   : > { %v13719_v49 = vpack.c.bf16 %v4787_v48, %v4781_v24 }
 0x54b   : > { %v4319_v50 = vadd.f32 %v4223_v42, %v3948_v16  ;;  %v13722_v0 = vadd.f32 %v3950_v37, %v3902_v29  ;;  %v3855_v44 = vadd.f32 %v3854_v33, %v3806_v9  ;;  %v14913_v42 = vld [vmem:[#allocation55_spill] sm:$0xff]  ;;  %v14915_v9 = vld [vmem:[#allocation16_spill] sm:$0xff]  ;;  %v4505_v33 = vmul.f32 0.5, %v13706_v34 }
 0x54c   : > { %14912 = vst [vmem:[#allocation32_spill] sm:$0xff] %v13719_v49 }
 0x54d   : > { %v4415_v12 = vmul.f32 0.7978846, %v4319_v50  ;;  %v4037_v51 = vmul.f32 %v13722_v0, %v13722_v0  ;;  %v11780_v35 = vpop.eup %11779 }
 0x54e   : > { %v4697_v48 = vadd.f32 1.0, %v11780_v35 }
 0x54f   : > { %11781 = vtanh.f32 %v4415_v12  ;;  %v4133_v41 = vmul.f32 %v4037_v51, %v13722_v0 }
 0x550   : > { %v3903_v63 = vpop.f32.mrf.mxu2  ;;  %v3808_v21 = vpop.f32.mrf.mxu0 }
 0x551   : > { %v4229_v55 = vmul.f32 0.044715, %v4133_v41  ;;  %v3904_v61 = vadd.f32 %v3903_v63, %v3855_v44  ;;  %v3952_v52 = vpop.f32.mrf.mxu3  ;;  %v3809_v54 = vadd.f32 %v3808_v21, %v13589_v30  ;;  %v3857_v53 = vpop.f32.mrf.mxu1  ;;  %v4511_v30 = vmul.f32 0.5, %v3948_v16  ;;  %v14916_v44 = vld [vmem:[#allocation24_spill] sm:$0xff] }
 0x552   : > { %v4793_v41 = vmul.f32 %v4697_v48, %v4505_v33  ;;  %v10325_v33 = vld [vmem:[#allocation8 + $0x468] sm:$0xf0] }
 0x553   : > { %v4325_v22 = vadd.f32 %v4229_v55, %v13722_v0  ;;  %v13729_v24 = vadd.f32 %v3952_v52, %v3904_v61  ;;  %v3858_v18 = vadd.f32 %v3857_v53, %v3809_v54  ;;  %6657 = vmatmul.bf16.gmra.mxu0 %v14913_v42  ;;  %v13739_v54 = vld [vmem:[#allocation10] sm:$0x3f] }
 0x554   : > { %6706 = vmatmul.bf16.gmra.mxu1 %v14914_v2 }
 0x555   : > { %v11782_v29 = vpop.eup %11781  ;;  %v4043_v37 = vmul.f32 %v13729_v24, %v13729_v24  ;;  %6755 = vmatmul.bf16.gmra.mxu2 %v14915_v9  ;;  %v4421_v12 = vmul.f32 0.7978846, %v4325_v22  ;;  %v10709_v9 = vld [vmem:[#allocation8 + $0x768] sm:$0xf0] }
 0x556   : > { %v4703_v50 = vadd.f32 1.0, %v11782_v29  ;;  %6804 = vmatmul.bf16.gmra.mxu3 %v14916_v44  ;;  %v11448_v29 = vld [vmem:[#allocation8 + $0x754] sm:$0xf] }
 0x557   : > { %v4139_v51 = vmul.f32 %v4043_v37, %v13729_v24  ;;  %v11352_v44 = vld [vmem:[#allocation8 + $0x454] sm:$0xf]  ;;  %11783 = vtanh.f32 %v4421_v12  ;;  %v10712_v37 = vor.u32 %v11448_v29, %v10709_v9  ;;  %v10688_v9 = vor.u32 %v11442_v13, %v10685_v4  ;;  %v10877_v29 = vld [vmem:[#allocation8 + $0x8b8] sm:$0xf0] }
 0x558   : > { %v4799_v63 = vmul.f32 %v4703_v50, %v4511_v30  ;;  %v3906_v35 = vpop.f32.mrf.mxu2  ;;  %v3810_v21 = vpop.f32.mrf.mxu0  ;;  %v10901_v30 = vld [vmem:[#allocation8 + $0x8e8] sm:$0xf0] }
 0x559   : > { %v4235_v55 = vmul.f32 0.044715, %v4139_v51  ;;  %v3907_v61 = vadd.f32 %v3906_v35, %v3858_v18  ;;  %v3955_v52 = vpop.f32.mrf.mxu3  ;;  %v3811_v34 = vadd.f32 %v3810_v21, %v13597_v5  ;;  %v3859_v16 = vpop.f32.mrf.mxu1  ;;  %v11496_v18 = vld [vmem:[#allocation8 + $0x8d4] sm:$0xf]  ;;  %v10328_v51 = vor.u32 %v11352_v44, %v10325_v33  ;;  %7104 = vmatpush.bf16.msrb.mxu2 %v10712_v37 }
 0x55a   : > { %v13741_v53 = vpack.c.bf16 %v4799_v63, %v4793_v41  ;;  %v10904_v35 = vor.u32 %v11496_v18, %v10901_v30  ;;  %v11400_v41 = vld [vmem:[#allocation8 + $0x5d4] sm:$0xf]  ;;  %v10517_v63 = vld [vmem:[#allocation8 + $0x5e8] sm:$0xf0]  ;;  %v10493_v18 = vld [vmem:[#allocation8 + $0x5b8] sm:$0xf0] }
 0x55b   : > { %v4331_v22 = vadd.f32 %v4235_v55, %v13729_v24  ;;  %v13745_v48 = vadd.f32 %v3955_v52, %v3907_v61  ;;  %v3860_v50 = vadd.f32 %v3859_v16, %v3811_v34  ;;  %v10520_v12 = vor.u32 %v11400_v41, %v10517_v63  ;;  %7006 = vmatpush.bf16.msrb.mxu0 %v10328_v51  ;;  %v11346_v61 = vld [vmem:[#allocation8 + $0x424] sm:$0xf]  ;;  %v10301_v52 = vld [vmem:[#allocation8 + $0x438] sm:$0xf0] }
 0x55c   : > { %14917 = vst [vmem:[#allocation33_spill] sm:$0xff] %v13741_v53  ;;  %v13750_v55 = vperm.slane %v13739_v54, 0  ;;  %7153 = vmatpush.bf16.msrb.mxu3 %v10904_v35  ;;  %v10304_v34 = vor.u32 %v11346_v61, %v10301_v52  ;;  %v11490_v16 = vld [vmem:[#allocation8 + $0x8a4] sm:$0xf] }
 0x55d   : > { %v4427_v5 = vmul.f32 0.7978846, %v4331_v22  ;;  %v4049_v21 = vmul.f32 %v13745_v48, %v13745_v48  ;;  %7055 = vmatpush.bf16.msrb.mxu1 %v10520_v12  ;;  %v11394_v22 = vld [vmem:[#allocation8 + $0x5a4] sm:$0xf]  ;;  %v10880_v37 = vor.u32 %v11490_v16, %v10877_v29  ;;  %v11784_v30 = vpop.eup %11783  ;;  %7105 = vmatpush.bf16.msrb.mxu2 %v10688_v9  ;;  %v4523_v9 = vmul.f32 0.5, %v13729_v24 }
 0x55e   : > { %v10496_v4 = vor.u32 %v11394_v22, %v10493_v18  ;;  %v4709_v12 = vadd.f32 1.0, %v11784_v30  ;;  %v10661_v29 = vld [vmem:[#allocation8 + $0x708] sm:$0xf0]  ;;  %v11484_v30 = vld [vmem:[#allocation8 + $0x874] sm:$0xf] }
 0x55f   : > { %11785 = vtanh.f32 %v4427_v5  ;;  %v4145_v44 = vmul.f32 %v4049_v21, %v13745_v48  ;;  %7007 = vmatpush.bf16.msrb.mxu0 %v10304_v34  ;;  %v10277_v18 = vld [vmem:[#allocation8 + $0x408] sm:$0xf0] }
 0x560   : > { %v3908_v33 = vpop.f32.mrf.mxu2  ;;  %v6623_v51 = vpop.f32.mrf.mxu0  ;;  %7154 = vmatpush.bf16.msrb.mxu3 %v10880_v37  ;;  %v11340_v37 = vld [vmem:[#allocation8 + $0x3f4] sm:$0xf] }
 0x561   : > { %v4241_v41 = vmul.f32 0.044715, %v4145_v44  ;;  %v3909_v63 = vadd.f32 %v3908_v33, %v3860_v50  ;;  %v3957_v39 = vpop.f32.mrf.mxu3  ;;  %v6624_v13 = vadd.f32 %v6623_v51, %v13750_v55  ;;  %v6672_v35 = vpop.f32.mrf.mxu1  ;;  %7056 = vmatpush.bf16.msrb.mxu1 %v10496_v4  ;;  %v4517_v50 = vmul.f32 0.5, %v13722_v0  ;;  %v10853_v4 = vld [vmem:[#allocation8 + $0x888] sm:$0xf0] }
 0x562   : > { %v10280_v51 = vor.u32 %v11340_v37, %v10277_v18  ;;  %v10856_v24 = vor.u32 %v11484_v30, %v10853_v4 }
 0x563   : > { %v4337_v5 = vadd.f32 %v4241_v41, %v13745_v48  ;;  %v3958_v21 = vadd.f32 %v3957_v39, %v3909_v63  ;;  %v6673_v61 = vadd.f32 %v6672_v35, %v6624_v13  ;;  %6818 = vmatmul.bf16.vlgmr.msra.gmra.mxu0 %v13439_v62  ;;  %v11436_v39 = vld [vmem:[#allocation8 + $0x6f4] sm:$0xf]  ;;  %v4805_v41 = vmul.f32 %v4709_v12, %v4517_v50  ;;  %v10469_v50 = vld [vmem:[#allocation8 + $0x588] sm:$0xf0] }
 0x564   : > { %6867 = vmatmul.bf16.vlgmr.msra.gmra.mxu1 %v13636_v11  ;;  %v10664_v33 = vor.u32 %v11436_v39, %v10661_v29  ;;  %7008 = vmatpush.bf16.msrb.mxu0 %v10280_v51  ;;  %v11388_v12 = vld [vmem:[#allocation8 + $0x574] sm:$0xf] }
 0x565   : > { %v11786_v52 = vpop.eup %11785  ;;  %v4433_v44 = vmul.f32 0.7978846, %v4337_v5  ;;  %v4055_v16 = vmul.f32 %v3958_v21, %v3958_v21  ;;  %6916 = vmatmul.bf16.vlgmr.msra.gmra.mxu2 %v14882_v58  ;;  %7155 = vmatpush.bf16.msrb.mxu3 %v10856_v24  ;;  %v4535_v4 = vmul.f32 0.5, %v3958_v21 }
 0x566   : > { %v4715_v34 = vadd.f32 1.0, %v11786_v52  ;;  %6965 = vmatmul.bf16.vlgmr.msra.gmra.mxu3 %v14883_v56  ;;  %7106 = vmatpush.bf16.msrb.mxu2 %v10664_v33 }
 0x567   : > { %v4151_v22 = vmul.f32 %v4055_v16, %v3958_v21  ;;  %11787 = vtanh.f32 %v4433_v44 }
 0x568   : > { %v4811_v0 = vmul.f32 %v4715_v34, %v4523_v9  ;;  %v6721_v63 = vpop.f32.mrf.mxu2  ;;  %v6625_v58 = vpop.f32.mrf.mxu0  ;;  %v10472_v34 = vor.u32 %v11388_v12, %v10469_v50  ;;  %v11478_v12 = vld [vmem:[#allocation8 + $0x844] sm:$0xf] }
 0x569   : > { %v4247_v13 = vmul.f32 0.044715, %v4151_v22  ;;  %v6722_v35 = vadd.f32 %v6721_v63, %v6673_v61  ;;  %v6770_v5 = vpop.f32.mrf.mxu3  ;;  %v6626_v56 = vadd.f32 %v6625_v58, %v13750_v55  ;;  %v6674_v16 = vpop.f32.mrf.mxu1 }
 0x56a   : > { %v13761_v52 = vpack.c.bf16 %v4811_v0, %v4805_v41  ;;  %7057 = vmatpush.bf16.msrb.mxu1 %v10472_v34 }
 0x56b   : > { %v4343_v39 = vadd.f32 %v4247_v13, %v3958_v21  ;;  %v13764_v29 = vadd.f32 %v6770_v5, %v6722_v35  ;;  %v6675_v9 = vadd.f32 %v6674_v16, %v6626_v56  ;;  %v4529_v56 = vmul.f32 0.5, %v13745_v48  ;;  %v11430_v35 = vld [vmem:[#allocation8 + $0x6c4] sm:$0xf]  ;;  %v10637_v5 = vld [vmem:[#allocation8 + $0x6d8] sm:$0xf0] }
 0x56c   : > { %14918 = vst [vmem:[#allocation36_spill] sm:$0xff] %v13761_v52  ;;  %v10640_v24 = vor.u32 %v11430_v35, %v10637_v5  ;;  %v11334_v16 = vld [vmem:[#allocation8 + $0x3c4] sm:$0xf] }
 0x56d   : > { %v4439_v61 = vmul.f32 0.7978846, %v4343_v39  ;;  %v11788_v33 = vpop.eup %11787  ;;  %v10253_v39 = vld [vmem:[#allocation8 + $0x3d8] sm:$0xf0] }
 0x56e   : > { %v4721_v0 = vadd.f32 1.0, %v11788_v33  ;;  %7107 = vmatpush.bf16.msrb.mxu2 %v10640_v24 }
 0x56f   : > { %11789 = vtanh.f32 %v4439_v61  ;;  %v10256_v61 = vor.u32 %v11334_v16, %v10253_v39 }
 0x570   : > { %v6723_v22 = vpop.f32.mrf.mxu2  ;;  %v6628_v30 = vpop.f32.mrf.mxu0  ;;  %v4817_v50 = vmul.f32 %v4721_v0, %v4529_v56  ;;  %v10445_v0 = vld [vmem:[#allocation8 + $0x558] sm:$0xf0] }
 0x571   : > { %v6724_v37 = vadd.f32 %v6723_v22, %v6675_v9  ;;  %v6772_v18 = vpop.f32.mrf.mxu3  ;;  %v6629_v58 = vadd.f32 %v6628_v30, %v13750_v55  ;;  %v6677_v41 = vpop.f32.mrf.mxu1  ;;  %v10829_v22 = vld [vmem:[#allocation8 + $0x858] sm:$0xf0]  ;;  %7009 = vmatpush.bf16.msrb.mxu0 %v10256_v61 }
 0x573   : > { %v13767_v44 = vadd.f32 %v6772_v18, %v6724_v37  ;;  %v6678_v63 = vadd.f32 %v6677_v41, %v6629_v58  ;;  %6823 = vmatmul.bf16.gmra.mxu0 %v13467_v19  ;;  %v10832_v18 = vor.u32 %v11478_v12, %v10829_v22  ;;  %v10229_v22 = vld [vmem:[#allocation8 + $0x3a8] sm:$0xf0] }
 0x574   : > { %6872 = vmatmul.bf16.gmra.mxu1 %v13658_v31 }
 0x575   : > { %v11790_v51 = vpop.eup %11789  ;;  %6921 = vmatmul.bf16.gmra.mxu2 %v14887_v46  ;;  %7156 = vmatpush.bf16.msrb.mxu3 %v10832_v18 }
 0x576   : > { %v4727_v13 = vadd.f32 1.0, %v11790_v51  ;;  %6970 = vmatmul.bf16.gmra.mxu3 %v14888_v14  ;;  %v11382_v51 = vld [vmem:[#allocation8 + $0x544] sm:$0xf] }
 0x578   : > { %v4823_v9 = vmul.f32 %v4727_v13, %v4535_v4  ;;  %v6726_v34 = vpop.f32.mrf.mxu2  ;;  %v6630_v37 = vpop.f32.mrf.mxu0  ;;  %v10448_v4 = vor.u32 %v11382_v51, %v10445_v0 }
 0x579   : > { %v6727_v48 = vadd.f32 %v6726_v34, %v6678_v63  ;;  %v6775_v33 = vpop.f32.mrf.mxu3  ;;  %v6631_v30 = vadd.f32 %v6630_v37, %v13750_v55  ;;  %v6679_v58 = vpop.f32.mrf.mxu1  ;;  %v11328_v34 = vld [vmem:[#allocation8 + $0x394] sm:$0xf] }
 0x57a   : > { %v13774_v21 = vpack.c.bf16 %v4823_v9, %v4817_v50  ;;  %7058 = vmatpush.bf16.msrb.mxu1 %v10448_v4  ;;  %v11424_v50 = vld [vmem:[#allocation8 + $0x694] sm:$0xf]  ;;  %v10613_v9 = vld [vmem:[#allocation8 + $0x6a8] sm:$0xf0]  ;;  %v10232_v18 = vor.u32 %v11328_v34, %v10229_v22 }
 0x57b   : > { %v13777_v41 = vadd.f32 %v6775_v33, %v6727_v48  ;;  %v6680_v56 = vadd.f32 %v6679_v58, %v6631_v30  ;;  %v10616_v61 = vor.u32 %v11424_v50, %v10613_v9  ;;  %v11472_v48 = vld [vmem:[#allocation8 + $0x814] sm:$0xf]  ;;  %v10805_v33 = vld [vmem:[#allocation8 + $0x828] sm:$0xf0] }
 0x57c   : > { %14919 = vst [vmem:[#allocation37_spill] sm:$0xff] %v13774_v21  ;;  %v10808_v30 = vor.u32 %v11472_v48, %v10805_v33  ;;  %7010 = vmatpush.bf16.msrb.mxu0 %v10232_v18  ;;  %v11418_v33 = vld [vmem:[#allocation8 + $0x664] sm:$0xf] }
 0x57d   : > { %7108 = vmatpush.bf16.msrb.mxu2 %v10616_v61  ;;  %v11322_v18 = vld [vmem:[#allocation8 + $0x364] sm:$0xf] }
 0x57e   : > { %7157 = vmatpush.bf16.msrb.mxu3 %v10808_v30 }
 0x580   : > { %v6728_v13 = vpop.f32.mrf.mxu2  ;;  %v6633_v5 = vpop.f32.mrf.mxu0 }
 0x581   : > { %v6729_v63 = vadd.f32 %v6728_v13, %v6680_v56  ;;  %v6777_v35 = vpop.f32.mrf.mxu3  ;;  %v6634_v24 = vadd.f32 %v6633_v5, %v13750_v55  ;;  %v6682_v16 = vpop.f32.mrf.mxu1 }
 0x583   : > { %v13780_v39 = vadd.f32 %v6777_v35, %v6729_v63  ;;  %v6683_v12 = vadd.f32 %v6682_v16, %v6634_v24  ;;  %6828 = vmatmul.bf16.gmra.mxu0 %v13495_v26  ;;  %v11376_v63 = vld [vmem:[#allocation8 + $0x514] sm:$0xf]  ;;  %v10421_v35 = vld [vmem:[#allocation8 + $0x528] sm:$0xf0] }
 0x584   : > { %6877 = vmatmul.bf16.gmra.mxu1 %v13680_v27  ;;  %v10424_v24 = vor.u32 %v11376_v63, %v10421_v35 }
 0x585   : > { %6926 = vmatmul.bf16.gmra.mxu2 %v14891_v32 }
 0x586   : > { %6975 = vmatmul.bf16.gmra.mxu3 %v14892_v43  ;;  %7059 = vmatpush.bf16.msrb.mxu1 %v10424_v24 }
 0x588   : > { %v6731_v37 = vpop.f32.mrf.mxu2  ;;  %v6635_v0 = vpop.f32.mrf.mxu0 }
 0x589   : > { %v6732_v58 = vadd.f32 %v6731_v37, %v6683_v12  ;;  %v6780_v51 = vpop.f32.mrf.mxu3  ;;  %v6636_v56 = vadd.f32 %v6635_v0, %v13750_v55  ;;  %v6684_v4 = vpop.f32.mrf.mxu1  ;;  %v10589_v37 = vld [vmem:[#allocation8 + $0x678] sm:$0xf0] }
 0x58a   : > { %v10592_v30 = vor.u32 %v11418_v33, %v10589_v37  ;;  %v10781_v0 = vld [vmem:[#allocation8 + $0x7f8] sm:$0xf0] }
 0x58b   : > { %v13787_v13 = vadd.f32 %v6780_v51, %v6732_v58  ;;  %v6685_v5 = vadd.f32 %v6684_v4, %v6636_v56  ;;  %v10205_v58 = vld [vmem:[#allocation8 + $0x378] sm:$0xf0]  ;;  %v11466_v51 = vld [vmem:[#allocation8 + $0x7e4] sm:$0xf] }
 0x58c   : > { %v10208_v4 = vor.u32 %v11322_v18, %v10205_v58  ;;  %v10784_v63 = vor.u32 %v11466_v51, %v10781_v0  ;;  %7109 = vmatpush.bf16.msrb.mxu2 %v10592_v30 }
 0x58e   : > { %7011 = vmatpush.bf16.msrb.mxu0 %v10208_v4  ;;  %7158 = vmatpush.bf16.msrb.mxu3 %v10784_v63  ;;  %v10565_v4 = vld [vmem:[#allocation8 + $0x648] sm:$0xf0]  ;;  %v11316_v63 = vld [vmem:[#allocation8 + $0x334] sm:$0xf] }
 0x590   : > { %v6733_v16 = vpop.f32.mrf.mxu2  ;;  %v6638_v34 = vpop.f32.mrf.mxu0 }
 0x591   : > { %v6734_v50 = vadd.f32 %v6733_v16, %v6685_v5  ;;  %v6782_v9 = vpop.f32.mrf.mxu3  ;;  %v6639_v12 = vadd.f32 %v6638_v34, %v13750_v55  ;;  %v6687_v22 = vpop.f32.mrf.mxu1  ;;  %v11370_v34 = vld [vmem:[#allocation8 + $0x4e4] sm:$0xf] }
 0x593   : > { %v13790_v61 = vadd.f32 %v6782_v9, %v6734_v50  ;;  %v6688_v48 = vadd.f32 %v6687_v22, %v6639_v12  ;;  %6833 = vmatmul.bf16.gmra.mxu0 %v13523_v6  ;;  %v10397_v12 = vld [vmem:[#allocation8 + $0x4f8] sm:$0xf0] }
 0x594   : > { %6882 = vmatmul.bf16.gmra.mxu1 %v13702_v40  ;;  %v10400_v33 = vor.u32 %v11370_v34, %v10397_v12 }
 0x595   : > { %6931 = vmatmul.bf16.gmra.mxu2 %v14895_v25 }
 0x596   : > { %6980 = vmatmul.bf16.gmra.mxu3 %v14896_v1  ;;  %7060 = vmatpush.bf16.msrb.mxu1 %v10400_v33 }
 0x598   : > { %v6736_v56 = vpop.f32.mrf.mxu2  ;;  %v6640_v24 = vpop.f32.mrf.mxu0 }
 0x599   : > { %v6737_v35 = vadd.f32 %v6736_v56, %v6688_v48  ;;  %v6785_v5 = vpop.f32.mrf.mxu3  ;;  %v6641_v16 = vadd.f32 %v6640_v24, %v13750_v55  ;;  %v6689_v50 = vpop.f32.mrf.mxu1  ;;  %v11412_v56 = vld [vmem:[#allocation8 + $0x634] sm:$0xf] }
 0x59a   : > { %v11460_v24 = vld [vmem:[#allocation8 + $0x7b4] sm:$0xf] }
 0x59b   : > { %v13797_v9 = vadd.f32 %v6785_v5, %v6737_v35  ;;  %v6690_v22 = vadd.f32 %v6689_v50, %v6641_v16  ;;  %v10568_v35 = vor.u32 %v11412_v56, %v10565_v4  ;;  %v10181_v5 = vld [vmem:[#allocation8 + $0x348] sm:$0xf0] }
 0x59c   : > { %v10757_v16 = vld [vmem:[#allocation8 + $0x7c8] sm:$0xf0]  ;;  %v10184_v34 = vor.u32 %v11316_v63, %v10181_v5 }
 0x59d   : > { %7110 = vmatpush.bf16.msrb.mxu2 %v10568_v35 }
 0x59e   : > { %7012 = vmatpush.bf16.msrb.mxu0 %v10184_v34  ;;  %v10541_v34 = vld [vmem:[#allocation8 + $0x618] sm:$0xf0] }
 0x5a0   : > { %v6738_v37 = vpop.f32.mrf.mxu2  ;;  %v6643_v58 = vpop.f32.mrf.mxu0 }
 0x5a1   : > { %v6739_v1 = vadd.f32 %v6738_v37, %v6690_v22  ;;  %v6787_v18 = vpop.f32.mrf.mxu3  ;;  %v6644_v48 = vadd.f32 %v6643_v58, %v13750_v55  ;;  %v6692_v51 = vpop.f32.mrf.mxu1 }
 0x5a3   : > { %v13800_v30 = vadd.f32 %v6787_v18, %v6739_v1  ;;  %v6693_v0 = vadd.f32 %v6692_v51, %v6644_v48  ;;  %6838 = vmatmul.bf16.gmra.mxu0 %v13551_v3  ;;  %v10760_v1 = vor.u32 %v11460_v24, %v10757_v16  ;;  %v11364_v48 = vld [vmem:[#allocation8 + $0x4b4] sm:$0xf]  ;;  %v10373_v51 = vld [vmem:[#allocation8 + $0x4c8] sm:$0xf0] }
 0x5a4   : > { %6887 = vmatmul.bf16.gmra.mxu1 %v13719_v49  ;;  %v10376_v4 = vor.u32 %v11364_v48, %v10373_v51 }
 0x5a5   : > { %6936 = vmatmul.bf16.gmra.mxu2 %v14899_v57  ;;  %7159 = vmatpush.bf16.msrb.mxu3 %v10760_v1  ;;  %v11310_v1 = vld [vmem:[#allocation8 + $0x304] sm:$0xf] }
 0x5a6   : > { %6985 = vmatmul.bf16.gmra.mxu3 %v14900_v38  ;;  %7061 = vmatpush.bf16.msrb.mxu1 %v10376_v4 }
 0x5a8   : > { %v6741_v50 = vpop.f32.mrf.mxu2  ;;  %v6645_v33 = vpop.f32.mrf.mxu0 }
 0x5a9   : > { %v6742_v12 = vadd.f32 %v6741_v50, %v6693_v0  ;;  %v6790_v22 = vpop.f32.mrf.mxu3  ;;  %v6646_v37 = vadd.f32 %v6645_v33, %v13750_v55  ;;  %v6694_v18 = vpop.f32.mrf.mxu1  ;;  %v11406_v50 = vld [vmem:[#allocation8 + $0x604] sm:$0xf]  ;;  %v10733_v33 = vld [vmem:[#allocation8 + $0x798] sm:$0xf0] }
 0x5ab   : > { %v13807_v58 = vadd.f32 %v6790_v22, %v6742_v12  ;;  %v6695_v56 = vadd.f32 %v6694_v18, %v6646_v37  ;;  %v10157_v12 = vld [vmem:[#allocation8 + $0x318] sm:$0xf0]  ;;  %v11454_v22 = vld [vmem:[#allocation8 + $0x784] sm:$0xf] }
 0x5ac   : > { %v10160_v18 = vor.u32 %v11310_v1, %v10157_v12 }
 0x5ae   : > { %7013 = vmatpush.bf16.msrb.mxu0 %v10160_v18  ;;  %v11356_v18 = vld [vmem:[#allocation8 + $0x46c] sm:$0xf0] }
 0x5b0   : > { %v6743_v38 = vpop.f32.mrf.mxu2  ;;  %v6648_v5 = vpop.f32.mrf.mxu0 }
 0x5b1   : > { %v6744_v57 = vadd.f32 %v6743_v38, %v6695_v56  ;;  %v6792_v63 = vpop.f32.mrf.mxu3  ;;  %v6649_v0 = vadd.f32 %v6648_v5, %v13750_v55  ;;  %v6697_v24 = vpop.f32.mrf.mxu1  ;;  %v10544_v38 = vor.u32 %v11406_v50, %v10541_v34 }
 0x5b3   : > { %v13810_v35 = vadd.f32 %v6792_v63, %v6744_v57  ;;  %v6698_v16 = vadd.f32 %v6697_v24, %v6649_v0  ;;  %6843 = vmatmul.bf16.gmra.mxu0 %v13574_v15  ;;  %v10736_v57 = vor.u32 %v11454_v22, %v10733_v33  ;;  %7111 = vmatpush.bf16.msrb.mxu2 %v10544_v38  ;;  %v11358_v0 = vld [vmem:[#allocation8 + $0x484] sm:$0xf]  ;;  %v10349_v24 = vld [vmem:[#allocation8 + $0x498] sm:$0xf0] }
 0x5b4   : > { %6892 = vmatmul.bf16.gmra.mxu1 %v13741_v53  ;;  %v10352_v34 = vor.u32 %v11358_v0, %v10349_v24 }
 0x5b5   : > { %6941 = vmatmul.bf16.gmra.mxu2 %v14903_v36  ;;  %7160 = vmatpush.bf16.msrb.mxu3 %v10736_v57  ;;  %v9947_v57 = vld [vmem:[#allocation8 + $0x158] sm:$0xf] }
 0x5b6   : > { %6990 = vmatmul.bf16.gmra.mxu3 %v14904_v59  ;;  %7062 = vmatpush.bf16.msrb.mxu1 %v10352_v34 }
 0x5b8   : > { %v6746_v37 = vpop.f32.mrf.mxu2  ;;  %v6650_v56 = vpop.f32.mrf.mxu0 }
 0x5b9   : > { %v6747_v48 = vadd.f32 %v6746_v37, %v6698_v16  ;;  %v6795_v51 = vpop.f32.mrf.mxu3  ;;  %v6651_v4 = vadd.f32 %v6650_v56, %v13750_v55  ;;  %v6699_v63 = vpop.f32.mrf.mxu1  ;;  %v10331_v37 = vld [vmem:[#allocation8 + $0x458] sm:$0xf]  ;;  %v11404_v56 = vld [vmem:[#allocation8 + $0x5ec] sm:$0xf0] }
 0x5bb   : > { %v13817_v5 = vadd.f32 %v6795_v51, %v6747_v48  ;;  %v6700_v50 = vadd.f32 %v6699_v63, %v6651_v4  ;;  %v11260_v48 = vld [vmem:[#allocation8 + $0x16c] sm:$0xf0]  ;;  %v10523_v51 = vld [vmem:[#allocation8 + $0x5d8] sm:$0xf] }
 0x5bc   : > { %v9948_v63 = vor.u32 %v11260_v48, %v9947_v57 }
 0x5be   : > { %7202 = vmatpush.bf16.msra.mxu0 %v9948_v63  ;;  %v11350_v63 = vld [vmem:[#allocation8 + $0x43c] sm:$0xf0] }
 0x5c0   : > { %v6748_v59 = vpop.f32.mrf.mxu2  ;;  %v6653_v12 = vpop.f32.mrf.mxu0 }
 0x5c1   : > { %v6749_v36 = vadd.f32 %v6748_v59, %v6700_v50  ;;  %v6797_v1 = vpop.f32.mrf.mxu3  ;;  %v6654_v16 = vadd.f32 %v6653_v12, %v13750_v55  ;;  %v6702_v22 = vpop.f32.mrf.mxu1  ;;  %v10332_v59 = vor.u32 %v11356_v18, %v10331_v37 }
 0x5c3   : > { %v13820_v38 = vadd.f32 %v6797_v1, %v6749_v36  ;;  %v6703_v33 = vadd.f32 %v6702_v22, %v6654_v16  ;;  %6848 = vmatmul.bf16.gmra.mxu0 %v13595_v7  ;;  %v10524_v36 = vor.u32 %v11404_v56, %v10523_v51  ;;  %7300 = vmatpush.bf16.msra.mxu2 %v10332_v59  ;;  %v10139_v16 = vld [vmem:[#allocation8 + $0x2d8] sm:$0xf]  ;;  %v11308_v22 = vld [vmem:[#allocation8 + $0x2ec] sm:$0xf0] }
 0x5c4   : > { %6897 = vmatmul.bf16.gmra.mxu1 %v13761_v52  ;;  %v10140_v18 = vor.u32 %v11308_v22, %v10139_v16 }
 0x5c5   : > { %6946 = vmatmul.bf16.gmra.mxu2 %v14908_v8  ;;  %7349 = vmatpush.bf16.msra.mxu3 %v10524_v36  ;;  %v9923_v36 = vld [vmem:[#allocation8 + $0x128] sm:$0xf] }
 0x5c6   : > { %6995 = vmatmul.bf16.gmra.mxu3 %v14909_v10  ;;  %7251 = vmatpush.bf16.msra.mxu1 %v10140_v18 }
 0x5c8   : > { %v6751_v4 = vpop.f32.mrf.mxu2  ;;  %v6655_v50 = vpop.f32.mrf.mxu0 }
 0x5c9   : > { %v6752_v0 = vadd.f32 %v6751_v4, %v6703_v33  ;;  %v6800_v24 = vpop.f32.mrf.mxu3  ;;  %v6656_v34 = vadd.f32 %v6655_v50, %v13750_v55  ;;  %v6704_v1 = vpop.f32.mrf.mxu1  ;;  %v10307_v4 = vld [vmem:[#allocation8 + $0x428] sm:$0xf]  ;;  %v11398_v50 = vld [vmem:[#allocation8 + $0x5bc] sm:$0xf0] }
 0x5cb   : > { %v13827_v12 = vadd.f32 %v6800_v24, %v6752_v0  ;;  %v6705_v37 = vadd.f32 %v6704_v1, %v6656_v34  ;;  %v11254_v0 = vld [vmem:[#allocation8 + $0x13c] sm:$0xf0]  ;;  %v10499_v24 = vld [vmem:[#allocation8 + $0x5a8] sm:$0xf] }
 0x5cc   : > { %v9924_v1 = vor.u32 %v11254_v0, %v9923_v36 }
 0x5ce   : > { %7203 = vmatpush.bf16.msra.mxu0 %v9924_v1  ;;  %v9899_v1 = vld [vmem:[#allocation8 + $0xf8] sm:$0xf] }
 0x5d0   : > { %v6753_v10 = vpop.f32.mrf.mxu2  ;;  %v6658_v48 = vpop.f32.mrf.mxu0 }
 0x5d1   : > { %v6754_v8 = vadd.f32 %v6753_v10, %v6705_v37  ;;  %v6802_v57 = vpop.f32.mrf.mxu3  ;;  %v6659_v33 = vadd.f32 %v6658_v48, %v13750_v55  ;;  %v6707_v51 = vpop.f32.mrf.mxu1  ;;  %v10308_v10 = vor.u32 %v11350_v63, %v10307_v4 }
 0x5d3   : > { %v13830_v59 = vadd.f32 %v6802_v57, %v6754_v8  ;;  %v6708_v56 = vadd.f32 %v6707_v51, %v6659_v33  ;;  %6853 = vmatmul.bf16.gmra.mxu0 %v13611_v20  ;;  %v10500_v8 = vor.u32 %v11398_v50, %v10499_v24  ;;  %7301 = vmatpush.bf16.msra.mxu2 %v10308_v10  ;;  %v10115_v33 = vld [vmem:[#allocation8 + $0x2a8] sm:$0xf]  ;;  %v11302_v51 = vld [vmem:[#allocation8 + $0x2bc] sm:$0xf0] }
 0x5d4   : > { %6902 = vmatmul.bf16.gmra.mxu1 %v13774_v21  ;;  %v10116_v63 = vor.u32 %v11302_v51, %v10115_v33 }
 0x5d5   : > { %6951 = vmatmul.bf16.gmra.mxu2 %v14913_v42  ;;  %7350 = vmatpush.bf16.msra.mxu3 %v10500_v8 }
 0x5d6   : > { %7000 = vmatmul.bf16.gmra.mxu3 %v14914_v2  ;;  %7252 = vmatpush.bf16.msra.mxu1 %v10116_v63 }
 0x5d8   : > { %v6756_v34 = vpop.f32.mrf.mxu2  ;;  %v6660_v37 = vpop.f32.mrf.mxu0 }
 0x5d9   : > { %v6757_v16 = vadd.f32 %v6756_v34, %v6708_v56  ;;  %v6805_v22 = vpop.f32.mrf.mxu3  ;;  %v6661_v18 = vadd.f32 %v6660_v37, %v13750_v55  ;;  %v6709_v57 = vpop.f32.mrf.mxu1  ;;  %v13846_v34 = vperm.slane %v13739_v54, 1  ;;  %v11392_v37 = vld [vmem:[#allocation8 + $0x58c] sm:$0xf0] }
 0x5db   : > { %v13837_v48 = vadd.f32 %v6805_v22, %v6757_v16  ;;  %v6710_v4 = vadd.f32 %v6709_v57, %v6661_v18  ;;  %v11248_v16 = vld [vmem:[#allocation8 + $0x10c] sm:$0xf0]  ;;  %v10475_v22 = vld [vmem:[#allocation8 + $0x578] sm:$0xf] }
 0x5dc   : > { %v9900_v57 = vor.u32 %v11248_v16, %v9899_v1  ;;  %v10476_v33 = vor.u32 %v11392_v37, %v10475_v22 }
 0x5de   : > { %7204 = vmatpush.bf16.msra.mxu0 %v9900_v57  ;;  %7351 = vmatpush.bf16.msra.mxu3 %v10476_v33  ;;  %v11338_v57 = vld [vmem:[#allocation8 + $0x3dc] sm:$0xf0] }
 0x5e0   : > { %v6758_v2 = vpop.f32.mrf.mxu2  ;;  %v6819_v56 = vpop.f32.mrf.mxu0 }
 0x5e1   : > { %v6759_v36 = vadd.f32 %v6758_v2, %v6710_v4  ;;  %v6807_v0 = vpop.f32.mrf.mxu3  ;;  %v6820_v24 = vadd.f32 %v6819_v56, %v13764_v29  ;;  %v6868_v10 = vpop.f32.mrf.mxu1  ;;  %v10283_v2 = vld [vmem:[#allocation8 + $0x3f8] sm:$0xf]  ;;  %v11344_v29 = vld [vmem:[#allocation8 + $0x40c] sm:$0xf0] }
 0x5e2   : > { %v10284_v8 = vor.u32 %v11344_v29, %v10283_v2  ;;  %v10091_v56 = vld [vmem:[#allocation8 + $0x278] sm:$0xf] }
 0x5e3   : > { %v13840_v50 = vadd.f32 %v6807_v0, %v6759_v36  ;;  %v6869_v55 = vadd.f32 %v6868_v10, %v6820_v24  ;;  %7014 = vmatmul.bf16.vlgmr.msrb.gmra.mxu0 %v14884_v60  ;;  %v11296_v24 = vld [vmem:[#allocation8 + $0x28c] sm:$0xf0] }
 0x5e4   : > { %7063 = vmatmul.bf16.vlgmr.msrb.gmra.mxu1 %v14885_v45  ;;  %7302 = vmatpush.bf16.msra.mxu2 %v10284_v8 }
 0x5e5   : > { %7112 = vmatmul.bf16.vlgmr.msrb.gmra.mxu2 %v13439_v62  ;;  %8378 = vst [vmem:[%s13850_s24] sm:$0xff] %v6869_v55  ;;  %v10092_v55 = vor.u32 %v11296_v24, %v10091_v56 }
 0x5e6   : > { %7161 = vmatmul.bf16.vlgmr.msrb.gmra.mxu3 %v13636_v11 }
 0x5e7   : > { %7253 = vmatpush.bf16.msra.mxu1 %v10092_v55 }
 0x5e8   : > { %v6917_v18 = vpop.f32.mrf.mxu2  ;;  %v6821_v4 = vpop.f32.mrf.mxu0 }
 0x5e9   : > { %v6918_v54 = vadd.f32 %v6917_v18, %v13846_v34  ;;  %v6966_v51 = vpop.f32.mrf.mxu3  ;;  %v6822_v63 = vadd.f32 %v6821_v4, %v13767_v44  ;;  %v6870_v36 = vpop.f32.mrf.mxu1  ;;  %v10259_v18 = vld [vmem:[#allocation8 + $0x3c8] sm:$0xf] }
 0x5ea   : > { %v10260_v33 = vor.u32 %v11338_v57, %v10259_v18  ;;  %v10451_v4 = vld [vmem:[#allocation8 + $0x548] sm:$0xf] }
 0x5eb   : > { %v13856_v0 = vadd.f32 %v6966_v51, %v6918_v54  ;;  %v6871_v10 = vadd.f32 %v6870_v36, %v6822_v63  ;;  %v9875_v54 = vld [vmem:[#allocation8 + $0xc8] sm:$0xf]  ;;  %v11242_v51 = vld [vmem:[#allocation8 + $0xdc] sm:$0xf0] }
 0x5ec   : > { %v9876_v63 = vor.u32 %v11242_v51, %v9875_v54  ;;  %v11386_v36 = vld [vmem:[#allocation8 + $0x55c] sm:$0xf0]  ;;  %7303 = vmatpush.bf16.msra.mxu2 %v10260_v33 }
 0x5ed   : > { %8384 = vst [vmem:[%s13850_s24 + $0x30] sm:$0xff] %v6871_v10  ;;  %v10452_v55 = vor.u32 %v11386_v36, %v10451_v4  ;;  %v11332_v36 = vld [vmem:[#allocation8 + $0x3ac] sm:$0xf0] }
 0x5ee   : > { %7205 = vmatpush.bf16.msra.mxu0 %v9876_v63  ;;  %v10235_v63 = vld [vmem:[#allocation8 + $0x398] sm:$0xf] }
 0x5ef   : > { %7352 = vmatpush.bf16.msra.mxu3 %v10452_v55  ;;  %v10427_v55 = vld [vmem:[#allocation8 + $0x518] sm:$0xf] }
 0x5f0   : > { %v6919_v2 = vpop.f32.mrf.mxu2  ;;  %v6824_v16 = vpop.f32.mrf.mxu0 }
 0x5f1   : > { %v6920_v29 = vadd.f32 %v6919_v2, %v13846_v34  ;;  %v6968_v1 = vpop.f32.mrf.mxu3  ;;  %v6825_v8 = vadd.f32 %v6824_v16, %v13777_v41  ;;  %v6873_v44 = vpop.f32.mrf.mxu1  ;;  %v10067_v16 = vld [vmem:[#allocation8 + $0x248] sm:$0xf] }
 0x5f3   : > { %v13861_v22 = vadd.f32 %v6968_v1, %v6920_v29  ;;  %v6874_v37 = vadd.f32 %v6873_v44, %v6825_v8  ;;  %7019 = vmatmul.bf16.gmra.mxu0 %v14889_v47  ;;  %v11290_v8 = vld [vmem:[#allocation8 + $0x25c] sm:$0xf0] }
 0x5f4   : > { %7068 = vmatmul.bf16.gmra.mxu1 %v14890_v17 }
 0x5f5   : > { %7117 = vmatmul.bf16.gmra.mxu2 %v13467_v19  ;;  %8390 = vst [vmem:[%s13850_s24 + $0x60] sm:$0xff] %v6874_v37  ;;  %v10068_v37 = vor.u32 %v11290_v8, %v10067_v16 }
 0x5f6   : > { %7166 = vmatmul.bf16.gmra.mxu3 %v13658_v31 }
 0x5f7   : > { %7254 = vmatpush.bf16.msra.mxu1 %v10068_v37 }
 0x5f8   : > { %v6922_v41 = vpop.f32.mrf.mxu2  ;;  %v6826_v10 = vpop.f32.mrf.mxu0 }
 0x5f9   : > { %v6923_v56 = vadd.f32 %v6922_v41, %v13846_v34  ;;  %v6971_v24 = vpop.f32.mrf.mxu3  ;;  %v6827_v2 = vadd.f32 %v6826_v10, %v13780_v39  ;;  %v6875_v29 = vpop.f32.mrf.mxu1  ;;  %v11236_v10 = vld [vmem:[#allocation8 + $0xac] sm:$0xf0] }
 0x5fb   : > { %v13870_v1 = vadd.f32 %v6971_v24, %v6923_v56  ;;  %v6876_v44 = vadd.f32 %v6875_v29, %v6827_v2  ;;  %v10236_v56 = vor.u32 %v11332_v36, %v10235_v63  ;;  %v9851_v24 = vld [vmem:[#allocation8 + $0x98] sm:$0xf]  ;;  %v11380_v29 = vld [vmem:[#allocation8 + $0x52c] sm:$0xf0] }
 0x5fc   : > { %v9852_v2 = vor.u32 %v11236_v10, %v9851_v24  ;;  %v10428_v37 = vor.u32 %v11380_v29, %v10427_v55  ;;  %v14921_v29 = vld [vmem:[#allocation20_spill] sm:$0xff] }
 0x5fd   : > { %8396 = vst [vmem:[%s13850_s24 + $0x90] sm:$0xff] %v6876_v44  ;;  %7304 = vmatpush.bf16.msra.mxu2 %v10236_v56 }
 0x5fe   : > { %7206 = vmatpush.bf16.msra.mxu0 %v9852_v2  ;;  %7353 = vmatpush.bf16.msra.mxu3 %v10428_v37  ;;  %v14920_v2 = vld [vmem:[#allocation66_spill] sm:$0xff]  ;;  %v9827_v37 = vld [vmem:[#allocation8 + $0x68] sm:$0xf] }
 0x600   : > { %v6924_v18 = vpop.f32.mrf.mxu2  ;;  %v6829_v33 = vpop.f32.mrf.mxu0 }
 0x601   : > { %v6925_v57 = vadd.f32 %v6924_v18, %v13846_v34  ;;  %v6973_v54 = vpop.f32.mrf.mxu3  ;;  %v6830_v51 = vadd.f32 %v6829_v33, %v13787_v13  ;;  %v6878_v39 = vpop.f32.mrf.mxu1  ;;  %v10043_v33 = vld [vmem:[#allocation8 + $0x218] sm:$0xf] }
 0x603   : > { %v13875_v4 = vadd.f32 %v6973_v54, %v6925_v57  ;;  %v6879_v41 = vadd.f32 %v6878_v39, %v6830_v51  ;;  %7024 = vmatmul.bf16.gmra.mxu0 %v14893_v28  ;;  %v11284_v51 = vld [vmem:[#allocation8 + $0x22c] sm:$0xf0] }
 0x604   : > { %7073 = vmatmul.bf16.gmra.mxu1 %v14894_v23 }
 0x605   : > { %7122 = vmatmul.bf16.gmra.mxu2 %v13495_v26  ;;  %8402 = vst [vmem:[%s13850_s24 + $0xc0] sm:$0xff] %v6879_v41  ;;  %v10044_v41 = vor.u32 %v11284_v51, %v10043_v33  ;;  %v11374_v51 = vld [vmem:[#allocation8 + $0x4fc] sm:$0xf0] }
 0x606   : > { %7171 = vmatmul.bf16.gmra.mxu3 %v13680_v27 }
 0x607   : > { %7255 = vmatpush.bf16.msra.mxu1 %v10044_v41 }
 0x608   : > { %v6927_v13 = vpop.f32.mrf.mxu2  ;;  %v6831_v44 = vpop.f32.mrf.mxu0 }
 0x609   : > { %v6928_v16 = vadd.f32 %v6927_v13, %v13846_v34  ;;  %v6976_v8 = vpop.f32.mrf.mxu3  ;;  %v6832_v18 = vadd.f32 %v6831_v44, %v13790_v61  ;;  %v6880_v57 = vpop.f32.mrf.mxu1 }
 0x60b   : > { %v13884_v54 = vadd.f32 %v6976_v8, %v6928_v16  ;;  %v6881_v39 = vadd.f32 %v6880_v57, %v6832_v18  ;;  %v10211_v16 = vld [vmem:[#allocation8 + $0x368] sm:$0xf]  ;;  %v11326_v8 = vld [vmem:[#allocation8 + $0x37c] sm:$0xf0] }
 0x60c   : > { %v10212_v44 = vor.u32 %v11326_v8, %v10211_v16  ;;  %v11230_v18 = vld [vmem:[#allocation8 + $0x7c] sm:$0xf0]  ;;  %v10403_v57 = vld [vmem:[#allocation8 + $0x4e8] sm:$0xf] }
 0x60d   : > { %8408 = vst [vmem:[%s13850_s24 + $0xf0] sm:$0xff] %v6881_v39  ;;  %v9828_v33 = vor.u32 %v11230_v18, %v9827_v37 }
 0x60e   : > { %7305 = vmatpush.bf16.msra.mxu2 %v10212_v44 }
 0x60f   : > { %7207 = vmatpush.bf16.msra.mxu0 %v9828_v33 }
 0x610   : > { %v6929_v63 = vpop.f32.mrf.mxu2  ;;  %v6834_v56 = vpop.f32.mrf.mxu0 }
 0x611   : > { %v6930_v36 = vadd.f32 %v6929_v63, %v13846_v34  ;;  %v6978_v24 = vpop.f32.mrf.mxu3  ;;  %v6835_v10 = vadd.f32 %v6834_v56, %v13797_v9  ;;  %v6883_v61 = vpop.f32.mrf.mxu1 }
 0x613   : > { %v13889_v55 = vadd.f32 %v6978_v24, %v6930_v36  ;;  %v6884_v13 = vadd.f32 %v6883_v61, %v6835_v10  ;;  %7029 = vmatmul.bf16.gmra.mxu0 %v14920_v2  ;;  %v10404_v36 = vor.u32 %v11374_v51, %v10403_v57  ;;  %v10019_v61 = vld [vmem:[#allocation8 + $0x1e8] sm:$0xf] }
 0x614   : > { %7078 = vmatmul.bf16.gmra.mxu1 %v14921_v29 }
 0x615   : > { %7127 = vmatmul.bf16.gmra.mxu2 %v13523_v6  ;;  %8414 = vst [vmem:[%s13850_s24 + $0x120] sm:$0xff] %v6884_v13  ;;  %7354 = vmatpush.bf16.msra.mxu3 %v10404_v36  ;;  %v11278_v13 = vld [vmem:[#allocation8 + $0x1fc] sm:$0xf0]  ;;  %v11320_v36 = vld [vmem:[#allocation8 + $0x34c] sm:$0xf0] }
 0x616   : > { %7176 = vmatmul.bf16.gmra.mxu3 %v13702_v40  ;;  %v10020_v8 = vor.u32 %v11278_v13, %v10019_v61  ;;  %v11224_v61 = vld [vmem:[#allocation8 + $0x4c] sm:$0xf0]  ;;  %v10379_v13 = vld [vmem:[#allocation8 + $0x4b8] sm:$0xf] }
 0x618   : > { %v6932_v9 = vpop.f32.mrf.mxu2  ;;  %v6836_v63 = vpop.f32.mrf.mxu0  ;;  %7256 = vmatpush.bf16.msra.mxu1 %v10020_v8  ;;  %v11368_v8 = vld [vmem:[#allocation8 + $0x4cc] sm:$0xf0] }
 0x619   : > { %v6933_v39 = vadd.f32 %v6932_v9, %v13846_v34  ;;  %v6981_v41 = vpop.f32.mrf.mxu3  ;;  %v6837_v24 = vadd.f32 %v6836_v63, %v13800_v30  ;;  %v6885_v56 = vpop.f32.mrf.mxu1  ;;  %v10187_v63 = vld [vmem:[#allocation8 + $0x338] sm:$0xf] }
 0x61b   : > { %v13898_v10 = vadd.f32 %v6981_v41, %v6933_v39  ;;  %v6886_v16 = vadd.f32 %v6885_v56, %v6837_v24  ;;  %v14922_v39 = vld [vmem:[#allocation67_spill] sm:$0xff]  ;;  %v14923_v41 = vld [vmem:[#allocation21_spill] sm:$0xff]  ;;  %v10188_v24 = vor.u32 %v11320_v36, %v10187_v63  ;;  %v9803_v56 = vld [vmem:[#allocation8 + $0x38] sm:$0xf] }
 0x61c   : > { %v9995_v63 = vld [vmem:[#allocation8 + $0x1b8] sm:$0xf]  ;;  %v11272_v36 = vld [vmem:[#allocation8 + $0x1cc] sm:$0xf0] }
 0x61d   : > { %8420 = vst [vmem:[%s13850_s24 + $0x150] sm:$0xff] %v6886_v16  ;;  %v9804_v16 = vor.u32 %v11224_v61, %v9803_v56  ;;  %7306 = vmatpush.bf16.msra.mxu2 %v10188_v24  ;;  %v9996_v56 = vor.u32 %v11272_v36, %v9995_v63  ;;  %v10355_v63 = vld [vmem:[#allocation8 + $0x488] sm:$0xf] }
 0x61f   : > { %7208 = vmatpush.bf16.msra.mxu0 %v9804_v16  ;;  %7257 = vmatpush.bf16.msra.mxu1 %v9996_v56 }
 0x620   : > { %v6934_v37 = vpop.f32.mrf.mxu2  ;;  %v6839_v44 = vpop.f32.mrf.mxu0 }
 0x621   : > { %v6935_v18 = vadd.f32 %v6934_v37, %v13846_v34  ;;  %v6983_v9 = vpop.f32.mrf.mxu3  ;;  %v6840_v57 = vadd.f32 %v6839_v44, %v13807_v58  ;;  %v6888_v30 = vpop.f32.mrf.mxu1  ;;  %v10380_v44 = vor.u32 %v11368_v8, %v10379_v13 }
 0x623   : > { %v13903_v51 = vadd.f32 %v6983_v9, %v6935_v18  ;;  %v6889_v33 = vadd.f32 %v6888_v30, %v6840_v57  ;;  %7034 = vmatmul.bf16.gmra.mxu0 %v14922_v39  ;;  %7355 = vmatpush.bf16.msra.mxu3 %v10380_v44 }
 0x624   : > { %7083 = vmatmul.bf16.gmra.mxu1 %v14923_v41 }
 0x625   : > { %7132 = vmatmul.bf16.gmra.mxu2 %v13551_v3  ;;  %8426 = vst [vmem:[%s13850_s24 + $0x180] sm:$0xff] %v6889_v33 }
 0x626   : > { %7181 = vmatmul.bf16.gmra.mxu3 %v13719_v49 }
 0x628   : > { %v6937_v58 = vpop.f32.mrf.mxu2  ;;  %v6841_v9 = vpop.f32.mrf.mxu0 }
 0x629   : > { %v6938_v37 = vadd.f32 %v6937_v58, %v13846_v34  ;;  %v6986_v18 = vpop.f32.mrf.mxu3  ;;  %v6842_v57 = vadd.f32 %v6841_v9, %v13810_v35  ;;  %v6890_v30 = vpop.f32.mrf.mxu1  ;;  %v11314_v9 = vld [vmem:[#allocation8 + $0x31c] sm:$0xf0] }
 0x62b   : > { %v13912_v33 = vadd.f32 %v6986_v18, %v6938_v37  ;;  %v6891_v49 = vadd.f32 %v6890_v30, %v6842_v57  ;;  %v14924_v37 = vld [vmem:[#allocation68_spill] sm:$0xff]  ;;  %v14925_v18 = vld [vmem:[#allocation22_spill] sm:$0xff]  ;;  %v11218_v30 = vld [vmem:[#allocation8 + $0x1c] sm:$0xf0] }
 0x62c   : > { %v9779_v57 = vld [vmem:[#allocation8 + $0x8] sm:$0xf] }
 0x62d   : > { %8432 = vst [vmem:[%s13850_s24 + $0x1b0] sm:$0xff] %v6891_v49  ;;  %v10163_v49 = vld [vmem:[#allocation8 + $0x308] sm:$0xf]  ;;  %v9780_v36 = vor.u32 %v11218_v30, %v9779_v57 }
 0x62e   : > { %v10164_v44 = vor.u32 %v11314_v9, %v10163_v49  ;;  %v9971_v49 = vld [vmem:[#allocation8 + $0x188] sm:$0xf]  ;;  %v11266_v9 = vld [vmem:[#allocation8 + $0x19c] sm:$0xf0] }
 0x62f   : > { %7209 = vmatpush.bf16.msra.mxu0 %v9780_v36  ;;  %v9972_v57 = vor.u32 %v11266_v9, %v9971_v49  ;;  %v11305_v49 = vld [vmem:[#allocation8 + $0x2dc] sm:$0xf]  ;;  %v10141_v9 = vld [vmem:[#allocation8 + $0x2f0] sm:$0xf0] }
 0x630   : > { %v6939_v61 = vpop.f32.mrf.mxu2  ;;  %v6844_v24 = vpop.f32.mrf.mxu0  ;;  %7307 = vmatpush.bf16.msra.mxu2 %v10164_v44 }
 0x631   : > { %v6940_v58 = vadd.f32 %v6939_v61, %v13846_v34  ;;  %v6988_v3 = vpop.f32.mrf.mxu3  ;;  %v6845_v13 = vadd.f32 %v6844_v24, %v13817_v5  ;;  %v6893_v35 = vpop.f32.mrf.mxu1  ;;  %7258 = vmatpush.bf16.msra.mxu1 %v9972_v57 }
 0x633   : > { %v13917_v8 = vadd.f32 %v6988_v3, %v6940_v58  ;;  %v6894_v16 = vadd.f32 %v6893_v35, %v6845_v13  ;;  %7039 = vmatmul.bf16.gmra.mxu0 %v14924_v37  ;;  %v11362_v3 = vld [vmem:[#allocation8 + $0x49c] sm:$0xf0] }
 0x634   : > { %7088 = vmatmul.bf16.gmra.mxu1 %v14925_v18  ;;  %v10356_v24 = vor.u32 %v11362_v3, %v10355_v63 }
 0x635   : > { %7137 = vmatmul.bf16.gmra.mxu2 %v13574_v15  ;;  %8438 = vst [vmem:[%s13850_s24 + $0x1e0] sm:$0xff] %v6894_v16 }
 0x636   : > { %7186 = vmatmul.bf16.gmra.mxu3 %v13741_v53 }
 0x637   : > { %7356 = vmatpush.bf16.msra.mxu3 %v10356_v24 }
 0x638   : > { %v6942_v5 = vpop.f32.mrf.mxu2  ;;  %v6846_v58 = vpop.f32.mrf.mxu0 }
 0x639   : > { %v6943_v56 = vadd.f32 %v6942_v5, %v13846_v34  ;;  %v6991_v61 = vpop.f32.mrf.mxu3  ;;  %v6847_v13 = vadd.f32 %v6846_v58, %v13820_v38  ;;  %v6895_v35 = vpop.f32.mrf.mxu1  ;;  %v9949_v58 = vld [vmem:[#allocation8 + $0x170] sm:$0xf0] }
 0x63b   : > { %v13926_v16 = vadd.f32 %v6991_v61, %v6943_v56  ;;  %v6896_v53 = vadd.f32 %v6895_v35, %v6847_v13  ;;  %v14926_v56 = vld [vmem:[#allocation69_spill] sm:$0xff]  ;;  %v14927_v61 = vld [vmem:[#allocation23_spill] sm:$0xff]  ;;  %v10715_v13 = vld [vmem:[#allocation8 + $0x758] sm:$0xf] }
 0x63c   : > { %v11452_v35 = vld [vmem:[#allocation8 + $0x76c] sm:$0xf0] }
 0x63d   : > { %8444 = vst [vmem:[%s13850_s24 + $0x210] sm:$0xff] %v6896_v53  ;;  %v11257_v53 = vld [vmem:[#allocation8 + $0x15c] sm:$0xf] }
 0x63e   : > { %v9952_v24 = vor.u32 %v11257_v53, %v9949_v58  ;;  %v10907_v58 = vld [vmem:[#allocation8 + $0x8d8] sm:$0xf] }
 0x640   : > { %v6944_v30 = vpop.f32.mrf.mxu2  ;;  %v6849_v44 = vpop.f32.mrf.mxu0  ;;  %7496 = vmatpush.bf16.msrb.mxu2 %v9952_v24 }
 0x641   : > { %v6945_v5 = vadd.f32 %v6944_v30, %v13846_v34  ;;  %v6993_v15 = vpop.f32.mrf.mxu3  ;;  %v6850_v63 = vadd.f32 %v6849_v44, %v13827_v12  ;;  %v6898_v38 = vpop.f32.mrf.mxu1  ;;  %v10144_v44 = vor.u32 %v11305_v49, %v10141_v9 }
 0x643   : > { %v13931_v3 = vadd.f32 %v6993_v15, %v6945_v5  ;;  %v6899_v36 = vadd.f32 %v6898_v38, %v6850_v63  ;;  %7044 = vmatmul.bf16.gmra.mxu0 %v14926_v56  ;;  %v10716_v15 = vor.u32 %v11452_v35, %v10715_v13  ;;  %7545 = vmatpush.bf16.msrb.mxu3 %v10144_v44 }
 0x644   : > { %7093 = vmatmul.bf16.gmra.mxu1 %v14927_v61 }
 0x645   : > { %7142 = vmatmul.bf16.gmra.mxu2 %v13595_v7  ;;  %8450 = vst [vmem:[%s13850_s24 + $0x240] sm:$0xff] %v6899_v36  ;;  %7398 = vmatpush.bf16.msrb.mxu0 %v10716_v15 }
 0x646   : > { %7191 = vmatmul.bf16.gmra.mxu3 %v13761_v52  ;;  %v11500_v52 = vld [vmem:[#allocation8 + $0x8ec] sm:$0xf0] }
 0x647   : > { %v10908_v13 = vor.u32 %v11500_v52, %v10907_v58  ;;  %v11251_v52 = vld [vmem:[#allocation8 + $0x12c] sm:$0xf]  ;;  %v10117_v58 = vld [vmem:[#allocation8 + $0x2c0] sm:$0xf0] }
 0x648   : > { %v6947_v12 = vpop.f32.mrf.mxu2  ;;  %v6851_v5 = vpop.f32.mrf.mxu0 }
 0x649   : > { %v6948_v57 = vadd.f32 %v6947_v12, %v13846_v34  ;;  %v6996_v30 = vpop.f32.mrf.mxu3  ;;  %v6852_v63 = vadd.f32 %v6851_v5, %v13830_v59  ;;  %v6900_v38 = vpop.f32.mrf.mxu1  ;;  %7447 = vmatpush.bf16.msrb.mxu1 %v10908_v13  ;;  %v9925_v5 = vld [vmem:[#allocation8 + $0x140] sm:$0xf0] }
 0x64a   : > { %v9928_v44 = vor.u32 %v11251_v52, %v9925_v5  ;;  %v10883_v5 = vld [vmem:[#allocation8 + $0x8a8] sm:$0xf] }
 0x64b   : > { %v13940_v36 = vadd.f32 %v6996_v30, %v6948_v57  ;;  %v6901_v53 = vadd.f32 %v6900_v38, %v6852_v63  ;;  %v14928_v57 = vld [vmem:[#allocation16_spill] sm:$0xff]  ;;  %v11446_v38 = vld [vmem:[#allocation8 + $0x73c] sm:$0xf0] }
 0x64c   : > { %v14929_v30 = vld [vmem:[#allocation24_spill] sm:$0xff]  ;;  %7497 = vmatpush.bf16.msrb.mxu2 %v9928_v44 }
 0x64d   : > { %8456 = vst [vmem:[%s13850_s24 + $0x270] sm:$0xff] %v6901_v53  ;;  %v10691_v63 = vld [vmem:[#allocation8 + $0x728] sm:$0xf]  ;;  %v11299_v53 = vld [vmem:[#allocation8 + $0x2ac] sm:$0xf] }
 0x650   : > { %v6949_v35 = vpop.f32.mrf.mxu2  ;;  %v6854_v24 = vpop.f32.mrf.mxu0 }
 0x651   : > { %v6950_v12 = vadd.f32 %v6949_v35, %v13846_v34  ;;  %v6998_v7 = vpop.f32.mrf.mxu3  ;;  %v6855_v49 = vadd.f32 %v6854_v24, %v13837_v48  ;;  %v6903_v59 = vpop.f32.mrf.mxu1  ;;  %v10120_v24 = vor.u32 %v11299_v53, %v10117_v58  ;;  %v14931_v58 = vld [vmem:[#allocation56_spill] sm:$0xff] }
 0x653   : > { %v13945_v9 = vadd.f32 %v6998_v7, %v6950_v12  ;;  %v6904_v15 = vadd.f32 %v6903_v59, %v6855_v49  ;;  %7049 = vmatmul.bf16.gmra.mxu0 %v14928_v57  ;;  %v10692_v7 = vor.u32 %v11446_v38, %v10691_v63  ;;  %7546 = vmatpush.bf16.msrb.mxu3 %v10120_v24  ;;  %v11293_v24 = vld [vmem:[#allocation8 + $0x27c] sm:$0xf] }
 0x654   : > { %7098 = vmatmul.bf16.gmra.mxu1 %v14929_v30 }
 0x655   : > { %7147 = vmatmul.bf16.gmra.mxu2 %v13611_v20  ;;  %8462 = vst [vmem:[%s13850_s24 + $0x2a0] sm:$0xff] %v6904_v15  ;;  %7399 = vmatpush.bf16.msrb.mxu0 %v10692_v7  ;;  %v14930_v7 = vld [vmem:[#allocation49_spill] sm:$0xff] }
 0x656   : > { %7196 = vmatmul.bf16.gmra.mxu3 %v13774_v21  ;;  %v11494_v21 = vld [vmem:[#allocation8 + $0x8bc] sm:$0xf0] }
 0x657   : > { %v10884_v20 = vor.u32 %v11494_v21, %v10883_v5  ;;  %v11245_v21 = vld [vmem:[#allocation8 + $0xfc] sm:$0xf] }
 0x658   : > { %v6952_v48 = vpop.f32.mrf.mxu2  ;;  %v6856_v12 = vpop.f32.mrf.mxu0 }
 0x659   : > { %v6953_v13 = vadd.f32 %v6952_v48, %v13846_v34  ;;  %v7001_v35 = vpop.f32.mrf.mxu3  ;;  %v6857_v49 = vadd.f32 %v6856_v12, %v13840_v50  ;;  %v6905_v59 = vpop.f32.mrf.mxu1  ;;  %7448 = vmatpush.bf16.msrb.mxu1 %v10884_v20  ;;  %v10667_v20 = vld [vmem:[#allocation8 + $0x6f8] sm:$0xf]  ;;  %v11440_v12 = vld [vmem:[#allocation8 + $0x70c] sm:$0xf0] }
 0x65b   : > { %v13954_v15 = vadd.f32 %v7001_v35, %v6953_v13  ;;  %v6906_v52 = vadd.f32 %v6905_v59, %v6857_v49  ;;  %v9901_v13 = vld [vmem:[#allocation8 + $0x110] sm:$0xf0] }
 0x65c   : > { %v10093_v49 = vld [vmem:[#allocation8 + $0x290] sm:$0xf0] }
 0x65d   : > { %8468 = vst [vmem:[%s13850_s24 + $0x2d0] sm:$0xff] %v6906_v52  ;;  %v10668_v52 = vor.u32 %v11440_v12, %v10667_v20 }
 0x65f   : > { %7400 = vmatpush.bf16.msrb.mxu0 %v10668_v52 }
 0x660   : > { %v6954_v63 = vpop.f32.mrf.mxu2  ;;  %v7015_v40 = vpop.f32.mrf.mxu0 }
 0x661   : > { %v6955_v38 = vadd.f32 %v6954_v63, %v13846_v34  ;;  %v7003_v48 = vpop.f32.mrf.mxu3  ;;  %v7064_v44 = vpop.f32.mrf.mxu1  ;;  %v7016_v50 = vadd.f32 %v7015_v40, %v13856_v0  ;;  %v9904_v34 = vor.u32 %v11245_v21, %v9901_v13  ;;  %v10096_v40 = vor.u32 %v11293_v24, %v10093_v49 }
 0x663   : > { %v13958_v53 = vadd.f32 %v7003_v48, %v6955_v38  ;;  %7210 = vmatmul.bf16.vlgmr.msra.gmra.mxu0 %v14930_v7  ;;  %v7065_v35 = vadd.f32 %v7064_v44, %v7016_v50  ;;  %7498 = vmatpush.bf16.msrb.mxu2 %v9904_v34  ;;  %v10859_v44 = vld [vmem:[#allocation8 + $0x878] sm:$0xf]  ;;  %v11488_v50 = vld [vmem:[#allocation8 + $0x88c] sm:$0xf0] }
 0x664   : > { %7259 = vmatmul.bf16.vlgmr.msra.gmra.mxu1 %v14931_v58  ;;  %7547 = vmatpush.bf16.msrb.mxu3 %v10096_v40  ;;  %v10860_v21 = vor.u32 %v11488_v50, %v10859_v44  ;;  %v11434_v40 = vld [vmem:[#allocation8 + $0x6dc] sm:$0xf0] }
 0x665   : > { %7308 = vmatmul.bf16.vlgmr.msra.gmra.mxu2 %v14884_v60 }
 0x666   : > { %7357 = vmatmul.bf16.vlgmr.msra.gmra.mxu3 %v14885_v45  ;;  %7449 = vmatpush.bf16.msrb.mxu1 %v10860_v21 }
 0x668   : > { %v7113_v59 = vpop.f32.mrf.mxu2  ;;  %v7017_v63 = vpop.f32.mrf.mxu0 }
 0x669   : > { %v7114_v0 = vadd.f32 %v7113_v59, %v7065_v35  ;;  %v7162_v5 = vpop.f32.mrf.mxu3  ;;  %v7066_v38 = vpop.f32.mrf.mxu1  ;;  %v7018_v45 = vadd.f32 %v7017_v63, %v13861_v22  ;;  %v11239_v22 = vld [vmem:[#allocation8 + $0xcc] sm:$0xf]  ;;  %v10643_v59 = vld [vmem:[#allocation8 + $0x6c8] sm:$0xf] }
 0x66b   : > { %v7163_v48 = vadd.f32 %v7162_v5, %v7114_v0  ;;  %v7067_v13 = vadd.f32 %v7066_v38, %v7018_v45  ;;  %v9877_v45 = vld [vmem:[#allocation8 + $0xe0] sm:$0xf0]  ;;  %v11287_v0 = vld [vmem:[#allocation8 + $0x24c] sm:$0xf] }
 0x66c   : > { %v10069_v5 = vld [vmem:[#allocation8 + $0x260] sm:$0xf0] }
 0x66d   : > { %8379 = vst [vmem:[%s13850_s24 + $0x8] sm:$0xff] %v7163_v48  ;;  %v10072_v38 = vor.u32 %v11287_v0, %v10069_v5  ;;  %v9853_v0 = vld [vmem:[#allocation8 + $0xb0] sm:$0xf0]  ;;  %v10619_v5 = vld [vmem:[#allocation8 + $0x698] sm:$0xf] }
 0x66f   : > { %7548 = vmatpush.bf16.msrb.mxu3 %v10072_v38  ;;  %v11428_v38 = vld [vmem:[#allocation8 + $0x6ac] sm:$0xf0] }
 0x670   : > { %v7115_v60 = vpop.f32.mrf.mxu2  ;;  %v7020_v35 = vpop.f32.mrf.mxu0 }
 0x671   : > { %v7116_v20 = vadd.f32 %v7115_v60, %v7067_v13  ;;  %v7164_v12 = vpop.f32.mrf.mxu3  ;;  %v7069_v24 = vpop.f32.mrf.mxu1  ;;  %v7021_v34 = vadd.f32 %v7020_v35, %v13870_v1  ;;  %v9880_v60 = vor.u32 %v11239_v22, %v9877_v45  ;;  %v10644_v1 = vor.u32 %v11434_v40, %v10643_v59  ;;  %v11482_v35 = vld [vmem:[#allocation8 + $0x85c] sm:$0xf0] }
 0x673   : > { %v7165_v49 = vadd.f32 %v7164_v12, %v7116_v20  ;;  %7215 = vmatmul.bf16.gmra.mxu0 %v14887_v46  ;;  %v7070_v52 = vadd.f32 %v7069_v24, %v7021_v34  ;;  %7499 = vmatpush.bf16.msrb.mxu2 %v9880_v60  ;;  %v10835_v12 = vld [vmem:[#allocation8 + $0x848] sm:$0xf] }
 0x674   : > { %7264 = vmatmul.bf16.gmra.mxu1 %v14888_v14  ;;  %7401 = vmatpush.bf16.msrb.mxu0 %v10644_v1  ;;  %v10836_v24 = vor.u32 %v11482_v35, %v10835_v12 }
 0x675   : > { %8385 = vst [vmem:[%s13850_s24 + $0x38] sm:$0xff] %v7165_v49  ;;  %7313 = vmatmul.bf16.gmra.mxu2 %v14889_v47 }
 0x676   : > { %7362 = vmatmul.bf16.gmra.mxu3 %v14890_v17  ;;  %7450 = vmatpush.bf16.msrb.mxu1 %v10836_v24 }
 0x678   : > { %v7118_v63 = vpop.f32.mrf.mxu2  ;;  %v7022_v50 = vpop.f32.mrf.mxu0 }
 0x679   : > { %v7119_v48 = vadd.f32 %v7118_v63, %v7070_v52  ;;  %v7167_v44 = vpop.f32.mrf.mxu3  ;;  %v7071_v21 = vpop.f32.mrf.mxu1  ;;  %v7023_v20 = vadd.f32 %v7022_v50, %v13875_v4  ;;  %v11233_v4 = vld [vmem:[#allocation8 + $0x9c] sm:$0xf] }
 0x67a   : > { %v9856_v1 = vor.u32 %v11233_v4, %v9853_v0 }
 0x67b   : > { %v7168_v13 = vadd.f32 %v7167_v44, %v7119_v48  ;;  %v7072_v49 = vadd.f32 %v7071_v21, %v7023_v20  ;;  %v11281_v48 = vld [vmem:[#allocation8 + $0x21c] sm:$0xf]  ;;  %v10045_v44 = vld [vmem:[#allocation8 + $0x230] sm:$0xf0] }
 0x67c   : > { %v10048_v21 = vor.u32 %v11281_v48, %v10045_v44  ;;  %7500 = vmatpush.bf16.msrb.mxu2 %v9856_v1  ;;  %v14932_v1 = vld [vmem:[#allocation59_spill] sm:$0xff]  ;;  %v10595_v48 = vld [vmem:[#allocation8 + $0x668] sm:$0xf] }
 0x67d   : > { %8391 = vst [vmem:[%s13850_s24 + $0x68] sm:$0xff] %v7168_v13 }
 0x67e   : > { %7549 = vmatpush.bf16.msrb.mxu3 %v10048_v21  ;;  %v11275_v21 = vld [vmem:[#allocation8 + $0x1ec] sm:$0xf] }
 0x680   : > { %v7120_v34 = vpop.f32.mrf.mxu2  ;;  %v7025_v59 = vpop.f32.mrf.mxu0 }
 0x681   : > { %v7121_v22 = vadd.f32 %v7120_v34, %v7072_v49  ;;  %v7169_v45 = vpop.f32.mrf.mxu3  ;;  %v7074_v52 = vpop.f32.mrf.mxu1  ;;  %v7026_v60 = vadd.f32 %v7025_v59, %v13884_v54  ;;  %v10620_v54 = vor.u32 %v11428_v38, %v10619_v5  ;;  %v10811_v34 = vld [vmem:[#allocation8 + $0x818] sm:$0xf]  ;;  %v9829_v38 = vld [vmem:[#allocation8 + $0x80] sm:$0xf0] }
 0x683   : > { %v7170_v40 = vadd.f32 %v7169_v45, %v7121_v22  ;;  %7220 = vmatmul.bf16.gmra.mxu0 %v14891_v32  ;;  %v7075_v63 = vadd.f32 %v7074_v52, %v7026_v60  ;;  %v11476_v22 = vld [vmem:[#allocation8 + $0x82c] sm:$0xf0] }
 0x684   : > { %7269 = vmatmul.bf16.gmra.mxu1 %v14892_v43  ;;  %7402 = vmatpush.bf16.msrb.mxu0 %v10620_v54  ;;  %v10812_v45 = vor.u32 %v11476_v22, %v10811_v34  ;;  %v11422_v54 = vld [vmem:[#allocation8 + $0x67c] sm:$0xf0] }
 0x685   : > { %8397 = vst [vmem:[%s13850_s24 + $0x98] sm:$0xff] %v7170_v40  ;;  %7318 = vmatmul.bf16.gmra.mxu2 %v14893_v28 }
 0x686   : > { %7367 = vmatmul.bf16.gmra.mxu3 %v14894_v23  ;;  %7451 = vmatpush.bf16.msrb.mxu1 %v10812_v45 }
 0x688   : > { %v7123_v50 = vpop.f32.mrf.mxu2  ;;  %v7027_v12 = vpop.f32.mrf.mxu0 }
 0x689   : > { %v7124_v13 = vadd.f32 %v7123_v50, %v7075_v63  ;;  %v7172_v20 = vpop.f32.mrf.mxu3  ;;  %v7076_v35 = vpop.f32.mrf.mxu1  ;;  %v7028_v49 = vadd.f32 %v7027_v12, %v13889_v55  ;;  %v11227_v55 = vld [vmem:[#allocation8 + $0x6c] sm:$0xf] }
 0x68a   : > { %v9832_v50 = vor.u32 %v11227_v55, %v9829_v38 }
 0x68b   : > { %v7173_v24 = vadd.f32 %v7172_v20, %v7124_v13  ;;  %v7077_v59 = vadd.f32 %v7076_v35, %v7028_v49  ;;  %v10021_v13 = vld [vmem:[#allocation8 + $0x200] sm:$0xf0] }
 0x68c   : > { %v10024_v12 = vor.u32 %v11275_v21, %v10021_v13  ;;  %7501 = vmatpush.bf16.msrb.mxu2 %v9832_v50  ;;  %v14934_v50 = vld [vmem:[#allocation60_spill] sm:$0xff]  ;;  %v10571_v21 = vld [vmem:[#allocation8 + $0x638] sm:$0xf] }
 0x68d   : > { %8403 = vst [vmem:[%s13850_s24 + $0xc8] sm:$0xff] %v7173_v24 }
 0x68e   : > { %7550 = vmatpush.bf16.msrb.mxu3 %v10024_v12  ;;  %v11269_v12 = vld [vmem:[#allocation8 + $0x1bc] sm:$0xf] }
 0x690   : > { %v7125_v52 = vpop.f32.mrf.mxu2  ;;  %v7030_v4 = vpop.f32.mrf.mxu0 }
 0x691   : > { %v7126_v40 = vadd.f32 %v7125_v52, %v7077_v59  ;;  %v7174_v60 = vpop.f32.mrf.mxu3  ;;  %v7079_v0 = vpop.f32.mrf.mxu1  ;;  %v7031_v63 = vadd.f32 %v7030_v4, %v13898_v10  ;;  %v10596_v10 = vor.u32 %v11422_v54, %v10595_v48  ;;  %v10787_v59 = vld [vmem:[#allocation8 + $0x7e8] sm:$0xf]  ;;  %v11470_v52 = vld [vmem:[#allocation8 + $0x7fc] sm:$0xf0]  ;;  %v9805_v54 = vld [vmem:[#allocation8 + $0x50] sm:$0xf0] }
 0x693   : > { %v7175_v5 = vadd.f32 %v7174_v60, %v7126_v40  ;;  %7225 = vmatmul.bf16.gmra.mxu0 %v14895_v25  ;;  %v7080_v44 = vadd.f32 %v7079_v0, %v7031_v63  ;;  %v10788_v40 = vor.u32 %v11470_v52, %v10787_v59 }
 0x694   : > { %7274 = vmatmul.bf16.gmra.mxu1 %v14932_v1  ;;  %7403 = vmatpush.bf16.msrb.mxu0 %v10596_v10  ;;  %v11416_v10 = vld [vmem:[#allocation8 + $0x64c] sm:$0xf0] }
 0x695   : > { %8409 = vst [vmem:[%s13850_s24 + $0xf8] sm:$0xff] %v7175_v5  ;;  %7323 = vmatmul.bf16.gmra.mxu2 %v14920_v2  ;;  %7452 = vmatpush.bf16.msrb.mxu1 %v10788_v40 }
 0x696   : > { %7372 = vmatmul.bf16.gmra.mxu3 %v14921_v29 }
 0x698   : > { %v7128_v20 = vpop.f32.mrf.mxu2  ;;  %v7032_v49 = vpop.f32.mrf.mxu0 }
 0x699   : > { %v7129_v35 = vadd.f32 %v7128_v20, %v7080_v44  ;;  %v7177_v24 = vpop.f32.mrf.mxu3  ;;  %v7081_v34 = vpop.f32.mrf.mxu1  ;;  %v7033_v45 = vadd.f32 %v7032_v49, %v13903_v51  ;;  %v14933_v44 = vld [vmem:[#allocation53_spill] sm:$0xff]  ;;  %v11221_v51 = vld [vmem:[#allocation8 + $0x3c] sm:$0xf] }
 0x69a   : > { %v9808_v20 = vor.u32 %v11221_v51, %v9805_v54 }
 0x69b   : > { %v7178_v22 = vadd.f32 %v7177_v24, %v7129_v35  ;;  %v7082_v60 = vadd.f32 %v7081_v34, %v7033_v45  ;;  %v9997_v35 = vld [vmem:[#allocation8 + $0x1d0] sm:$0xf0] }
 0x69c   : > { %v10000_v49 = vor.u32 %v11269_v12, %v9997_v35  ;;  %7502 = vmatpush.bf16.msrb.mxu2 %v9808_v20  ;;  %v14936_v20 = vld [vmem:[#allocation61_spill] sm:$0xff]  ;;  %v10547_v12 = vld [vmem:[#allocation8 + $0x608] sm:$0xf] }
 0x69d   : > { %8415 = vst [vmem:[%s13850_s24 + $0x128] sm:$0xff] %v7178_v22 }
 0x69e   : > { %7551 = vmatpush.bf16.msrb.mxu3 %v10000_v49  ;;  %v11263_v49 = vld [vmem:[#allocation8 + $0x18c] sm:$0xf] }
 0x6a0   : > { %v7130_v4 = vpop.f32.mrf.mxu2  ;;  %v7035_v63 = vpop.f32.mrf.mxu0 }
 0x6a1   : > { %v7131_v0 = vadd.f32 %v7130_v4, %v7082_v60  ;;  %v7179_v5 = vpop.f32.mrf.mxu3  ;;  %v7084_v55 = vpop.f32.mrf.mxu1  ;;  %v7036_v48 = vadd.f32 %v7035_v63, %v13912_v33  ;;  %v10572_v33 = vor.u32 %v11416_v10, %v10571_v21  ;;  %v10763_v60 = vld [vmem:[#allocation8 + $0x7b8] sm:$0xf]  ;;  %v11464_v4 = vld [vmem:[#allocation8 + $0x7cc] sm:$0xf0]  ;;  %v9781_v10 = vld [vmem:[#allocation8 + $0x20] sm:$0xf0] }
 0x6a3   : > { %v7180_v38 = vadd.f32 %v7179_v5, %v7131_v0  ;;  %7230 = vmatmul.bf16.gmra.mxu0 %v14933_v44  ;;  %v7085_v13 = vadd.f32 %v7084_v55, %v7036_v48  ;;  %v10764_v0 = vor.u32 %v11464_v4, %v10763_v60 }
 0x6a4   : > { %7279 = vmatmul.bf16.gmra.mxu1 %v14934_v50  ;;  %7404 = vmatpush.bf16.msrb.mxu0 %v10572_v33  ;;  %v11410_v33 = vld [vmem:[#allocation8 + $0x61c] sm:$0xf0] }
 0x6a5   : > { %8421 = vst [vmem:[%s13850_s24 + $0x158] sm:$0xff] %v7180_v38  ;;  %7328 = vmatmul.bf16.gmra.mxu2 %v14922_v39  ;;  %7453 = vmatpush.bf16.msrb.mxu1 %v10764_v0 }
 0x6a6   : > { %7377 = vmatmul.bf16.gmra.mxu3 %v14923_v41 }
 0x6a8   : > { %v7133_v24 = vpop.f32.mrf.mxu2  ;;  %v7037_v45 = vpop.f32.mrf.mxu0 }
 0x6a9   : > { %v7134_v34 = vadd.f32 %v7133_v24, %v7085_v13  ;;  %v7182_v22 = vpop.f32.mrf.mxu3  ;;  %v7086_v59 = vpop.f32.mrf.mxu1  ;;  %v7038_v40 = vadd.f32 %v7037_v45, %v13917_v8  ;;  %v14935_v13 = vld [vmem:[#allocation48_spill] sm:$0xff] }
 0x6aa   : > { %v11215_v8 = vld [vmem:[#allocation8 + $0xc] sm:$0xf] }
 0x6ab   : > { %v7183_v52 = vadd.f32 %v7182_v22, %v7134_v34  ;;  %v7087_v5 = vadd.f32 %v7086_v59, %v7038_v40  ;;  %v9784_v24 = vor.u32 %v11215_v8, %v9781_v10  ;;  %v9973_v34 = vld [vmem:[#allocation8 + $0x1a0] sm:$0xf0] }
 0x6ac   : > { %v9976_v45 = vor.u32 %v11263_v49, %v9973_v34  ;;  %v11353_v49 = vld [vmem:[#allocation8 + $0x45c] sm:$0xf] }
 0x6ad   : > { %8427 = vst [vmem:[%s13850_s24 + $0x188] sm:$0xff] %v7183_v52  ;;  %7503 = vmatpush.bf16.msrb.mxu2 %v9784_v24  ;;  %v14938_v24 = vld [vmem:[#allocation62_spill] sm:$0xff] }
 0x6ae   : > { %7552 = vmatpush.bf16.msrb.mxu3 %v9976_v45  ;;  %v11497_v45 = vld [vmem:[#allocation8 + $0x8dc] sm:$0xf] }
 0x6b0   : > { %v7135_v63 = vpop.f32.mrf.mxu2  ;;  %v7040_v48 = vpop.f32.mrf.mxu0 }
 0x6b1   : > { %v7136_v55 = vadd.f32 %v7135_v63, %v7087_v5  ;;  %v7184_v38 = vpop.f32.mrf.mxu3  ;;  %v7089_v51 = vpop.f32.mrf.mxu1  ;;  %v7041_v21 = vadd.f32 %v7040_v48, %v13926_v16  ;;  %v10548_v16 = vor.u32 %v11410_v33, %v10547_v12  ;;  %v10739_v5 = vld [vmem:[#allocation8 + $0x788] sm:$0xf]  ;;  %v11458_v63 = vld [vmem:[#allocation8 + $0x79c] sm:$0xf0]  ;;  %v10717_v33 = vld [vmem:[#allocation8 + $0x770] sm:$0xf0] }
 0x6b3   : > { %v7185_v54 = vadd.f32 %v7184_v38, %v7136_v55  ;;  %7235 = vmatmul.bf16.gmra.mxu0 %v14935_v13  ;;  %v7090_v35 = vadd.f32 %v7089_v51, %v7041_v21  ;;  %v10740_v55 = vor.u32 %v11458_v63, %v10739_v5 }
 0x6b4   : > { %7284 = vmatmul.bf16.gmra.mxu1 %v14936_v20  ;;  %7405 = vmatpush.bf16.msrb.mxu0 %v10548_v16  ;;  %v10333_v16 = vld [vmem:[#allocation8 + $0x470] sm:$0xf0] }
 0x6b5   : > { %8433 = vst [vmem:[%s13850_s24 + $0x1b8] sm:$0xff] %v7185_v54  ;;  %7333 = vmatmul.bf16.gmra.mxu2 %v14924_v37  ;;  %7454 = vmatpush.bf16.msrb.mxu1 %v10740_v55 }
 0x6b6   : > { %7382 = vmatmul.bf16.gmra.mxu3 %v14925_v18 }
 0x6b8   : > { %v7138_v22 = vpop.f32.mrf.mxu2  ;;  %v7042_v40 = vpop.f32.mrf.mxu0 }
 0x6b9   : > { %v7139_v59 = vadd.f32 %v7138_v22, %v7090_v35  ;;  %v7187_v52 = vpop.f32.mrf.mxu3  ;;  %v7091_v60 = vpop.f32.mrf.mxu1  ;;  %v7043_v0 = vadd.f32 %v7042_v40, %v13931_v3  ;;  %v14937_v35 = vld [vmem:[#allocation54_spill] sm:$0xff] }
 0x6ba   : > { %v11449_v3 = vld [vmem:[#allocation8 + $0x75c] sm:$0xf] }
 0x6bb   : > { %v7188_v4 = vadd.f32 %v7187_v52, %v7139_v59  ;;  %v7092_v38 = vadd.f32 %v7091_v60, %v7043_v0  ;;  %v10720_v22 = vor.u32 %v11449_v3, %v10717_v33  ;;  %v10909_v59 = vld [vmem:[#allocation8 + $0x8f0] sm:$0xf0] }
 0x6bc   : > { %v10912_v40 = vor.u32 %v11497_v45, %v10909_v59 }
 0x6bd   : > { %8439 = vst [vmem:[%s13850_s24 + $0x1e8] sm:$0xff] %v7188_v4  ;;  %7692 = vmatpush.bf16.msra.mxu2 %v10720_v22  ;;  %v10693_v22 = vld [vmem:[#allocation8 + $0x740] sm:$0xf0] }
 0x6be   : > { %7741 = vmatpush.bf16.msra.mxu3 %v10912_v40  ;;  %v10885_v40 = vld [vmem:[#allocation8 + $0x8c0] sm:$0xf0] }
 0x6c0   : > { %v7140_v48 = vpop.f32.mrf.mxu2  ;;  %v7045_v21 = vpop.f32.mrf.mxu0 }
 0x6c1   : > { %v7141_v51 = vadd.f32 %v7140_v48, %v7092_v38  ;;  %v7189_v54 = vpop.f32.mrf.mxu3  ;;  %v7094_v8 = vpop.f32.mrf.mxu1  ;;  %v7046_v12 = vadd.f32 %v7045_v21, %v13940_v36  ;;  %v10336_v36 = vor.u32 %v11353_v49, %v10333_v16  ;;  %v11401_v38 = vld [vmem:[#allocation8 + $0x5dc] sm:$0xf]  ;;  %v10525_v48 = vld [vmem:[#allocation8 + $0x5f0] sm:$0xf0]  ;;  %v11347_v16 = vld [vmem:[#allocation8 + $0x42c] sm:$0xf] }
 0x6c3   : > { %v7190_v10 = vadd.f32 %v7189_v54, %v7141_v51  ;;  %7240 = vmatmul.bf16.gmra.mxu0 %v14937_v35  ;;  %v7095_v34 = vadd.f32 %v7094_v8, %v7046_v12  ;;  %v10528_v51 = vor.u32 %v11401_v38, %v10525_v48 }
 0x6c4   : > { %7289 = vmatmul.bf16.gmra.mxu1 %v14938_v24  ;;  %7594 = vmatpush.bf16.msra.mxu0 %v10336_v36  ;;  %v11491_v36 = vld [vmem:[#allocation8 + $0x8ac] sm:$0xf] }
 0x6c5   : > { %8445 = vst [vmem:[%s13850_s24 + $0x218] sm:$0xff] %v7190_v10  ;;  %7338 = vmatmul.bf16.gmra.mxu2 %v14926_v56  ;;  %7643 = vmatpush.bf16.msra.mxu1 %v10528_v51  ;;  %v11395_v51 = vld [vmem:[#allocation8 + $0x5ac] sm:$0xf] }
 0x6c6   : > { %7387 = vmatmul.bf16.gmra.mxu3 %v14927_v61 }
 0x6c8   : > { %v7143_v52 = vpop.f32.mrf.mxu2  ;;  %v7047_v0 = vpop.f32.mrf.mxu0 }
 0x6c9   : > { %v7144_v60 = vadd.f32 %v7143_v52, %v7095_v34  ;;  %v7192_v4 = vpop.f32.mrf.mxu3  ;;  %v7096_v5 = vpop.f32.mrf.mxu1  ;;  %v7048_v55 = vadd.f32 %v7047_v0, %v13945_v9  ;;  %v14939_v34 = vld [vmem:[#allocation63_spill] sm:$0xff]  ;;  %v11443_v9 = vld [vmem:[#allocation8 + $0x72c] sm:$0xf] }
 0x6ca   : > { %v10696_v59 = vor.u32 %v11443_v9, %v10693_v22  ;;  %v10309_v52 = vld [vmem:[#allocation8 + $0x440] sm:$0xf0] }
 0x6cb   : > { %v7193_v63 = vadd.f32 %v7192_v4, %v7144_v60  ;;  %v7097_v54 = vadd.f32 %v7096_v5, %v7048_v55  ;;  %v10888_v4 = vor.u32 %v11491_v36, %v10885_v40  ;;  %v11341_v36 = vld [vmem:[#allocation8 + $0x3fc] sm:$0xf] }
 0x6cc   : > { %7693 = vmatpush.bf16.msra.mxu2 %v10696_v59  ;;  %v11437_v59 = vld [vmem:[#allocation8 + $0x6fc] sm:$0xf] }
 0x6cd   : > { %8451 = vst [vmem:[%s13850_s24 + $0x248] sm:$0xff] %v7193_v63  ;;  %7742 = vmatpush.bf16.msra.mxu3 %v10888_v4  ;;  %v10861_v4 = vld [vmem:[#allocation8 + $0x890] sm:$0xf0] }
 0x6d0   : > { %v7145_v21 = vpop.f32.mrf.mxu2  ;;  %v7050_v12 = vpop.f32.mrf.mxu0 }
 0x6d1   : > { %v7146_v8 = vadd.f32 %v7145_v21, %v7097_v54  ;;  %v7194_v10 = vpop.f32.mrf.mxu3  ;;  %v7099_v3 = vpop.f32.mrf.mxu1  ;;  %v7051_v49 = vadd.f32 %v7050_v12, %v13954_v15  ;;  %v10312_v15 = vor.u32 %v11347_v16, %v10309_v52  ;;  %v10501_v54 = vld [vmem:[#allocation8 + $0x5c0] sm:$0xf0]  ;;  %v10669_v52 = vld [vmem:[#allocation8 + $0x710] sm:$0xf0] }
 0x6d2   : > { %v10504_v21 = vor.u32 %v11395_v51, %v10501_v54  ;;  %v10672_v40 = vor.u32 %v11437_v59, %v10669_v52 }
 0x6d3   : > { %v7195_v33 = vadd.f32 %v7194_v10, %v7146_v8  ;;  %7245 = vmatmul.bf16.gmra.mxu0 %v14913_v42  ;;  %v7100_v45 = vadd.f32 %v7099_v3, %v7051_v49  ;;  %v14023_v8 = vld [vmem:[#allocation10] sm:$0x3f] }
 0x6d4   : > { %7294 = vmatmul.bf16.gmra.mxu1 %v14939_v34  ;;  %7595 = vmatpush.bf16.msra.mxu0 %v10312_v15  ;;  %v14026_v10 = vperm.slane %v14023_v8, 2  ;;  %v11485_v15 = vld [vmem:[#allocation8 + $0x87c] sm:$0xf] }
 0x6d5   : > { %8457 = vst [vmem:[%s13850_s24 + $0x278] sm:$0xff] %v7195_v33  ;;  %7343 = vmatmul.bf16.gmra.mxu2 %v14928_v57  ;;  %7644 = vmatpush.bf16.msra.mxu1 %v10504_v21 }
 0x6d6   : > { %7392 = vmatmul.bf16.gmra.mxu3 %v14929_v30  ;;  %7694 = vmatpush.bf16.msra.mxu2 %v10672_v40  ;;  %v11431_v40 = vld [vmem:[#allocation8 + $0x6cc] sm:$0xf] }
 0x6d8   : > { %v7148_v60 = vpop.f32.mrf.mxu2  ;;  %v7052_v63 = vpop.f32.mrf.mxu0 }
 0x6d9   : > { %v7149_v0 = vadd.f32 %v7148_v60, %v7100_v45  ;;  %v7197_v5 = vpop.f32.mrf.mxu3  ;;  %v7101_v55 = vpop.f32.mrf.mxu1  ;;  %v7053_v48 = vadd.f32 %v7052_v63, %v13958_v53  ;;  %v10285_v60 = vld [vmem:[#allocation8 + $0x410] sm:$0xf0]  ;;  %v10864_v63 = vor.u32 %v11485_v15, %v10861_v4  ;;  %v11335_v15 = vld [vmem:[#allocation8 + $0x3cc] sm:$0xf] }
 0x6db   : > { %v7198_v38 = vadd.f32 %v7197_v5, %v7149_v0  ;;  %v7102_v12 = vadd.f32 %v7101_v55, %v7053_v48  ;;  %v10288_v5 = vor.u32 %v11341_v36, %v10285_v60  ;;  %7743 = vmatpush.bf16.msra.mxu3 %v10864_v63  ;;  %v10645_v60 = vld [vmem:[#allocation8 + $0x6e0] sm:$0xf0] }
 0x6dc   : > { %v10648_v4 = vor.u32 %v11431_v40, %v10645_v60  ;;  %v10837_v63 = vld [vmem:[#allocation8 + $0x860] sm:$0xf0] }
 0x6dd   : > { %8463 = vst [vmem:[%s13850_s24 + $0x2a8] sm:$0xff] %v7198_v38  ;;  %7596 = vmatpush.bf16.msra.mxu0 %v10288_v5  ;;  %v11479_v5 = vld [vmem:[#allocation8 + $0x84c] sm:$0xf] }
 0x6de   : > { %7695 = vmatpush.bf16.msra.mxu2 %v10648_v4 }
 0x6e0   : > { %v7150_v3 = vpop.f32.mrf.mxu2  ;;  %v7211_v9 = vpop.f32.mrf.mxu0 }
 0x6e1   : > { %v7151_v33 = vadd.f32 %v7150_v3, %v7102_v12  ;;  %v7199_v49 = vpop.f32.mrf.mxu3  ;;  %v7212_v22 = vadd.f32 %v7211_v9, %v14026_v10  ;;  %v7260_v16 = vpop.f32.mrf.mxu1  ;;  %v11389_v12 = vld [vmem:[#allocation8 + $0x57c] sm:$0xf]  ;;  %v10477_v3 = vld [vmem:[#allocation8 + $0x590] sm:$0xf0] }
 0x6e3   : > { %v7200_v53 = vadd.f32 %v7199_v49, %v7151_v33  ;;  %v7261_v45 = vadd.f32 %v7260_v16, %v7212_v22  ;;  %7406 = vmatmul.bf16.vlgmr.msrb.gmra.mxu0 %v13439_v62  ;;  %v10480_v49 = vor.u32 %v11389_v12, %v10477_v3 }
 0x6e4   : > { %7455 = vmatmul.bf16.vlgmr.msrb.gmra.mxu1 %v13636_v11 }
 0x6e5   : > { %8469 = vst [vmem:[%s13850_s24 + $0x2d8] sm:$0xff] %v7200_v53  ;;  %7504 = vmatmul.bf16.vlgmr.msrb.gmra.mxu2 %v14930_v7  ;;  %7645 = vmatpush.bf16.msra.mxu1 %v10480_v49 }
 0x6e6   : > { %7553 = vmatmul.bf16.vlgmr.msrb.gmra.mxu3 %v14931_v58 }
 0x6e8   : > { %v7309_v0 = vpop.f32.mrf.mxu2  ;;  %v7213_v48 = vpop.f32.mrf.mxu0 }
 0x6e9   : > { %v7310_v55 = vadd.f32 %v7309_v0, %v7261_v45  ;;  %v7358_v38 = vpop.f32.mrf.mxu3  ;;  %v7214_v51 = vadd.f32 %v7213_v48, %v14026_v10  ;;  %v7262_v54 = vpop.f32.mrf.mxu1  ;;  %v10261_v0 = vld [vmem:[#allocation8 + $0x3e0] sm:$0xf0]  ;;  %v10840_v48 = vor.u32 %v11479_v5, %v10837_v63  ;;  %v11425_v5 = vld [vmem:[#allocation8 + $0x69c] sm:$0xf]  ;;  %v10621_v63 = vld [vmem:[#allocation8 + $0x6b0] sm:$0xf0] }
 0x6eb   : > { %v14035_v21 = vadd.f32 %v7358_v38, %v7310_v55  ;;  %v7263_v33 = vadd.f32 %v7262_v54, %v7214_v51  ;;  %v10264_v38 = vor.u32 %v11335_v15, %v10261_v0  ;;  %7744 = vmatpush.bf16.msra.mxu3 %v10840_v48  ;;  %v10237_v48 = vld [vmem:[#allocation8 + $0x3b0] sm:$0xf0] }
 0x6ed   : > { %7597 = vmatpush.bf16.msra.mxu0 %v10264_v38  ;;  %v10624_v38 = vor.u32 %v11425_v5, %v10621_v63 }
 0x6ef   : > { %7696 = vmatpush.bf16.msra.mxu2 %v10624_v38 }
 0x6f0   : > { %v7311_v9 = vpop.f32.mrf.mxu2  ;;  %v7216_v53 = vpop.f32.mrf.mxu0 }
 0x6f1   : > { %v7312_v22 = vadd.f32 %v7311_v9, %v7263_v33  ;;  %v7360_v16 = vpop.f32.mrf.mxu3  ;;  %v7217_v45 = vadd.f32 %v7216_v53, %v14026_v10  ;;  %v7265_v59 = vpop.f32.mrf.mxu1  ;;  %v11383_v9 = vld [vmem:[#allocation8 + $0x54c] sm:$0xf] }
 0x6f3   : > { %v14038_v52 = vadd.f32 %v7360_v16, %v7312_v22  ;;  %v7266_v36 = vadd.f32 %v7265_v59, %v7217_v45  ;;  %7411 = vmatmul.bf16.gmra.mxu0 %v13467_v19  ;;  %v10453_v22 = vld [vmem:[#allocation8 + $0x560] sm:$0xf0] }
 0x6f4   : > { %7460 = vmatmul.bf16.gmra.mxu1 %v13658_v31  ;;  %v10456_v53 = vor.u32 %v11383_v9, %v10453_v22 }
 0x6f5   : > { %7509 = vmatmul.bf16.gmra.mxu2 %v14887_v46 }
 0x6f6   : > { %7558 = vmatmul.bf16.gmra.mxu3 %v14888_v14  ;;  %7646 = vmatpush.bf16.msra.mxu1 %v10456_v53 }
 0x6f8   : > { %v7314_v55 = vpop.f32.mrf.mxu2  ;;  %v7218_v12 = vpop.f32.mrf.mxu0 }
 0x6f9   : > { %v7315_v51 = vadd.f32 %v7314_v55, %v7266_v36  ;;  %v7363_v54 = vpop.f32.mrf.mxu3  ;;  %v7219_v3 = vadd.f32 %v7218_v12, %v14026_v10  ;;  %v7267_v33 = vpop.f32.mrf.mxu1  ;;  %v11329_v55 = vld [vmem:[#allocation8 + $0x39c] sm:$0xf] }
 0x6fb   : > { %v14045_v49 = vadd.f32 %v7363_v54, %v7315_v51  ;;  %v7268_v16 = vadd.f32 %v7267_v33, %v7219_v3  ;;  %v11473_v51 = vld [vmem:[#allocation8 + $0x81c] sm:$0xf]  ;;  %v10813_v54 = vld [vmem:[#allocation8 + $0x830] sm:$0xf0]  ;;  %v10240_v3 = vor.u32 %v11329_v55, %v10237_v48 }
 0x6fc   : > { %v10816_v33 = vor.u32 %v11473_v51, %v10813_v54 }
 0x6fd   : > { %7598 = vmatpush.bf16.msra.mxu0 %v10240_v3  ;;  %v11419_v3 = vld [vmem:[#allocation8 + $0x66c] sm:$0xf] }
 0x6fe   : > { %7745 = vmatpush.bf16.msra.mxu3 %v10816_v33  ;;  %v10597_v33 = vld [vmem:[#allocation8 + $0x680] sm:$0xf0] }
 0x700   : > { %v7316_v45 = vpop.f32.mrf.mxu2  ;;  %v7221_v60 = vpop.f32.mrf.mxu0 }
 0x701   : > { %v7317_v59 = vadd.f32 %v7316_v45, %v7268_v16  ;;  %v7365_v40 = vpop.f32.mrf.mxu3  ;;  %v7222_v36 = vadd.f32 %v7221_v60, %v14026_v10  ;;  %v7270_v15 = vpop.f32.mrf.mxu1  ;;  %v10429_v60 = vld [vmem:[#allocation8 + $0x530] sm:$0xf0] }
 0x703   : > { %v14048_v4 = vadd.f32 %v7365_v40, %v7317_v59  ;;  %v7271_v0 = vadd.f32 %v7270_v15, %v7222_v36  ;;  %7416 = vmatmul.bf16.gmra.mxu0 %v13495_v26  ;;  %v11377_v40 = vld [vmem:[#allocation8 + $0x51c] sm:$0xf] }
 0x704   : > { %7465 = vmatmul.bf16.gmra.mxu1 %v13680_v27  ;;  %v10432_v15 = vor.u32 %v11377_v40, %v10429_v60 }
 0x705   : > { %7514 = vmatmul.bf16.gmra.mxu2 %v14891_v32 }
 0x706   : > { %7563 = vmatmul.bf16.gmra.mxu3 %v14892_v43  ;;  %7647 = vmatpush.bf16.msra.mxu1 %v10432_v15 }
 0x708   : > { %v7319_v12 = vpop.f32.mrf.mxu2  ;;  %v7223_v16 = vpop.f32.mrf.mxu0 }
 0x709   : > { %v7320_v9 = vadd.f32 %v7319_v12, %v7271_v0  ;;  %v7368_v22 = vpop.f32.mrf.mxu3  ;;  %v7224_v53 = vadd.f32 %v7223_v16, %v14026_v10  ;;  %v7272_v45 = vpop.f32.mrf.mxu1  ;;  %v14940_v12 = vld [vmem:[#allocation31_spill] sm:$0xff] }
 0x70a   : > { %v10213_v16 = vld [vmem:[#allocation8 + $0x380] sm:$0xf0] }
 0x70b   : > { %v14055_v59 = vadd.f32 %v7368_v22, %v7320_v9  ;;  %v7273_v36 = vadd.f32 %v7272_v45, %v7224_v53  ;;  %v11323_v9 = vld [vmem:[#allocation8 + $0x36c] sm:$0xf]  ;;  %v10600_v22 = vor.u32 %v11419_v3, %v10597_v33  ;;  %v10789_v45 = vld [vmem:[#allocation8 + $0x800] sm:$0xf0] }
 0x70c   : > { %v11467_v53 = vld [vmem:[#allocation8 + $0x7ec] sm:$0xf]  ;;  %v10216_v60 = vor.u32 %v11323_v9, %v10213_v16 }
 0x70d   : > { %7697 = vmatpush.bf16.msra.mxu2 %v10600_v22 }
 0x70e   : > { %7599 = vmatpush.bf16.msra.mxu0 %v10216_v60  ;;  %v14942_v60 = vld [vmem:[#allocation32_spill] sm:$0xff] }
 0x710   : > { %v7321_v5 = vpop.f32.mrf.mxu2  ;;  %v7226_v48 = vpop.f32.mrf.mxu0 }
 0x711   : > { %v7322_v63 = vadd.f32 %v7321_v5, %v7273_v36  ;;  %v7370_v55 = vpop.f32.mrf.mxu3  ;;  %v7227_v0 = vadd.f32 %v7226_v48, %v14026_v10  ;;  %v7275_v51 = vpop.f32.mrf.mxu1  ;;  %v10792_v36 = vor.u32 %v11467_v53, %v10789_v45 }
 0x713   : > { %v14058_v38 = vadd.f32 %v7370_v55, %v7322_v63  ;;  %v7276_v54 = vadd.f32 %v7275_v51, %v7227_v0  ;;  %7421 = vmatmul.bf16.gmra.mxu0 %v13523_v6  ;;  %7746 = vmatpush.bf16.msra.mxu3 %v10792_v36  ;;  %v11371_v51 = vld [vmem:[#allocation8 + $0x4ec] sm:$0xf]  ;;  %v10573_v36 = vld [vmem:[#allocation8 + $0x650] sm:$0xf0] }
 0x714   : > { %7470 = vmatmul.bf16.gmra.mxu1 %v14940_v12 }
 0x715   : > { %7519 = vmatmul.bf16.gmra.mxu2 %v14895_v25 }
 0x716   : > { %7568 = vmatmul.bf16.gmra.mxu3 %v14932_v1  ;;  %v10405_v1 = vld [vmem:[#allocation8 + $0x500] sm:$0xf0] }
 0x717   : > { %v10408_v33 = vor.u32 %v11371_v51, %v10405_v1  ;;  %v11413_v1 = vld [vmem:[#allocation8 + $0x63c] sm:$0xf] }
 0x718   : > { %v7324_v40 = vpop.f32.mrf.mxu2  ;;  %v7228_v63 = vpop.f32.mrf.mxu0 }
 0x719   : > { %v7325_v15 = vadd.f32 %v7324_v40, %v7276_v54  ;;  %v7373_v5 = vpop.f32.mrf.mxu3  ;;  %v7229_v55 = vadd.f32 %v7228_v63, %v14026_v10  ;;  %v7277_v48 = vpop.f32.mrf.mxu1  ;;  %7648 = vmatpush.bf16.msra.mxu1 %v10408_v33  ;;  %v14941_v40 = vld [vmem:[#allocation25_spill] sm:$0xff]  ;;  %v11461_v63 = vld [vmem:[#allocation8 + $0x7bc] sm:$0xf] }
 0x71b   : > { %v14065_v0 = vadd.f32 %v7373_v5, %v7325_v15  ;;  %v7278_v3 = vadd.f32 %v7277_v48, %v7229_v55  ;;  %v11317_v15 = vld [vmem:[#allocation8 + $0x33c] sm:$0xf]  ;;  %v10189_v5 = vld [vmem:[#allocation8 + $0x350] sm:$0xf0] }
 0x71c   : > { %v10765_v55 = vld [vmem:[#allocation8 + $0x7d0] sm:$0xf0]  ;;  %v10192_v51 = vor.u32 %v11317_v15, %v10189_v5 }
 0x71e   : > { %7600 = vmatpush.bf16.msra.mxu0 %v10192_v51  ;;  %v14944_v51 = vld [vmem:[#allocation33_spill] sm:$0xff] }
 0x720   : > { %v7326_v25 = vpop.f32.mrf.mxu2  ;;  %v7231_v16 = vpop.f32.mrf.mxu0 }
 0x721   : > { %v7327_v43 = vadd.f32 %v7326_v25, %v7278_v3  ;;  %v7375_v9 = vpop.f32.mrf.mxu3  ;;  %v7232_v54 = vadd.f32 %v7231_v16, %v14026_v10  ;;  %v7280_v53 = vpop.f32.mrf.mxu1  ;;  %v10576_v25 = vor.u32 %v11413_v1, %v10573_v36 }
 0x723   : > { %v14068_v22 = vadd.f32 %v7375_v9, %v7327_v43  ;;  %v7281_v45 = vadd.f32 %v7280_v53, %v7232_v54  ;;  %7426 = vmatmul.bf16.gmra.mxu0 %v14941_v40  ;;  %v10768_v43 = vor.u32 %v11461_v63, %v10765_v55  ;;  %7698 = vmatpush.bf16.msra.mxu2 %v10576_v25 }
 0x724   : > { %7475 = vmatmul.bf16.gmra.mxu1 %v14942_v60 }
 0x725   : > { %7524 = vmatmul.bf16.gmra.mxu2 %v14933_v44  ;;  %7747 = vmatpush.bf16.msra.mxu3 %v10768_v43  ;;  %v10381_v44 = vld [vmem:[#allocation8 + $0x4d0] sm:$0xf0]  ;;  %v11311_v43 = vld [vmem:[#allocation8 + $0x30c] sm:$0xf] }
 0x726   : > { %7573 = vmatmul.bf16.gmra.mxu3 %v14934_v50  ;;  %v11365_v50 = vld [vmem:[#allocation8 + $0x4bc] sm:$0xf] }
 0x727   : > { %v10384_v36 = vor.u32 %v11365_v50, %v10381_v44  ;;  %v11407_v44 = vld [vmem:[#allocation8 + $0x60c] sm:$0xf]  ;;  %v10549_v50 = vld [vmem:[#allocation8 + $0x620] sm:$0xf0] }
 0x728   : > { %v7329_v48 = vpop.f32.mrf.mxu2  ;;  %v7233_v9 = vpop.f32.mrf.mxu0 }
 0x729   : > { %v7330_v3 = vadd.f32 %v7329_v48, %v7281_v45  ;;  %v7378_v33 = vpop.f32.mrf.mxu3  ;;  %v7234_v16 = vadd.f32 %v7233_v9, %v14026_v10  ;;  %v7282_v54 = vpop.f32.mrf.mxu1  ;;  %7649 = vmatpush.bf16.msra.mxu1 %v10384_v36  ;;  %v14943_v48 = vld [vmem:[#allocation26_spill] sm:$0xff]  ;;  %v10741_v9 = vld [vmem:[#allocation8 + $0x7a0] sm:$0xf0] }
 0x72b   : > { %v14075_v53 = vadd.f32 %v7378_v33, %v7330_v3  ;;  %v7283_v1 = vadd.f32 %v7282_v54, %v7234_v16  ;;  %v10165_v3 = vld [vmem:[#allocation8 + $0x320] sm:$0xf0]  ;;  %v11455_v33 = vld [vmem:[#allocation8 + $0x78c] sm:$0xf] }
 0x72c   : > { %v10168_v54 = vor.u32 %v11311_v43, %v10165_v3 }
 0x72e   : > { %7601 = vmatpush.bf16.msra.mxu0 %v10168_v54  ;;  %v14946_v54 = vld [vmem:[#allocation36_spill] sm:$0xff] }
 0x730   : > { %v7331_v32 = vpop.f32.mrf.mxu2  ;;  %v7236_v5 = vpop.f32.mrf.mxu0 }
 0x731   : > { %v7332_v14 = vadd.f32 %v7331_v32, %v7283_v1  ;;  %v7380_v15 = vpop.f32.mrf.mxu3  ;;  %v7237_v45 = vadd.f32 %v7236_v5, %v14026_v10  ;;  %v7285_v63 = vpop.f32.mrf.mxu1  ;;  %v10552_v32 = vor.u32 %v11407_v44, %v10549_v50 }
 0x733   : > { %v14078_v25 = vadd.f32 %v7380_v15, %v7332_v14  ;;  %v7286_v55 = vadd.f32 %v7285_v63, %v7237_v45  ;;  %7431 = vmatmul.bf16.gmra.mxu0 %v14943_v48  ;;  %v10744_v14 = vor.u32 %v11455_v33, %v10741_v9  ;;  %7699 = vmatpush.bf16.msra.mxu2 %v10552_v32 }
 0x734   : > { %7480 = vmatmul.bf16.gmra.mxu1 %v14944_v51 }
 0x735   : > { %7529 = vmatmul.bf16.gmra.mxu2 %v14935_v13  ;;  %7748 = vmatpush.bf16.msra.mxu3 %v10744_v14  ;;  %v10357_v13 = vld [vmem:[#allocation8 + $0x4a0] sm:$0xf0]  ;;  %v9955_v14 = vld [vmem:[#allocation8 + $0x160] sm:$0xf] }
 0x736   : > { %7578 = vmatmul.bf16.gmra.mxu3 %v14936_v20  ;;  %v11359_v20 = vld [vmem:[#allocation8 + $0x48c] sm:$0xf] }
 0x737   : > { %v10360_v50 = vor.u32 %v11359_v20, %v10357_v13  ;;  %v10339_v13 = vld [vmem:[#allocation8 + $0x460] sm:$0xf]  ;;  %v11357_v20 = vld [vmem:[#allocation8 + $0x474] sm:$0xf0] }
 0x738   : > { %v7334_v16 = vpop.f32.mrf.mxu2  ;;  %v7238_v15 = vpop.f32.mrf.mxu0 }
 0x739   : > { %v7335_v1 = vadd.f32 %v7334_v16, %v7286_v55  ;;  %v7383_v36 = vpop.f32.mrf.mxu3  ;;  %v7239_v5 = vadd.f32 %v7238_v15, %v14026_v10  ;;  %v7287_v45 = vpop.f32.mrf.mxu1  ;;  %7650 = vmatpush.bf16.msra.mxu1 %v10360_v50  ;;  %v14945_v16 = vld [vmem:[#allocation27_spill] sm:$0xff]  ;;  %v11405_v15 = vld [vmem:[#allocation8 + $0x5f4] sm:$0xf0] }
 0x73b   : > { %v14085_v63 = vadd.f32 %v7383_v36, %v7335_v1  ;;  %v7288_v44 = vadd.f32 %v7287_v45, %v7239_v5  ;;  %v11261_v1 = vld [vmem:[#allocation8 + $0x174] sm:$0xf0]  ;;  %v10531_v36 = vld [vmem:[#allocation8 + $0x5e0] sm:$0xf] }
 0x73c   : > { %v9956_v45 = vor.u32 %v11261_v1, %v9955_v14 }
 0x73e   : > { %7790 = vmatpush.bf16.msrb.mxu0 %v9956_v45  ;;  %v14948_v45 = vld [vmem:[#allocation37_spill] sm:$0xff] }
 0x740   : > { %v7336_v46 = vpop.f32.mrf.mxu2  ;;  %v7241_v3 = vpop.f32.mrf.mxu0 }
 0x741   : > { %v7337_v58 = vadd.f32 %v7336_v46, %v7288_v44  ;;  %v7385_v43 = vpop.f32.mrf.mxu3  ;;  %v7242_v55 = vadd.f32 %v7241_v3, %v14026_v10  ;;  %v7290_v33 = vpop.f32.mrf.mxu1  ;;  %v10340_v46 = vor.u32 %v11357_v20, %v10339_v13 }
 0x743   : > { %v14088_v32 = vadd.f32 %v7385_v43, %v7337_v58  ;;  %v7291_v9 = vadd.f32 %v7290_v33, %v7242_v55  ;;  %7436 = vmatmul.bf16.gmra.mxu0 %v14945_v16  ;;  %v10532_v58 = vor.u32 %v11405_v15, %v10531_v36  ;;  %7888 = vmatpush.bf16.msrb.mxu2 %v10340_v46 }
 0x744   : > { %7485 = vmatmul.bf16.gmra.mxu1 %v14946_v54 }
 0x745   : > { %7534 = vmatmul.bf16.gmra.mxu2 %v14937_v35  ;;  %7937 = vmatpush.bf16.msrb.mxu3 %v10532_v58  ;;  %v11309_v35 = vld [vmem:[#allocation8 + $0x2f4] sm:$0xf0]  ;;  %v9931_v58 = vld [vmem:[#allocation8 + $0x130] sm:$0xf] }
 0x746   : > { %7583 = vmatmul.bf16.gmra.mxu3 %v14938_v24  ;;  %v10147_v24 = vld [vmem:[#allocation8 + $0x2e0] sm:$0xf] }
 0x747   : > { %v10148_v20 = vor.u32 %v11309_v35, %v10147_v24  ;;  %v10315_v35 = vld [vmem:[#allocation8 + $0x430] sm:$0xf]  ;;  %v11351_v24 = vld [vmem:[#allocation8 + $0x444] sm:$0xf0] }
 0x748   : > { %v7339_v5 = vpop.f32.mrf.mxu2  ;;  %v7243_v43 = vpop.f32.mrf.mxu0 }
 0x749   : > { %v7340_v44 = vadd.f32 %v7339_v5, %v7291_v9  ;;  %v7388_v50 = vpop.f32.mrf.mxu3  ;;  %v7244_v3 = vadd.f32 %v7243_v43, %v14026_v10  ;;  %v7292_v55 = vpop.f32.mrf.mxu1  ;;  %7839 = vmatpush.bf16.msrb.mxu1 %v10148_v20  ;;  %v14947_v5 = vld [vmem:[#allocation30_spill] sm:$0xff]  ;;  %v11399_v43 = vld [vmem:[#allocation8 + $0x5c4] sm:$0xf0] }
 0x74b   : > { %v14095_v33 = vadd.f32 %v7388_v50, %v7340_v44  ;;  %v7293_v13 = vadd.f32 %v7292_v55, %v7244_v3  ;;  %v11255_v44 = vld [vmem:[#allocation8 + $0x144] sm:$0xf0]  ;;  %v10507_v50 = vld [vmem:[#allocation8 + $0x5b0] sm:$0xf] }
 0x74c   : > { %v9932_v55 = vor.u32 %v11255_v44, %v9931_v58 }
 0x74e   : > { %7791 = vmatpush.bf16.msrb.mxu0 %v9932_v55  ;;  %v14950_v55 = vld [vmem:[#allocation17_spill] sm:$0xff] }
 0x750   : > { %v7341_v7 = vpop.f32.mrf.mxu2  ;;  %v7246_v1 = vpop.f32.mrf.mxu0 }
 0x751   : > { %v7342_v30 = vadd.f32 %v7341_v7, %v7293_v13  ;;  %v7390_v14 = vpop.f32.mrf.mxu3  ;;  %v7247_v9 = vadd.f32 %v7246_v1, %v14026_v10  ;;  %v7295_v36 = vpop.f32.mrf.mxu1  ;;  %v10316_v7 = vor.u32 %v11351_v24, %v10315_v35 }
 0x753   : > { %v14098_v46 = vadd.f32 %v7390_v14, %v7342_v30  ;;  %v7296_v15 = vadd.f32 %v7295_v36, %v7247_v9  ;;  %7441 = vmatmul.bf16.gmra.mxu0 %v14947_v5  ;;  %v10508_v30 = vor.u32 %v11399_v43, %v10507_v50  ;;  %7889 = vmatpush.bf16.msrb.mxu2 %v10316_v7 }
 0x754   : > { %7490 = vmatmul.bf16.gmra.mxu1 %v14948_v45 }
 0x755   : > { %7539 = vmatmul.bf16.gmra.mxu2 %v14913_v42  ;;  %7938 = vmatpush.bf16.msrb.mxu3 %v10508_v30  ;;  %v11303_v42 = vld [vmem:[#allocation8 + $0x2c4] sm:$0xf0]  ;;  %v14114_v30 = vperm.slane %v14023_v8, 3 }
 0x756   : > { %7588 = vmatmul.bf16.gmra.mxu3 %v14939_v34  ;;  %v10123_v34 = vld [vmem:[#allocation8 + $0x2b0] sm:$0xf] }
 0x757   : > { %v10124_v24 = vor.u32 %v11303_v42, %v10123_v34  ;;  %v10291_v42 = vld [vmem:[#allocation8 + $0x400] sm:$0xf]  ;;  %v11345_v34 = vld [vmem:[#allocation8 + $0x414] sm:$0xf0] }
 0x758   : > { %v7344_v3 = vpop.f32.mrf.mxu2  ;;  %v7248_v14 = vpop.f32.mrf.mxu0 }
 0x759   : > { %v7345_v13 = vadd.f32 %v7344_v3, %v7296_v15  ;;  %v7393_v20 = vpop.f32.mrf.mxu3  ;;  %v7249_v1 = vadd.f32 %v7248_v14, %v14026_v10  ;;  %v7297_v9 = vpop.f32.mrf.mxu1  ;;  %7840 = vmatpush.bf16.msrb.mxu1 %v10124_v24  ;;  %v14949_v3 = vld [vmem:[#allocation45_spill] sm:$0xff] }
 0x75b   : > { %v14105_v36 = vadd.f32 %v7393_v20, %v7345_v13  ;;  %v7298_v35 = vadd.f32 %v7297_v9, %v7249_v1  ;;  %v11249_v13 = vld [vmem:[#allocation8 + $0x114] sm:$0xf0]  ;;  %v10483_v20 = vld [vmem:[#allocation8 + $0x580] sm:$0xf] }
 0x75c   : > { %v11393_v9 = vld [vmem:[#allocation8 + $0x594] sm:$0xf0] }
 0x75d   : > { %v10484_v8 = vor.u32 %v11393_v9, %v10483_v20 }
 0x75f   : > { %7939 = vmatpush.bf16.msrb.mxu3 %v10484_v8  ;;  %v9883_v8 = vld [vmem:[#allocation8 + $0xd0] sm:$0xf] }
 0x760   : > { %v7346_v45 = vpop.f32.mrf.mxu2  ;;  %v7407_v15 = vpop.f32.mrf.mxu0 }
 0x761   : > { %v7347_v58 = vadd.f32 %v7346_v45, %v7298_v35  ;;  %v7395_v44 = vpop.f32.mrf.mxu3  ;;  %v7408_v50 = vadd.f32 %v7407_v15, %v14035_v21  ;;  %v7456_v7 = vpop.f32.mrf.mxu1  ;;  %v10292_v45 = vor.u32 %v11345_v34, %v10291_v42  ;;  %v9907_v21 = vld [vmem:[#allocation8 + $0x100] sm:$0xf] }
 0x762   : > { %v9908_v1 = vor.u32 %v11249_v13, %v9907_v21 }
 0x763   : > { %v14108_v43 = vadd.f32 %v7395_v44, %v7347_v58  ;;  %v7457_v10 = vadd.f32 %v7456_v7, %v7408_v50  ;;  %7602 = vmatmul.bf16.vlgmr.msra.gmra.mxu0 %v14949_v3  ;;  %7890 = vmatpush.bf16.msrb.mxu2 %v10292_v45  ;;  %v10099_v7 = vld [vmem:[#allocation8 + $0x280] sm:$0xf] }
 0x764   : > { %7651 = vmatmul.bf16.vlgmr.msra.gmra.mxu1 %v14950_v55  ;;  %7792 = vmatpush.bf16.msrb.mxu0 %v9908_v1 }
 0x765   : > { %7700 = vmatmul.bf16.vlgmr.msra.gmra.mxu2 %v13439_v62  ;;  %8380 = vst [vmem:[%s13850_s24 + $0x10] sm:$0xff] %v7457_v10  ;;  %v11297_v10 = vld [vmem:[#allocation8 + $0x294] sm:$0xf0] }
 0x766   : > { %7749 = vmatmul.bf16.vlgmr.msra.gmra.mxu3 %v13636_v11  ;;  %v10100_v34 = vor.u32 %v11297_v10, %v10099_v7  ;;  %v11387_v10 = vld [vmem:[#allocation8 + $0x564] sm:$0xf0] }
 0x768   : > { %v7505_v14 = vpop.f32.mrf.mxu2  ;;  %v7409_v58 = vpop.f32.mrf.mxu0  ;;  %7841 = vmatpush.bf16.msrb.mxu1 %v10100_v34 }
 0x769   : > { %v7506_v35 = vadd.f32 %v7505_v14, %v14114_v30  ;;  %v7554_v24 = vpop.f32.mrf.mxu3  ;;  %v7410_v44 = vadd.f32 %v7409_v58, %v14038_v52  ;;  %v7458_v15 = vpop.f32.mrf.mxu1 }
 0x76b   : > { %v14120_v50 = vadd.f32 %v7554_v24, %v7506_v35  ;;  %v7459_v42 = vadd.f32 %v7458_v15, %v7410_v44  ;;  %v10267_v35 = vld [vmem:[#allocation8 + $0x3d0] sm:$0xf]  ;;  %v11339_v24 = vld [vmem:[#allocation8 + $0x3e4] sm:$0xf0] }
 0x76c   : > { %v10268_v58 = vor.u32 %v11339_v24, %v10267_v35  ;;  %v11243_v44 = vld [vmem:[#allocation8 + $0xe4] sm:$0xf0]  ;;  %v10459_v15 = vld [vmem:[#allocation8 + $0x550] sm:$0xf] }
 0x76d   : > { %8386 = vst [vmem:[%s13850_s24 + $0x40] sm:$0xff] %v7459_v42  ;;  %v9884_v7 = vor.u32 %v11243_v44, %v9883_v8 }
 0x76e   : > { %7891 = vmatpush.bf16.msrb.mxu2 %v10268_v58 }
 0x76f   : > { %7793 = vmatpush.bf16.msrb.mxu0 %v9884_v7 }
 0x770   : > { %v7507_v21 = vpop.f32.mrf.mxu2  ;;  %v7412_v45 = vpop.f32.mrf.mxu0 }
 0x771   : > { %v7508_v13 = vadd.f32 %v7507_v21, %v14114_v30  ;;  %v7556_v14 = vpop.f32.mrf.mxu3  ;;  %v7413_v20 = vadd.f32 %v7412_v45, %v14045_v49  ;;  %v7461_v52 = vpop.f32.mrf.mxu1 }
 0x773   : > { %v14125_v9 = vadd.f32 %v7556_v14, %v7508_v13  ;;  %v7462_v1 = vadd.f32 %v7461_v52, %v7413_v20  ;;  %7607 = vmatmul.bf16.gmra.mxu0 %v14889_v47  ;;  %v10460_v13 = vor.u32 %v11387_v10, %v10459_v15  ;;  %v10075_v52 = vld [vmem:[#allocation8 + $0x250] sm:$0xf] }
 0x774   : > { %7656 = vmatmul.bf16.gmra.mxu1 %v14890_v17 }
 0x775   : > { %7705 = vmatmul.bf16.gmra.mxu2 %v13467_v19  ;;  %8392 = vst [vmem:[%s13850_s24 + $0x70] sm:$0xff] %v7462_v1  ;;  %7940 = vmatpush.bf16.msrb.mxu3 %v10460_v13  ;;  %v11291_v1 = vld [vmem:[#allocation8 + $0x264] sm:$0xf0]  ;;  %v9859_v13 = vld [vmem:[#allocation8 + $0xa0] sm:$0xf] }
 0x776   : > { %7754 = vmatmul.bf16.gmra.mxu3 %v13658_v31  ;;  %v10076_v24 = vor.u32 %v11291_v1, %v10075_v52  ;;  %v11381_v1 = vld [vmem:[#allocation8 + $0x534] sm:$0xf0] }
 0x778   : > { %v7510_v49 = vpop.f32.mrf.mxu2  ;;  %v7414_v21 = vpop.f32.mrf.mxu0  ;;  %7842 = vmatpush.bf16.msrb.mxu1 %v10076_v24 }
 0x779   : > { %v7511_v42 = vadd.f32 %v7510_v49, %v14114_v30  ;;  %v7559_v34 = vpop.f32.mrf.mxu3  ;;  %v7415_v14 = vadd.f32 %v7414_v21, %v14048_v4  ;;  %v7463_v45 = vpop.f32.mrf.mxu1 }
 0x77b   : > { %v14134_v20 = vadd.f32 %v7559_v34, %v7511_v42  ;;  %v7464_v35 = vadd.f32 %v7463_v45, %v7415_v14  ;;  %v10243_v42 = vld [vmem:[#allocation8 + $0x3a0] sm:$0xf]  ;;  %v11333_v34 = vld [vmem:[#allocation8 + $0x3b4] sm:$0xf0] }
 0x77c   : > { %v10244_v21 = vor.u32 %v11333_v34, %v10243_v42  ;;  %v11237_v14 = vld [vmem:[#allocation8 + $0xb4] sm:$0xf0]  ;;  %v10435_v45 = vld [vmem:[#allocation8 + $0x520] sm:$0xf] }
 0x77d   : > { %8398 = vst [vmem:[%s13850_s24 + $0xa0] sm:$0xff] %v7464_v35  ;;  %v9860_v52 = vor.u32 %v11237_v14, %v9859_v13 }
 0x77e   : > { %7892 = vmatpush.bf16.msrb.mxu2 %v10244_v21 }
 0x77f   : > { %7794 = vmatpush.bf16.msrb.mxu0 %v9860_v52 }
 0x780   : > { %v7512_v8 = vpop.f32.mrf.mxu2  ;;  %v7417_v58 = vpop.f32.mrf.mxu0 }
 0x781   : > { %v7513_v44 = vadd.f32 %v7512_v8, %v14114_v30  ;;  %v7561_v49 = vpop.f32.mrf.mxu3  ;;  %v7418_v15 = vadd.f32 %v7417_v58, %v14055_v59  ;;  %v7466_v4 = vpop.f32.mrf.mxu1 }
 0x783   : > { %v14139_v10 = vadd.f32 %v7561_v49, %v7513_v44  ;;  %v7467_v7 = vadd.f32 %v7466_v4, %v7418_v15  ;;  %7612 = vmatmul.bf16.gmra.mxu0 %v14893_v28  ;;  %v10436_v44 = vor.u32 %v11381_v1, %v10435_v45  ;;  %v10051_v4 = vld [vmem:[#allocation8 + $0x220] sm:$0xf] }
 0x784   : > { %7661 = vmatmul.bf16.gmra.mxu1 %v14894_v23 }
 0x785   : > { %7710 = vmatmul.bf16.gmra.mxu2 %v13495_v26  ;;  %8404 = vst [vmem:[%s13850_s24 + $0xd0] sm:$0xff] %v7467_v7  ;;  %7941 = vmatpush.bf16.msrb.mxu3 %v10436_v44  ;;  %v11285_v7 = vld [vmem:[#allocation8 + $0x234] sm:$0xf0]  ;;  %v9835_v44 = vld [vmem:[#allocation8 + $0x70] sm:$0xf] }
 0x786   : > { %7759 = vmatmul.bf16.gmra.mxu3 %v13680_v27  ;;  %v10052_v34 = vor.u32 %v11285_v7, %v10051_v4  ;;  %v11375_v7 = vld [vmem:[#allocation8 + $0x504] sm:$0xf0] }
 0x788   : > { %v7515_v59 = vpop.f32.mrf.mxu2  ;;  %v7419_v8 = vpop.f32.mrf.mxu0  ;;  %7843 = vmatpush.bf16.msrb.mxu1 %v10052_v34 }
 0x789   : > { %v7516_v35 = vadd.f32 %v7515_v59, %v14114_v30  ;;  %v7564_v24 = vpop.f32.mrf.mxu3  ;;  %v7420_v49 = vadd.f32 %v7419_v8, %v14058_v38  ;;  %v7468_v58 = vpop.f32.mrf.mxu1 }
 0x78b   : > { %v14148_v15 = vadd.f32 %v7564_v24, %v7516_v35  ;;  %v7469_v42 = vadd.f32 %v7468_v58, %v7420_v49  ;;  %v10219_v35 = vld [vmem:[#allocation8 + $0x370] sm:$0xf]  ;;  %v11327_v24 = vld [vmem:[#allocation8 + $0x384] sm:$0xf0] }
 0x78c   : > { %v10220_v8 = vor.u32 %v11327_v24, %v10219_v35  ;;  %v11231_v49 = vld [vmem:[#allocation8 + $0x84] sm:$0xf0]  ;;  %v10411_v58 = vld [vmem:[#allocation8 + $0x4f0] sm:$0xf] }
 0x78d   : > { %8410 = vst [vmem:[%s13850_s24 + $0x100] sm:$0xff] %v7469_v42  ;;  %v9836_v4 = vor.u32 %v11231_v49, %v9835_v44 }
 0x78e   : > { %7893 = vmatpush.bf16.msrb.mxu2 %v10220_v8 }
 0x78f   : > { %7795 = vmatpush.bf16.msrb.mxu0 %v9836_v4 }
 0x790   : > { %v7517_v13 = vpop.f32.mrf.mxu2  ;;  %v7422_v21 = vpop.f32.mrf.mxu0 }
 0x791   : > { %v7518_v14 = vadd.f32 %v7517_v13, %v14114_v30  ;;  %v7566_v59 = vpop.f32.mrf.mxu3  ;;  %v7423_v45 = vadd.f32 %v7422_v21, %v14065_v0  ;;  %v7471_v38 = vpop.f32.mrf.mxu1 }
 0x793   : > { %v14153_v1 = vadd.f32 %v7566_v59, %v7518_v14  ;;  %v7472_v52 = vadd.f32 %v7471_v38, %v7423_v45  ;;  %7617 = vmatmul.bf16.gmra.mxu0 %v14920_v2  ;;  %v10412_v14 = vor.u32 %v11375_v7, %v10411_v58  ;;  %v10027_v38 = vld [vmem:[#allocation8 + $0x1f0] sm:$0xf] }
 0x794   : > { %7666 = vmatmul.bf16.gmra.mxu1 %v14921_v29 }
 0x795   : > { %7715 = vmatmul.bf16.gmra.mxu2 %v13523_v6  ;;  %8416 = vst [vmem:[%s13850_s24 + $0x130] sm:$0xff] %v7472_v52  ;;  %7942 = vmatpush.bf16.msrb.mxu3 %v10412_v14  ;;  %v11279_v52 = vld [vmem:[#allocation8 + $0x204] sm:$0xf0]  ;;  %v9811_v14 = vld [vmem:[#allocation8 + $0x40] sm:$0xf] }
 0x796   : > { %7764 = vmatmul.bf16.gmra.mxu3 %v14940_v12  ;;  %v10028_v24 = vor.u32 %v11279_v52, %v10027_v38  ;;  %v11369_v52 = vld [vmem:[#allocation8 + $0x4d4] sm:$0xf0] }
 0x798   : > { %v7520_v0 = vpop.f32.mrf.mxu2  ;;  %v7424_v13 = vpop.f32.mrf.mxu0  ;;  %7844 = vmatpush.bf16.msrb.mxu1 %v10028_v24 }
 0x799   : > { %v7521_v42 = vadd.f32 %v7520_v0, %v14114_v30  ;;  %v7569_v34 = vpop.f32.mrf.mxu3  ;;  %v7425_v59 = vadd.f32 %v7424_v13, %v14068_v22  ;;  %v7473_v21 = vpop.f32.mrf.mxu1 }
 0x79b   : > { %v14162_v45 = vadd.f32 %v7569_v34, %v7521_v42  ;;  %v7474_v35 = vadd.f32 %v7473_v21, %v7425_v59  ;;  %v10195_v42 = vld [vmem:[#allocation8 + $0x340] sm:$0xf]  ;;  %v11321_v34 = vld [vmem:[#allocation8 + $0x354] sm:$0xf0] }
 0x79c   : > { %v10196_v13 = vor.u32 %v11321_v34, %v10195_v42  ;;  %v11225_v59 = vld [vmem:[#allocation8 + $0x54] sm:$0xf0]  ;;  %v10387_v21 = vld [vmem:[#allocation8 + $0x4c0] sm:$0xf] }
 0x79d   : > { %8422 = vst [vmem:[%s13850_s24 + $0x160] sm:$0xff] %v7474_v35  ;;  %v9812_v38 = vor.u32 %v11225_v59, %v9811_v14 }
 0x79e   : > { %7894 = vmatpush.bf16.msrb.mxu2 %v10196_v13 }
 0x79f   : > { %7796 = vmatpush.bf16.msrb.mxu0 %v9812_v38 }
 0x7a0   : > { %v7522_v44 = vpop.f32.mrf.mxu2  ;;  %v7427_v8 = vpop.f32.mrf.mxu0 }
 0x7a1   : > { %v7523_v49 = vadd.f32 %v7522_v44, %v14114_v30  ;;  %v7571_v0 = vpop.f32.mrf.mxu3  ;;  %v7428_v58 = vadd.f32 %v7427_v8, %v14075_v53  ;;  %v7476_v22 = vpop.f32.mrf.mxu1 }
 0x7a3   : > { %v14167_v7 = vadd.f32 %v7571_v0, %v7523_v49  ;;  %v7477_v4 = vadd.f32 %v7476_v22, %v7428_v58  ;;  %7622 = vmatmul.bf16.gmra.mxu0 %v14922_v39  ;;  %v10388_v49 = vor.u32 %v11369_v52, %v10387_v21  ;;  %v10003_v22 = vld [vmem:[#allocation8 + $0x1c0] sm:$0xf] }
 0x7a4   : > { %7671 = vmatmul.bf16.gmra.mxu1 %v14923_v41 }
 0x7a5   : > { %7720 = vmatmul.bf16.gmra.mxu2 %v14941_v40  ;;  %8428 = vst [vmem:[%s13850_s24 + $0x190] sm:$0xff] %v7477_v4  ;;  %7943 = vmatpush.bf16.msrb.mxu3 %v10388_v49  ;;  %v11273_v4 = vld [vmem:[#allocation8 + $0x1d4] sm:$0xf0]  ;;  %v9787_v49 = vld [vmem:[#allocation8 + $0x10] sm:$0xf] }
 0x7a6   : > { %7769 = vmatmul.bf16.gmra.mxu3 %v14942_v60  ;;  %v10004_v34 = vor.u32 %v11273_v4, %v10003_v22  ;;  %v11363_v4 = vld [vmem:[#allocation8 + $0x4a4] sm:$0xf0] }
 0x7a8   : > { %v7525_v53 = vpop.f32.mrf.mxu2  ;;  %v7429_v44 = vpop.f32.mrf.mxu0  ;;  %7845 = vmatpush.bf16.msrb.mxu1 %v10004_v34 }
 0x7a9   : > { %v7526_v35 = vadd.f32 %v7525_v53, %v14114_v30  ;;  %v7574_v24 = vpop.f32.mrf.mxu3  ;;  %v7430_v0 = vadd.f32 %v7429_v44, %v14078_v25  ;;  %v7478_v8 = vpop.f32.mrf.mxu1 }
 0x7ab   : > { %v14176_v58 = vadd.f32 %v7574_v24, %v7526_v35  ;;  %v7479_v42 = vadd.f32 %v7478_v8, %v7430_v0  ;;  %v10171_v35 = vld [vmem:[#allocation8 + $0x310] sm:$0xf]  ;;  %v11315_v24 = vld [vmem:[#allocation8 + $0x324] sm:$0xf0] }
 0x7ac   : > { %v10172_v44 = vor.u32 %v11315_v24, %v10171_v35  ;;  %v11219_v0 = vld [vmem:[#allocation8 + $0x24] sm:$0xf0]  ;;  %v10363_v8 = vld [vmem:[#allocation8 + $0x490] sm:$0xf] }
 0x7ad   : > { %8434 = vst [vmem:[%s13850_s24 + $0x1c0] sm:$0xff] %v7479_v42  ;;  %v9788_v22 = vor.u32 %v11219_v0, %v9787_v49 }
 0x7ae   : > { %7895 = vmatpush.bf16.msrb.mxu2 %v10172_v44 }
 0x7af   : > { %7797 = vmatpush.bf16.msrb.mxu0 %v9788_v22 }
 0x7b0   : > { %v7527_v14 = vpop.f32.mrf.mxu2  ;;  %v7432_v13 = vpop.f32.mrf.mxu0 }
 0x7b1   : > { %v7528_v59 = vadd.f32 %v7527_v14, %v14114_v30  ;;  %v7576_v53 = vpop.f32.mrf.mxu3  ;;  %v7433_v21 = vadd.f32 %v7432_v13, %v14085_v63  ;;  %v7481_v25 = vpop.f32.mrf.mxu1 }
 0x7b3   : > { %v14181_v52 = vadd.f32 %v7576_v53, %v7528_v59  ;;  %v7482_v38 = vadd.f32 %v7481_v25, %v7433_v21  ;;  %7627 = vmatmul.bf16.gmra.mxu0 %v14924_v37  ;;  %v10364_v59 = vor.u32 %v11363_v4, %v10363_v8  ;;  %v9979_v25 = vld [vmem:[#allocation8 + $0x190] sm:$0xf] }
 0x7b4   : > { %7676 = vmatmul.bf16.gmra.mxu1 %v14925_v18 }
 0x7b5   : > { %7725 = vmatmul.bf16.gmra.mxu2 %v14943_v48  ;;  %8440 = vst [vmem:[%s13850_s24 + $0x1f0] sm:$0xff] %v7482_v38  ;;  %7944 = vmatpush.bf16.msrb.mxu3 %v10364_v59  ;;  %v11267_v38 = vld [vmem:[#allocation8 + $0x1a4] sm:$0xf0]  ;;  %v10723_v59 = vld [vmem:[#allocation8 + $0x760] sm:$0xf] }
 0x7b6   : > { %7774 = vmatmul.bf16.gmra.mxu3 %v14944_v51  ;;  %v9980_v24 = vor.u32 %v11267_v38, %v9979_v25  ;;  %v10149_v38 = vld [vmem:[#allocation8 + $0x2f8] sm:$0xf0] }
 0x7b8   : > { %v7530_v63 = vpop.f32.mrf.mxu2  ;;  %v7434_v14 = vpop.f32.mrf.mxu0  ;;  %7846 = vmatpush.bf16.msrb.mxu1 %v9980_v24 }
 0x7b9   : > { %v7531_v42 = vadd.f32 %v7530_v63, %v14114_v30  ;;  %v7579_v34 = vpop.f32.mrf.mxu3  ;;  %v7435_v53 = vadd.f32 %v7434_v14, %v14088_v32  ;;  %v7483_v13 = vpop.f32.mrf.mxu1 }
 0x7bb   : > { %v14190_v21 = vadd.f32 %v7579_v34, %v7531_v42  ;;  %v7484_v35 = vadd.f32 %v7483_v13, %v7435_v53  ;;  %v11258_v42 = vld [vmem:[#allocation8 + $0x164] sm:$0xf]  ;;  %v9957_v34 = vld [vmem:[#allocation8 + $0x178] sm:$0xf0]  ;;  %v11453_v53 = vld [vmem:[#allocation8 + $0x774] sm:$0xf0] }
 0x7bc   : > { %v9960_v14 = vor.u32 %v11258_v42, %v9957_v34  ;;  %v11306_v13 = vld [vmem:[#allocation8 + $0x2e4] sm:$0xf]  ;;  %v10724_v25 = vor.u32 %v11453_v53, %v10723_v59  ;;  %v11501_v42 = vld [vmem:[#allocation8 + $0x8f4] sm:$0xf0] }
 0x7bd   : > { %8446 = vst [vmem:[%s13850_s24 + $0x220] sm:$0xff] %v7484_v35 }
 0x7be   : > { %8084 = vmatpush.bf16.msra.mxu2 %v9960_v14  ;;  %7986 = vmatpush.bf16.msra.mxu0 %v10724_v25 }
 0x7c0   : > { %v7532_v49 = vpop.f32.mrf.mxu2  ;;  %v7437_v44 = vpop.f32.mrf.mxu0 }
 0x7c1   : > { %v7533_v0 = vadd.f32 %v7532_v49, %v14114_v30  ;;  %v7581_v63 = vpop.f32.mrf.mxu3  ;;  %v7438_v8 = vadd.f32 %v7437_v44, %v14095_v33  ;;  %v7486_v32 = vpop.f32.mrf.mxu1 }
 0x7c3   : > { %v14195_v4 = vadd.f32 %v7581_v63, %v7533_v0  ;;  %v7487_v22 = vadd.f32 %v7486_v32, %v7438_v8  ;;  %7632 = vmatmul.bf16.gmra.mxu0 %v14926_v56  ;;  %v10152_v0 = vor.u32 %v11306_v13, %v10149_v38 }
 0x7c4   : > { %7681 = vmatmul.bf16.gmra.mxu1 %v14927_v61 }
 0x7c5   : > { %7730 = vmatmul.bf16.gmra.mxu2 %v14945_v16  ;;  %8452 = vst [vmem:[%s13850_s24 + $0x250] sm:$0xff] %v7487_v22  ;;  %8133 = vmatpush.bf16.msra.mxu3 %v10152_v0  ;;  %v10915_v22 = vld [vmem:[#allocation8 + $0x8e0] sm:$0xf]  ;;  %v9933_v0 = vld [vmem:[#allocation8 + $0x148] sm:$0xf0] }
 0x7c6   : > { %7779 = vmatmul.bf16.gmra.mxu3 %v14946_v54  ;;  %v10916_v34 = vor.u32 %v11501_v42, %v10915_v22  ;;  %v11300_v22 = vld [vmem:[#allocation8 + $0x2b4] sm:$0xf] }
 0x7c8   : > { %v7535_v33 = vpop.f32.mrf.mxu2  ;;  %v7439_v49 = vpop.f32.mrf.mxu0  ;;  %8035 = vmatpush.bf16.msra.mxu1 %v10916_v34  ;;  %v10125_v34 = vld [vmem:[#allocation8 + $0x2c8] sm:$0xf0] }
 0x7c9   : > { %v7536_v35 = vadd.f32 %v7535_v33, %v14114_v30  ;;  %v7584_v24 = vpop.f32.mrf.mxu3  ;;  %v7440_v63 = vadd.f32 %v7439_v49, %v14098_v46  ;;  %v7488_v44 = vpop.f32.mrf.mxu1  ;;  %v11252_v49 = vld [vmem:[#allocation8 + $0x134] sm:$0xf] }
 0x7cb   : > { %v14204_v8 = vadd.f32 %v7584_v24, %v7536_v35  ;;  %v7489_v32 = vadd.f32 %v7488_v44, %v7440_v63  ;;  %v14951_v35 = vld [vmem:[#allocation24_spill] sm:$0xff]  ;;  %v14952_v24 = vld [vmem:[#allocation37_spill] sm:$0xff]  ;;  %v9936_v63 = vor.u32 %v11252_v49, %v9933_v0 }
 0x7cc   : > { %v10699_v44 = vld [vmem:[#allocation8 + $0x730] sm:$0xf] }
 0x7cd   : > { %8458 = vst [vmem:[%s13850_s24 + $0x280] sm:$0xff] %v7489_v32  ;;  %v11447_v32 = vld [vmem:[#allocation8 + $0x744] sm:$0xf0]  ;;  %8085 = vmatpush.bf16.msra.mxu2 %v9936_v63  ;;  %v10891_v0 = vld [vmem:[#allocation8 + $0x8b0] sm:$0xf] }
 0x7ce   : > { %v10700_v42 = vor.u32 %v11447_v32, %v10699_v44 }
 0x7d0   : > { %v7537_v59 = vpop.f32.mrf.mxu2  ;;  %v7442_v14 = vpop.f32.mrf.mxu0  ;;  %7987 = vmatpush.bf16.msra.mxu0 %v10700_v42  ;;  %v14953_v42 = vld [vmem:[#allocation49_spill] sm:$0xff] }
 0x7d1   : > { %v7538_v53 = vadd.f32 %v7537_v59, %v14114_v30  ;;  %v7586_v33 = vpop.f32.mrf.mxu3  ;;  %v7443_v13 = vadd.f32 %v7442_v14, %v14105_v36  ;;  %v7491_v46 = vpop.f32.mrf.mxu1  ;;  %v10128_v14 = vor.u32 %v11300_v22, %v10125_v34  ;;  %v14954_v34 = vld [vmem:[#allocation56_spill] sm:$0xff] }
 0x7d3   : > { %v14209_v38 = vadd.f32 %v7586_v33, %v7538_v53  ;;  %v7492_v25 = vadd.f32 %v7491_v46, %v7443_v13  ;;  %7637 = vmatmul.bf16.gmra.mxu0 %v14928_v57  ;;  %8134 = vmatpush.bf16.msra.mxu3 %v10128_v14  ;;  %v11294_v14 = vld [vmem:[#allocation8 + $0x284] sm:$0xf] }
 0x7d4   : > { %7686 = vmatmul.bf16.gmra.mxu1 %v14951_v35 }
 0x7d5   : > { %7735 = vmatmul.bf16.gmra.mxu2 %v14947_v5  ;;  %8464 = vst [vmem:[%s13850_s24 + $0x2b0] sm:$0xff] %v7492_v25 }
 0x7d6   : > { %7784 = vmatmul.bf16.gmra.mxu3 %v14952_v24  ;;  %v11495_v24 = vld [vmem:[#allocation8 + $0x8c4] sm:$0xf0] }
 0x7d7   : > { %v10892_v5 = vor.u32 %v11495_v24, %v10891_v0  ;;  %v11246_v24 = vld [vmem:[#allocation8 + $0x104] sm:$0xf] }
 0x7d8   : > { %v7540_v36 = vpop.f32.mrf.mxu2  ;;  %v7444_v33 = vpop.f32.mrf.mxu0 }
 0x7d9   : > { %v7541_v59 = vadd.f32 %v7540_v36, %v14114_v30  ;;  %v7589_v53 = vpop.f32.mrf.mxu3  ;;  %v7445_v13 = vadd.f32 %v7444_v33, %v14108_v43  ;;  %v7493_v46 = vpop.f32.mrf.mxu1  ;;  %8036 = vmatpush.bf16.msra.mxu1 %v10892_v5  ;;  %v10675_v5 = vld [vmem:[#allocation8 + $0x700] sm:$0xf]  ;;  %v11441_v33 = vld [vmem:[#allocation8 + $0x714] sm:$0xf0] }
 0x7db   : > { %v14218_v25 = vadd.f32 %v7589_v53, %v7541_v59  ;;  %v7494_v49 = vadd.f32 %v7493_v46, %v7445_v13  ;;  %v9909_v59 = vld [vmem:[#allocation8 + $0x118] sm:$0xf0] }
 0x7dc   : > { %v10101_v13 = vld [vmem:[#allocation8 + $0x298] sm:$0xf0] }
 0x7dd   : > { %8470 = vst [vmem:[%s13850_s24 + $0x2e0] sm:$0xff] %v7494_v49  ;;  %v10676_v49 = vor.u32 %v11441_v33, %v10675_v5 }
 0x7df   : > { %7988 = vmatpush.bf16.msra.mxu0 %v10676_v49  ;;  %v14956_v49 = vld [vmem:[#allocation57_spill] sm:$0xff] }
 0x7e0   : > { %v7542_v44 = vpop.f32.mrf.mxu2  ;;  %v7603_v54 = vpop.f32.mrf.mxu0 }
 0x7e1   : > { %v7543_v32 = vadd.f32 %v7542_v44, %v14114_v30  ;;  %v7591_v36 = vpop.f32.mrf.mxu3  ;;  %v7652_v63 = vpop.f32.mrf.mxu1  ;;  %v7604_v43 = vadd.f32 %v7603_v54, %v14120_v50  ;;  %v9912_v30 = vor.u32 %v11246_v24, %v9909_v59  ;;  %v10104_v54 = vor.u32 %v11294_v14, %v10101_v13 }
 0x7e3   : > { %v14222_v22 = vadd.f32 %v7591_v36, %v7543_v32  ;;  %7798 = vmatmul.bf16.vlgmr.msrb.gmra.mxu0 %v14953_v42  ;;  %v7653_v53 = vadd.f32 %v7652_v63, %v7604_v43  ;;  %8086 = vmatpush.bf16.msra.mxu2 %v9912_v30  ;;  %v10867_v63 = vld [vmem:[#allocation8 + $0x880] sm:$0xf]  ;;  %v11489_v43 = vld [vmem:[#allocation8 + $0x894] sm:$0xf0] }
 0x7e4   : > { %7847 = vmatmul.bf16.vlgmr.msrb.gmra.mxu1 %v14954_v34  ;;  %8135 = vmatpush.bf16.msra.mxu3 %v10104_v54  ;;  %v10868_v24 = vor.u32 %v11489_v43, %v10867_v63  ;;  %v10651_v54 = vld [vmem:[#allocation8 + $0x6d0] sm:$0xf] }
 0x7e5   : > { %7896 = vmatmul.bf16.vlgmr.msrb.gmra.mxu2 %v14949_v3 }
 0x7e6   : > { %7945 = vmatmul.bf16.vlgmr.msrb.gmra.mxu3 %v14950_v55  ;;  %8037 = vmatpush.bf16.msra.mxu1 %v10868_v24 }
 0x7e8   : > { %v7701_v46 = vpop.f32.mrf.mxu2  ;;  %v7605_v44 = vpop.f32.mrf.mxu0 }
 0x7e9   : > { %v7702_v50 = vadd.f32 %v7701_v46, %v7653_v53  ;;  %v7750_v0 = vpop.f32.mrf.mxu3  ;;  %v7654_v32 = vpop.f32.mrf.mxu1  ;;  %v7606_v55 = vadd.f32 %v7605_v44, %v14125_v9  ;;  %v14955_v46 = vld [vmem:[#allocation50_spill] sm:$0xff] }
 0x7ea   : > { %v11240_v9 = vld [vmem:[#allocation8 + $0xd4] sm:$0xf] }
 0x7eb   : > { %v7751_v36 = vadd.f32 %v7750_v0, %v7702_v50  ;;  %v7655_v59 = vadd.f32 %v7654_v32, %v7606_v55  ;;  %v9885_v55 = vld [vmem:[#allocation8 + $0xe8] sm:$0xf0]  ;;  %v11435_v0 = vld [vmem:[#allocation8 + $0x6e4] sm:$0xf0]  ;;  %v11288_v44 = vld [vmem:[#allocation8 + $0x254] sm:$0xf] }
 0x7ec   : > { %v10077_v32 = vld [vmem:[#allocation8 + $0x268] sm:$0xf0] }
 0x7ed   : > { %8381 = vst [vmem:[%s13850_s24 + $0x18] sm:$0xff] %v7751_v36  ;;  %v10080_v63 = vor.u32 %v11288_v44, %v10077_v32 }
 0x7ef   : > { %8136 = vmatpush.bf16.msra.mxu3 %v10080_v63  ;;  %v9861_v63 = vld [vmem:[#allocation8 + $0xb8] sm:$0xf0] }
 0x7f0   : > { %v7703_v3 = vpop.f32.mrf.mxu2  ;;  %v7608_v53 = vpop.f32.mrf.mxu0 }
 0x7f1   : > { %v7704_v5 = vadd.f32 %v7703_v3, %v7655_v59  ;;  %v7752_v33 = vpop.f32.mrf.mxu3  ;;  %v7657_v14 = vpop.f32.mrf.mxu1  ;;  %v7609_v30 = vadd.f32 %v7608_v53, %v14134_v20  ;;  %v9888_v3 = vor.u32 %v11240_v9, %v9885_v55  ;;  %v10652_v20 = vor.u32 %v11435_v0, %v10651_v54 }
 0x7f3   : > { %v7753_v13 = vadd.f32 %v7752_v33, %v7704_v5  ;;  %7803 = vmatmul.bf16.gmra.mxu0 %v14955_v46  ;;  %v7658_v50 = vadd.f32 %v7657_v14, %v7609_v30  ;;  %8087 = vmatpush.bf16.msra.mxu2 %v9888_v3  ;;  %v10843_v14 = vld [vmem:[#allocation8 + $0x850] sm:$0xf] }
 0x7f4   : > { %7852 = vmatmul.bf16.gmra.mxu1 %v14956_v49  ;;  %7989 = vmatpush.bf16.msra.mxu0 %v10652_v20  ;;  %v14958_v20 = vld [vmem:[#allocation58_spill] sm:$0xff] }
 0x7f5   : > { %8387 = vst [vmem:[%s13850_s24 + $0x48] sm:$0xff] %v7753_v13  ;;  %7901 = vmatmul.bf16.gmra.mxu2 %v14889_v47  ;;  %v11483_v13 = vld [vmem:[#allocation8 + $0x864] sm:$0xf0] }
 0x7f6   : > { %7950 = vmatmul.bf16.gmra.mxu3 %v14890_v17  ;;  %v10844_v30 = vor.u32 %v11483_v13, %v10843_v14 }
 0x7f8   : > { %v7706_v36 = vpop.f32.mrf.mxu2  ;;  %v7610_v59 = vpop.f32.mrf.mxu0  ;;  %8038 = vmatpush.bf16.msra.mxu1 %v10844_v30 }
 0x7f9   : > { %v7707_v43 = vadd.f32 %v7706_v36, %v7658_v50  ;;  %v7755_v24 = vpop.f32.mrf.mxu3  ;;  %v7659_v5 = vpop.f32.mrf.mxu1  ;;  %v7611_v53 = vadd.f32 %v7610_v59, %v14139_v10  ;;  %v14957_v36 = vld [vmem:[#allocation51_spill] sm:$0xff] }
 0x7fa   : > { %v11234_v10 = vld [vmem:[#allocation8 + $0xa4] sm:$0xf] }
 0x7fb   : > { %v7756_v33 = vadd.f32 %v7755_v24, %v7707_v43  ;;  %v7660_v9 = vadd.f32 %v7659_v5, %v7611_v53  ;;  %v10627_v43 = vld [vmem:[#allocation8 + $0x6a0] sm:$0xf]  ;;  %v9864_v59 = vor.u32 %v11234_v10, %v9861_v63  ;;  %v11429_v5 = vld [vmem:[#allocation8 + $0x6b4] sm:$0xf0]  ;;  %v10053_v53 = vld [vmem:[#allocation8 + $0x238] sm:$0xf0] }
 0x7fd   : > { %8393 = vst [vmem:[%s13850_s24 + $0x78] sm:$0xff] %v7756_v33  ;;  %v11282_v33 = vld [vmem:[#allocation8 + $0x224] sm:$0xf]  ;;  %8088 = vmatpush.bf16.msra.mxu2 %v9864_v59 }
 0x7fe   : > { %v10056_v13 = vor.u32 %v11282_v33, %v10053_v53 }
 0x800   : > { %v7708_v55 = vpop.f32.mrf.mxu2  ;;  %v7613_v50 = vpop.f32.mrf.mxu0  ;;  %8137 = vmatpush.bf16.msra.mxu3 %v10056_v13  ;;  %v9837_v13 = vld [vmem:[#allocation8 + $0x88] sm:$0xf0] }
 0x801   : > { %v7709_v54 = vadd.f32 %v7708_v55, %v7660_v9  ;;  %v7757_v0 = vpop.f32.mrf.mxu3  ;;  %v7662_v44 = vpop.f32.mrf.mxu1  ;;  %v7614_v3 = vadd.f32 %v7613_v50, %v14148_v15  ;;  %v10628_v15 = vor.u32 %v11429_v5, %v10627_v43 }
 0x803   : > { %v7758_v32 = vadd.f32 %v7757_v0, %v7709_v54  ;;  %7808 = vmatmul.bf16.gmra.mxu0 %v14957_v36  ;;  %v7663_v24 = vadd.f32 %v7662_v44, %v7614_v3  ;;  %v10819_v44 = vld [vmem:[#allocation8 + $0x820] sm:$0xf] }
 0x804   : > { %7857 = vmatmul.bf16.gmra.mxu1 %v14958_v20  ;;  %7990 = vmatpush.bf16.msra.mxu0 %v10628_v15  ;;  %v14960_v15 = vld [vmem:[#allocation59_spill] sm:$0xff] }
 0x805   : > { %8399 = vst [vmem:[%s13850_s24 + $0xa8] sm:$0xff] %v7758_v32  ;;  %7906 = vmatmul.bf16.gmra.mxu2 %v14893_v28  ;;  %v11477_v32 = vld [vmem:[#allocation8 + $0x834] sm:$0xf0] }
 0x806   : > { %7955 = vmatmul.bf16.gmra.mxu3 %v14894_v23  ;;  %v10820_v3 = vor.u32 %v11477_v32, %v10819_v44 }
 0x808   : > { %v7711_v14 = vpop.f32.mrf.mxu2  ;;  %v7615_v55 = vpop.f32.mrf.mxu0  ;;  %8039 = vmatpush.bf16.msra.mxu1 %v10820_v3 }
 0x809   : > { %v7712_v30 = vadd.f32 %v7711_v14, %v7663_v24  ;;  %v7760_v9 = vpop.f32.mrf.mxu3  ;;  %v7664_v54 = vpop.f32.mrf.mxu1  ;;  %v7616_v50 = vadd.f32 %v7615_v55, %v14153_v1  ;;  %v14959_v14 = vld [vmem:[#allocation52_spill] sm:$0xff]  ;;  %v11228_v1 = vld [vmem:[#allocation8 + $0x74] sm:$0xf] }
 0x80a   : > { %v9840_v55 = vor.u32 %v11228_v1, %v9837_v13 }
 0x80b   : > { %v7761_v0 = vadd.f32 %v7760_v9, %v7712_v30  ;;  %v7665_v10 = vadd.f32 %v7664_v54, %v7616_v50  ;;  %v10603_v30 = vld [vmem:[#allocation8 + $0x670] sm:$0xf]  ;;  %v11423_v54 = vld [vmem:[#allocation8 + $0x684] sm:$0xf0]  ;;  %v10029_v50 = vld [vmem:[#allocation8 + $0x208] sm:$0xf0] }
 0x80c   : > { %8089 = vmatpush.bf16.msra.mxu2 %v9840_v55 }
 0x80d   : > { %8405 = vst [vmem:[%s13850_s24 + $0xd8] sm:$0xff] %v7761_v0  ;;  %v11276_v0 = vld [vmem:[#allocation8 + $0x1f4] sm:$0xf] }
 0x80e   : > { %v10032_v32 = vor.u32 %v11276_v0, %v10029_v50 }
 0x810   : > { %v7713_v63 = vpop.f32.mrf.mxu2  ;;  %v7618_v24 = vpop.f32.mrf.mxu0  ;;  %8138 = vmatpush.bf16.msra.mxu3 %v10032_v32  ;;  %v9813_v32 = vld [vmem:[#allocation8 + $0x58] sm:$0xf0] }
 0x811   : > { %v7714_v43 = vadd.f32 %v7713_v63, %v7665_v10  ;;  %v7762_v5 = vpop.f32.mrf.mxu3  ;;  %v7667_v33 = vpop.f32.mrf.mxu1  ;;  %v7619_v59 = vadd.f32 %v7618_v24, %v14162_v45  ;;  %v10604_v45 = vor.u32 %v11423_v54, %v10603_v30 }
 0x813   : > { %v7763_v53 = vadd.f32 %v7762_v5, %v7714_v43  ;;  %7813 = vmatmul.bf16.gmra.mxu0 %v14959_v14  ;;  %v7668_v9 = vadd.f32 %v7667_v33, %v7619_v59  ;;  %v10795_v33 = vld [vmem:[#allocation8 + $0x7f0] sm:$0xf] }
 0x814   : > { %7862 = vmatmul.bf16.gmra.mxu1 %v14960_v15  ;;  %7991 = vmatpush.bf16.msra.mxu0 %v10604_v45  ;;  %v14962_v45 = vld [vmem:[#allocation60_spill] sm:$0xff] }
 0x815   : > { %8411 = vst [vmem:[%s13850_s24 + $0x108] sm:$0xff] %v7763_v53  ;;  %7911 = vmatmul.bf16.gmra.mxu2 %v14920_v2  ;;  %v11471_v53 = vld [vmem:[#allocation8 + $0x804] sm:$0xf0] }
 0x816   : > { %7960 = vmatmul.bf16.gmra.mxu3 %v14921_v29  ;;  %v10796_v59 = vor.u32 %v11471_v53, %v10795_v33 }
 0x818   : > { %v7716_v44 = vpop.f32.mrf.mxu2  ;;  %v7620_v63 = vpop.f32.mrf.mxu0  ;;  %8040 = vmatpush.bf16.msra.mxu1 %v10796_v59 }
 0x819   : > { %v7717_v3 = vadd.f32 %v7716_v44, %v7668_v9  ;;  %v7765_v10 = vpop.f32.mrf.mxu3  ;;  %v7669_v43 = vpop.f32.mrf.mxu1  ;;  %v7621_v24 = vadd.f32 %v7620_v63, %v14167_v7  ;;  %v14961_v44 = vld [vmem:[#allocation53_spill] sm:$0xff]  ;;  %v11222_v7 = vld [vmem:[#allocation8 + $0x44] sm:$0xf] }
 0x81a   : > { %v9816_v63 = vor.u32 %v11222_v7, %v9813_v32 }
 0x81b   : > { %v7766_v5 = vadd.f32 %v7765_v10, %v7717_v3  ;;  %v7670_v1 = vadd.f32 %v7669_v43, %v7621_v24  ;;  %v10579_v3 = vld [vmem:[#allocation8 + $0x640] sm:$0xf]  ;;  %v11417_v43 = vld [vmem:[#allocation8 + $0x654] sm:$0xf0]  ;;  %v10005_v24 = vld [vmem:[#allocation8 + $0x1d8] sm:$0xf0] }
 0x81c   : > { %8090 = vmatpush.bf16.msra.mxu2 %v9816_v63 }
 0x81d   : > { %8417 = vst [vmem:[%s13850_s24 + $0x138] sm:$0xff] %v7766_v5  ;;  %v11270_v5 = vld [vmem:[#allocation8 + $0x1c4] sm:$0xf] }
 0x81e   : > { %v10008_v53 = vor.u32 %v11270_v5, %v10005_v24 }
 0x820   : > { %v7718_v13 = vpop.f32.mrf.mxu2  ;;  %v7623_v9 = vpop.f32.mrf.mxu0  ;;  %8139 = vmatpush.bf16.msra.mxu3 %v10008_v53  ;;  %v9789_v53 = vld [vmem:[#allocation8 + $0x28] sm:$0xf0] }
 0x821   : > { %v7719_v30 = vadd.f32 %v7718_v13, %v7670_v1  ;;  %v7767_v54 = vpop.f32.mrf.mxu3  ;;  %v7672_v0 = vpop.f32.mrf.mxu1  ;;  %v7624_v55 = vadd.f32 %v7623_v9, %v14176_v58  ;;  %v10580_v58 = vor.u32 %v11417_v43, %v10579_v3 }
 0x823   : > { %v7768_v50 = vadd.f32 %v7767_v54, %v7719_v30  ;;  %7818 = vmatmul.bf16.gmra.mxu0 %v14961_v44  ;;  %v7673_v10 = vadd.f32 %v7672_v0, %v7624_v55  ;;  %v10771_v0 = vld [vmem:[#allocation8 + $0x7c0] sm:$0xf] }
 0x824   : > { %7867 = vmatmul.bf16.gmra.mxu1 %v14962_v45  ;;  %7992 = vmatpush.bf16.msra.mxu0 %v10580_v58  ;;  %v14964_v58 = vld [vmem:[#allocation61_spill] sm:$0xff] }
 0x825   : > { %8423 = vst [vmem:[%s13850_s24 + $0x168] sm:$0xff] %v7768_v50  ;;  %7916 = vmatmul.bf16.gmra.mxu2 %v14922_v39  ;;  %v11465_v50 = vld [vmem:[#allocation8 + $0x7d4] sm:$0xf0] }
 0x826   : > { %7965 = vmatmul.bf16.gmra.mxu3 %v14923_v41  ;;  %v10772_v55 = vor.u32 %v11465_v50, %v10771_v0 }
 0x828   : > { %v7721_v33 = vpop.f32.mrf.mxu2  ;;  %v7625_v13 = vpop.f32.mrf.mxu0  ;;  %8041 = vmatpush.bf16.msra.mxu1 %v10772_v55 }
 0x829   : > { %v7722_v59 = vadd.f32 %v7721_v33, %v7673_v10  ;;  %v7770_v1 = vpop.f32.mrf.mxu3  ;;  %v7674_v30 = vpop.f32.mrf.mxu1  ;;  %v7626_v9 = vadd.f32 %v7625_v13, %v14181_v52  ;;  %v14963_v33 = vld [vmem:[#allocation48_spill] sm:$0xff]  ;;  %v11216_v52 = vld [vmem:[#allocation8 + $0x14] sm:$0xf] }
 0x82a   : > { %v9792_v13 = vor.u32 %v11216_v52, %v9789_v53 }
 0x82b   : > { %v7771_v54 = vadd.f32 %v7770_v1, %v7722_v59  ;;  %v7675_v7 = vadd.f32 %v7674_v30, %v7626_v9  ;;  %v10555_v59 = vld [vmem:[#allocation8 + $0x610] sm:$0xf]  ;;  %v11411_v30 = vld [vmem:[#allocation8 + $0x624] sm:$0xf0]  ;;  %v9981_v9 = vld [vmem:[#allocation8 + $0x1a8] sm:$0xf0] }
 0x82c   : > { %8091 = vmatpush.bf16.msra.mxu2 %v9792_v13 }
 0x82d   : > { %8429 = vst [vmem:[%s13850_s24 + $0x198] sm:$0xff] %v7771_v54  ;;  %v11264_v54 = vld [vmem:[#allocation8 + $0x194] sm:$0xf] }
 0x82e   : > { %v9984_v50 = vor.u32 %v11264_v54, %v9981_v9 }
 0x830   : > { %v7723_v32 = vpop.f32.mrf.mxu2  ;;  %v7628_v10 = vpop.f32.mrf.mxu0  ;;  %8140 = vmatpush.bf16.msra.mxu3 %v9984_v50  ;;  %v10725_v50 = vld [vmem:[#allocation8 + $0x778] sm:$0xf0] }
 0x831   : > { %v7724_v3 = vadd.f32 %v7723_v32, %v7675_v7  ;;  %v7772_v43 = vpop.f32.mrf.mxu3  ;;  %v7677_v5 = vpop.f32.mrf.mxu1  ;;  %v7629_v63 = vadd.f32 %v7628_v10, %v14190_v21  ;;  %v10556_v21 = vor.u32 %v11411_v30, %v10555_v59 }
 0x833   : > { %v7773_v24 = vadd.f32 %v7772_v43, %v7724_v3  ;;  %7823 = vmatmul.bf16.gmra.mxu0 %v14963_v33  ;;  %v7678_v1 = vadd.f32 %v7677_v5, %v7629_v63  ;;  %v10747_v5 = vld [vmem:[#allocation8 + $0x790] sm:$0xf] }
 0x834   : > { %7872 = vmatmul.bf16.gmra.mxu1 %v14964_v58  ;;  %7993 = vmatpush.bf16.msra.mxu0 %v10556_v21  ;;  %v14966_v21 = vld [vmem:[#allocation62_spill] sm:$0xff] }
 0x835   : > { %8435 = vst [vmem:[%s13850_s24 + $0x1c8] sm:$0xff] %v7773_v24  ;;  %7921 = vmatmul.bf16.gmra.mxu2 %v14924_v37  ;;  %v11459_v24 = vld [vmem:[#allocation8 + $0x7a4] sm:$0xf0] }
 0x836   : > { %7970 = vmatmul.bf16.gmra.mxu3 %v14925_v18  ;;  %v10748_v63 = vor.u32 %v11459_v24, %v10747_v5 }
 0x838   : > { %v7726_v0 = vpop.f32.mrf.mxu2  ;;  %v7630_v32 = vpop.f32.mrf.mxu0  ;;  %8042 = vmatpush.bf16.msra.mxu1 %v10748_v63 }
 0x839   : > { %v7727_v55 = vadd.f32 %v7726_v0, %v7678_v1  ;;  %v7775_v7 = vpop.f32.mrf.mxu3  ;;  %v7679_v3 = vpop.f32.mrf.mxu1  ;;  %v7631_v10 = vadd.f32 %v7630_v32, %v14195_v4  ;;  %v14965_v0 = vld [vmem:[#allocation54_spill] sm:$0xff]  ;;  %v11450_v4 = vld [vmem:[#allocation8 + $0x764] sm:$0xf] }
 0x83a   : > { %v10728_v32 = vor.u32 %v11450_v4, %v10725_v50 }
 0x83b   : > { %v7776_v43 = vadd.f32 %v7775_v7, %v7727_v55  ;;  %v7680_v52 = vadd.f32 %v7679_v3, %v7631_v10  ;;  %v11354_v55 = vld [vmem:[#allocation8 + $0x464] sm:$0xf]  ;;  %v10341_v3 = vld [vmem:[#allocation8 + $0x478] sm:$0xf0] }
 0x83c   : > { %v10917_v10 = vld [vmem:[#allocation8 + $0x8f8] sm:$0xf0]  ;;  %8280 = vmatpush.bf16.msrb.mxu2 %v10728_v32 }
 0x83d   : > { %8441 = vst [vmem:[%s13850_s24 + $0x1f8] sm:$0xff] %v7776_v43  ;;  %v11498_v43 = vld [vmem:[#allocation8 + $0x8e4] sm:$0xf] }
 0x83e   : > { %v10920_v24 = vor.u32 %v11498_v43, %v10917_v10 }
 0x840   : > { %v7728_v53 = vpop.f32.mrf.mxu2  ;;  %v7633_v1 = vpop.f32.mrf.mxu0  ;;  %8329 = vmatpush.bf16.msrb.mxu3 %v10920_v24  ;;  %v10701_v24 = vld [vmem:[#allocation8 + $0x748] sm:$0xf0] }
 0x841   : > { %v7729_v59 = vadd.f32 %v7728_v53, %v7680_v52  ;;  %v7777_v30 = vpop.f32.mrf.mxu3  ;;  %v7682_v54 = vpop.f32.mrf.mxu1  ;;  %v7634_v13 = vadd.f32 %v7633_v1, %v14204_v8  ;;  %v10344_v8 = vor.u32 %v11354_v55, %v10341_v3 }
 0x843   : > { %v7778_v9 = vadd.f32 %v7777_v30, %v7729_v59  ;;  %7828 = vmatmul.bf16.gmra.mxu0 %v14965_v0  ;;  %v7683_v7 = vadd.f32 %v7682_v54, %v7634_v13  ;;  %v11402_v54 = vld [vmem:[#allocation8 + $0x5e4] sm:$0xf] }
 0x844   : > { %7877 = vmatmul.bf16.gmra.mxu1 %v14966_v21  ;;  %8182 = vmatpush.bf16.msrb.mxu0 %v10344_v8  ;;  %v14968_v8 = vld [vmem:[#allocation63_spill] sm:$0xff] }
 0x845   : > { %8447 = vst [vmem:[%s13850_s24 + $0x228] sm:$0xff] %v7778_v9  ;;  %7926 = vmatmul.bf16.gmra.mxu2 %v14926_v56  ;;  %v10533_v9 = vld [vmem:[#allocation8 + $0x5f8] sm:$0xf0] }
 0x846   : > { %7975 = vmatmul.bf16.gmra.mxu3 %v14927_v61  ;;  %v10536_v13 = vor.u32 %v11402_v54, %v10533_v9 }
 0x848   : > { %v7731_v5 = vpop.f32.mrf.mxu2  ;;  %v7635_v53 = vpop.f32.mrf.mxu0  ;;  %8231 = vmatpush.bf16.msrb.mxu1 %v10536_v13 }
 0x849   : > { %v7732_v63 = vadd.f32 %v7731_v5, %v7683_v7  ;;  %v7780_v52 = vpop.f32.mrf.mxu3  ;;  %v7684_v59 = vpop.f32.mrf.mxu1  ;;  %v7636_v1 = vadd.f32 %v7635_v53, %v14209_v38  ;;  %v14967_v5 = vld [vmem:[#allocation55_spill] sm:$0xff]  ;;  %v11444_v38 = vld [vmem:[#allocation8 + $0x734] sm:$0xf] }
 0x84a   : > { %v10704_v53 = vor.u32 %v11444_v38, %v10701_v24  ;;  %v14287_v38 = vld [vmem:[#allocation10] sm:$0x3f] }
 0x84b   : > { %v7781_v30 = vadd.f32 %v7780_v52, %v7732_v63  ;;  %v7685_v4 = vadd.f32 %v7684_v59, %v7636_v1  ;;  %v11348_v63 = vld [vmem:[#allocation8 + $0x434] sm:$0xf]  ;;  %v10317_v59 = vld [vmem:[#allocation8 + $0x448] sm:$0xf0]  ;;  %v14290_v24 = vperm.slane %v14287_v38, 4 }
 0x84c   : > { %v10893_v1 = vld [vmem:[#allocation8 + $0x8c8] sm:$0xf0]  ;;  %8281 = vmatpush.bf16.msrb.mxu2 %v10704_v53 }
 0x84d   : > { %8453 = vst [vmem:[%s13850_s24 + $0x258] sm:$0xff] %v7781_v30  ;;  %v11492_v30 = vld [vmem:[#allocation8 + $0x8b4] sm:$0xf] }
 0x84e   : > { %v10896_v9 = vor.u32 %v11492_v30, %v10893_v1 }
 0x850   : > { %v7733_v50 = vpop.f32.mrf.mxu2  ;;  %v7638_v7 = vpop.f32.mrf.mxu0  ;;  %8330 = vmatpush.bf16.msrb.mxu3 %v10896_v9  ;;  %v11438_v9 = vld [vmem:[#allocation8 + $0x704] sm:$0xf] }
 0x851   : > { %v7734_v55 = vadd.f32 %v7733_v50, %v7685_v4  ;;  %v7782_v3 = vpop.f32.mrf.mxu3  ;;  %v7687_v43 = vpop.f32.mrf.mxu1  ;;  %v7639_v32 = vadd.f32 %v7638_v7, %v14218_v25  ;;  %v10320_v25 = vor.u32 %v11348_v63, %v10317_v59 }
 0x853   : > { %v7783_v10 = vadd.f32 %v7782_v3, %v7734_v55  ;;  %7833 = vmatmul.bf16.gmra.mxu0 %v14967_v5  ;;  %v7688_v52 = vadd.f32 %v7687_v43, %v7639_v32  ;;  %v10509_v43 = vld [vmem:[#allocation8 + $0x5c8] sm:$0xf0] }
 0x854   : > { %7882 = vmatmul.bf16.gmra.mxu1 %v14968_v8  ;;  %8183 = vmatpush.bf16.msrb.mxu0 %v10320_v25 }
 0x855   : > { %8459 = vst [vmem:[%s13850_s24 + $0x288] sm:$0xff] %v7783_v10  ;;  %7931 = vmatmul.bf16.gmra.mxu2 %v14928_v57  ;;  %v11396_v10 = vld [vmem:[#allocation8 + $0x5b4] sm:$0xf] }
 0x856   : > { %7980 = vmatmul.bf16.gmra.mxu3 %v14951_v35  ;;  %v10512_v32 = vor.u32 %v11396_v10, %v10509_v43 }
 0x858   : > { %v7736_v54 = vpop.f32.mrf.mxu2  ;;  %v7640_v50 = vpop.f32.mrf.mxu0  ;;  %8232 = vmatpush.bf16.msrb.mxu1 %v10512_v32 }
 0x859   : > { %v7737_v13 = vadd.f32 %v7736_v54, %v7688_v52  ;;  %v7785_v4 = vpop.f32.mrf.mxu3  ;;  %v7689_v55 = vpop.f32.mrf.mxu1  ;;  %v7641_v7 = vadd.f32 %v7640_v50, %v14222_v22 }
 0x85b   : > { %v7786_v3 = vadd.f32 %v7785_v4, %v7737_v13  ;;  %v7690_v63 = vadd.f32 %v7689_v55, %v7641_v7  ;;  %v10677_v13 = vld [vmem:[#allocation8 + $0x718] sm:$0xf0]  ;;  %v11342_v4 = vld [vmem:[#allocation8 + $0x404] sm:$0xf] }
 0x85c   : > { %v10680_v50 = vor.u32 %v11438_v9, %v10677_v13  ;;  %v10293_v55 = vld [vmem:[#allocation8 + $0x418] sm:$0xf0] }
 0x85d   : > { %8465 = vst [vmem:[%s13850_s24 + $0x2b8] sm:$0xff] %v7786_v3  ;;  %v11486_v3 = vld [vmem:[#allocation8 + $0x884] sm:$0xf]  ;;  %v10869_v7 = vld [vmem:[#allocation8 + $0x898] sm:$0xf0]  ;;  %v10296_v43 = vor.u32 %v11342_v4, %v10293_v55 }
 0x85e   : > { %v10872_v32 = vor.u32 %v11486_v3, %v10869_v7  ;;  %8282 = vmatpush.bf16.msrb.mxu2 %v10680_v50 }
 0x85f   : > { %8184 = vmatpush.bf16.msrb.mxu0 %v10296_v43  ;;  %v10653_v43 = vld [vmem:[#allocation8 + $0x6e8] sm:$0xf0] }
 0x860   : > { %v7738_v52 = vpop.f32.mrf.mxu2  ;;  %v7799_v30 = vpop.f32.mrf.mxu0  ;;  %8331 = vmatpush.bf16.msrb.mxu3 %v10872_v32  ;;  %v11336_v32 = vld [vmem:[#allocation8 + $0x3d4] sm:$0xf] }
 0x861   : > { %v7739_v53 = vadd.f32 %v7738_v52, %v7690_v63  ;;  %v7787_v59 = vpop.f32.mrf.mxu3  ;;  %v7800_v1 = vadd.f32 %v7799_v30, %v14290_v24  ;;  %v7848_v54 = vpop.f32.mrf.mxu1 }
 0x863   : > { %v7788_v22 = vadd.f32 %v7787_v59, %v7739_v53  ;;  %v7849_v25 = vadd.f32 %v7848_v54, %v7800_v1  ;;  %7994 = vmatmul.bf16.vlgmr.msra.gmra.mxu0 %v13439_v62  ;;  %v10485_v1 = vld [vmem:[#allocation8 + $0x598] sm:$0xf0] }
 0x864   : > { %8043 = vmatmul.bf16.vlgmr.msra.gmra.mxu1 %v13636_v11 }
 0x865   : > { %8471 = vst [vmem:[%s13850_s24 + $0x2e8] sm:$0xff] %v7788_v22  ;;  %8092 = vmatmul.bf16.vlgmr.msra.gmra.mxu2 %v14953_v42 }
 0x866   : > { %8141 = vmatmul.bf16.vlgmr.msra.gmra.mxu3 %v14954_v34  ;;  %v11390_v34 = vld [vmem:[#allocation8 + $0x584] sm:$0xf] }
 0x867   : > { %v10488_v22 = vor.u32 %v11390_v34, %v10485_v1 }
 0x868   : > { %v7897_v10 = vpop.f32.mrf.mxu2  ;;  %v7801_v53 = vpop.f32.mrf.mxu0 }
 0x869   : > { %v7898_v63 = vadd.f32 %v7897_v10, %v7849_v25  ;;  %v7946_v52 = vpop.f32.mrf.mxu3  ;;  %v7802_v59 = vadd.f32 %v7801_v53, %v14290_v24  ;;  %v7850_v30 = vpop.f32.mrf.mxu1  ;;  %8233 = vmatpush.bf16.msrb.mxu1 %v10488_v22  ;;  %v11432_v10 = vld [vmem:[#allocation8 + $0x6d4] sm:$0xf] }
 0x86a   : > { %v11480_v53 = vld [vmem:[#allocation8 + $0x854] sm:$0xf] }
 0x86b   : > { %v14299_v42 = vadd.f32 %v7946_v52, %v7898_v63  ;;  %v7851_v54 = vadd.f32 %v7850_v30, %v7802_v59  ;;  %v10656_v63 = vor.u32 %v11432_v10, %v10653_v43  ;;  %v10269_v52 = vld [vmem:[#allocation8 + $0x3e8] sm:$0xf0] }
 0x86c   : > { %v10845_v59 = vld [vmem:[#allocation8 + $0x868] sm:$0xf0]  ;;  %v10272_v34 = vor.u32 %v11336_v32, %v10269_v52 }
 0x86d   : > { %v10848_v1 = vor.u32 %v11480_v53, %v10845_v59  ;;  %8283 = vmatpush.bf16.msrb.mxu2 %v10656_v63 }
 0x86e   : > { %8185 = vmatpush.bf16.msrb.mxu0 %v10272_v34  ;;  %v10629_v34 = vld [vmem:[#allocation8 + $0x6b8] sm:$0xf0] }
 0x86f   : > { %8332 = vmatpush.bf16.msrb.mxu3 %v10848_v1  ;;  %v11330_v1 = vld [vmem:[#allocation8 + $0x3a4] sm:$0xf] }
 0x870   : > { %v7899_v9 = vpop.f32.mrf.mxu2  ;;  %v7804_v55 = vpop.f32.mrf.mxu0 }
 0x871   : > { %v7900_v13 = vadd.f32 %v7899_v9, %v7851_v54  ;;  %v7948_v4 = vpop.f32.mrf.mxu3  ;;  %v7805_v25 = vadd.f32 %v7804_v55, %v14290_v24  ;;  %v7853_v3 = vpop.f32.mrf.mxu1  ;;  %v10461_v55 = vld [vmem:[#allocation8 + $0x568] sm:$0xf0] }
 0x873   : > { %v14302_v50 = vadd.f32 %v7948_v4, %v7900_v13  ;;  %v7854_v7 = vadd.f32 %v7853_v3, %v7805_v25  ;;  %7999 = vmatmul.bf16.gmra.mxu0 %v13467_v19 }
 0x874   : > { %8048 = vmatmul.bf16.gmra.mxu1 %v13658_v31 }
 0x875   : > { %8097 = vmatmul.bf16.gmra.mxu2 %v14955_v46 }
 0x876   : > { %8146 = vmatmul.bf16.gmra.mxu3 %v14956_v49  ;;  %v11384_v49 = vld [vmem:[#allocation8 + $0x554] sm:$0xf] }
 0x877   : > { %v10464_v3 = vor.u32 %v11384_v49, %v10461_v55 }
 0x878   : > { %v7902_v30 = vpop.f32.mrf.mxu2  ;;  %v7806_v9 = vpop.f32.mrf.mxu0 }
 0x879   : > { %v7903_v54 = vadd.f32 %v7902_v30, %v7854_v7  ;;  %v7951_v22 = vpop.f32.mrf.mxu3  ;;  %v7807_v13 = vadd.f32 %v7806_v9, %v14290_v24  ;;  %v7855_v4 = vpop.f32.mrf.mxu1  ;;  %8234 = vmatpush.bf16.msrb.mxu1 %v10464_v3  ;;  %v11426_v30 = vld [vmem:[#allocation8 + $0x6a4] sm:$0xf] }
 0x87a   : > { %v11474_v9 = vld [vmem:[#allocation8 + $0x824] sm:$0xf] }
 0x87b   : > { %v14309_v46 = vadd.f32 %v7951_v22, %v7903_v54  ;;  %v7856_v25 = vadd.f32 %v7855_v4, %v7807_v13  ;;  %v10632_v54 = vor.u32 %v11426_v30, %v10629_v34  ;;  %v10245_v22 = vld [vmem:[#allocation8 + $0x3b8] sm:$0xf0] }
 0x87c   : > { %v10821_v13 = vld [vmem:[#allocation8 + $0x838] sm:$0xf0]  ;;  %v10248_v49 = vor.u32 %v11330_v1, %v10245_v22 }
 0x87d   : > { %v10824_v55 = vor.u32 %v11474_v9, %v10821_v13  ;;  %8284 = vmatpush.bf16.msrb.mxu2 %v10632_v54 }
 0x87e   : > { %8186 = vmatpush.bf16.msrb.mxu0 %v10248_v49  ;;  %v10605_v49 = vld [vmem:[#allocation8 + $0x688] sm:$0xf0] }
 0x87f   : > { %8333 = vmatpush.bf16.msrb.mxu3 %v10824_v55  ;;  %v11324_v55 = vld [vmem:[#allocation8 + $0x374] sm:$0xf] }
 0x880   : > { %v7904_v10 = vpop.f32.mrf.mxu2  ;;  %v7809_v52 = vpop.f32.mrf.mxu0 }
 0x881   : > { %v7905_v43 = vadd.f32 %v7904_v10, %v7856_v25  ;;  %v7953_v32 = vpop.f32.mrf.mxu3  ;;  %v7810_v7 = vadd.f32 %v7809_v52, %v14290_v24  ;;  %v7858_v53 = vpop.f32.mrf.mxu1  ;;  %v10437_v52 = vld [vmem:[#allocation8 + $0x538] sm:$0xf0] }
 0x883   : > { %v14312_v63 = vadd.f32 %v7953_v32, %v7905_v43  ;;  %v7859_v59 = vadd.f32 %v7858_v53, %v7810_v7  ;;  %8004 = vmatmul.bf16.gmra.mxu0 %v13495_v26 }
 0x884   : > { %8053 = vmatmul.bf16.gmra.mxu1 %v13680_v27 }
 0x885   : > { %8102 = vmatmul.bf16.gmra.mxu2 %v14957_v36 }
 0x886   : > { %8151 = vmatmul.bf16.gmra.mxu3 %v14958_v20  ;;  %v11378_v20 = vld [vmem:[#allocation8 + $0x524] sm:$0xf] }
 0x887   : > { %v10440_v53 = vor.u32 %v11378_v20, %v10437_v52 }
 0x888   : > { %v7907_v4 = vpop.f32.mrf.mxu2  ;;  %v7811_v10 = vpop.f32.mrf.mxu0 }
 0x889   : > { %v7908_v25 = vadd.f32 %v7907_v4, %v7859_v59  ;;  %v7956_v3 = vpop.f32.mrf.mxu3  ;;  %v7812_v43 = vadd.f32 %v7811_v10, %v14290_v24  ;;  %v7860_v32 = vpop.f32.mrf.mxu1  ;;  %8235 = vmatpush.bf16.msrb.mxu1 %v10440_v53  ;;  %v11420_v4 = vld [vmem:[#allocation8 + $0x674] sm:$0xf] }
 0x88a   : > { %v11468_v10 = vld [vmem:[#allocation8 + $0x7f4] sm:$0xf] }
 0x88b   : > { %v14319_v36 = vadd.f32 %v7956_v3, %v7908_v25  ;;  %v7861_v7 = vadd.f32 %v7860_v32, %v7812_v43  ;;  %v10608_v25 = vor.u32 %v11420_v4, %v10605_v49  ;;  %v10221_v3 = vld [vmem:[#allocation8 + $0x388] sm:$0xf0] }
 0x88c   : > { %v10797_v43 = vld [vmem:[#allocation8 + $0x808] sm:$0xf0]  ;;  %v10224_v20 = vor.u32 %v11324_v55, %v10221_v3 }
 0x88d   : > { %v10800_v52 = vor.u32 %v11468_v10, %v10797_v43  ;;  %8285 = vmatpush.bf16.msrb.mxu2 %v10608_v25 }
 0x88e   : > { %8187 = vmatpush.bf16.msrb.mxu0 %v10224_v20  ;;  %v10581_v20 = vld [vmem:[#allocation8 + $0x658] sm:$0xf0] }
 0x88f   : > { %8334 = vmatpush.bf16.msrb.mxu3 %v10800_v52  ;;  %v11318_v52 = vld [vmem:[#allocation8 + $0x344] sm:$0xf] }
 0x890   : > { %v7909_v30 = vpop.f32.mrf.mxu2  ;;  %v7814_v22 = vpop.f32.mrf.mxu0 }
 0x891   : > { %v7910_v34 = vadd.f32 %v7909_v30, %v7861_v7  ;;  %v7958_v1 = vpop.f32.mrf.mxu3  ;;  %v7815_v59 = vadd.f32 %v7814_v22, %v14290_v24  ;;  %v7863_v9 = vpop.f32.mrf.mxu1  ;;  %v10413_v22 = vld [vmem:[#allocation8 + $0x508] sm:$0xf0] }
 0x893   : > { %v14322_v54 = vadd.f32 %v7958_v1, %v7910_v34  ;;  %v7864_v13 = vadd.f32 %v7863_v9, %v7815_v59  ;;  %8009 = vmatmul.bf16.gmra.mxu0 %v13523_v6 }
 0x894   : > { %8058 = vmatmul.bf16.gmra.mxu1 %v14940_v12 }
 0x895   : > { %8107 = vmatmul.bf16.gmra.mxu2 %v14959_v14 }
 0x896   : > { %8156 = vmatmul.bf16.gmra.mxu3 %v14960_v15  ;;  %v11372_v15 = vld [vmem:[#allocation8 + $0x4f4] sm:$0xf] }
 0x897   : > { %v10416_v9 = vor.u32 %v11372_v15, %v10413_v22 }
 0x898   : > { %v7912_v32 = vpop.f32.mrf.mxu2  ;;  %v7816_v30 = vpop.f32.mrf.mxu0 }
 0x899   : > { %v7913_v7 = vadd.f32 %v7912_v32, %v7864_v13  ;;  %v7961_v53 = vpop.f32.mrf.mxu3  ;;  %v7817_v34 = vadd.f32 %v7816_v30, %v14290_v24  ;;  %v7865_v1 = vpop.f32.mrf.mxu1  ;;  %8236 = vmatpush.bf16.msrb.mxu1 %v10416_v9  ;;  %v11414_v32 = vld [vmem:[#allocation8 + $0x644] sm:$0xf] }
 0x89a   : > { %v11462_v30 = vld [vmem:[#allocation8 + $0x7c4] sm:$0xf] }
 0x89b   : > { %v14329_v14 = vadd.f32 %v7961_v53, %v7913_v7  ;;  %v7866_v59 = vadd.f32 %v7865_v1, %v7817_v34  ;;  %v10584_v7 = vor.u32 %v11414_v32, %v10581_v20  ;;  %v10197_v53 = vld [vmem:[#allocation8 + $0x358] sm:$0xf0] }
 0x89c   : > { %v10773_v34 = vld [vmem:[#allocation8 + $0x7d8] sm:$0xf0]  ;;  %v10200_v15 = vor.u32 %v11318_v52, %v10197_v53 }
 0x89d   : > { %v10776_v22 = vor.u32 %v11462_v30, %v10773_v34  ;;  %8286 = vmatpush.bf16.msrb.mxu2 %v10584_v7 }
 0x89e   : > { %8188 = vmatpush.bf16.msrb.mxu0 %v10200_v15  ;;  %v10557_v15 = vld [vmem:[#allocation8 + $0x628] sm:$0xf0] }
 0x89f   : > { %8335 = vmatpush.bf16.msrb.mxu3 %v10776_v22  ;;  %v11312_v22 = vld [vmem:[#allocation8 + $0x314] sm:$0xf] }
 0x8a0   : > { %v7914_v4 = vpop.f32.mrf.mxu2  ;;  %v7819_v3 = vpop.f32.mrf.mxu0 }
 0x8a1   : > { %v7915_v49 = vadd.f32 %v7914_v4, %v7866_v59  ;;  %v7963_v55 = vpop.f32.mrf.mxu3  ;;  %v7820_v13 = vadd.f32 %v7819_v3, %v14290_v24  ;;  %v7868_v10 = vpop.f32.mrf.mxu1  ;;  %v10389_v3 = vld [vmem:[#allocation8 + $0x4d8] sm:$0xf0] }
 0x8a3   : > { %v14332_v25 = vadd.f32 %v7963_v55, %v7915_v49  ;;  %v7869_v43 = vadd.f32 %v7868_v10, %v7820_v13  ;;  %8014 = vmatmul.bf16.gmra.mxu0 %v14941_v40 }
 0x8a4   : > { %8063 = vmatmul.bf16.gmra.mxu1 %v14942_v60 }
 0x8a5   : > { %8112 = vmatmul.bf16.gmra.mxu2 %v14961_v44 }
 0x8a6   : > { %8161 = vmatmul.bf16.gmra.mxu3 %v14962_v45  ;;  %v11366_v45 = vld [vmem:[#allocation8 + $0x4c4] sm:$0xf] }
 0x8a7   : > { %v10392_v10 = vor.u32 %v11366_v45, %v10389_v3 }
 0x8a8   : > { %v7917_v1 = vpop.f32.mrf.mxu2  ;;  %v7821_v4 = vpop.f32.mrf.mxu0 }
 0x8a9   : > { %v7918_v59 = vadd.f32 %v7917_v1, %v7869_v43  ;;  %v7966_v9 = vpop.f32.mrf.mxu3  ;;  %v7822_v49 = vadd.f32 %v7821_v4, %v14290_v24  ;;  %v7870_v55 = vpop.f32.mrf.mxu1  ;;  %8237 = vmatpush.bf16.msrb.mxu1 %v10392_v10  ;;  %v11408_v1 = vld [vmem:[#allocation8 + $0x614] sm:$0xf] }
 0x8aa   : > { %v11456_v4 = vld [vmem:[#allocation8 + $0x794] sm:$0xf] }
 0x8ab   : > { %v14339_v44 = vadd.f32 %v7966_v9, %v7918_v59  ;;  %v7871_v13 = vadd.f32 %v7870_v55, %v7822_v49  ;;  %v10560_v59 = vor.u32 %v11408_v1, %v10557_v15  ;;  %v10173_v9 = vld [vmem:[#allocation8 + $0x328] sm:$0xf0] }
 0x8ac   : > { %v10749_v49 = vld [vmem:[#allocation8 + $0x7a8] sm:$0xf0]  ;;  %v10176_v45 = vor.u32 %v11312_v22, %v10173_v9 }
 0x8ad   : > { %v10752_v3 = vor.u32 %v11456_v4, %v10749_v49  ;;  %8287 = vmatpush.bf16.msrb.mxu2 %v10560_v59 }
 0x8ae   : > { %8189 = vmatpush.bf16.msrb.mxu0 %v10176_v45 }
 0x8af   : > { %8336 = vmatpush.bf16.msrb.mxu3 %v10752_v3 }
 0x8b0   : > { %v7919_v32 = vpop.f32.mrf.mxu2  ;;  %v7824_v53 = vpop.f32.mrf.mxu0 }
 0x8b1   : > { %v7920_v20 = vadd.f32 %v7919_v32, %v7871_v13  ;;  %v7968_v52 = vpop.f32.mrf.mxu3  ;;  %v7825_v43 = vadd.f32 %v7824_v53, %v14290_v24  ;;  %v7873_v30 = vpop.f32.mrf.mxu1  ;;  %v10365_v53 = vld [vmem:[#allocation8 + $0x4a8] sm:$0xf0] }
 0x8b3   : > { %v14342_v7 = vadd.f32 %v7968_v52, %v7920_v20  ;;  %v7874_v34 = vadd.f32 %v7873_v30, %v7825_v43  ;;  %8019 = vmatmul.bf16.gmra.mxu0 %v14943_v48 }
 0x8b4   : > { %8068 = vmatmul.bf16.gmra.mxu1 %v14944_v51 }
 0x8b5   : > { %8117 = vmatmul.bf16.gmra.mxu2 %v14963_v33 }
 0x8b6   : > { %8166 = vmatmul.bf16.gmra.mxu3 %v14964_v58  ;;  %v11360_v58 = vld [vmem:[#allocation8 + $0x494] sm:$0xf] }
 0x8b7   : > { %v10368_v30 = vor.u32 %v11360_v58, %v10365_v53 }
 0x8b8   : > { %v7922_v55 = vpop.f32.mrf.mxu2  ;;  %v7826_v32 = vpop.f32.mrf.mxu0 }
 0x8b9   : > { %v7923_v13 = vadd.f32 %v7922_v55, %v7874_v34  ;;  %v7971_v10 = vpop.f32.mrf.mxu3  ;;  %v7827_v20 = vadd.f32 %v7826_v32, %v14290_v24  ;;  %v7875_v52 = vpop.f32.mrf.mxu1  ;;  %8238 = vmatpush.bf16.msrb.mxu1 %v10368_v30  ;;  %v14969_v55 = vld [vmem:[#allocation36_spill] sm:$0xff] }
 0x8bb   : > { %v14349_v33 = vadd.f32 %v7971_v10, %v7923_v13  ;;  %v7876_v43 = vadd.f32 %v7875_v52, %v7827_v20 }
 0x8c0   : > { %v7924_v1 = vpop.f32.mrf.mxu2  ;;  %v7829_v9 = vpop.f32.mrf.mxu0 }
 0x8c1   : > { %v7925_v15 = vadd.f32 %v7924_v1, %v7876_v43  ;;  %v7973_v22 = vpop.f32.mrf.mxu3  ;;  %v7830_v34 = vadd.f32 %v7829_v9, %v14290_v24  ;;  %v7878_v4 = vpop.f32.mrf.mxu1  ;;  %v14970_v9 = vld [vmem:[#allocation30_spill] sm:$0xff] }
 0x8c3   : > { %v14352_v59 = vadd.f32 %v7973_v22, %v7925_v15  ;;  %v7879_v49 = vadd.f32 %v7878_v4, %v7830_v34  ;;  %8024 = vmatmul.bf16.gmra.mxu0 %v14945_v16  ;;  %v14971_v34 = vld [vmem:[#allocation37_spill] sm:$0xff] }
 0x8c4   : > { %8073 = vmatmul.bf16.gmra.mxu1 %v14969_v55 }
 0x8c5   : > { %8122 = vmatmul.bf16.gmra.mxu2 %v14965_v0 }
 0x8c6   : > { %8171 = vmatmul.bf16.gmra.mxu3 %v14966_v21 }
 0x8c8   : > { %v7927_v45 = vpop.f32.mrf.mxu2  ;;  %v7831_v10 = vpop.f32.mrf.mxu0 }
 0x8c9   : > { %v7928_v3 = vadd.f32 %v7927_v45, %v7879_v49  ;;  %v7976_v13 = vpop.f32.mrf.mxu3  ;;  %v7832_v32 = vadd.f32 %v7831_v10, %v14290_v24  ;;  %v7880_v20 = vpop.f32.mrf.mxu1 }
 0x8cb   : > { %v14359_v52 = vadd.f32 %v7976_v13, %v7928_v3  ;;  %v7881_v58 = vadd.f32 %v7880_v20, %v7832_v32 }
 0x8d0   : > { %v7929_v53 = vpop.f32.mrf.mxu2  ;;  %v7834_v1 = vpop.f32.mrf.mxu0 }
 0x8d1   : > { %v7930_v43 = vadd.f32 %v7929_v53, %v7881_v58  ;;  %v7978_v30 = vpop.f32.mrf.mxu3  ;;  %v7835_v15 = vadd.f32 %v7834_v1, %v14290_v24  ;;  %v7883_v22 = vpop.f32.mrf.mxu1 }
 0x8d3   : > { %v14362_v0 = vadd.f32 %v7978_v30, %v7930_v43  ;;  %v7884_v21 = vadd.f32 %v7883_v22, %v7835_v15  ;;  %8029 = vmatmul.bf16.gmra.mxu0 %v14970_v9  ;;  %v14972_v22 = vld [vmem:[#allocation45_spill] sm:$0xff] }
 0x8d4   : > { %8078 = vmatmul.bf16.gmra.mxu1 %v14971_v34 }
 0x8d5   : > { %8127 = vmatmul.bf16.gmra.mxu2 %v14967_v5 }
 0x8d6   : > { %8176 = vmatmul.bf16.gmra.mxu3 %v14968_v8 }
 0x8d8   : > { %v7932_v4 = vpop.f32.mrf.mxu2  ;;  %v7836_v3 = vpop.f32.mrf.mxu0 }
 0x8d9   : > { %v7933_v49 = vadd.f32 %v7932_v4, %v7884_v21  ;;  %v7981_v45 = vpop.f32.mrf.mxu3  ;;  %v7837_v13 = vadd.f32 %v7836_v3, %v14290_v24  ;;  %v7885_v10 = vpop.f32.mrf.mxu1  ;;  %v14973_v21 = vld [vmem:[#allocation17_spill] sm:$0xff]  ;;  %v14378_v24 = vperm.slane %v14287_v38, 5 }
 0x8db   : > { %v14369_v32 = vadd.f32 %v7981_v45, %v7933_v49  ;;  %v7886_v20 = vadd.f32 %v7885_v10, %v7837_v13 }
 0x8e0   : > { %v7934_v58 = vpop.f32.mrf.mxu2  ;;  %v7995_v30 = vpop.f32.mrf.mxu0 }
 0x8e1   : > { %v7935_v53 = vadd.f32 %v7934_v58, %v7886_v20  ;;  %v7983_v43 = vpop.f32.mrf.mxu3  ;;  %v7996_v1 = vadd.f32 %v7995_v30, %v14299_v42  ;;  %v8044_v5 = vpop.f32.mrf.mxu1 }
 0x8e3   : > { %v14372_v15 = vadd.f32 %v7983_v43, %v7935_v53  ;;  %v8045_v8 = vadd.f32 %v8044_v5, %v7996_v1  ;;  %8190 = vmatmul.bf16.vlgmr.msrb.gmra.mxu0 %v14972_v22 }
 0x8e4   : > { %8239 = vmatmul.bf16.vlgmr.msrb.gmra.mxu1 %v14973_v21 }
 0x8e5   : > { %8288 = vmatmul.bf16.vlgmr.msrb.gmra.mxu2 %v13439_v62  ;;  %8382 = vst [vmem:[%s13850_s24 + $0x20] sm:$0xff] %v8045_v8 }
 0x8e6   : > { %8337 = vmatmul.bf16.vlgmr.msrb.gmra.mxu3 %v13636_v11 }
 0x8e8   : > { %v8093_v4 = vpop.f32.mrf.mxu2  ;;  %v7997_v45 = vpop.f32.mrf.mxu0 }
 0x8e9   : > { %v8094_v42 = vadd.f32 %v8093_v4, %v14378_v24  ;;  %v8142_v49 = vpop.f32.mrf.mxu3  ;;  %v7998_v3 = vadd.f32 %v7997_v45, %v14302_v50  ;;  %v8046_v13 = vpop.f32.mrf.mxu1 }
 0x8eb   : > { %v14384_v10 = vadd.f32 %v8142_v49, %v8094_v42  ;;  %v8047_v20 = vadd.f32 %v8046_v13, %v7998_v3 }
 0x8ed   : > { %8388 = vst [vmem:[%s13850_s24 + $0x50] sm:$0xff] %v8047_v20 }
 0x8f0   : > { %v8095_v62 = vpop.f32.mrf.mxu2  ;;  %v8000_v53 = vpop.f32.mrf.mxu0 }
 0x8f1   : > { %v8096_v38 = vadd.f32 %v8095_v62, %v14378_v24  ;;  %v8144_v58 = vpop.f32.mrf.mxu3  ;;  %v8001_v11 = vadd.f32 %v8000_v53, %v14309_v46  ;;  %v8049_v43 = vpop.f32.mrf.mxu1 }
 0x8f3   : > { %v14389_v30 = vadd.f32 %v8144_v58, %v8096_v38  ;;  %v8050_v1 = vadd.f32 %v8049_v43, %v8001_v11  ;;  %8195 = vmatmul.bf16.gmra.mxu0 %v14889_v47 }
 0x8f4   : > { %8244 = vmatmul.bf16.gmra.mxu1 %v14890_v17 }
 0x8f5   : > { %8293 = vmatmul.bf16.gmra.mxu2 %v13467_v19  ;;  %8394 = vst [vmem:[%s13850_s24 + $0x80] sm:$0xff] %v8050_v1 }
 0x8f6   : > { %8342 = vmatmul.bf16.gmra.mxu3 %v13658_v31 }
 0x8f8   : > { %v8098_v50 = vpop.f32.mrf.mxu2  ;;  %v8002_v22 = vpop.f32.mrf.mxu0 }
 0x8f9   : > { %v8099_v5 = vadd.f32 %v8098_v50, %v14378_v24  ;;  %v8147_v8 = vpop.f32.mrf.mxu3  ;;  %v8003_v46 = vadd.f32 %v8002_v22, %v14312_v63  ;;  %v8051_v21 = vpop.f32.mrf.mxu1 }
 0x8fb   : > { %v14398_v4 = vadd.f32 %v8147_v8, %v8099_v5  ;;  %v8052_v42 = vadd.f32 %v8051_v21, %v8003_v46 }
 0x8fd   : > { %8400 = vst [vmem:[%s13850_s24 + $0xb0] sm:$0xff] %v8052_v42 }
 0x900   : > { %v8100_v47 = vpop.f32.mrf.mxu2  ;;  %v8005_v49 = vpop.f32.mrf.mxu0 }
 0x901   : > { %v8101_v17 = vadd.f32 %v8100_v47, %v14378_v24  ;;  %v8149_v19 = vpop.f32.mrf.mxu3  ;;  %v8006_v31 = vadd.f32 %v8005_v49, %v14319_v36  ;;  %v8054_v45 = vpop.f32.mrf.mxu1 }
 0x903   : > { %v14403_v3 = vadd.f32 %v8149_v19, %v8101_v17  ;;  %v8055_v13 = vadd.f32 %v8054_v45, %v8006_v31  ;;  %8200 = vmatmul.bf16.gmra.mxu0 %v14893_v28 }
 0x904   : > { %8249 = vmatmul.bf16.gmra.mxu1 %v14894_v23 }
 0x905   : > { %8298 = vmatmul.bf16.gmra.mxu2 %v13495_v26  ;;  %8406 = vst [vmem:[%s13850_s24 + $0xe0] sm:$0xff] %v8055_v13 }
 0x906   : > { %8347 = vmatmul.bf16.gmra.mxu3 %v13680_v27 }
 0x908   : > { %v8103_v63 = vpop.f32.mrf.mxu2  ;;  %v8007_v38 = vpop.f32.mrf.mxu0 }
 0x909   : > { %v8104_v20 = vadd.f32 %v8103_v63, %v14378_v24  ;;  %v8152_v62 = vpop.f32.mrf.mxu3  ;;  %v8008_v36 = vadd.f32 %v8007_v38, %v14322_v54  ;;  %v8056_v58 = vpop.f32.mrf.mxu1 }
 0x90b   : > { %v14412_v53 = vadd.f32 %v8152_v62, %v8104_v20  ;;  %v8057_v11 = vadd.f32 %v8056_v58, %v8008_v36 }
 0x90d   : > { %8412 = vst [vmem:[%s13850_s24 + $0x110] sm:$0xff] %v8057_v11 }
 0x910   : > { %v8105_v28 = vpop.f32.mrf.mxu2  ;;  %v8010_v43 = vpop.f32.mrf.mxu0 }
 0x911   : > { %v8106_v23 = vadd.f32 %v8105_v28, %v14378_v24  ;;  %v8154_v26 = vpop.f32.mrf.mxu3  ;;  %v8011_v27 = vadd.f32 %v8010_v43, %v14329_v14  ;;  %v8059_v1 = vpop.f32.mrf.mxu1 }
 0x913   : > { %v14417_v50 = vadd.f32 %v8154_v26, %v8106_v23  ;;  %v8060_v5 = vadd.f32 %v8059_v1, %v8011_v27  ;;  %8205 = vmatmul.bf16.gmra.mxu0 %v14920_v2 }
 0x914   : > { %8254 = vmatmul.bf16.gmra.mxu1 %v14921_v29 }
 0x915   : > { %8303 = vmatmul.bf16.gmra.mxu2 %v13523_v6  ;;  %8418 = vst [vmem:[%s13850_s24 + $0x140] sm:$0xff] %v8060_v5 }
 0x916   : > { %8352 = vmatmul.bf16.gmra.mxu3 %v14940_v12 }
 0x918   : > { %v8108_v54 = vpop.f32.mrf.mxu2  ;;  %v8012_v46 = vpop.f32.mrf.mxu0 }
 0x919   : > { %v8109_v8 = vadd.f32 %v8108_v54, %v14378_v24  ;;  %v8157_v22 = vpop.f32.mrf.mxu3  ;;  %v8013_v14 = vadd.f32 %v8012_v46, %v14332_v25  ;;  %v8061_v21 = vpop.f32.mrf.mxu1 }
 0x91b   : > { %v14426_v42 = vadd.f32 %v8157_v22, %v8109_v8  ;;  %v8062_v47 = vadd.f32 %v8061_v21, %v8013_v14 }
 0x91d   : > { %8424 = vst [vmem:[%s13850_s24 + $0x170] sm:$0xff] %v8062_v47 }
 0x920   : > { %v8110_v2 = vpop.f32.mrf.mxu2  ;;  %v8015_v17 = vpop.f32.mrf.mxu0 }
 0x921   : > { %v8111_v29 = vadd.f32 %v8110_v2, %v14378_v24  ;;  %v8159_v6 = vpop.f32.mrf.mxu3  ;;  %v8016_v12 = vadd.f32 %v8015_v17, %v14339_v44  ;;  %v8064_v19 = vpop.f32.mrf.mxu1 }
 0x923   : > { %v14431_v49 = vadd.f32 %v8159_v6, %v8111_v29  ;;  %v8065_v31 = vadd.f32 %v8064_v19, %v8016_v12  ;;  %8210 = vmatmul.bf16.gmra.mxu0 %v14922_v39 }
 0x924   : > { %8259 = vmatmul.bf16.gmra.mxu1 %v14923_v41 }
 0x925   : > { %8308 = vmatmul.bf16.gmra.mxu2 %v14941_v40  ;;  %8430 = vst [vmem:[%s13850_s24 + $0x1a0] sm:$0xff] %v8065_v31 }
 0x926   : > { %8357 = vmatmul.bf16.gmra.mxu3 %v14942_v60 }
 0x928   : > { %v8113_v25 = vpop.f32.mrf.mxu2  ;;  %v8017_v63 = vpop.f32.mrf.mxu0 }
 0x929   : > { %v8114_v45 = vadd.f32 %v8113_v25, %v14378_v24  ;;  %v8162_v13 = vpop.f32.mrf.mxu3  ;;  %v8018_v44 = vadd.f32 %v8017_v63, %v14342_v7  ;;  %v8066_v20 = vpop.f32.mrf.mxu1 }
 0x92b   : > { %v14440_v62 = vadd.f32 %v8162_v13, %v8114_v45  ;;  %v8067_v38 = vadd.f32 %v8066_v20, %v8018_v44 }
 0x92d   : > { %8436 = vst [vmem:[%s13850_s24 + $0x1d0] sm:$0xff] %v8067_v38 }
 0x930   : > { %v8115_v39 = vpop.f32.mrf.mxu2  ;;  %v8020_v36 = vpop.f32.mrf.mxu0 }
 0x931   : > { %v8116_v41 = vadd.f32 %v8115_v39, %v14378_v24  ;;  %v8164_v40 = vpop.f32.mrf.mxu3  ;;  %v8021_v60 = vadd.f32 %v8020_v36, %v14349_v33  ;;  %v8069_v58 = vpop.f32.mrf.mxu1 }
 0x933   : > { %v14445_v11 = vadd.f32 %v8164_v40, %v8116_v41  ;;  %v8070_v28 = vadd.f32 %v8069_v58, %v8021_v60  ;;  %8215 = vmatmul.bf16.gmra.mxu0 %v14924_v37 }
 0x934   : > { %8264 = vmatmul.bf16.gmra.mxu1 %v14925_v18 }
 0x935   : > { %8313 = vmatmul.bf16.gmra.mxu2 %v14943_v48  ;;  %8442 = vst [vmem:[%s13850_s24 + $0x200] sm:$0xff] %v8070_v28 }
 0x936   : > { %8362 = vmatmul.bf16.gmra.mxu3 %v14944_v51 }
 0x938   : > { %v8118_v7 = vpop.f32.mrf.mxu2  ;;  %v8022_v43 = vpop.f32.mrf.mxu0 }
 0x939   : > { %v8119_v23 = vadd.f32 %v8118_v7, %v14378_v24  ;;  %v8167_v26 = vpop.f32.mrf.mxu3  ;;  %v8023_v33 = vadd.f32 %v8022_v43, %v14352_v59  ;;  %v8071_v27 = vpop.f32.mrf.mxu1 }
 0x93b   : > { %v14454_v1 = vadd.f32 %v8167_v26, %v8119_v23  ;;  %v8072_v5 = vadd.f32 %v8071_v27, %v8023_v33 }
 0x93d   : > { %8448 = vst [vmem:[%s13850_s24 + $0x230] sm:$0xff] %v8072_v5 }
 0x940   : > { %v8120_v37 = vpop.f32.mrf.mxu2  ;;  %v8025_v54 = vpop.f32.mrf.mxu0 }
 0x941   : > { %v8121_v18 = vadd.f32 %v8120_v37, %v14378_v24  ;;  %v8169_v48 = vpop.f32.mrf.mxu3  ;;  %v8026_v51 = vadd.f32 %v8025_v54, %v14359_v52  ;;  %v8074_v8 = vpop.f32.mrf.mxu1 }
 0x943   : > { %v14459_v22 = vadd.f32 %v8169_v48, %v8121_v18  ;;  %v8075_v46 = vadd.f32 %v8074_v8, %v8026_v51  ;;  %8220 = vmatmul.bf16.gmra.mxu0 %v14926_v56 }
 0x944   : > { %8269 = vmatmul.bf16.gmra.mxu1 %v14927_v61 }
 0x945   : > { %8318 = vmatmul.bf16.gmra.mxu2 %v14945_v16  ;;  %8454 = vst [vmem:[%s13850_s24 + $0x260] sm:$0xff] %v8075_v46 }
 0x946   : > { %8367 = vmatmul.bf16.gmra.mxu3 %v14969_v55 }
 0x948   : > { %v8123_v59 = vpop.f32.mrf.mxu2  ;;  %v8027_v47 = vpop.f32.mrf.mxu0 }
 0x949   : > { %v8124_v14 = vadd.f32 %v8123_v59, %v14378_v24  ;;  %v8172_v21 = vpop.f32.mrf.mxu3  ;;  %v8028_v52 = vadd.f32 %v8027_v47, %v14362_v0  ;;  %v8076_v2 = vpop.f32.mrf.mxu1 }
 0x94b   : > { %v14468_v29 = vadd.f32 %v8172_v21, %v8124_v14  ;;  %v8077_v6 = vadd.f32 %v8076_v2, %v8028_v52 }
 0x94d   : > { %8460 = vst [vmem:[%s13850_s24 + $0x290] sm:$0xff] %v8077_v6 }
 0x950   : > { %v8125_v56 = vpop.f32.mrf.mxu2  ;;  %v8030_v17 = vpop.f32.mrf.mxu0 }
 0x951   : > { %v8126_v61 = vadd.f32 %v8125_v56, %v14378_v24  ;;  %v8174_v16 = vpop.f32.mrf.mxu3  ;;  %v8031_v55 = vadd.f32 %v8030_v17, %v14369_v32  ;;  %v8079_v12 = vpop.f32.mrf.mxu1 }
 0x953   : > { %v14473_v19 = vadd.f32 %v8174_v16, %v8126_v61  ;;  %v8080_v31 = vadd.f32 %v8079_v12, %v8031_v55  ;;  %8225 = vmatmul.bf16.gmra.mxu0 %v14928_v57 }
 0x954   : > { %8274 = vmatmul.bf16.gmra.mxu1 %v14951_v35 }
 0x955   : > { %8323 = vmatmul.bf16.gmra.mxu2 %v14970_v9  ;;  %8466 = vst [vmem:[%s13850_s24 + $0x2c0] sm:$0xff] %v8080_v31 }
 0x956   : > { %8372 = vmatmul.bf16.gmra.mxu3 %v14971_v34 }
 0x958   : > { %v8128_v0 = vpop.f32.mrf.mxu2  ;;  %v8032_v13 = vpop.f32.mrf.mxu0 }
 0x959   : > { %v8129_v25 = vadd.f32 %v8128_v0, %v14378_v24  ;;  %v8177_v45 = vpop.f32.mrf.mxu3  ;;  %v8033_v32 = vadd.f32 %v8032_v13, %v14372_v15  ;;  %v8081_v63 = vpop.f32.mrf.mxu1 }
 0x95b   : > { %v14482_v44 = vadd.f32 %v8177_v45, %v8129_v25  ;;  %v8082_v20 = vadd.f32 %v8081_v63, %v8033_v32 }
 0x95d   : > { %8472 = vst [vmem:[%s13850_s24 + $0x2f0] sm:$0xff] %v8082_v20 }
 0x960   : > { %v8130_v57 = vpop.f32.mrf.mxu2  ;;  %v8191_v38 = vpop.f32.mrf.mxu0 }
 0x961   : > { %v8131_v35 = vadd.f32 %v8130_v57, %v14378_v24  ;;  %v8179_v9 = vpop.f32.mrf.mxu3  ;;  %v8240_v39 = vpop.f32.mrf.mxu1  ;;  %v8192_v41 = vadd.f32 %v8191_v38, %v14384_v10 }
 0x963   : > { %v14486_v34 = vadd.f32 %v8179_v9, %v8131_v35  ;;  %v8241_v40 = vadd.f32 %v8240_v39, %v8192_v41 }
 0x968   : > { %v8289_v36 = vpop.f32.mrf.mxu2  ;;  %v8193_v58 = vpop.f32.mrf.mxu0 }
 0x969   : > { %v8290_v15 = vadd.f32 %v8289_v36, %v8241_v40  ;;  %v8338_v60 = vpop.f32.mrf.mxu3  ;;  %v8242_v28 = vpop.f32.mrf.mxu1  ;;  %v8194_v23 = vadd.f32 %v8193_v58, %v14389_v30 }
 0x96b   : > { %v8339_v7 = vadd.f32 %v8338_v60, %v8290_v15  ;;  %v8243_v26 = vadd.f32 %v8242_v28, %v8194_v23 }
 0x96d   : > { %8383 = vst [vmem:[%s13850_s24 + $0x28] sm:$0xff] %v8339_v7 }
 0x970   : > { %v8291_v24 = vpop.f32.mrf.mxu2  ;;  %v8196_v27 = vpop.f32.mrf.mxu0 }
 0x971   : > { %v8292_v43 = vadd.f32 %v8291_v24, %v8243_v26  ;;  %v8340_v33 = vpop.f32.mrf.mxu3  ;;  %v8245_v5 = vpop.f32.mrf.mxu1  ;;  %v8197_v10 = vadd.f32 %v8196_v27, %v14398_v4 }
 0x973   : > { %v8341_v37 = vadd.f32 %v8340_v33, %v8292_v43  ;;  %v8246_v18 = vadd.f32 %v8245_v5, %v8197_v10 }
 0x975   : > { %8389 = vst [vmem:[%s13850_s24 + $0x58] sm:$0xff] %v8341_v37 }
 0x978   : > { %v8294_v48 = vpop.f32.mrf.mxu2  ;;  %v8198_v8 = vpop.f32.mrf.mxu0 }
 0x979   : > { %v8295_v54 = vadd.f32 %v8294_v48, %v8246_v18  ;;  %v8343_v51 = vpop.f32.mrf.mxu3  ;;  %v8247_v46 = vpop.f32.mrf.mxu1  ;;  %v8199_v59 = vadd.f32 %v8198_v8, %v14403_v3 }
 0x97b   : > { %v8344_v30 = vadd.f32 %v8343_v51, %v8295_v54  ;;  %v8248_v14 = vadd.f32 %v8247_v46, %v8199_v59 }
 0x97d   : > { %8395 = vst [vmem:[%s13850_s24 + $0x88] sm:$0xff] %v8344_v30 }
 0x980   : > { %v8296_v21 = vpop.f32.mrf.mxu2  ;;  %v8201_v2 = vpop.f32.mrf.mxu0 }
 0x981   : > { %v8297_v47 = vadd.f32 %v8296_v21, %v8248_v14  ;;  %v8345_v52 = vpop.f32.mrf.mxu3  ;;  %v8250_v6 = vpop.f32.mrf.mxu1  ;;  %v8202_v56 = vadd.f32 %v8201_v2, %v14412_v53 }
 0x983   : > { %v8346_v4 = vadd.f32 %v8345_v52, %v8297_v47  ;;  %v8251_v61 = vadd.f32 %v8250_v6, %v8202_v56 }
 0x985   : > { %8401 = vst [vmem:[%s13850_s24 + $0xb8] sm:$0xff] %v8346_v4 }
 0x988   : > { %v8299_v16 = vpop.f32.mrf.mxu2  ;;  %v8203_v12 = vpop.f32.mrf.mxu0 }
 0x989   : > { %v8300_v17 = vadd.f32 %v8299_v16, %v8251_v61  ;;  %v8348_v55 = vpop.f32.mrf.mxu3  ;;  %v8252_v31 = vpop.f32.mrf.mxu1  ;;  %v8204_v0 = vadd.f32 %v8203_v12, %v14417_v50 }
 0x98b   : > { %v8349_v3 = vadd.f32 %v8348_v55, %v8300_v17  ;;  %v8253_v25 = vadd.f32 %v8252_v31, %v8204_v0 }
 0x98d   : > { %8407 = vst [vmem:[%s13850_s24 + $0xe8] sm:$0xff] %v8349_v3 }
 0x990   : > { %v8301_v45 = vpop.f32.mrf.mxu2  ;;  %v8206_v63 = vpop.f32.mrf.mxu0 }
 0x991   : > { %v8302_v13 = vadd.f32 %v8301_v45, %v8253_v25  ;;  %v8350_v32 = vpop.f32.mrf.mxu3  ;;  %v8255_v20 = vpop.f32.mrf.mxu1  ;;  %v8207_v57 = vadd.f32 %v8206_v63, %v14426_v42 }
 0x993   : > { %v8351_v53 = vadd.f32 %v8350_v32, %v8302_v13  ;;  %v8256_v35 = vadd.f32 %v8255_v20, %v8207_v57 }
 0x995   : > { %8413 = vst [vmem:[%s13850_s24 + $0x118] sm:$0xff] %v8351_v53 }
 0x998   : > { %v8304_v9 = vpop.f32.mrf.mxu2  ;;  %v8208_v41 = vpop.f32.mrf.mxu0 }
 0x999   : > { %v8305_v38 = vadd.f32 %v8304_v9, %v8256_v35  ;;  %v8353_v39 = vpop.f32.mrf.mxu3  ;;  %v8257_v40 = vpop.f32.mrf.mxu1  ;;  %v8209_v36 = vadd.f32 %v8208_v41, %v14431_v49 }
 0x99b   : > { %v8354_v50 = vadd.f32 %v8353_v39, %v8305_v38  ;;  %v8258_v15 = vadd.f32 %v8257_v40, %v8209_v36 }
 0x99d   : > { %8419 = vst [vmem:[%s13850_s24 + $0x148] sm:$0xff] %v8354_v50 }
 0x9a0   : > { %v8306_v60 = vpop.f32.mrf.mxu2  ;;  %v8211_v7 = vpop.f32.mrf.mxu0 }
 0x9a1   : > { %v8307_v58 = vadd.f32 %v8306_v60, %v8258_v15  ;;  %v8355_v28 = vpop.f32.mrf.mxu3  ;;  %v8260_v23 = vpop.f32.mrf.mxu1  ;;  %v8212_v26 = vadd.f32 %v8211_v7, %v14440_v62 }
 0x9a3   : > { %v8356_v42 = vadd.f32 %v8355_v28, %v8307_v58  ;;  %v8261_v24 = vadd.f32 %v8260_v23, %v8212_v26 }
 0x9a5   : > { %8425 = vst [vmem:[%s13850_s24 + $0x178] sm:$0xff] %v8356_v42 }
 0x9a8   : > { %v8309_v43 = vpop.f32.mrf.mxu2  ;;  %v8213_v5 = vpop.f32.mrf.mxu0 }
 0x9a9   : > { %v8310_v33 = vadd.f32 %v8309_v43, %v8261_v24  ;;  %v8358_v27 = vpop.f32.mrf.mxu3  ;;  %v8262_v37 = vpop.f32.mrf.mxu1  ;;  %v8214_v10 = vadd.f32 %v8213_v5, %v14445_v11 }
 0x9ab   : > { %v8359_v49 = vadd.f32 %v8358_v27, %v8310_v33  ;;  %v8263_v18 = vadd.f32 %v8262_v37, %v8214_v10 }
 0x9ad   : > { %8431 = vst [vmem:[%s13850_s24 + $0x1a8] sm:$0xff] %v8359_v49 }
 0x9b0   : > { %v8311_v48 = vpop.f32.mrf.mxu2  ;;  %v8216_v8 = vpop.f32.mrf.mxu0 }
 0x9b1   : > { %v8312_v54 = vadd.f32 %v8311_v48, %v8263_v18  ;;  %v8360_v51 = vpop.f32.mrf.mxu3  ;;  %v8265_v46 = vpop.f32.mrf.mxu1  ;;  %v8217_v30 = vadd.f32 %v8216_v8, %v14454_v1 }
 0x9b3   : > { %v8361_v62 = vadd.f32 %v8360_v51, %v8312_v54  ;;  %v8266_v59 = vadd.f32 %v8265_v46, %v8217_v30 }
 0x9b5   : > { %8437 = vst [vmem:[%s13850_s24 + $0x1d8] sm:$0xff] %v8361_v62 }
 0x9b8   : > { %v8314_v14 = vpop.f32.mrf.mxu2  ;;  %v8218_v52 = vpop.f32.mrf.mxu0 }
 0x9b9   : > { %v8315_v21 = vadd.f32 %v8314_v14, %v8266_v59  ;;  %v8363_v47 = vpop.f32.mrf.mxu3  ;;  %v8267_v2 = vpop.f32.mrf.mxu1  ;;  %v8219_v6 = vadd.f32 %v8218_v52, %v14459_v22 }
 0x9bb   : > { %v8364_v11 = vadd.f32 %v8363_v47, %v8315_v21  ;;  %v8268_v4 = vadd.f32 %v8267_v2, %v8219_v6 }
 0x9bd   : > { %8443 = vst [vmem:[%s13850_s24 + $0x208] sm:$0xff] %v8364_v11 }
 0x9c0   : > { %v8316_v56 = vpop.f32.mrf.mxu2  ;;  %v8221_v17 = vpop.f32.mrf.mxu0 }
 0x9c1   : > { %v8317_v61 = vadd.f32 %v8316_v56, %v8268_v4  ;;  %v8365_v16 = vpop.f32.mrf.mxu3  ;;  %v8270_v55 = vpop.f32.mrf.mxu1  ;;  %v8222_v12 = vadd.f32 %v8221_v17, %v14468_v29 }
 0x9c3   : > { %v8366_v1 = vadd.f32 %v8365_v16, %v8317_v61  ;;  %v8271_v31 = vadd.f32 %v8270_v55, %v8222_v12 }
 0x9c5   : > { %8449 = vst [vmem:[%s13850_s24 + $0x238] sm:$0xff] %v8366_v1 }
 0x9c8   : > { %v8319_v3 = vpop.f32.mrf.mxu2  ;;  %v8223_v45 = vpop.f32.mrf.mxu0 }
 0x9c9   : > { %v8320_v0 = vadd.f32 %v8319_v3, %v8271_v31  ;;  %v8368_v25 = vpop.f32.mrf.mxu3  ;;  %v8272_v22 = vpop.f32.mrf.mxu1  ;;  %v8224_v32 = vadd.f32 %v8223_v45, %v14473_v19 }
 0x9cb   : > { %v8369_v13 = vadd.f32 %v8368_v25, %v8320_v0  ;;  %v8273_v63 = vadd.f32 %v8272_v22, %v8224_v32 }
 0x9cd   : > { %8455 = vst [vmem:[%s13850_s24 + $0x268] sm:$0xff] %v8369_v13 }
 0x9d0   : > { %v8321_v20 = vpop.f32.mrf.mxu2  ;;  %v8226_v35 = vpop.f32.mrf.mxu0 }
 0x9d1   : > { %v8322_v53 = vadd.f32 %v8321_v20, %v8273_v63  ;;  %v8370_v57 = vpop.f32.mrf.mxu3  ;;  %v8227_v9 = vadd.f32 %v8226_v35, %v14482_v44  ;;  %v8275_v38 = vpop.f32.mrf.mxu1 }
 0x9d3   : > { %v8371_v29 = vadd.f32 %v8370_v57, %v8322_v53  ;;  %v8276_v39 = vadd.f32 %v8275_v38, %v8227_v9 }
 0x9d5   : > { %8461 = vst [vmem:[%s13850_s24 + $0x298] sm:$0xff] %v8371_v29 }
 0x9d8   : > { %v8324_v41 = vpop.f32.mrf.mxu2  ;;  %v8228_v19 = vpop.f32.mrf.mxu0 }
 0x9d9   : > { %v8325_v40 = vadd.f32 %v8324_v41, %v8276_v39  ;;  %v8373_v50 = vpop.f32.mrf.mxu3  ;;  %v8229_v15 = vadd.f32 %v8228_v19, %v14486_v34  ;;  %v8277_v60 = vpop.f32.mrf.mxu1 }
 0x9db   : > { %v8374_v36 = vadd.f32 %v8373_v50, %v8325_v40  ;;  %v8278_v44 = vadd.f32 %v8277_v60, %v8229_v15 }
 0x9dd   : > { %8467 = vst [vmem:[%s13850_s24 + $0x2c8] sm:$0xff] %v8374_v36 }
 0x9e0   : > { %v8326_v58 = vpop.f32.mrf.mxu2 }
 0x9e1   : > { %v8327_v28 = vadd.f32 %v8326_v58, %v8278_v44  ;;  %v8375_v7 = vpop.f32.mrf.mxu3 }
 0x9e3   : > { %v8376_v23 = vadd.f32 %v8375_v7, %v8327_v28 }
 0x9e5   : > { %8473 = vst [vmem:[%s13850_s24 + $0x2f8] sm:$0xff] %v8376_v23 }
 0x9e6   : > { %11972 = shalt.err (!%p11969_p10)
}
 0x9e7   : > { %s12029_s1 = smov 768   ;;  %s12030_s27 = smov 48  }
 0x9e8   : > { %11524 = dma.vmem_to_hbm [thread:$0]  (%p12144_p0), %s8489_s6, 12288, %s8491_s10, %s8475_s22, %s12029_s1, %s12029_s1, %s12030_s27  }
 0x9e9 PF: > { %p11556_p11 = scmp.ge.s32.totalorder %s12019_s21, 2  ;;  %s8505_s8 = sand.u32 1, %s12007_s18  }
 0x9ea   : > { %s8506_s24 = scalar_lea.sflag [#allocation4], %s8505_s8 }
 0x9eb   : > { %p11544_p12 = pnand %p11556_p11, %p12096_p6 }
 0x9ed   : > { %p11545_p13 = pneg %p11544_p12 }
 0x9ef   : > { %12002 = dma.done.wait (%p11545_p13), %s8506_s24, 12288  }
 0x9f0   : > { %12004 = vsyncadd (%p11545_p13), %s8506_s24, 4294955008  ;;  %p20_p3 = scmp.ge.s32.totalorder %s12134_s9, 7   ;;  %s14974_s18 = smov %s12011_s19 }
 0x9f1   : > { %s14975_s19 = smov %s12015_s20  ;;  %s14976_s20 = smov %s12150_s13 }
 0x9f2   : > { %s14977_s21 = smov %s12134_s9  ;;  %22 = sbr.rel (!%p20_p3) target bundleno = 9 (0x9), region = 101 }
 0x9f7   :  { %8512 = vsyncpa [#allocation3], 1 }
 0x9f8   :  { %8514 = vsyncpa [#allocation3 + $0x1], 1 }
 0x9f9   :  { %8515 = vsyncpa [#allocation6], 1 }
 0x9fa   :  { %8516 = vsyncpa [#allocation9], 1 }
 0x9fb   :  { %8517 = vsyncpa [#allocation4], 1 }
 0x9fc   :  { %8519 = vsyncpa [#allocation4 + $0x1], 1 }

</bundles_post_ra>
